<compile_context>
chip_gen: v7x
topology: tpu7x:2x2x1
jax: 0.10.0
libtpu: 0.0.40
codegen_flags: <defaults>
</compile_context>

<pallas_src>
import jax
import jax.numpy as jnp
from jax.experimental import pallas as pl
from jax.experimental.pallas import tpu as pltpu


K_PAD = 32      # conv im2col contraction: 9*3 = 27 padded to 32
C_BODY = 64     # stand-in conv output channels (logical)
C_PAD = 128     # conv channels padded to a full lane width
H_RNN = 400     # logical RNN hidden size (PoolingLinearClassifier expects 400*3)
H_PAD = 512     # padded hidden (4*128) so Wh matmuls / h stores are lane-dense
LAT = 128       # per-branch latent width in the fusion concat (vis_out/text_out/tab pad)
BB = 8          # batch rows per grid step (sublane multiple; grid is batch-parallel)
BN_EPS = 1e-5


# ----------------------------------------------------------------------------
# Small in-kernel helpers
# ----------------------------------------------------------------------------
def _bn(x, ss):
    # eval-mode BatchNorm1d folded to scale/shift: row 0 = scale, row 1 = shift
    return x * ss[0:1, :] + ss[1:2, :]


def _mm(a, w_bf16, b):
    # bf16 MXU matmul with f32 accumulation + f32 bias
    return jnp.dot(a.astype(jnp.bfloat16), w_bf16,
                   preferred_element_type=jnp.float32) + b


# ----------------------------------------------------------------------------
# Fully fused model kernel (one grid step = BB batch rows)
# ----------------------------------------------------------------------------
def fused_model_kernel(xcol_ref, emb_ref, tab_ref,
                       cw_ref, cb_ref,
                       hbn1_ref, hw1_ref, hb1_ref,
                       hbn2_ref, hw2_ref, hb2_ref,
                       wx_ref, wh_ref, rb_ref,
                       nbn_ref, nw_ref, nb_ref,
                       fbn_ref, fw1_ref, fb1_ref,
                       fw2_ref, fb2_ref,
                       o_ref, xw_ref):
    bb = xcol_ref.shape[0]
    seq_len = emb_ref.shape[0]

    # ---------------- image branch ----------------
    # conv-as-matmul + ReLU + AdaptiveConcatPool2d, per image (2-D ops only),
    # then the create_head MLP batched over the whole block (MXU M = bb).
    cw = cw_ref[...]
    cb = cb_ref[...]
    pooled_rows = []
    for i in range(bb):
        feat = jnp.maximum(_mm(xcol_ref[i], cw, cb), 0.0)            # (HW, C_PAD)
        pooled_rows.append(jnp.concatenate(
            [jnp.max(feat, axis=0, keepdims=True),
             jnp.mean(feat, axis=0, keepdims=True)], axis=1))        # (1, 2*C_PAD)
    pooled_img = jnp.concatenate(pooled_rows, axis=0)                # (bb, 2*C_PAD)
    h1 = jnp.maximum(_mm(_bn(pooled_img, hbn1_ref[...]),
                         hw1_ref[...], hb1_ref[...]), 0.0)
    img_lat = _mm(_bn(h1, hbn2_ref[...]), hw2_ref[...], hb2_ref[...])  # (bb, 128)

    # ---------------- text branch ----------------
    # Hoisted input projection (off the serial tanh/Wh chain) into VMEM scratch.
    wx = wx_ref[...]
    rb = rb_ref[...]
    for t in range(seq_len):
        xw_ref[t] = _mm(emb_ref[t], wx, rb)                          # (bb, H_PAD)

    # TODO(synk): stage Wh in the MXU across timesteps (matmul_push_rhs/acc_lhs) so
    # the 512x512 weight is pushed once instead of once per step.
    wh = wh_ref[...]
    h = jnp.zeros((bb, wh_ref.shape[1]), jnp.float32)
    run_sum = jnp.zeros_like(h)
    run_max = None
    for t in range(seq_len):                 # static unroll; T is small and known
        h = jnp.tanh(xw_ref[t] + jnp.dot(h.astype(jnp.bfloat16), wh,
                                         preferred_element_type=jnp.float32))
        run_max = h if run_max is None else jnp.maximum(run_max, h)
        run_sum = run_sum + h

    # TODO(synk): pooling includes padding tokens (fastai masked_concat_pool masks pads).
    pooled_txt = jnp.concatenate([h, run_max, run_sum * (1.0 / seq_len)], axis=1)
    txt_lat = _mm(_bn(pooled_txt, nbn_ref[...]), nw_ref[...], nb_ref[...])  # (bb, 128)

    # ---------------- fusion head (lane-aligned 128 | 128 | 128 concat) ----------------
    cat = jnp.concatenate([jnp.maximum(img_lat, 0.0),
                           jnp.maximum(tab_ref[...], 0.0),
                           jnp.maximum(txt_lat, 0.0)], axis=1)       # (bb, 384)
    fh = jnp.maximum(_mm(_bn(cat, fbn_ref[...]), fw1_ref[...], fb1_ref[...]), 0.0)
    o_ref[...] = jax.nn.sigmoid(_mm(fh, fw2_ref[...], fb2_ref[...]))


# ----------------------------------------------------------------------------
# pallas_call plumbing
# ----------------------------------------------------------------------------
def _full_spec(a):
    return pl.BlockSpec(a.shape, lambda b, _nd=a.ndim: (0,) * _nd)


def fused_forward(params, xcol, emb_t, tab_pad):
    bpad, hw, _ = xcol.shape
    seq_len, _, emb_dim = emb_t.shape
    n_out = params["fc2_w"].shape[1]

    weights = (params["conv_w"], params["conv_b"],
               params["head_bn1"], params["head_w1"], params["head_b1"],
               params["head_bn2"], params["head_w2"], params["head_b2"],
               params["rnn_wx"], params["rnn_wh"], params["rnn_b"],
               params["nlp_bn"], params["nlp_w"], params["nlp_b"],
               params["fc1_bn"], params["fc1_w"], params["fc1_b"],
               params["fc2_w"], params["fc2_b"])

    return pl.pallas_call(
        fused_model_kernel,
        out_shape=jax.ShapeDtypeStruct((bpad, n_out), jnp.float32),
        grid=(bpad // BB,),
        in_specs=[pl.BlockSpec((BB, hw, K_PAD), lambda b: (b, 0, 0)),
                  pl.BlockSpec((seq_len, BB, emb_dim), lambda b: (0, b, 0)),
                  pl.BlockSpec((BB, LAT), lambda b: (b, 0))]
                 + [_full_spec(a) for a in weights],
        out_specs=pl.BlockSpec((BB, n_out), lambda b: (b, 0)),
        scratch_shapes=[pltpu.VMEM((seq_len, BB, H_PAD), jnp.float32)],
        compiler_params=pltpu.CompilerParams(dimension_semantics=("parallel",)),
    )(xcol, emb_t, tab_pad, *weights)


@jax.jit
def forward(params, img, tab, text):
    B, cin, H, W = img.shape
    bpad = ((B + BB - 1) // BB) * BB

    # ---- image glue: NCHW -> NHWC, 3x3 'same' im2col, K 27 -> 32, batch padded ----
    # TODO(synk): move im2col into the kernel (halo BlockSpec) for large resolutions;
    # at 16x16 the XLA-side materialization is negligible.
    x = jnp.transpose(img, (0, 2, 3, 1)).astype(jnp.float32)
    xp = jnp.pad(x, ((0, 0), (1, 1), (1, 1), (0, 0)))
    cols = [xp[:, kh:kh + H, kw:kw + W, :] for kh in range(3) for kw in range(3)]
    xcol = jnp.concatenate(cols, axis=-1).reshape(B, H * W, 9 * cin)
    xcol = jnp.pad(xcol, ((0, bpad - B), (0, 0), (0, K_PAD - 9 * cin)))

    # ---- text glue: embedding lookup, time-major, batch padded ----
    emb = jnp.take(params["emb"], text, axis=0)                      # (B, T, E)
    emb_t = jnp.transpose(emb, (1, 0, 2))
    emb_t = jnp.pad(emb_t, ((0, 0), (0, bpad - B), (0, 0)))

    # ---- tabular: tabLatent = tab[1] (passthrough), zero-padded to 128 lanes ----
    conts = tab[1].astype(jnp.float32)
    tab_pad = jnp.pad(conts, ((0, bpad - B), (0, LAT - conts.shape[1])))

    out = fused_forward(params, xcol, emb_t, tab_pad)
    return out[:B]                                                   # (B, 2)


# ----------------------------------------------------------------------------
# Parameters (deterministic, in-script; matmul weights stored padded + bf16,
# eval-mode BatchNorm folded to a packed (2, n) scale/shift array)
# ----------------------------------------------------------------------------
def bn_fold(n, eps=BN_EPS):
    scale = jnp.full((1, n), (1.0 + eps) ** -0.5, jnp.float32)   # gamma=1, var=1
    shift = jnp.zeros((1, n), jnp.float32)                       # beta=0, mean=0
    return jnp.concatenate([scale, shift], axis=0)               # (2, n)


def init_params(key, *, n_cont, vocab, emb_dim, head_mid=512, vis_out=LAT, text_out=LAT):
    assert vis_out == LAT and text_out == LAT and n_cont <= LAT
    ks = jax.random.split(key, 9)

    def norm(k, shape, scale=0.05):
        return (scale * jax.random.normal(k, shape)).astype(jnp.float32)

    p = {}
    # TODO(synk): full ResNet50 cnn_body is not reproduced; stand-in is a single
    # 3x3 conv + ReLU producing the pre-pool feature map (downstream head faithful).
    cw = norm(ks[0], (27, C_BODY))
    p["conv_w"] = jnp.pad(cw, ((0, K_PAD - 27), (0, C_PAD - C_BODY))).astype(jnp.bfloat16)
    p["conv_b"] = jnp.zeros((1, C_PAD), jnp.float32)
    # cnn_head = create_head(2*C_BODY, vis_out): BN -> Lin(.,512) -> ReLU -> BN -> Lin(512,vis_out)
    p["head_bn1"] = bn_fold(2 * C_PAD)
    w1 = norm(ks[1], (2 * C_BODY, head_mid))
    w1p = jnp.zeros((2 * C_PAD, head_mid), jnp.float32)
    w1p = w1p.at[:C_BODY].set(w1[:C_BODY])                       # max-pool half
    w1p = w1p.at[C_PAD:C_PAD + C_BODY].set(w1[C_BODY:])          # avg-pool half
    p["head_w1"] = w1p.astype(jnp.bfloat16)
    p["head_b1"] = jnp.zeros((1, head_mid), jnp.float32)
    p["head_bn2"] = bn_fold(head_mid)
    p["head_w2"] = norm(ks[2], (head_mid, vis_out)).astype(jnp.bfloat16)
    p["head_b2"] = jnp.zeros((1, vis_out), jnp.float32)
    # TODO(synk): AWD-LSTM encoder (encoder[0]) is not reproduced; stand-in is
    # embedding + single tanh RNN (hidden 400, zero-padded to 512 so padded lanes
    # stay exactly 0 through the recurrence).
    p["emb"] = norm(ks[3], (vocab, emb_dim), 0.1)
    p["rnn_wx"] = jnp.pad(norm(ks[4], (emb_dim, H_RNN)),
                          ((0, 0), (0, H_PAD - H_RNN))).astype(jnp.bfloat16)
    p["rnn_wh"] = jnp.pad(norm(ks[5], (H_RNN, H_RNN)),
                          ((0, H_PAD - H_RNN), (0, H_PAD - H_RNN))).astype(jnp.bfloat16)
    p["rnn_b"] = jnp.zeros((1, H_PAD), jnp.float32)
    # PoolingLinearClassifier([400*3, text_out], [0.5]): BN(1200) -> Dropout -> Lin(1200, text_out);
    # weight rows scattered into the 3*H_PAD padded pooled layout (pad rows stay zero)
    p["nlp_bn"] = bn_fold(3 * H_PAD)
    nw = norm(ks[6], (3 * H_RNN, text_out))
    nwp = jnp.zeros((3 * H_PAD, text_out), jnp.float32)
    for i in range(3):
        nwp = nwp.at[i * H_PAD:i * H_PAD + H_RNN].set(nw[i * H_RNN:(i + 1) * H_RNN])
    p["nlp_w"] = nwp.astype(jnp.bfloat16)
    p["nlp_b"] = jnp.zeros((1, text_out), jnp.float32)
    # fc1 = bn_drop_lin(vis_out + n_cont + text_out, 128, bn=True, p=0.5, actn=ReLU);
    # rows scattered into the lane-aligned 128|128|128 concat layout (pad rows zero)
    fw = norm(ks[7], (vis_out + n_cont + text_out, 128))
    fwp = jnp.zeros((3 * LAT, 128), jnp.float32)
    fwp = fwp.at[:vis_out].set(fw[:vis_out])
    fwp = fwp.at[LAT:LAT + n_cont].set(fw[vis_out:vis_out + n_cont])
    fwp = fwp.at[2 * LAT:2 * LAT + text_out].set(fw[vis_out + n_cont:])
    p["fc1_bn"] = bn_fold(3 * LAT)
    p["fc1_w"] = fwp.astype(jnp.bfloat16)
    p["fc1_b"] = jnp.zeros((1, 128), jnp.float32)
    # fc2 = bn_drop_lin(128, 2, bn=False, p=0.05, actn=Sigmoid)
    p["fc2_w"] = norm(ks[8], (128, 2)).astype(jnp.bfloat16)
    p["fc2_b"] = jnp.zeros((1, 2), jnp.float32)
    return p


# ----------------------------------------------------------------------------
if __name__ == "__main__":
    B, N_CONT, T_SEQ, VOCAB, EMB = 2, 8, 8, 50, 64
    key = jax.random.PRNGKey(0)
    k_param, k_img, k_cont, k_cat, k_txt = jax.random.split(key, 5)

    params = init_params(k_param, n_cont=N_CONT, vocab=VOCAB, emb_dim=EMB)

    img = jax.random.normal(k_img, (B, 3, 16, 16), jnp.float32)          # NCHW input
    tab = (jax.random.randint(k_cat, (B, 1), 0, 5, dtype=jnp.int32),     # (cats, conts)
           jax.random.normal(k_cont, (B, N_CONT), jnp.float32))
    text = jax.random.randint(k_txt, (B, T_SEQ), 0, VOCAB, dtype=jnp.int32)

    out = jax.block_until_ready(forward(params, img, tab, text))
    assert out.shape == (B, 2), out.shape
    assert bool(jnp.all(jnp.isfinite(out)))
    assert bool(jnp.all((out >= 0.0) & (out <= 1.0)))   # sigmoid output
    print("KERNEL_OK")
</pallas_src>

<mosaic_0001>
module attributes {stable_mosaic.version = 11 : i64} {
  func.func @fused_model_kernel(%arg0: i32, %arg1: memref<8x256x32xf32, #tpu.memory_space<vmem>>, %arg2: memref<8x8x64xf32, #tpu.memory_space<vmem>>, %arg3: memref<8x128xf32, #tpu.memory_space<vmem>>, %arg4: memref<32x128xbf16, #tpu.memory_space<vmem>>, %arg5: memref<1x128xf32, #tpu.memory_space<vmem>>, %arg6: memref<2x256xf32, #tpu.memory_space<vmem>>, %arg7: memref<256x512xbf16, #tpu.memory_space<vmem>>, %arg8: memref<1x512xf32, #tpu.memory_space<vmem>>, %arg9: memref<2x512xf32, #tpu.memory_space<vmem>>, %arg10: memref<512x128xbf16, #tpu.memory_space<vmem>>, %arg11: memref<1x128xf32, #tpu.memory_space<vmem>>, %arg12: memref<64x512xbf16, #tpu.memory_space<vmem>>, %arg13: memref<512x512xbf16, #tpu.memory_space<vmem>>, %arg14: memref<1x512xf32, #tpu.memory_space<vmem>>, %arg15: memref<2x1536xf32, #tpu.memory_space<vmem>>, %arg16: memref<1536x128xbf16, #tpu.memory_space<vmem>>, %arg17: memref<1x128xf32, #tpu.memory_space<vmem>>, %arg18: memref<2x384xf32, #tpu.memory_space<vmem>>, %arg19: memref<384x128xbf16, #tpu.memory_space<vmem>>, %arg20: memref<1x128xf32, #tpu.memory_space<vmem>>, %arg21: memref<128x2xbf16, #tpu.memory_space<vmem>>, %arg22: memref<1x2xf32, #tpu.memory_space<vmem>>, %arg23: memref<8x2xf32, #tpu.memory_space<vmem>>, %arg24: memref<8x8x512xf32, #tpu.memory_space<vmem>>) attributes {dimension_semantics = [#tpu.dimension_semantics<parallel>], iteration_bounds = array<i64: 1>, scalar_prefetch = 0 : i64, scratch_operands = 1 : i64, tpu.core_type = #tpu.core_type<tc>, window_params = [{transform_indices = @transform_0, window_bounds = array<i64: 8, 256, 32>}, {transform_indices = @transform_1, window_bounds = array<i64: 8, 8, 64>}, {transform_indices = @transform_2, window_bounds = array<i64: 8, 128>}, {pipeline_mode = #tpu.pipeline_mode<synchronous>, transform_indices = @transform_3, window_bounds = array<i64: 32, 128>}, {pipeline_mode = #tpu.pipeline_mode<synchronous>, transform_indices = @transform_4, window_bounds = array<i64: 1, 128>}, {pipeline_mode = #tpu.pipeline_mode<synchronous>, transform_indices = @transform_5, window_bounds = array<i64: 2, 256>}, {pipeline_mode = #tpu.pipeline_mode<synchronous>, transform_indices = @transform_6, window_bounds = array<i64: 256, 512>}, {pipeline_mode = #tpu.pipeline_mode<synchronous>, transform_indices = @transform_7, window_bounds = array<i64: 1, 512>}, {pipeline_mode = #tpu.pipeline_mode<synchronous>, transform_indices = @transform_8, window_bounds = array<i64: 2, 512>}, {pipeline_mode = #tpu.pipeline_mode<synchronous>, transform_indices = @transform_9, window_bounds = array<i64: 512, 128>}, {pipeline_mode = #tpu.pipeline_mode<synchronous>, transform_indices = @transform_10, window_bounds = array<i64: 1, 128>}, {pipeline_mode = #tpu.pipeline_mode<synchronous>, transform_indices = @transform_11, window_bounds = array<i64: 64, 512>}, {pipeline_mode = #tpu.pipeline_mode<synchronous>, transform_indices = @transform_12, window_bounds = array<i64: 512, 512>}, {pipeline_mode = #tpu.pipeline_mode<synchronous>, transform_indices = @transform_13, window_bounds = array<i64: 1, 512>}, {pipeline_mode = #tpu.pipeline_mode<synchronous>, transform_indices = @transform_14, window_bounds = array<i64: 2, 1536>}, {pipeline_mode = #tpu.pipeline_mode<synchronous>, transform_indices = @transform_15, window_bounds = array<i64: 1536, 128>}, {pipeline_mode = #tpu.pipeline_mode<synchronous>, transform_indices = @transform_16, window_bounds = array<i64: 1, 128>}, {pipeline_mode = #tpu.pipeline_mode<synchronous>, transform_indices = @transform_17, window_bounds = array<i64: 2, 384>}, {pipeline_mode = #tpu.pipeline_mode<synchronous>, transform_indices = @transform_18, window_bounds = array<i64: 384, 128>}, {pipeline_mode = #tpu.pipeline_mode<synchronous>, transform_indices = @transform_19, window_bounds = array<i64: 1, 128>}, {pipeline_mode = #tpu.pipeline_mode<synchronous>, transform_indices = @transform_20, window_bounds = array<i64: 128, 2>}, {pipeline_mode = #tpu.pipeline_mode<synchronous>, transform_indices = @transform_21, window_bounds = array<i64: 1, 2>}, {transform_indices = @transform_22, window_bounds = array<i64: 8, 2>}]} {
    %c0 = arith.constant 0 : index
    %c0_0 = arith.constant 0 : index
    %0 = vector.load %arg4[%c0, %c0_0] : memref<32x128xbf16, #tpu.memory_space<vmem>>, vector<32x128xbf16>
    %c0_1 = arith.constant 0 : index
    %c0_2 = arith.constant 0 : index
    %1 = vector.load %arg5[%c0_1, %c0_2] : memref<1x128xf32, #tpu.memory_space<vmem>>, vector<1x128xf32>
    %c0_3 = arith.constant 0 : index
    %c0_4 = arith.constant 0 : index
    %c0_5 = arith.constant 0 : index
    %2 = vector.load %arg1[%c0_3, %c0_4, %c0_5] : memref<8x256x32xf32, #tpu.memory_space<vmem>>, vector<1x256x32xf32>
    %3 = vector.shape_cast %2 : vector<1x256x32xf32> to vector<256x32xf32>
    %4 = arith.truncf %3 : vector<256x32xf32> to vector<256x32xbf16>
    %cst = arith.constant dense<0.000000e+00> : vector<256x128xf32>
    %5 = tpu.matmul %4, %0, %cst {dimension_numbers = #tpu.dot_dimension_numbers<[1], [0], [0], [1], [0, 0, 1, 1], [], []>} : vector<256x32xbf16>, vector<32x128xbf16>, vector<256x128xf32> -> vector<256x128xf32>
    %6 = vector.broadcast %1 : vector<1x128xf32> to vector<256x128xf32>
    %7 = arith.addf %5, %6 : vector<256x128xf32>
    %cst_6 = arith.constant 0.000000e+00 : f32
    %8 = vector.broadcast %cst_6 : f32 to vector<256x128xf32>
    %9 = arith.maximumf %7, %8 : vector<256x128xf32>
    %cst_7 = arith.constant dense<0xFF800000> : vector<128xf32>
    %10 = vector.multi_reduction <maximumf>, %9, %cst_7 [0] : vector<256x128xf32> to vector<128xf32>
    %11 = vector.shape_cast %10 : vector<128xf32> to vector<1x128xf32>
    %cst_8 = arith.constant dense<0.000000e+00> : vector<128xf32>
    %12 = vector.multi_reduction <add>, %9, %cst_8 [0] : vector<256x128xf32> to vector<128xf32>
    %13 = vector.shape_cast %12 : vector<128xf32> to vector<1x128xf32>
    %cst_9 = arith.constant 2.560000e+02 : f32
    %14 = vector.broadcast %cst_9 : f32 to vector<1x128xf32>
    %15 = arith.divf %13, %14 : vector<1x128xf32>
    %16 = tpu.concatenate %11, %15 in 1 : vector<1x128xf32>, vector<1x128xf32> -> vector<1x256xf32>
    %c1 = arith.constant 1 : index
    %c0_10 = arith.constant 0 : index
    %c0_11 = arith.constant 0 : index
    %17 = vector.load %arg1[%c1, %c0_10, %c0_11] : memref<8x256x32xf32, #tpu.memory_space<vmem>>, vector<1x256x32xf32>
    %18 = vector.shape_cast %17 : vector<1x256x32xf32> to vector<256x32xf32>
    %19 = arith.truncf %18 : vector<256x32xf32> to vector<256x32xbf16>
    %cst_12 = arith.constant dense<0.000000e+00> : vector<256x128xf32>
    %20 = tpu.matmul %19, %0, %cst_12 {dimension_numbers = #tpu.dot_dimension_numbers<[1], [0], [0], [1], [0, 0, 1, 1], [], []>} : vector<256x32xbf16>, vector<32x128xbf16>, vector<256x128xf32> -> vector<256x128xf32>
    %21 = vector.broadcast %1 : vector<1x128xf32> to vector<256x128xf32>
    %22 = arith.addf %20, %21 : vector<256x128xf32>
    %cst_13 = arith.constant 0.000000e+00 : f32
    %23 = vector.broadcast %cst_13 : f32 to vector<256x128xf32>
    %24 = arith.maximumf %22, %23 : vector<256x128xf32>
    %cst_14 = arith.constant dense<0xFF800000> : vector<128xf32>
    %25 = vector.multi_reduction <maximumf>, %24, %cst_14 [0] : vector<256x128xf32> to vector<128xf32>
    %26 = vector.shape_cast %25 : vector<128xf32> to vector<1x128xf32>
    %cst_15 = arith.constant dense<0.000000e+00> : vector<128xf32>
    %27 = vector.multi_reduction <add>, %24, %cst_15 [0] : vector<256x128xf32> to vector<128xf32>
    %28 = vector.shape_cast %27 : vector<128xf32> to vector<1x128xf32>
    %cst_16 = arith.constant 2.560000e+02 : f32
    %29 = vector.broadcast %cst_16 : f32 to vector<1x128xf32>
    %30 = arith.divf %28, %29 : vector<1x128xf32>
    %31 = tpu.concatenate %26, %30 in 1 : vector<1x128xf32>, vector<1x128xf32> -> vector<1x256xf32>
    %c2 = arith.constant 2 : index
    %c0_17 = arith.constant 0 : index
    %c0_18 = arith.constant 0 : index
    %32 = vector.load %arg1[%c2, %c0_17, %c0_18] : memref<8x256x32xf32, #tpu.memory_space<vmem>>, vector<1x256x32xf32>
    %33 = vector.shape_cast %32 : vector<1x256x32xf32> to vector<256x32xf32>
    %34 = arith.truncf %33 : vector<256x32xf32> to vector<256x32xbf16>
    %cst_19 = arith.constant dense<0.000000e+00> : vector<256x128xf32>
    %35 = tpu.matmul %34, %0, %cst_19 {dimension_numbers = #tpu.dot_dimension_numbers<[1], [0], [0], [1], [0, 0, 1, 1], [], []>} : vector<256x32xbf16>, vector<32x128xbf16>, vector<256x128xf32> -> vector<256x128xf32>
    %36 = vector.broadcast %1 : vector<1x128xf32> to vector<256x128xf32>
    %37 = arith.addf %35, %36 : vector<256x128xf32>
    %cst_20 = arith.constant 0.000000e+00 : f32
    %38 = vector.broadcast %cst_20 : f32 to vector<256x128xf32>
    %39 = arith.maximumf %37, %38 : vector<256x128xf32>
    %cst_21 = arith.constant dense<0xFF800000> : vector<128xf32>
    %40 = vector.multi_reduction <maximumf>, %39, %cst_21 [0] : vector<256x128xf32> to vector<128xf32>
    %41 = vector.shape_cast %40 : vector<128xf32> to vector<1x128xf32>
    %cst_22 = arith.constant dense<0.000000e+00> : vector<128xf32>
    %42 = vector.multi_reduction <add>, %39, %cst_22 [0] : vector<256x128xf32> to vector<128xf32>
    %43 = vector.shape_cast %42 : vector<128xf32> to vector<1x128xf32>
    %cst_23 = arith.constant 2.560000e+02 : f32
    %44 = vector.broadcast %cst_23 : f32 to vector<1x128xf32>
    %45 = arith.divf %43, %44 : vector<1x128xf32>
    %46 = tpu.concatenate %41, %45 in 1 : vector<1x128xf32>, vector<1x128xf32> -> vector<1x256xf32>
    %c3 = arith.constant 3 : index
    %c0_24 = arith.constant 0 : index
    %c0_25 = arith.constant 0 : index
    %47 = vector.load %arg1[%c3, %c0_24, %c0_25] : memref<8x256x32xf32, #tpu.memory_space<vmem>>, vector<1x256x32xf32>
    %48 = vector.shape_cast %47 : vector<1x256x32xf32> to vector<256x32xf32>
    %49 = arith.truncf %48 : vector<256x32xf32> to vector<256x32xbf16>
    %cst_26 = arith.constant dense<0.000000e+00> : vector<256x128xf32>
    %50 = tpu.matmul %49, %0, %cst_26 {dimension_numbers = #tpu.dot_dimension_numbers<[1], [0], [0], [1], [0, 0, 1, 1], [], []>} : vector<256x32xbf16>, vector<32x128xbf16>, vector<256x128xf32> -> vector<256x128xf32>
    %51 = vector.broadcast %1 : vector<1x128xf32> to vector<256x128xf32>
    %52 = arith.addf %50, %51 : vector<256x128xf32>
    %cst_27 = arith.constant 0.000000e+00 : f32
    %53 = vector.broadcast %cst_27 : f32 to vector<256x128xf32>
    %54 = arith.maximumf %52, %53 : vector<256x128xf32>
    %cst_28 = arith.constant dense<0xFF800000> : vector<128xf32>
    %55 = vector.multi_reduction <maximumf>, %54, %cst_28 [0] : vector<256x128xf32> to vector<128xf32>
    %56 = vector.shape_cast %55 : vector<128xf32> to vector<1x128xf32>
    %cst_29 = arith.constant dense<0.000000e+00> : vector<128xf32>
    %57 = vector.multi_reduction <add>, %54, %cst_29 [0] : vector<256x128xf32> to vector<128xf32>
    %58 = vector.shape_cast %57 : vector<128xf32> to vector<1x128xf32>
    %cst_30 = arith.constant 2.560000e+02 : f32
    %59 = vector.broadcast %cst_30 : f32 to vector<1x128xf32>
    %60 = arith.divf %58, %59 : vector<1x128xf32>
    %61 = tpu.concatenate %56, %60 in 1 : vector<1x128xf32>, vector<1x128xf32> -> vector<1x256xf32>
    %c4 = arith.constant 4 : index
    %c0_31 = arith.constant 0 : index
    %c0_32 = arith.constant 0 : index
    %62 = vector.load %arg1[%c4, %c0_31, %c0_32] : memref<8x256x32xf32, #tpu.memory_space<vmem>>, vector<1x256x32xf32>
    %63 = vector.shape_cast %62 : vector<1x256x32xf32> to vector<256x32xf32>
    %64 = arith.truncf %63 : vector<256x32xf32> to vector<256x32xbf16>
    %cst_33 = arith.constant dense<0.000000e+00> : vector<256x128xf32>
    %65 = tpu.matmul %64, %0, %cst_33 {dimension_numbers = #tpu.dot_dimension_numbers<[1], [0], [0], [1], [0, 0, 1, 1], [], []>} : vector<256x32xbf16>, vector<32x128xbf16>, vector<256x128xf32> -> vector<256x128xf32>
    %66 = vector.broadcast %1 : vector<1x128xf32> to vector<256x128xf32>
    %67 = arith.addf %65, %66 : vector<256x128xf32>
    %cst_34 = arith.constant 0.000000e+00 : f32
    %68 = vector.broadcast %cst_34 : f32 to vector<256x128xf32>
    %69 = arith.maximumf %67, %68 : vector<256x128xf32>
    %cst_35 = arith.constant dense<0xFF800000> : vector<128xf32>
    %70 = vector.multi_reduction <maximumf>, %69, %cst_35 [0] : vector<256x128xf32> to vector<128xf32>
    %71 = vector.shape_cast %70 : vector<128xf32> to vector<1x128xf32>
    %cst_36 = arith.constant dense<0.000000e+00> : vector<128xf32>
    %72 = vector.multi_reduction <add>, %69, %cst_36 [0] : vector<256x128xf32> to vector<128xf32>
    %73 = vector.shape_cast %72 : vector<128xf32> to vector<1x128xf32>
    %cst_37 = arith.constant 2.560000e+02 : f32
    %74 = vector.broadcast %cst_37 : f32 to vector<1x128xf32>
    %75 = arith.divf %73, %74 : vector<1x128xf32>
    %76 = tpu.concatenate %71, %75 in 1 : vector<1x128xf32>, vector<1x128xf32> -> vector<1x256xf32>
    %c5 = arith.constant 5 : index
    %c0_38 = arith.constant 0 : index
    %c0_39 = arith.constant 0 : index
    %77 = vector.load %arg1[%c5, %c0_38, %c0_39] : memref<8x256x32xf32, #tpu.memory_space<vmem>>, vector<1x256x32xf32>
    %78 = vector.shape_cast %77 : vector<1x256x32xf32> to vector<256x32xf32>
    %79 = arith.truncf %78 : vector<256x32xf32> to vector<256x32xbf16>
    %cst_40 = arith.constant dense<0.000000e+00> : vector<256x128xf32>
    %80 = tpu.matmul %79, %0, %cst_40 {dimension_numbers = #tpu.dot_dimension_numbers<[1], [0], [0], [1], [0, 0, 1, 1], [], []>} : vector<256x32xbf16>, vector<32x128xbf16>, vector<256x128xf32> -> vector<256x128xf32>
    %81 = vector.broadcast %1 : vector<1x128xf32> to vector<256x128xf32>
    %82 = arith.addf %80, %81 : vector<256x128xf32>
    %cst_41 = arith.constant 0.000000e+00 : f32
    %83 = vector.broadcast %cst_41 : f32 to vector<256x128xf32>
    %84 = arith.maximumf %82, %83 : vector<256x128xf32>
    %cst_42 = arith.constant dense<0xFF800000> : vector<128xf32>
    %85 = vector.multi_reduction <maximumf>, %84, %cst_42 [0] : vector<256x128xf32> to vector<128xf32>
    %86 = vector.shape_cast %85 : vector<128xf32> to vector<1x128xf32>
    %cst_43 = arith.constant dense<0.000000e+00> : vector<128xf32>
    %87 = vector.multi_reduction <add>, %84, %cst_43 [0] : vector<256x128xf32> to vector<128xf32>
    %88 = vector.shape_cast %87 : vector<128xf32> to vector<1x128xf32>
    %cst_44 = arith.constant 2.560000e+02 : f32
    %89 = vector.broadcast %cst_44 : f32 to vector<1x128xf32>
    %90 = arith.divf %88, %89 : vector<1x128xf32>
    %91 = tpu.concatenate %86, %90 in 1 : vector<1x128xf32>, vector<1x128xf32> -> vector<1x256xf32>
    %c6 = arith.constant 6 : index
    %c0_45 = arith.constant 0 : index
    %c0_46 = arith.constant 0 : index
    %92 = vector.load %arg1[%c6, %c0_45, %c0_46] : memref<8x256x32xf32, #tpu.memory_space<vmem>>, vector<1x256x32xf32>
    %93 = vector.shape_cast %92 : vector<1x256x32xf32> to vector<256x32xf32>
    %94 = arith.truncf %93 : vector<256x32xf32> to vector<256x32xbf16>
    %cst_47 = arith.constant dense<0.000000e+00> : vector<256x128xf32>
    %95 = tpu.matmul %94, %0, %cst_47 {dimension_numbers = #tpu.dot_dimension_numbers<[1], [0], [0], [1], [0, 0, 1, 1], [], []>} : vector<256x32xbf16>, vector<32x128xbf16>, vector<256x128xf32> -> vector<256x128xf32>
    %96 = vector.broadcast %1 : vector<1x128xf32> to vector<256x128xf32>
    %97 = arith.addf %95, %96 : vector<256x128xf32>
    %cst_48 = arith.constant 0.000000e+00 : f32
    %98 = vector.broadcast %cst_48 : f32 to vector<256x128xf32>
    %99 = arith.maximumf %97, %98 : vector<256x128xf32>
    %cst_49 = arith.constant dense<0xFF800000> : vector<128xf32>
    %100 = vector.multi_reduction <maximumf>, %99, %cst_49 [0] : vector<256x128xf32> to vector<128xf32>
    %101 = vector.shape_cast %100 : vector<128xf32> to vector<1x128xf32>
    %cst_50 = arith.constant dense<0.000000e+00> : vector<128xf32>
    %102 = vector.multi_reduction <add>, %99, %cst_50 [0] : vector<256x128xf32> to vector<128xf32>
    %103 = vector.shape_cast %102 : vector<128xf32> to vector<1x128xf32>
    %cst_51 = arith.constant 2.560000e+02 : f32
    %104 = vector.broadcast %cst_51 : f32 to vector<1x128xf32>
    %105 = arith.divf %103, %104 : vector<1x128xf32>
    %106 = tpu.concatenate %101, %105 in 1 : vector<1x128xf32>, vector<1x128xf32> -> vector<1x256xf32>
    %c7 = arith.constant 7 : index
    %c0_52 = arith.constant 0 : index
    %c0_53 = arith.constant 0 : index
    %107 = vector.load %arg1[%c7, %c0_52, %c0_53] : memref<8x256x32xf32, #tpu.memory_space<vmem>>, vector<1x256x32xf32>
    %108 = vector.shape_cast %107 : vector<1x256x32xf32> to vector<256x32xf32>
    %109 = arith.truncf %108 : vector<256x32xf32> to vector<256x32xbf16>
    %cst_54 = arith.constant dense<0.000000e+00> : vector<256x128xf32>
    %110 = tpu.matmul %109, %0, %cst_54 {dimension_numbers = #tpu.dot_dimension_numbers<[1], [0], [0], [1], [0, 0, 1, 1], [], []>} : vector<256x32xbf16>, vector<32x128xbf16>, vector<256x128xf32> -> vector<256x128xf32>
    %111 = vector.broadcast %1 : vector<1x128xf32> to vector<256x128xf32>
    %112 = arith.addf %110, %111 : vector<256x128xf32>
    %cst_55 = arith.constant 0.000000e+00 : f32
    %113 = vector.broadcast %cst_55 : f32 to vector<256x128xf32>
    %114 = arith.maximumf %112, %113 : vector<256x128xf32>
    %cst_56 = arith.constant dense<0xFF800000> : vector<128xf32>
    %115 = vector.multi_reduction <maximumf>, %114, %cst_56 [0] : vector<256x128xf32> to vector<128xf32>
    %116 = vector.shape_cast %115 : vector<128xf32> to vector<1x128xf32>
    %cst_57 = arith.constant dense<0.000000e+00> : vector<128xf32>
    %117 = vector.multi_reduction <add>, %114, %cst_57 [0] : vector<256x128xf32> to vector<128xf32>
    %118 = vector.shape_cast %117 : vector<128xf32> to vector<1x128xf32>
    %cst_58 = arith.constant 2.560000e+02 : f32
    %119 = vector.broadcast %cst_58 : f32 to vector<1x128xf32>
    %120 = arith.divf %118, %119 : vector<1x128xf32>
    %121 = tpu.concatenate %116, %120 in 1 : vector<1x128xf32>, vector<1x128xf32> -> vector<1x256xf32>
    %122 = tpu.concatenate %16, %31, %46, %61, %76, %91, %106, %121 in 0 : vector<1x256xf32>, vector<1x256xf32>, vector<1x256xf32>, vector<1x256xf32>, vector<1x256xf32>, vector<1x256xf32>, vector<1x256xf32>, vector<1x256xf32> -> vector<8x256xf32>
    %c0_59 = arith.constant 0 : index
    %c0_60 = arith.constant 0 : index
    %123 = vector.load %arg6[%c0_59, %c0_60] : memref<2x256xf32, #tpu.memory_space<vmem>>, vector<2x256xf32>
    %124 = vector.extract_strided_slice %123 {offsets = [0, 0], sizes = [1, 256], strides = [1, 1]} : vector<2x256xf32> to vector<1x256xf32>
    %125 = vector.broadcast %124 : vector<1x256xf32> to vector<8x256xf32>
    %126 = arith.mulf %122, %125 : vector<8x256xf32>
    %127 = vector.extract_strided_slice %123 {offsets = [1, 0], sizes = [1, 256], strides = [1, 1]} : vector<2x256xf32> to vector<1x256xf32>
    %128 = vector.broadcast %127 : vector<1x256xf32> to vector<8x256xf32>
    %129 = arith.addf %126, %128 : vector<8x256xf32>
    %c0_61 = arith.constant 0 : index
    %c0_62 = arith.constant 0 : index
    %130 = vector.load %arg7[%c0_61, %c0_62] : memref<256x512xbf16, #tpu.memory_space<vmem>>, vector<256x512xbf16>
    %c0_63 = arith.constant 0 : index
    %c0_64 = arith.constant 0 : index
    %131 = vector.load %arg8[%c0_63, %c0_64] : memref<1x512xf32, #tpu.memory_space<vmem>>, vector<1x512xf32>
    %132 = arith.truncf %129 : vector<8x256xf32> to vector<8x256xbf16>
    %cst_65 = arith.constant dense<0.000000e+00> : vector<8x512xf32>
    %133 = tpu.matmul %132, %130, %cst_65 {dimension_numbers = #tpu.dot_dimension_numbers<[1], [0], [0], [1], [0, 0, 1, 1], [], []>} : vector<8x256xbf16>, vector<256x512xbf16>, vector<8x512xf32> -> vector<8x512xf32>
    %134 = vector.broadcast %131 : vector<1x512xf32> to vector<8x512xf32>
    %135 = arith.addf %133, %134 : vector<8x512xf32>
    %cst_66 = arith.constant 0.000000e+00 : f32
    %136 = vector.broadcast %cst_66 : f32 to vector<8x512xf32>
    %137 = arith.maximumf %135, %136 : vector<8x512xf32>
    %c0_67 = arith.constant 0 : index
    %c0_68 = arith.constant 0 : index
    %138 = vector.load %arg9[%c0_67, %c0_68] : memref<2x512xf32, #tpu.memory_space<vmem>>, vector<2x512xf32>
    %139 = vector.extract_strided_slice %138 {offsets = [0, 0], sizes = [1, 512], strides = [1, 1]} : vector<2x512xf32> to vector<1x512xf32>
    %140 = vector.broadcast %139 : vector<1x512xf32> to vector<8x512xf32>
    %141 = arith.mulf %137, %140 : vector<8x512xf32>
    %142 = vector.extract_strided_slice %138 {offsets = [1, 0], sizes = [1, 512], strides = [1, 1]} : vector<2x512xf32> to vector<1x512xf32>
    %143 = vector.broadcast %142 : vector<1x512xf32> to vector<8x512xf32>
    %144 = arith.addf %141, %143 : vector<8x512xf32>
    %c0_69 = arith.constant 0 : index
    %c0_70 = arith.constant 0 : index
    %145 = vector.load %arg10[%c0_69, %c0_70] : memref<512x128xbf16, #tpu.memory_space<vmem>>, vector<512x128xbf16>
    %c0_71 = arith.constant 0 : index
    %c0_72 = arith.constant 0 : index
    %146 = vector.load %arg11[%c0_71, %c0_72] : memref<1x128xf32, #tpu.memory_space<vmem>>, vector<1x128xf32>
    %147 = arith.truncf %144 : vector<8x512xf32> to vector<8x512xbf16>
    %cst_73 = arith.constant dense<0.000000e+00> : vector<8x128xf32>
    %148 = tpu.matmul %147, %145, %cst_73 {dimension_numbers = #tpu.dot_dimension_numbers<[1], [0], [0], [1], [0, 0, 1, 1], [], []>} : vector<8x512xbf16>, vector<512x128xbf16>, vector<8x128xf32> -> vector<8x128xf32>
    %149 = vector.broadcast %146 : vector<1x128xf32> to vector<8x128xf32>
    %150 = arith.addf %148, %149 : vector<8x128xf32>
    %c0_74 = arith.constant 0 : index
    %c0_75 = arith.constant 0 : index
    %151 = vector.load %arg12[%c0_74, %c0_75] : memref<64x512xbf16, #tpu.memory_space<vmem>>, vector<64x512xbf16>
    %c0_76 = arith.constant 0 : index
    %c0_77 = arith.constant 0 : index
    %152 = vector.load %arg14[%c0_76, %c0_77] : memref<1x512xf32, #tpu.memory_space<vmem>>, vector<1x512xf32>
    %c0_78 = arith.constant 0 : index
    %c0_79 = arith.constant 0 : index
    %c0_80 = arith.constant 0 : index
    %153 = vector.load %arg2[%c0_78, %c0_79, %c0_80] : memref<8x8x64xf32, #tpu.memory_space<vmem>>, vector<1x8x64xf32>
    %154 = vector.shape_cast %153 : vector<1x8x64xf32> to vector<8x64xf32>
    %155 = arith.truncf %154 : vector<8x64xf32> to vector<8x64xbf16>
    %cst_81 = arith.constant dense<0.000000e+00> : vector<8x512xf32>
    %156 = tpu.matmul %155, %151, %cst_81 {dimension_numbers = #tpu.dot_dimension_numbers<[1], [0], [0], [1], [0, 0, 1, 1], [], []>} : vector<8x64xbf16>, vector<64x512xbf16>, vector<8x512xf32> -> vector<8x512xf32>
    %157 = vector.broadcast %152 : vector<1x512xf32> to vector<8x512xf32>
    %158 = arith.addf %156, %157 : vector<8x512xf32>
    %c0_82 = arith.constant 0 : index
    %c0_83 = arith.constant 0 : index
    %c0_84 = arith.constant 0 : index
    %159 = vector.load %arg24[%c0_82, %c0_83, %c0_84] : memref<8x8x512xf32, #tpu.memory_space<vmem>>, vector<1x8x512xf32>
    %160 = vector.shape_cast %159 : vector<1x8x512xf32> to vector<8x512xf32>
    %161 = vector.shape_cast %158 : vector<8x512xf32> to vector<1x8x512xf32>
    tpu.vector_store %arg24[%c0_82, %c0_83, %c0_84], %161 {strides = array<i32>} : memref<8x8x512xf32, #tpu.memory_space<vmem>>, vector<1x8x512xf32>,
    %c1_85 = arith.constant 1 : index
    %c0_86 = arith.constant 0 : index
    %c0_87 = arith.constant 0 : index
    %162 = vector.load %arg2[%c1_85, %c0_86, %c0_87] : memref<8x8x64xf32, #tpu.memory_space<vmem>>, vector<1x8x64xf32>
    %163 = vector.shape_cast %162 : vector<1x8x64xf32> to vector<8x64xf32>
    %164 = arith.truncf %163 : vector<8x64xf32> to vector<8x64xbf16>
    %cst_88 = arith.constant dense<0.000000e+00> : vector<8x512xf32>
    %165 = tpu.matmul %164, %151, %cst_88 {dimension_numbers = #tpu.dot_dimension_numbers<[1], [0], [0], [1], [0, 0, 1, 1], [], []>} : vector<8x64xbf16>, vector<64x512xbf16>, vector<8x512xf32> -> vector<8x512xf32>
    %166 = vector.broadcast %152 : vector<1x512xf32> to vector<8x512xf32>
    %167 = arith.addf %165, %166 : vector<8x512xf32>
    %c1_89 = arith.constant 1 : index
    %c0_90 = arith.constant 0 : index
    %c0_91 = arith.constant 0 : index
    %168 = vector.load %arg24[%c1_89, %c0_90, %c0_91] : memref<8x8x512xf32, #tpu.memory_space<vmem>>, vector<1x8x512xf32>
    %169 = vector.shape_cast %168 : vector<1x8x512xf32> to vector<8x512xf32>
    %170 = vector.shape_cast %167 : vector<8x512xf32> to vector<1x8x512xf32>
    tpu.vector_store %arg24[%c1_89, %c0_90, %c0_91], %170 {strides = array<i32>} : memref<8x8x512xf32, #tpu.memory_space<vmem>>, vector<1x8x512xf32>,
    %c2_92 = arith.constant 2 : index
    %c0_93 = arith.constant 0 : index
    %c0_94 = arith.constant 0 : index
    %171 = vector.load %arg2[%c2_92, %c0_93, %c0_94] : memref<8x8x64xf32, #tpu.memory_space<vmem>>, vector<1x8x64xf32>
    %172 = vector.shape_cast %171 : vector<1x8x64xf32> to vector<8x64xf32>
    %173 = arith.truncf %172 : vector<8x64xf32> to vector<8x64xbf16>
    %cst_95 = arith.constant dense<0.000000e+00> : vector<8x512xf32>
    %174 = tpu.matmul %173, %151, %cst_95 {dimension_numbers = #tpu.dot_dimension_numbers<[1], [0], [0], [1], [0, 0, 1, 1], [], []>} : vector<8x64xbf16>, vector<64x512xbf16>, vector<8x512xf32> -> vector<8x512xf32>
    %175 = vector.broadcast %152 : vector<1x512xf32> to vector<8x512xf32>
    %176 = arith.addf %174, %175 : vector<8x512xf32>
    %c2_96 = arith.constant 2 : index
    %c0_97 = arith.constant 0 : index
    %c0_98 = arith.constant 0 : index
    %177 = vector.load %arg24[%c2_96, %c0_97, %c0_98] : memref<8x8x512xf32, #tpu.memory_space<vmem>>, vector<1x8x512xf32>
    %178 = vector.shape_cast %177 : vector<1x8x512xf32> to vector<8x512xf32>
    %179 = vector.shape_cast %176 : vector<8x512xf32> to vector<1x8x512xf32>
    tpu.vector_store %arg24[%c2_96, %c0_97, %c0_98], %179 {strides = array<i32>} : memref<8x8x512xf32, #tpu.memory_space<vmem>>, vector<1x8x512xf32>,
    %c3_99 = arith.constant 3 : index
    %c0_100 = arith.constant 0 : index
    %c0_101 = arith.constant 0 : index
    %180 = vector.load %arg2[%c3_99, %c0_100, %c0_101] : memref<8x8x64xf32, #tpu.memory_space<vmem>>, vector<1x8x64xf32>
    %181 = vector.shape_cast %180 : vector<1x8x64xf32> to vector<8x64xf32>
    %182 = arith.truncf %181 : vector<8x64xf32> to vector<8x64xbf16>
    %cst_102 = arith.constant dense<0.000000e+00> : vector<8x512xf32>
    %183 = tpu.matmul %182, %151, %cst_102 {dimension_numbers = #tpu.dot_dimension_numbers<[1], [0], [0], [1], [0, 0, 1, 1], [], []>} : vector<8x64xbf16>, vector<64x512xbf16>, vector<8x512xf32> -> vector<8x512xf32>
    %184 = vector.broadcast %152 : vector<1x512xf32> to vector<8x512xf32>
    %185 = arith.addf %183, %184 : vector<8x512xf32>
    %c3_103 = arith.constant 3 : index
    %c0_104 = arith.constant 0 : index
    %c0_105 = arith.constant 0 : index
    %186 = vector.load %arg24[%c3_103, %c0_104, %c0_105] : memref<8x8x512xf32, #tpu.memory_space<vmem>>, vector<1x8x512xf32>
    %187 = vector.shape_cast %186 : vector<1x8x512xf32> to vector<8x512xf32>
    %188 = vector.shape_cast %185 : vector<8x512xf32> to vector<1x8x512xf32>
    tpu.vector_store %arg24[%c3_103, %c0_104, %c0_105], %188 {strides = array<i32>} : memref<8x8x512xf32, #tpu.memory_space<vmem>>, vector<1x8x512xf32>,
    %c4_106 = arith.constant 4 : index
    %c0_107 = arith.constant 0 : index
    %c0_108 = arith.constant 0 : index
    %189 = vector.load %arg2[%c4_106, %c0_107, %c0_108] : memref<8x8x64xf32, #tpu.memory_space<vmem>>, vector<1x8x64xf32>
    %190 = vector.shape_cast %189 : vector<1x8x64xf32> to vector<8x64xf32>
    %191 = arith.truncf %190 : vector<8x64xf32> to vector<8x64xbf16>
    %cst_109 = arith.constant dense<0.000000e+00> : vector<8x512xf32>
    %192 = tpu.matmul %191, %151, %cst_109 {dimension_numbers = #tpu.dot_dimension_numbers<[1], [0], [0], [1], [0, 0, 1, 1], [], []>} : vector<8x64xbf16>, vector<64x512xbf16>, vector<8x512xf32> -> vector<8x512xf32>
    %193 = vector.broadcast %152 : vector<1x512xf32> to vector<8x512xf32>
    %194 = arith.addf %192, %193 : vector<8x512xf32>
    %c4_110 = arith.constant 4 : index
    %c0_111 = arith.constant 0 : index
    %c0_112 = arith.constant 0 : index
    %195 = vector.load %arg24[%c4_110, %c0_111, %c0_112] : memref<8x8x512xf32, #tpu.memory_space<vmem>>, vector<1x8x512xf32>
    %196 = vector.shape_cast %195 : vector<1x8x512xf32> to vector<8x512xf32>
    %197 = vector.shape_cast %194 : vector<8x512xf32> to vector<1x8x512xf32>
    tpu.vector_store %arg24[%c4_110, %c0_111, %c0_112], %197 {strides = array<i32>} : memref<8x8x512xf32, #tpu.memory_space<vmem>>, vector<1x8x512xf32>,
    %c5_113 = arith.constant 5 : index
    %c0_114 = arith.constant 0 : index
    %c0_115 = arith.constant 0 : index
    %198 = vector.load %arg2[%c5_113, %c0_114, %c0_115] : memref<8x8x64xf32, #tpu.memory_space<vmem>>, vector<1x8x64xf32>
    %199 = vector.shape_cast %198 : vector<1x8x64xf32> to vector<8x64xf32>
    %200 = arith.truncf %199 : vector<8x64xf32> to vector<8x64xbf16>
    %cst_116 = arith.constant dense<0.000000e+00> : vector<8x512xf32>
    %201 = tpu.matmul %200, %151, %cst_116 {dimension_numbers = #tpu.dot_dimension_numbers<[1], [0], [0], [1], [0, 0, 1, 1], [], []>} : vector<8x64xbf16>, vector<64x512xbf16>, vector<8x512xf32> -> vector<8x512xf32>
    %202 = vector.broadcast %152 : vector<1x512xf32> to vector<8x512xf32>
    %203 = arith.addf %201, %202 : vector<8x512xf32>
    %c5_117 = arith.constant 5 : index
    %c0_118 = arith.constant 0 : index
    %c0_119 = arith.constant 0 : index
    %204 = vector.load %arg24[%c5_117, %c0_118, %c0_119] : memref<8x8x512xf32, #tpu.memory_space<vmem>>, vector<1x8x512xf32>
    %205 = vector.shape_cast %204 : vector<1x8x512xf32> to vector<8x512xf32>
    %206 = vector.shape_cast %203 : vector<8x512xf32> to vector<1x8x512xf32>
    tpu.vector_store %arg24[%c5_117, %c0_118, %c0_119], %206 {strides = array<i32>} : memref<8x8x512xf32, #tpu.memory_space<vmem>>, vector<1x8x512xf32>,
    %c6_120 = arith.constant 6 : index
    %c0_121 = arith.constant 0 : index
    %c0_122 = arith.constant 0 : index
    %207 = vector.load %arg2[%c6_120, %c0_121, %c0_122] : memref<8x8x64xf32, #tpu.memory_space<vmem>>, vector<1x8x64xf32>
    %208 = vector.shape_cast %207 : vector<1x8x64xf32> to vector<8x64xf32>
    %209 = arith.truncf %208 : vector<8x64xf32> to vector<8x64xbf16>
    %cst_123 = arith.constant dense<0.000000e+00> : vector<8x512xf32>
    %210 = tpu.matmul %209, %151, %cst_123 {dimension_numbers = #tpu.dot_dimension_numbers<[1], [0], [0], [1], [0, 0, 1, 1], [], []>} : vector<8x64xbf16>, vector<64x512xbf16>, vector<8x512xf32> -> vector<8x512xf32>
    %211 = vector.broadcast %152 : vector<1x512xf32> to vector<8x512xf32>
    %212 = arith.addf %210, %211 : vector<8x512xf32>
    %c6_124 = arith.constant 6 : index
    %c0_125 = arith.constant 0 : index
    %c0_126 = arith.constant 0 : index
    %213 = vector.load %arg24[%c6_124, %c0_125, %c0_126] : memref<8x8x512xf32, #tpu.memory_space<vmem>>, vector<1x8x512xf32>
    %214 = vector.shape_cast %213 : vector<1x8x512xf32> to vector<8x512xf32>
    %215 = vector.shape_cast %212 : vector<8x512xf32> to vector<1x8x512xf32>
    tpu.vector_store %arg24[%c6_124, %c0_125, %c0_126], %215 {strides = array<i32>} : memref<8x8x512xf32, #tpu.memory_space<vmem>>, vector<1x8x512xf32>,
    %c7_127 = arith.constant 7 : index
    %c0_128 = arith.constant 0 : index
    %c0_129 = arith.constant 0 : index
    %216 = vector.load %arg2[%c7_127, %c0_128, %c0_129] : memref<8x8x64xf32, #tpu.memory_space<vmem>>, vector<1x8x64xf32>
    %217 = vector.shape_cast %216 : vector<1x8x64xf32> to vector<8x64xf32>
    %218 = arith.truncf %217 : vector<8x64xf32> to vector<8x64xbf16>
    %cst_130 = arith.constant dense<0.000000e+00> : vector<8x512xf32>
    %219 = tpu.matmul %218, %151, %cst_130 {dimension_numbers = #tpu.dot_dimension_numbers<[1], [0], [0], [1], [0, 0, 1, 1], [], []>} : vector<8x64xbf16>, vector<64x512xbf16>, vector<8x512xf32> -> vector<8x512xf32>
    %220 = vector.broadcast %152 : vector<1x512xf32> to vector<8x512xf32>
    %221 = arith.addf %219, %220 : vector<8x512xf32>
    %c7_131 = arith.constant 7 : index
    %c0_132 = arith.constant 0 : index
    %c0_133 = arith.constant 0 : index
    %222 = vector.load %arg24[%c7_131, %c0_132, %c0_133] : memref<8x8x512xf32, #tpu.memory_space<vmem>>, vector<1x8x512xf32>
    %223 = vector.shape_cast %222 : vector<1x8x512xf32> to vector<8x512xf32>
    %224 = vector.shape_cast %221 : vector<8x512xf32> to vector<1x8x512xf32>
    tpu.vector_store %arg24[%c7_131, %c0_132, %c0_133], %224 {strides = array<i32>} : memref<8x8x512xf32, #tpu.memory_space<vmem>>, vector<1x8x512xf32>,
    %c0_134 = arith.constant 0 : index
    %c0_135 = arith.constant 0 : index
    %225 = vector.load %arg13[%c0_134, %c0_135] : memref<512x512xbf16, #tpu.memory_space<vmem>>, vector<512x512xbf16>
    %cst_136 = arith.constant 0.000000e+00 : f32
    %226 = vector.broadcast %cst_136 : f32 to vector<8x512xf32>
    %cst_137 = arith.constant 0.000000e+00 : f32
    %227 = vector.broadcast %cst_137 : f32 to vector<8x512xf32>
    %c0_138 = arith.constant 0 : index
    %c0_139 = arith.constant 0 : index
    %c0_140 = arith.constant 0 : index
    %228 = vector.load %arg24[%c0_138, %c0_139, %c0_140] : memref<8x8x512xf32, #tpu.memory_space<vmem>>, vector<1x8x512xf32>
    %229 = vector.shape_cast %228 : vector<1x8x512xf32> to vector<8x512xf32>
    %230 = arith.truncf %226 : vector<8x512xf32> to vector<8x512xbf16>
    %cst_141 = arith.constant dense<0.000000e+00> : vector<8x512xf32>
    %231 = tpu.matmul %230, %225, %cst_141 {dimension_numbers = #tpu.dot_dimension_numbers<[1], [0], [0], [1], [0, 0, 1, 1], [], []>} : vector<8x512xbf16>, vector<512x512xbf16>, vector<8x512xf32> -> vector<8x512xf32>
    %232 = arith.addf %229, %231 : vector<8x512xf32>
    %233 = math.tanh %232 : vector<8x512xf32>
    %234 = arith.addf %227, %233 : vector<8x512xf32>
    %c1_142 = arith.constant 1 : index
    %c0_143 = arith.constant 0 : index
    %c0_144 = arith.constant 0 : index
    %235 = vector.load %arg24[%c1_142, %c0_143, %c0_144] : memref<8x8x512xf32, #tpu.memory_space<vmem>>, vector<1x8x512xf32>
    %236 = vector.shape_cast %235 : vector<1x8x512xf32> to vector<8x512xf32>
    %237 = arith.truncf %233 : vector<8x512xf32> to vector<8x512xbf16>
    %cst_145 = arith.constant dense<0.000000e+00> : vector<8x512xf32>
    %238 = tpu.matmul %237, %225, %cst_145 {dimension_numbers = #tpu.dot_dimension_numbers<[1], [0], [0], [1], [0, 0, 1, 1], [], []>} : vector<8x512xbf16>, vector<512x512xbf16>, vector<8x512xf32> -> vector<8x512xf32>
    %239 = arith.addf %236, %238 : vector<8x512xf32>
    %240 = math.tanh %239 : vector<8x512xf32>
    %241 = arith.maximumf %233, %240 : vector<8x512xf32>
    %242 = arith.addf %234, %240 : vector<8x512xf32>
    %c2_146 = arith.constant 2 : index
    %c0_147 = arith.constant 0 : index
    %c0_148 = arith.constant 0 : index
    %243 = vector.load %arg24[%c2_146, %c0_147, %c0_148] : memref<8x8x512xf32, #tpu.memory_space<vmem>>, vector<1x8x512xf32>
    %244 = vector.shape_cast %243 : vector<1x8x512xf32> to vector<8x512xf32>
    %245 = arith.truncf %240 : vector<8x512xf32> to vector<8x512xbf16>
    %cst_149 = arith.constant dense<0.000000e+00> : vector<8x512xf32>
    %246 = tpu.matmul %245, %225, %cst_149 {dimension_numbers = #tpu.dot_dimension_numbers<[1], [0], [0], [1], [0, 0, 1, 1], [], []>} : vector<8x512xbf16>, vector<512x512xbf16>, vector<8x512xf32> -> vector<8x512xf32>
    %247 = arith.addf %244, %246 : vector<8x512xf32>
    %248 = math.tanh %247 : vector<8x512xf32>
    %249 = arith.maximumf %241, %248 : vector<8x512xf32>
    %250 = arith.addf %242, %248 : vector<8x512xf32>
    %c3_150 = arith.constant 3 : index
    %c0_151 = arith.constant 0 : index
    %c0_152 = arith.constant 0 : index
    %251 = vector.load %arg24[%c3_150, %c0_151, %c0_152] : memref<8x8x512xf32, #tpu.memory_space<vmem>>, vector<1x8x512xf32>
    %252 = vector.shape_cast %251 : vector<1x8x512xf32> to vector<8x512xf32>
    %253 = arith.truncf %248 : vector<8x512xf32> to vector<8x512xbf16>
    %cst_153 = arith.constant dense<0.000000e+00> : vector<8x512xf32>
    %254 = tpu.matmul %253, %225, %cst_153 {dimension_numbers = #tpu.dot_dimension_numbers<[1], [0], [0], [1], [0, 0, 1, 1], [], []>} : vector<8x512xbf16>, vector<512x512xbf16>, vector<8x512xf32> -> vector<8x512xf32>
    %255 = arith.addf %252, %254 : vector<8x512xf32>
    %256 = math.tanh %255 : vector<8x512xf32>
    %257 = arith.maximumf %249, %256 : vector<8x512xf32>
    %258 = arith.addf %250, %256 : vector<8x512xf32>
    %c4_154 = arith.constant 4 : index
    %c0_155 = arith.constant 0 : index
    %c0_156 = arith.constant 0 : index
    %259 = vector.load %arg24[%c4_154, %c0_155, %c0_156] : memref<8x8x512xf32, #tpu.memory_space<vmem>>, vector<1x8x512xf32>
    %260 = vector.shape_cast %259 : vector<1x8x512xf32> to vector<8x512xf32>
    %261 = arith.truncf %256 : vector<8x512xf32> to vector<8x512xbf16>
    %cst_157 = arith.constant dense<0.000000e+00> : vector<8x512xf32>
    %262 = tpu.matmul %261, %225, %cst_157 {dimension_numbers = #tpu.dot_dimension_numbers<[1], [0], [0], [1], [0, 0, 1, 1], [], []>} : vector<8x512xbf16>, vector<512x512xbf16>, vector<8x512xf32> -> vector<8x512xf32>
    %263 = arith.addf %260, %262 : vector<8x512xf32>
    %264 = math.tanh %263 : vector<8x512xf32>
    %265 = arith.maximumf %257, %264 : vector<8x512xf32>
    %266 = arith.addf %258, %264 : vector<8x512xf32>
    %c5_158 = arith.constant 5 : index
    %c0_159 = arith.constant 0 : index
    %c0_160 = arith.constant 0 : index
    %267 = vector.load %arg24[%c5_158, %c0_159, %c0_160] : memref<8x8x512xf32, #tpu.memory_space<vmem>>, vector<1x8x512xf32>
    %268 = vector.shape_cast %267 : vector<1x8x512xf32> to vector<8x512xf32>
    %269 = arith.truncf %264 : vector<8x512xf32> to vector<8x512xbf16>
    %cst_161 = arith.constant dense<0.000000e+00> : vector<8x512xf32>
    %270 = tpu.matmul %269, %225, %cst_161 {dimension_numbers = #tpu.dot_dimension_numbers<[1], [0], [0], [1], [0, 0, 1, 1], [], []>} : vector<8x512xbf16>, vector<512x512xbf16>, vector<8x512xf32> -> vector<8x512xf32>
    %271 = arith.addf %268, %270 : vector<8x512xf32>
    %272 = math.tanh %271 : vector<8x512xf32>
    %273 = arith.maximumf %265, %272 : vector<8x512xf32>
    %274 = arith.addf %266, %272 : vector<8x512xf32>
    %c6_162 = arith.constant 6 : index
    %c0_163 = arith.constant 0 : index
    %c0_164 = arith.constant 0 : index
    %275 = vector.load %arg24[%c6_162, %c0_163, %c0_164] : memref<8x8x512xf32, #tpu.memory_space<vmem>>, vector<1x8x512xf32>
    %276 = vector.shape_cast %275 : vector<1x8x512xf32> to vector<8x512xf32>
    %277 = arith.truncf %272 : vector<8x512xf32> to vector<8x512xbf16>
    %cst_165 = arith.constant dense<0.000000e+00> : vector<8x512xf32>
    %278 = tpu.matmul %277, %225, %cst_165 {dimension_numbers = #tpu.dot_dimension_numbers<[1], [0], [0], [1], [0, 0, 1, 1], [], []>} : vector<8x512xbf16>, vector<512x512xbf16>, vector<8x512xf32> -> vector<8x512xf32>
    %279 = arith.addf %276, %278 : vector<8x512xf32>
    %280 = math.tanh %279 : vector<8x512xf32>
    %281 = arith.maximumf %273, %280 : vector<8x512xf32>
    %282 = arith.addf %274, %280 : vector<8x512xf32>
    %c7_166 = arith.constant 7 : index
    %c0_167 = arith.constant 0 : index
    %c0_168 = arith.constant 0 : index
    %283 = vector.load %arg24[%c7_166, %c0_167, %c0_168] : memref<8x8x512xf32, #tpu.memory_space<vmem>>, vector<1x8x512xf32>
    %284 = vector.shape_cast %283 : vector<1x8x512xf32> to vector<8x512xf32>
    %285 = arith.truncf %280 : vector<8x512xf32> to vector<8x512xbf16>
    %cst_169 = arith.constant dense<0.000000e+00> : vector<8x512xf32>
    %286 = tpu.matmul %285, %225, %cst_169 {dimension_numbers = #tpu.dot_dimension_numbers<[1], [0], [0], [1], [0, 0, 1, 1], [], []>} : vector<8x512xbf16>, vector<512x512xbf16>, vector<8x512xf32> -> vector<8x512xf32>
    %287 = arith.addf %284, %286 : vector<8x512xf32>
    %288 = math.tanh %287 : vector<8x512xf32>
    %289 = arith.maximumf %281, %288 : vector<8x512xf32>
    %290 = arith.addf %282, %288 : vector<8x512xf32>
    %cst_170 = arith.constant 1.250000e-01 : f32
    %291 = vector.broadcast %cst_170 : f32 to vector<8x512xf32>
    %292 = arith.mulf %290, %291 : vector<8x512xf32>
    %293 = tpu.concatenate %288, %289, %292 in 1 : vector<8x512xf32>, vector<8x512xf32>, vector<8x512xf32> -> vector<8x1536xf32>
    %c0_171 = arith.constant 0 : index
    %c0_172 = arith.constant 0 : index
    %294 = vector.load %arg15[%c0_171, %c0_172] : memref<2x1536xf32, #tpu.memory_space<vmem>>, vector<2x1536xf32>
    %295 = vector.extract_strided_slice %294 {offsets = [0, 0], sizes = [1, 1536], strides = [1, 1]} : vector<2x1536xf32> to vector<1x1536xf32>
    %296 = vector.broadcast %295 : vector<1x1536xf32> to vector<8x1536xf32>
    %297 = arith.mulf %293, %296 : vector<8x1536xf32>
    %298 = vector.extract_strided_slice %294 {offsets = [1, 0], sizes = [1, 1536], strides = [1, 1]} : vector<2x1536xf32> to vector<1x1536xf32>
    %299 = vector.broadcast %298 : vector<1x1536xf32> to vector<8x1536xf32>
    %300 = arith.addf %297, %299 : vector<8x1536xf32>
    %c0_173 = arith.constant 0 : index
    %c0_174 = arith.constant 0 : index
    %301 = vector.load %arg16[%c0_173, %c0_174] : memref<1536x128xbf16, #tpu.memory_space<vmem>>, vector<1536x128xbf16>
    %c0_175 = arith.constant 0 : index
    %c0_176 = arith.constant 0 : index
    %302 = vector.load %arg17[%c0_175, %c0_176] : memref<1x128xf32, #tpu.memory_space<vmem>>, vector<1x128xf32>
    %303 = arith.truncf %300 : vector<8x1536xf32> to vector<8x1536xbf16>
    %cst_177 = arith.constant dense<0.000000e+00> : vector<8x128xf32>
    %304 = tpu.matmul %303, %301, %cst_177 {dimension_numbers = #tpu.dot_dimension_numbers<[1], [0], [0], [1], [0, 0, 1, 1], [], []>} : vector<8x1536xbf16>, vector<1536x128xbf16>, vector<8x128xf32> -> vector<8x128xf32>
    %305 = vector.broadcast %302 : vector<1x128xf32> to vector<8x128xf32>
    %306 = arith.addf %304, %305 : vector<8x128xf32>
    %cst_178 = arith.constant 0.000000e+00 : f32
    %307 = vector.broadcast %cst_178 : f32 to vector<8x128xf32>
    %308 = arith.maximumf %150, %307 : vector<8x128xf32>
    %c0_179 = arith.constant 0 : index
    %c0_180 = arith.constant 0 : index
    %309 = vector.load %arg3[%c0_179, %c0_180] : memref<8x128xf32, #tpu.memory_space<vmem>>, vector<8x128xf32>
    %cst_181 = arith.constant 0.000000e+00 : f32
    %310 = vector.broadcast %cst_181 : f32 to vector<8x128xf32>
    %311 = arith.maximumf %309, %310 : vector<8x128xf32>
    %cst_182 = arith.constant 0.000000e+00 : f32
    %312 = vector.broadcast %cst_182 : f32 to vector<8x128xf32>
    %313 = arith.maximumf %306, %312 : vector<8x128xf32>
    %314 = tpu.concatenate %308, %311, %313 in 1 : vector<8x128xf32>, vector<8x128xf32>, vector<8x128xf32> -> vector<8x384xf32>
    %c0_183 = arith.constant 0 : index
    %c0_184 = arith.constant 0 : index
    %315 = vector.load %arg18[%c0_183, %c0_184] : memref<2x384xf32, #tpu.memory_space<vmem>>, vector<2x384xf32>
    %316 = vector.extract_strided_slice %315 {offsets = [0, 0], sizes = [1, 384], strides = [1, 1]} : vector<2x384xf32> to vector<1x384xf32>
    %317 = vector.broadcast %316 : vector<1x384xf32> to vector<8x384xf32>
    %318 = arith.mulf %314, %317 : vector<8x384xf32>
    %319 = vector.extract_strided_slice %315 {offsets = [1, 0], sizes = [1, 384], strides = [1, 1]} : vector<2x384xf32> to vector<1x384xf32>
    %320 = vector.broadcast %319 : vector<1x384xf32> to vector<8x384xf32>
    %321 = arith.addf %318, %320 : vector<8x384xf32>
    %c0_185 = arith.constant 0 : index
    %c0_186 = arith.constant 0 : index
    %322 = vector.load %arg19[%c0_185, %c0_186] : memref<384x128xbf16, #tpu.memory_space<vmem>>, vector<384x128xbf16>
    %c0_187 = arith.constant 0 : index
    %c0_188 = arith.constant 0 : index
    %323 = vector.load %arg20[%c0_187, %c0_188] : memref<1x128xf32, #tpu.memory_space<vmem>>, vector<1x128xf32>
    %324 = arith.truncf %321 : vector<8x384xf32> to vector<8x384xbf16>
    %cst_189 = arith.constant dense<0.000000e+00> : vector<8x128xf32>
    %325 = tpu.matmul %324, %322, %cst_189 {dimension_numbers = #tpu.dot_dimension_numbers<[1], [0], [0], [1], [0, 0, 1, 1], [], []>} : vector<8x384xbf16>, vector<384x128xbf16>, vector<8x128xf32> -> vector<8x128xf32>
    %326 = vector.broadcast %323 : vector<1x128xf32> to vector<8x128xf32>
    %327 = arith.addf %325, %326 : vector<8x128xf32>
    %cst_190 = arith.constant 0.000000e+00 : f32
    %328 = vector.broadcast %cst_190 : f32 to vector<8x128xf32>
    %329 = arith.maximumf %327, %328 : vector<8x128xf32>
    %c0_191 = arith.constant 0 : index
    %c0_192 = arith.constant 0 : index
    %330 = vector.load %arg21[%c0_191, %c0_192] : memref<128x2xbf16, #tpu.memory_space<vmem>>, vector<128x2xbf16>
    %c0_193 = arith.constant 0 : index
    %c0_194 = arith.constant 0 : index
    %331 = vector.load %arg22[%c0_193, %c0_194] : memref<1x2xf32, #tpu.memory_space<vmem>>, vector<1x2xf32>
    %332 = arith.truncf %329 : vector<8x128xf32> to vector<8x128xbf16>
    %cst_195 = arith.constant dense<0.000000e+00> : vector<8x2xf32>
    %333 = tpu.matmul %332, %330, %cst_195 {dimension_numbers = #tpu.dot_dimension_numbers<[1], [0], [0], [1], [0, 0, 1, 1], [], []>} : vector<8x128xbf16>, vector<128x2xbf16>, vector<8x2xf32> -> vector<8x2xf32>
    %334 = vector.broadcast %331 : vector<1x2xf32> to vector<8x2xf32>
    %335 = arith.addf %333, %334 : vector<8x2xf32>
    %336 = arith.negf %335 : vector<8x2xf32>
    %337 = math.exp %336 : vector<8x2xf32>
    %cst_196 = arith.constant 1.000000e+00 : f32
    %338 = vector.broadcast %cst_196 : f32 to vector<8x2xf32>
    %339 = arith.addf %338, %337 : vector<8x2xf32>
    %340 = arith.divf %338, %339 : vector<8x2xf32>
    %c0_197 = arith.constant 0 : index
    %c0_198 = arith.constant 0 : index
    %341 = vector.load %arg23[%c0_197, %c0_198] : memref<8x2xf32, #tpu.memory_space<vmem>>, vector<8x2xf32>
    tpu.vector_store %arg23[%c0_197, %c0_198], %340 {strides = array<i32>} : memref<8x2xf32, #tpu.memory_space<vmem>>, vector<8x2xf32>,
    return
  }
  func.func @transform_0(%arg0: i32) -> (i32, i32, i32) {
    %c0_i32 = arith.constant 0 : i32
    %c0_i32_0 = arith.constant 0 : i32
    %c0_i32_1 = arith.constant 0 : i32
    return %arg0, %c0_i32, %c0_i32_0 : i32, i32, i32
  }
  func.func @transform_1(%arg0: i32) -> (i32, i32, i32) {
    %c0_i32 = arith.constant 0 : i32
    %c0_i32_0 = arith.constant 0 : i32
    %c0_i32_1 = arith.constant 0 : i32
    return %c0_i32, %arg0, %c0_i32_0 : i32, i32, i32
  }
  func.func @transform_2(%arg0: i32) -> (i32, i32) {
    %c0_i32 = arith.constant 0 : i32
    %c0_i32_0 = arith.constant 0 : i32
    return %arg0, %c0_i32 : i32, i32
  }
  func.func @transform_3(%arg0: i32) -> (i32, i32) {
    %c0_i32 = arith.constant 0 : i32
    %c0_i32_0 = arith.constant 0 : i32
    %c0_i32_1 = arith.constant 0 : i32
    return %c0_i32, %c0_i32_0 : i32, i32
  }
  func.func @transform_4(%arg0: i32) -> (i32, i32) {
    %c0_i32 = arith.constant 0 : i32
    %c0_i32_0 = arith.constant 0 : i32
    %c0_i32_1 = arith.constant 0 : i32
    return %c0_i32, %c0_i32_0 : i32, i32
  }
  func.func @transform_5(%arg0: i32) -> (i32, i32) {
    %c0_i32 = arith.constant 0 : i32
    %c0_i32_0 = arith.constant 0 : i32
    %c0_i32_1 = arith.constant 0 : i32
    return %c0_i32, %c0_i32_0 : i32, i32
  }
  func.func @transform_6(%arg0: i32) -> (i32, i32) {
    %c0_i32 = arith.constant 0 : i32
    %c0_i32_0 = arith.constant 0 : i32
    %c0_i32_1 = arith.constant 0 : i32
    return %c0_i32, %c0_i32_0 : i32, i32
  }
  func.func @transform_7(%arg0: i32) -> (i32, i32) {
    %c0_i32 = arith.constant 0 : i32
    %c0_i32_0 = arith.constant 0 : i32
    %c0_i32_1 = arith.constant 0 : i32
    return %c0_i32, %c0_i32_0 : i32, i32
  }
  func.func @transform_8(%arg0: i32) -> (i32, i32) {
    %c0_i32 = arith.constant 0 : i32
    %c0_i32_0 = arith.constant 0 : i32
    %c0_i32_1 = arith.constant 0 : i32
    return %c0_i32, %c0_i32_0 : i32, i32
  }
  func.func @transform_9(%arg0: i32) -> (i32, i32) {
    %c0_i32 = arith.constant 0 : i32
    %c0_i32_0 = arith.constant 0 : i32
    %c0_i32_1 = arith.constant 0 : i32
    return %c0_i32, %c0_i32_0 : i32, i32
  }
  func.func @transform_10(%arg0: i32) -> (i32, i32) {
    %c0_i32 = arith.constant 0 : i32
    %c0_i32_0 = arith.constant 0 : i32
    %c0_i32_1 = arith.constant 0 : i32
    return %c0_i32, %c0_i32_0 : i32, i32
  }
  func.func @transform_11(%arg0: i32) -> (i32, i32) {
    %c0_i32 = arith.constant 0 : i32
    %c0_i32_0 = arith.constant 0 : i32
    %c0_i32_1 = arith.constant 0 : i32
    return %c0_i32, %c0_i32_0 : i32, i32
  }
  func.func @transform_12(%arg0: i32) -> (i32, i32) {
    %c0_i32 = arith.constant 0 : i32
    %c0_i32_0 = arith.constant 0 : i32
    %c0_i32_1 = arith.constant 0 : i32
    return %c0_i32, %c0_i32_0 : i32, i32
  }
  func.func @transform_13(%arg0: i32) -> (i32, i32) {
    %c0_i32 = arith.constant 0 : i32
    %c0_i32_0 = arith.constant 0 : i32
    %c0_i32_1 = arith.constant 0 : i32
    return %c0_i32, %c0_i32_0 : i32, i32
  }
  func.func @transform_14(%arg0: i32) -> (i32, i32) {
    %c0_i32 = arith.constant 0 : i32
    %c0_i32_0 = arith.constant 0 : i32
    %c0_i32_1 = arith.constant 0 : i32
    return %c0_i32, %c0_i32_0 : i32, i32
  }
  func.func @transform_15(%arg0: i32) -> (i32, i32) {
    %c0_i32 = arith.constant 0 : i32
    %c0_i32_0 = arith.constant 0 : i32
    %c0_i32_1 = arith.constant 0 : i32
    return %c0_i32, %c0_i32_0 : i32, i32
  }
  func.func @transform_16(%arg0: i32) -> (i32, i32) {
    %c0_i32 = arith.constant 0 : i32
    %c0_i32_0 = arith.constant 0 : i32
    %c0_i32_1 = arith.constant 0 : i32
    return %c0_i32, %c0_i32_0 : i32, i32
  }
  func.func @transform_17(%arg0: i32) -> (i32, i32) {
    %c0_i32 = arith.constant 0 : i32
    %c0_i32_0 = arith.constant 0 : i32
    %c0_i32_1 = arith.constant 0 : i32
    return %c0_i32, %c0_i32_0 : i32, i32
  }
  func.func @transform_18(%arg0: i32) -> (i32, i32) {
    %c0_i32 = arith.constant 0 : i32
    %c0_i32_0 = arith.constant 0 : i32
    %c0_i32_1 = arith.constant 0 : i32
    return %c0_i32, %c0_i32_0 : i32, i32
  }
  func.func @transform_19(%arg0: i32) -> (i32, i32) {
    %c0_i32 = arith.constant 0 : i32
    %c0_i32_0 = arith.constant 0 : i32
    %c0_i32_1 = arith.constant 0 : i32
    return %c0_i32, %c0_i32_0 : i32, i32
  }
  func.func @transform_20(%arg0: i32) -> (i32, i32) {
    %c0_i32 = arith.constant 0 : i32
    %c0_i32_0 = arith.constant 0 : i32
    %c0_i32_1 = arith.constant 0 : i32
    return %c0_i32, %c0_i32_0 : i32, i32
  }
  func.func @transform_21(%arg0: i32) -> (i32, i32) {
    %c0_i32 = arith.constant 0 : i32
    %c0_i32_0 = arith.constant 0 : i32
    %c0_i32_1 = arith.constant 0 : i32
    return %c0_i32, %c0_i32_0 : i32, i32
  }
  func.func @transform_22(%arg0: i32) -> (i32, i32) {
    %c0_i32 = arith.constant 0 : i32
    %c0_i32_0 = arith.constant 0 : i32
    return %arg0, %c0_i32 : i32, i32
  }
}

</mosaic_0001>

<bundles_post_ra>
// kernel: forward.1
= control target key start
LH: loop header
LB: loop body
LE: loop exit
PB: predicated region body
PF: predicated region fallthrough
CT: control target
= control target key end

     0   :  { %vm143_vm0 = vcmask 261120   ;;  %vm3058_vm1 = vcmask 1040384   ;;  %vm3061_vm2 = vcmask 1041408   ;;  %vm3064_vm3 = vcmask 1042432   ;;  %s17875_s3 = inlined_call_operand.vmem [shape: bf16[32,128], index: 3, kind: input, shape index: {}]   ;;  %s17876_s0 = inlined_call_operand.vmem [shape: f32[8,256,32], index: 0, kind: input, shape index: {}]   ;;  %s17877_s4 = inlined_call_operand.vmem [shape: f32[1,128], index: 4, kind: input, shape index: {}]   ;;  %s17878_s6 = inlined_call_operand.vmem [shape: bf16[256,512], index: 6, kind: input, shape index: {}]   ;;  %s17879_s9 = inlined_call_operand.vmem [shape: bf16[512,128], index: 9, kind: input, shape index: {}]   ;;  %s17880_s5 = inlined_call_operand.vmem [shape: f32[2,256], index: 5, kind: input, shape index: {}]   ;;  %s17881_s11 = inlined_call_operand.vmem [shape: bf16[64,512], index: 11, kind: input, shape index: {}]   ;;  %s17882_s7 = inlined_call_operand.vmem [shape: f32[1,512], index: 7, kind: input, shape index: {}]   ;;  %s17883_s8 = inlined_call_operand.vmem [shape: f32[2,512], index: 8, kind: input, shape index: {}]   ;;  %s17884_s12 = inlined_call_operand.vmem [shape: bf16[512,512], index: 12, kind: input, shape index: {}]   ;;  %s17885_s1 = inlined_call_operand.vmem [shape: f32[8,8,64], index: 1, kind: input, shape index: {}]   ;;  %s17886_s10 = inlined_call_operand.vmem [shape: f32[1,128], index: 10, kind: input, shape index: {}]   ;;  %s17887_s13 = inlined_call_operand.vmem [shape: f32[1,512], index: 13, kind: input, shape index: {}]   ;;  %s17888_s15 = inlined_call_operand.vmem [shape: bf16[1536,128], index: 15, kind: input, shape index: {}]   ;;  %s17889_s18 = inlined_call_operand.vmem [shape: bf16[384,128], index: 18, kind: input, shape index: {}]   ;;  %s17890_s14 = inlined_call_operand.vmem [shape: f32[2,1536], index: 14, kind: input, shape index: {}]   ;;  %s17891_s17 = inlined_call_operand.vmem [shape: f32[2,384], index: 17, kind: input, shape index: {}]   ;;  %s17892_s2 = inlined_call_operand.vmem [shape: f32[8,128], index: 2, kind: input, shape index: {}]   ;;  %s17893_s20 = inlined_call_operand.vmem [shape: bf16[128,2], index: 20, kind: input, shape index: {}]   ;;  %s17894_s16 = inlined_call_operand.vmem [shape: f32[1,128], index: 16, kind: input, shape index: {}]   ;;  %s17895_s19 = inlined_call_operand.vmem [shape: f32[1,128], index: 19, kind: input, shape index: {}]   ;;  %s17896_s21 = inlined_call_operand.vmem [shape: f32[1,2], index: 21, kind: input, shape index: {}]   ;;  %s17897_s22 = inlined_call_operand.vmem [shape: f32[8,2], index: 22, kind: output, shape index: {}]  }
   0x1   :  { %18339 = sst [smem:[#allocation109_spill]] %s17875_s3  ;;  %vm3067_vm4 = vcmask 1043456   ;;  %vm3070_vm5 = vcmask 1044480   ;;  %vm3073_vm6 = vcmask 1045504   ;;  %vm3076_vm7 = vcmask 1046528  }
   0x2   :  { %18340 = sst [smem:[#allocation110_spill]] %s17876_s0  ;;  %s18346_s29 = sld [smem:[#allocation109_spill]]  ;;  %vm4164_vm8 = vcmask 523264   ;;  %vm11328_vm9 = vmmov 0   ;;  %vm8913_vm10 = vcmask 15360  }
   0x3   :  { %18341 = sst [smem:[#allocation111_spill]] %s17877_s4  ;;  %s18347_s0 = sld [smem:[#allocation110_spill]] }
   0x4   :  { %18342 = sst [smem:[#allocation112_spill]] %s17878_s6  ;;  %s18348_s27 = sld [smem:[#allocation111_spill]] }
   0x5   :  { %18343 = sst [smem:[#allocation113_spill]] %s17879_s9  ;;  %s18349_s25 = sld [smem:[#allocation112_spill]] }
   0x6   :  { %18344 = sst [smem:[#allocation114_spill]] %s17880_s5 }
   0x7   :  { %18345 = sst [smem:[#allocation115_spill]] %s17881_s11  ;;  %s18350_s11 = sld [smem:[#allocation113_spill]] }
   0x8   :  { %v11447_v0 = vld [vmem:[%s18346_s29] sm:$0xff]   ;;  %v11452_v1 = vld [vmem:[%s18346_s29 + $0x8] sm:$0xff]   ;;  %s18355_s30 = sld [smem:[#allocation114_spill]]  ;;  %s18359_s24 = sld [smem:[#allocation115_spill]] }
   0x9   :  { %10030 = vmatprep.subr.bf16.mxu0 %v11447_v0  ;;  %10358 = vmatprep.subr.bf16.mxu1 %v11447_v0  ;;  %v77_v2 = vld [vmem:[%s18347_s0] sm:$0xff]  ;;  %v78_v3 = vld [vmem:[%s18347_s0 + $0x8] sm:$0xff]  ;;  %v79_v7 = vld [vmem:[%s18347_s0 + $0x10] sm:$0xff] }
   0xa   :  { %v101_v4 = vld [vmem:[%s18347_s0 + $0xc0] sm:$0xff]  ;;  %10031 = vmatpush3.bf16.msra.mxu0 %v11447_v0  ;;  %10360 = vmatpush3.bf16.msra.mxu1 %v11447_v0  ;;  %v109_v5 = vpack.c.bf16 %v78_v3, %v77_v2  ;;  %v102_v6 = vld [vmem:[%s18347_s0 + $0xc8] sm:$0xff]  ;;  %v80_v8 = vld [vmem:[%s18347_s0 + $0x18] sm:$0xff] }
   0xb   :  { %10032 = vmatprep.subr.bf16.mxu0 %v11452_v1  ;;  %10359 = vmatprep.subr.bf16.mxu1 %v11452_v1  ;;  %v121_v9 = vpack.c.bf16 %v102_v6, %v101_v4  ;;  %v103_v10 = vld [vmem:[%s18347_s0 + $0xd0] sm:$0xff]  ;;  %v104_v11 = vld [vmem:[%s18347_s0 + $0xd8] sm:$0xff]  ;;  %v81_v12 = vld [vmem:[%s18347_s0 + $0x20] sm:$0xff]  ;;  %v110_v16 = vpack.c.bf16 %v80_v8, %v79_v7 }
   0xc   :  { %10034 = vmatprep.mubr.msk.bf16.mxu0 %vm143_vm0, %v109_v5  ;;  %v82_v13 = vld [vmem:[%s18347_s0 + $0x28] sm:$0xff]  ;;  %v105_v14 = vld [vmem:[%s18347_s0 + $0xe0] sm:$0xff]  ;;  %v122_v17 = vpack.c.bf16 %v104_v11, %v103_v10  ;;  %v83_v20 = vld [vmem:[%s18347_s0 + $0x30] sm:$0xff] }
   0xd   :  { %v106_v15 = vld [vmem:[%s18347_s0 + $0xe8] sm:$0xff]  ;;  %10058 = vmatprep.mubr.msk.bf16.mxu1 %vm143_vm0, %v121_v9  ;;  %v111_v18 = vpack.c.bf16 %v82_v13, %v81_v12  ;;  %v84_v21 = vld [vmem:[%s18347_s0 + $0x38] sm:$0xff]  ;;  %v107_v22 = vld [vmem:[%s18347_s0 + $0xf0] sm:$0xff] }
   0xe   :  { %10033 = vmatpush3.bf16.msra.mxu0 %v11452_v1  ;;  %10361 = vmatpush3.bf16.msra.mxu1 %v11452_v1  ;;  %v123_v19 = vpack.c.bf16 %v106_v15, %v105_v14  ;;  %v108_v23 = vld [vmem:[%s18347_s0 + $0xf8] sm:$0xff]  ;;  %v85_v24 = vld [vmem:[%s18347_s0 + $0x40] sm:$0xff]  ;;  %v86_v25 = vld [vmem:[%s18347_s0 + $0x48] sm:$0xff]  ;;  %v112_v28 = vpack.c.bf16 %v84_v21, %v83_v20 }
   0xf   :  { %10066 = vmatprep.subr.bf16.mxu1 %v11447_v0  ;;  %10102 = vmatprep.subr.bf16.mxu0 %v11447_v0  ;;  %v8938_v26 = vld [vmem:[%s18347_s0 + $0x100] sm:$0xff]  ;;  %v8939_v27 = vld [vmem:[%s18347_s0 + $0x108] sm:$0xff]  ;;  %v124_v29 = vpack.c.bf16 %v108_v23, %v107_v22  ;;  %v113_v30 = vpack.c.bf16 %v86_v25, %v85_v24  ;;  %v87_v32 = vld [vmem:[%s18347_s0 + $0x50] sm:$0xff] }
  0x10   :  { %v494_v31 = vpack.c.bf16 %v8939_v27, %v8938_v26  ;;  %v88_v33 = vld [vmem:[%s18347_s0 + $0x58] sm:$0xff]  ;;  %v8940_v34 = vld [vmem:[%s18347_s0 + $0x110] sm:$0xff]  ;;  %v89_v36 = vld [vmem:[%s18347_s0 + $0x60] sm:$0xff] }
  0x11   :  { %10035 = vmatmul.mubr.msk.bf16.vlgmr.msra.gmra.mrb[0].mxu0 %vm143_vm0, %v110_v16  ;;  %10059 = vmatmul.mubr.msk.bf16.vlgmr.msra.gmra.mrb[0].mxu1 %vm143_vm0, %v122_v17  ;;  %v8941_v35 = vld [vmem:[%s18347_s0 + $0x118] sm:$0xff]  ;;  %v90_v37 = vld [vmem:[%s18347_s0 + $0x68] sm:$0xff]  ;;  %v8942_v38 = vld [vmem:[%s18347_s0 + $0x120] sm:$0xff]  ;;  %v114_v40 = vpack.c.bf16 %v88_v33, %v87_v32 }
  0x12   :  { %10067 = vmatpush3.bf16.msra.mxu1 %v11447_v0  ;;  %10038 = vmatprep.mubr.msk.bf16.mxu0 %vm143_vm0, %v111_v18  ;;  %v8943_v39 = vld [vmem:[%s18347_s0 + $0x128] sm:$0xff]  ;;  %v495_v41 = vpack.c.bf16 %v8941_v35, %v8940_v34  ;;  %v115_v42 = vpack.c.bf16 %v90_v37, %v89_v36  ;;  %v91_v44 = vld [vmem:[%s18347_s0 + $0x70] sm:$0xff]  ;;  %v92_v45 = vld [vmem:[%s18347_s0 + $0x78] sm:$0xff] }
  0x13   :  { %10062 = vmatprep.mubr.msk.bf16.mxu1 %vm143_vm0, %v123_v19  ;;  %10068 = vmatprep.subr.bf16.mxu1 %v11452_v1  ;;  %v496_v43 = vpack.c.bf16 %v8943_v39, %v8942_v38  ;;  %v8944_v46 = vld [vmem:[%s18347_s0 + $0x130] sm:$0xff]  ;;  %v8945_v47 = vld [vmem:[%s18347_s0 + $0x138] sm:$0xff]  ;;  %v93_v48 = vld [vmem:[%s18347_s0 + $0x80] sm:$0xff]  ;;  %v116_v52 = vpack.c.bf16 %v92_v45, %v91_v44 }
  0x14   :  { %10103 = vmatpush3.bf16.msra.mxu0 %v11447_v0  ;;  %v94_v49 = vld [vmem:[%s18347_s0 + $0x88] sm:$0xff]  ;;  %v8946_v50 = vld [vmem:[%s18347_s0 + $0x140] sm:$0xff]  ;;  %v497_v53 = vpack.c.bf16 %v8945_v47, %v8944_v46  ;;  %v95_v56 = vld [vmem:[%s18347_s0 + $0x90] sm:$0xff] }
  0x15   :  { %10104 = vmatprep.subr.bf16.mxu0 %v11452_v1  ;;  %v8947_v51 = vld [vmem:[%s18347_s0 + $0x148] sm:$0xff]  ;;  %v117_v54 = vpack.c.bf16 %v94_v49, %v93_v48  ;;  %v96_v57 = vld [vmem:[%s18347_s0 + $0x98] sm:$0xff]  ;;  %v8948_v58 = vld [vmem:[%s18347_s0 + $0x150] sm:$0xff] }
  0x16   :  { %10069 = vmatpush3.bf16.msra.mxu1 %v11452_v1  ;;  %v498_v55 = vpack.c.bf16 %v8947_v51, %v8946_v50  ;;  %v8949_v59 = vld [vmem:[%s18347_s0 + $0x158] sm:$0xff]  ;;  %v97_v60 = vld [vmem:[%s18347_s0 + $0xa0] sm:$0xff]  ;;  %v98_v61 = vld [vmem:[%s18347_s0 + $0xa8] sm:$0xff]  ;;  %v118_v2 = vpack.c.bf16 %v96_v57, %v95_v56 }
  0x17   :  { %10138 = vmatprep.subr.bf16.mxu1 %v11447_v0  ;;  %v8950_v62 = vld [vmem:[%s18347_s0 + $0x160] sm:$0xff]  ;;  %v8951_v63 = vld [vmem:[%s18347_s0 + $0x168] sm:$0xff]  ;;  %v499_v3 = vpack.c.bf16 %v8949_v59, %v8948_v58  ;;  %v119_v4 = vpack.c.bf16 %v98_v61, %v97_v60  ;;  %v99_v6 = vld [vmem:[%s18347_s0 + $0xb0] sm:$0xff] }
  0x18   :  { %10105 = vmatpush3.bf16.msra.mxu0 %v11452_v1  ;;  %v500_v5 = vpack.c.bf16 %v8951_v63, %v8950_v62  ;;  %v100_v7 = vld [vmem:[%s18347_s0 + $0xb8] sm:$0xff]  ;;  %v8952_v8 = vld [vmem:[%s18347_s0 + $0x170] sm:$0xff]  ;;  %v8954_v10 = vld [vmem:[%s18347_s0 + $0x180] sm:$0xff] }
  0x19   :  { %10039 = vmatmul.mubr.msk.bf16.gmra.mrb[4].mxu0 %vm143_vm0, %v112_v28  ;;  %10063 = vmatmul.mubr.msk.bf16.gmra.mrb[4].mxu1 %vm143_vm0, %v124_v29  ;;  %v8953_v9 = vld [vmem:[%s18347_s0 + $0x178] sm:$0xff]  ;;  %v8955_v11 = vld [vmem:[%s18347_s0 + $0x188] sm:$0xff]  ;;  %v8986_v12 = vld [vmem:[%s18347_s0 + $0x200] sm:$0xff]  ;;  %v120_v14 = vpack.c.bf16 %v100_v7, %v99_v6 }
  0x1a   :  { %10042 = vmatprep.mubr.msk.bf16.mxu0 %vm143_vm0, %v113_v30  ;;  %10070 = vmatprep.mubr.msk.bf16.mxu1 %vm143_vm0, %v494_v31  ;;  %v8987_v13 = vld [vmem:[%s18347_s0 + $0x208] sm:$0xff]  ;;  %v501_v15 = vpack.c.bf16 %v8953_v9, %v8952_v8  ;;  %v502_v16 = vpack.c.bf16 %v8955_v11, %v8954_v10  ;;  %v8956_v18 = vld [vmem:[%s18347_s0 + $0x190] sm:$0xff]  ;;  %v8957_v19 = vld [vmem:[%s18347_s0 + $0x198] sm:$0xff] }
  0x1b   :  { %10174 = vmatprep.subr.bf16.mxu0 %v11447_v0  ;;  %v859_v17 = vpack.c.bf16 %v8987_v13, %v8986_v12  ;;  %v8988_v20 = vld [vmem:[%s18347_s0 + $0x210] sm:$0xff]  ;;  %v8989_v21 = vld [vmem:[%s18347_s0 + $0x218] sm:$0xff]  ;;  %v8958_v22 = vld [vmem:[%s18347_s0 + $0x1a0] sm:$0xff]  ;;  %v503_v26 = vpack.c.bf16 %v8957_v19, %v8956_v18 }
  0x1c   :  { %v8959_v23 = vld [vmem:[%s18347_s0 + $0x1a8] sm:$0xff]  ;;  %v8990_v24 = vld [vmem:[%s18347_s0 + $0x220] sm:$0xff]  ;;  %v860_v27 = vpack.c.bf16 %v8989_v21, %v8988_v20  ;;  %v8960_v30 = vld [vmem:[%s18347_s0 + $0x1b0] sm:$0xff] }
  0x1d   :  { %v8991_v25 = vld [vmem:[%s18347_s0 + $0x228] sm:$0xff]  ;;  %v504_v28 = vpack.c.bf16 %v8959_v23, %v8958_v22  ;;  %v8961_v31 = vld [vmem:[%s18347_s0 + $0x1b8] sm:$0xff]  ;;  %v8992_v32 = vld [vmem:[%s18347_s0 + $0x230] sm:$0xff] }
  0x1e   :  { %v861_v29 = vpack.c.bf16 %v8991_v25, %v8990_v24  ;;  %v8993_v33 = vld [vmem:[%s18347_s0 + $0x238] sm:$0xff]  ;;  %v8962_v34 = vld [vmem:[%s18347_s0 + $0x1c0] sm:$0xff]  ;;  %v8963_v35 = vld [vmem:[%s18347_s0 + $0x1c8] sm:$0xff]  ;;  %v505_v38 = vpack.c.bf16 %v8961_v31, %v8960_v30 }
  0x1f   :  { %v8994_v36 = vld [vmem:[%s18347_s0 + $0x240] sm:$0xff]  ;;  %v8995_v37 = vld [vmem:[%s18347_s0 + $0x248] sm:$0xff]  ;;  %v862_v39 = vpack.c.bf16 %v8993_v33, %v8992_v32  ;;  %v8996_v44 = vld [vmem:[%s18347_s0 + $0x250] sm:$0xff] }
  0x20   :  { %v8997_v45 = vld [vmem:[%s18347_s0 + $0x258] sm:$0xff]  ;;  %v8966_v46 = vld [vmem:[%s18347_s0 + $0x1e0] sm:$0xff]  ;;  %v8967_v47 = vld [vmem:[%s18347_s0 + $0x1e8] sm:$0xff] }
  0x21   :  { %10043 = vmatmul.mubr.msk.bf16.gmra.mrb[8].mxu0 %vm143_vm0, %v114_v40  ;;  %10071 = vmatmul.mubr.msk.bf16.vlgmr.msra.gmra.mrb[8].mxu1 %vm143_vm0, %v495_v41  ;;  %v506_v40 = vpack.c.bf16 %v8963_v35, %v8962_v34  ;;  %v863_v41 = vpack.c.bf16 %v8995_v37, %v8994_v36  ;;  %v8998_v48 = vld [vmem:[%s18347_s0 + $0x260] sm:$0xff]  ;;  %v8999_v49 = vld [vmem:[%s18347_s0 + $0x268] sm:$0xff]  ;;  %v864_v51 = vpack.c.bf16 %v8997_v45, %v8996_v44  ;;  %v9000_v56 = vld [vmem:[%s18347_s0 + $0x270] sm:$0xff] }
  0x22   :  { %10139 = vmatpush3.bf16.msra.mxu1 %v11447_v0  ;;  %10046 = vmatprep.mubr.msk.bf16.mxu0 %vm143_vm0, %v115_v42  ;;  %v8964_v42 = vld [vmem:[%s18347_s0 + $0x1d0] sm:$0xff]  ;;  %v9001_v57 = vld [vmem:[%s18347_s0 + $0x278] sm:$0xff]  ;;  %v9002_v58 = vld [vmem:[%s18347_s0 + $0x280] sm:$0xff] }
  0x23   :  { %10074 = vmatprep.mubr.msk.bf16.mxu1 %vm143_vm0, %v496_v43  ;;  %10140 = vmatprep.subr.bf16.mxu1 %v11452_v1  ;;  %v8965_v43 = vld [vmem:[%s18347_s0 + $0x1d8] sm:$0xff]  ;;  %v9003_v59 = vld [vmem:[%s18347_s0 + $0x288] sm:$0xff]  ;;  %v9034_v60 = vld [vmem:[%s18347_s0 + $0x300] sm:$0xff]  ;;  %v866_v63 = vpack.c.bf16 %v9001_v57, %v9000_v56 }
  0x24   :  { %v507_v50 = vpack.c.bf16 %v8965_v43, %v8964_v42  ;;  %v9035_v61 = vld [vmem:[%s18347_s0 + $0x308] sm:$0xff]  ;;  %v9036_v6 = vld [vmem:[%s18347_s0 + $0x310] sm:$0xff]  ;;  %v9037_v7 = vld [vmem:[%s18347_s0 + $0x318] sm:$0xff] }
  0x25   :  { %v9006_v8 = vld [vmem:[%s18347_s0 + $0x2a0] sm:$0xff]  ;;  %v9007_v9 = vld [vmem:[%s18347_s0 + $0x2a8] sm:$0xff]  ;;  %v1225_v13 = vpack.c.bf16 %v9037_v7, %v9036_v6  ;;  %v9040_v18 = vld [vmem:[%s18347_s0 + $0x330] sm:$0xff] }
  0x26   :  { %10141 = vmatpush3.bf16.msra.mxu1 %v11452_v1  ;;  %v9038_v10 = vld [vmem:[%s18347_s0 + $0x320] sm:$0xff]  ;;  %v9039_v11 = vld [vmem:[%s18347_s0 + $0x328] sm:$0xff]  ;;  %v9041_v19 = vld [vmem:[%s18347_s0 + $0x338] sm:$0xff] }
  0x27   :  { %10210 = vmatprep.subr.bf16.mxu1 %v11447_v0  ;;  %v9010_v20 = vld [vmem:[%s18347_s0 + $0x2c0] sm:$0xff]  ;;  %v9011_v21 = vld [vmem:[%s18347_s0 + $0x2c8] sm:$0xff]  ;;  %v1227_v25 = vpack.c.bf16 %v9041_v19, %v9040_v18  ;;  %v9044_v30 = vld [vmem:[%s18347_s0 + $0x350] sm:$0xff] }
  0x28   :  { %v9042_v22 = vld [vmem:[%s18347_s0 + $0x340] sm:$0xff]  ;;  %v9043_v23 = vld [vmem:[%s18347_s0 + $0x348] sm:$0xff]  ;;  %v9045_v31 = vld [vmem:[%s18347_s0 + $0x358] sm:$0xff] }
  0x29   :  { %10047 = vmatmul.mubr.msk.bf16.gmra.mrb[12].mxu0 %vm143_vm0, %v116_v52  ;;  %10075 = vmatmul.mubr.msk.bf16.gmra.mrb[12].mxu1 %vm143_vm0, %v497_v53  ;;  %v508_v52 = vpack.c.bf16 %v8967_v47, %v8966_v46  ;;  %v865_v53 = vpack.c.bf16 %v8999_v49, %v8998_v48  ;;  %v9014_v32 = vld [vmem:[%s18347_s0 + $0x2e0] sm:$0xff]  ;;  %v9015_v33 = vld [vmem:[%s18347_s0 + $0x2e8] sm:$0xff]  ;;  %v1229_v37 = vpack.c.bf16 %v9045_v31, %v9044_v30  ;;  %v9048_v42 = vld [vmem:[%s18347_s0 + $0x370] sm:$0xff] }
  0x2a   :  { %10050 = vmatprep.mubr.msk.bf16.mxu0 %vm143_vm0, %v117_v54  ;;  %10078 = vmatprep.mubr.msk.bf16.mxu1 %vm143_vm0, %v498_v55  ;;  %v8968_v54 = vld [vmem:[%s18347_s0 + $0x1f0] sm:$0xff]  ;;  %v8969_v55 = vld [vmem:[%s18347_s0 + $0x1f8] sm:$0xff]  ;;  %v9046_v34 = vld [vmem:[%s18347_s0 + $0x360] sm:$0xff] }
  0x2b   :  { %v509_v62 = vpack.c.bf16 %v8969_v55, %v8968_v54  ;;  %v9047_v35 = vld [vmem:[%s18347_s0 + $0x368] sm:$0xff]  ;;  %v9049_v43 = vld [vmem:[%s18347_s0 + $0x378] sm:$0xff]  ;;  %v9050_v44 = vld [vmem:[%s18347_s0 + $0x380] sm:$0xff] }
  0x2c   :  { %v9051_v45 = vld [vmem:[%s18347_s0 + $0x388] sm:$0xff]  ;;  %v9082_v46 = vld [vmem:[%s18347_s0 + $0x400] sm:$0xff]  ;;  %v1231_v49 = vpack.c.bf16 %v9049_v43, %v9048_v42  ;;  %v9084_v54 = vld [vmem:[%s18347_s0 + $0x410] sm:$0xff] }
  0x2d   :  { %v9083_v47 = vld [vmem:[%s18347_s0 + $0x408] sm:$0xff]  ;;  %v9085_v55 = vld [vmem:[%s18347_s0 + $0x418] sm:$0xff]  ;;  %v9054_v56 = vld [vmem:[%s18347_s0 + $0x3a0] sm:$0xff] }
  0x2e   :  { %v9055_v57 = vld [vmem:[%s18347_s0 + $0x3a8] sm:$0xff]  ;;  %v9058_v6 = vld [vmem:[%s18347_s0 + $0x3c0] sm:$0xff] }
  0x2f   :  { %v9059_v7 = vld [vmem:[%s18347_s0 + $0x3c8] sm:$0xff]  ;;  %v9062_v18 = vld [vmem:[%s18347_s0 + $0x3e0] sm:$0xff] }
  0x30   :  { %v9063_v19 = vld [vmem:[%s18347_s0 + $0x3e8] sm:$0xff]  ;;  %v9098_v30 = vld [vmem:[%s18347_s0 + $0x480] sm:$0xff] }
  0x31   :  { %10051 = vmatmul.mubr.msk.bf16.gmra.mrb[16].mxu0 %vm143_vm0, %v118_v2  ;;  %10079 = vmatmul.mubr.msk.bf16.gmra.mrb[16].mxu1 %vm143_vm0, %v499_v3  ;;  %v867_v2 = vpack.c.bf16 %v9003_v59, %v9002_v58  ;;  %v1224_v3 = vpack.c.bf16 %v9035_v61, %v9034_v60  ;;  %v9086_v58 = vld [vmem:[%s18347_s0 + $0x420] sm:$0xff]  ;;  %v9087_v59 = vld [vmem:[%s18347_s0 + $0x428] sm:$0xff]  ;;  %v1590_v61 = vpack.c.bf16 %v9085_v55, %v9084_v54 }
  0x32   :  { %10054 = vmatprep.mubr.msk.bf16.mxu0 %vm143_vm0, %v119_v4  ;;  %10082 = vmatprep.mubr.msk.bf16.mxu1 %vm143_vm0, %v500_v5  ;;  %v9004_v4 = vld [vmem:[%s18347_s0 + $0x290] sm:$0xff]  ;;  %v9005_v5 = vld [vmem:[%s18347_s0 + $0x298] sm:$0xff]  ;;  %v9099_v31 = vld [vmem:[%s18347_s0 + $0x488] sm:$0xff] }
  0x33   :  { %v868_v12 = vpack.c.bf16 %v9005_v5, %v9004_v4  ;;  %v9088_v4 = vld [vmem:[%s18347_s0 + $0x430] sm:$0xff]  ;;  %v9089_v5 = vld [vmem:[%s18347_s0 + $0x438] sm:$0xff]  ;;  %v9102_v42 = vld [vmem:[%s18347_s0 + $0x4a0] sm:$0xff] }
  0x34   :  { %v9103_v43 = vld [vmem:[%s18347_s0 + $0x4a8] sm:$0xff]  ;;  %v9106_v54 = vld [vmem:[%s18347_s0 + $0x4c0] sm:$0xff] }
  0x35   :  { %v9138_v55 = vld [vmem:[%s18347_s0 + $0x540] sm:$0xff] }
  0x39   :  { %10055 = vmatmul.mubr.msk.bf16.gmra.mrb[20].mxu0 %vm143_vm0, %v120_v14  ;;  %10083 = vmatmul.mubr.msk.bf16.gmra.mrb[20].mxu1 %vm143_vm0, %v501_v15  ;;  %v869_v14 = vpack.c.bf16 %v9007_v9, %v9006_v8  ;;  %v1226_v15 = vpack.c.bf16 %v9039_v11, %v9038_v10  ;;  %v9090_v8 = vld [vmem:[%s18347_s0 + $0x440] sm:$0xff]  ;;  %v9091_v9 = vld [vmem:[%s18347_s0 + $0x448] sm:$0xff]  ;;  %v1592_v11 = vpack.c.bf16 %v9089_v5, %v9088_v4 }
  0x3a   :  { %10086 = vmatprep.mubr.msk.bf16.mxu1 %vm143_vm0, %v502_v16  ;;  %10106 = vmatprep.mubr.msk.bf16.mxu0 %vm143_vm0, %v859_v17  ;;  %v9008_v16 = vld [vmem:[%s18347_s0 + $0x2b0] sm:$0xff]  ;;  %v9009_v17 = vld [vmem:[%s18347_s0 + $0x2b8] sm:$0xff]  ;;  %v9142_v4 = vld [vmem:[%s18347_s0 + $0x560] sm:$0xff] }
  0x3b   :  { %v870_v24 = vpack.c.bf16 %v9009_v17, %v9008_v16  ;;  %v9092_v16 = vld [vmem:[%s18347_s0 + $0x450] sm:$0xff]  ;;  %v9093_v17 = vld [vmem:[%s18347_s0 + $0x458] sm:$0xff]  ;;  %v9143_v5 = vld [vmem:[%s18347_s0 + $0x568] sm:$0xff] }
  0x41   :  { %10087 = vmatmul.mubr.msk.bf16.gmra.mrb[24].mxu1 %vm143_vm0, %v503_v26  ;;  %10107 = vmatmul.mubr.msk.bf16.vlgmr.msra.gmra.mrb[24].mxu0 %vm143_vm0, %v860_v27  ;;  %v871_v26 = vpack.c.bf16 %v9011_v21, %v9010_v20  ;;  %v1228_v27 = vpack.c.bf16 %v9043_v23, %v9042_v22  ;;  %v9094_v20 = vld [vmem:[%s18347_s0 + $0x460] sm:$0xff]  ;;  %v9095_v21 = vld [vmem:[%s18347_s0 + $0x468] sm:$0xff]  ;;  %v1594_v23 = vpack.c.bf16 %v9093_v17, %v9092_v16 }
  0x42   :  { %10090 = vmatprep.mubr.msk.bf16.mxu1 %vm143_vm0, %v504_v28  ;;  %10110 = vmatprep.mubr.msk.bf16.mxu0 %vm143_vm0, %v861_v29  ;;  %v9012_v28 = vld [vmem:[%s18347_s0 + $0x2d0] sm:$0xff]  ;;  %v9013_v29 = vld [vmem:[%s18347_s0 + $0x2d8] sm:$0xff]  ;;  %v9178_v16 = vld [vmem:[%s18347_s0 + $0x600] sm:$0xff] }
  0x43   :  { %10175 = vmatpush3.bf16.msra.mxu0 %v11447_v0  ;;  %v872_v36 = vpack.c.bf16 %v9013_v29, %v9012_v28  ;;  %v9096_v28 = vld [vmem:[%s18347_s0 + $0x470] sm:$0xff]  ;;  %v9097_v29 = vld [vmem:[%s18347_s0 + $0x478] sm:$0xff]  ;;  %v9179_v17 = vld [vmem:[%s18347_s0 + $0x608] sm:$0xff] }
  0x44   :  { %10176 = vmatprep.subr.bf16.mxu0 %v11452_v1 }
  0x47   :  { %10177 = vmatpush3.bf16.msra.mxu0 %v11452_v1 }
  0x48   :  { %10246 = vmatprep.subr.bf16.mxu0 %v11447_v0 }
  0x49   :  { %10091 = vmatmul.mubr.msk.bf16.gmra.mrb[28].mxu1 %vm143_vm0, %v505_v38  ;;  %10111 = vmatmul.mubr.msk.bf16.gmra.mrb[28].mxu0 %vm143_vm0, %v862_v39  ;;  %v873_v38 = vpack.c.bf16 %v9015_v33, %v9014_v32  ;;  %v1230_v39 = vpack.c.bf16 %v9047_v35, %v9046_v34  ;;  %v9130_v32 = vld [vmem:[%s18347_s0 + $0x500] sm:$0xff]  ;;  %v9131_v33 = vld [vmem:[%s18347_s0 + $0x508] sm:$0xff]  ;;  %v1596_v35 = vpack.c.bf16 %v9097_v29, %v9096_v28 }
  0x4a   :  { %10094 = vmatprep.mubr.msk.bf16.mxu1 %vm143_vm0, %v506_v40  ;;  %10114 = vmatprep.mubr.msk.bf16.mxu0 %vm143_vm0, %v863_v41  ;;  %v9016_v40 = vld [vmem:[%s18347_s0 + $0x2f0] sm:$0xff]  ;;  %v9017_v41 = vld [vmem:[%s18347_s0 + $0x2f8] sm:$0xff]  ;;  %v9182_v28 = vld [vmem:[%s18347_s0 + $0x620] sm:$0xff] }
  0x4b   :  { %v874_v48 = vpack.c.bf16 %v9017_v41, %v9016_v40  ;;  %v9132_v40 = vld [vmem:[%s18347_s0 + $0x510] sm:$0xff]  ;;  %v9133_v41 = vld [vmem:[%s18347_s0 + $0x518] sm:$0xff]  ;;  %v9183_v29 = vld [vmem:[%s18347_s0 + $0x628] sm:$0xff] }
  0x51   :  { %10095 = vmatmul.mubr.msk.bf16.gmra.mrb[32].mxu1 %vm143_vm0, %v507_v50  ;;  %10115 = vmatmul.mubr.msk.bf16.gmra.mrb[32].mxu0 %vm143_vm0, %v864_v51  ;;  %v1232_v50 = vpack.c.bf16 %v9051_v45, %v9050_v44  ;;  %v1589_v51 = vpack.c.bf16 %v9083_v47, %v9082_v46  ;;  %v9134_v44 = vld [vmem:[%s18347_s0 + $0x520] sm:$0xff]  ;;  %v9135_v45 = vld [vmem:[%s18347_s0 + $0x528] sm:$0xff]  ;;  %v1955_v47 = vpack.c.bf16 %v9133_v41, %v9132_v40 }
  0x52   :  { %10098 = vmatprep.mubr.msk.bf16.mxu1 %vm143_vm0, %v508_v52  ;;  %10118 = vmatprep.mubr.msk.bf16.mxu0 %vm143_vm0, %v865_v53  ;;  %v9052_v52 = vld [vmem:[%s18347_s0 + $0x390] sm:$0xff]  ;;  %v9053_v53 = vld [vmem:[%s18347_s0 + $0x398] sm:$0xff]  ;;  %v9186_v40 = vld [vmem:[%s18347_s0 + $0x640] sm:$0xff] }
  0x53   :  { %v1233_v60 = vpack.c.bf16 %v9053_v53, %v9052_v52  ;;  %v9136_v52 = vld [vmem:[%s18347_s0 + $0x530] sm:$0xff]  ;;  %v9137_v53 = vld [vmem:[%s18347_s0 + $0x538] sm:$0xff]  ;;  %v9187_v41 = vld [vmem:[%s18347_s0 + $0x648] sm:$0xff] }
  0x59   :  { %10099 = vmatmul.mubr.msk.bf16.gmra.mrb[36].mxu1 %vm143_vm0, %v509_v62  ;;  %10119 = vmatmul.mubr.msk.bf16.gmra.mrb[36].mxu0 %vm143_vm0, %v866_v63  ;;  %v1234_v62 = vpack.c.bf16 %v9055_v57, %v9054_v56  ;;  %v1591_v63 = vpack.c.bf16 %v9087_v59, %v9086_v58  ;;  %v9139_v56 = vld [vmem:[%s18347_s0 + $0x548] sm:$0xff]  ;;  %v1957_v58 = vpack.c.bf16 %v9137_v53, %v9136_v52  ;;  %v9190_v52 = vld [vmem:[%s18347_s0 + $0x660] sm:$0xff] }
  0x5a   :  { %10122 = vmatprep.mubr.msk.bf16.mxu0 %vm143_vm0, %v867_v2  ;;  %10142 = vmatprep.mubr.msk.bf16.mxu1 %vm143_vm0, %v1224_v3  ;;  %v9056_v2 = vld [vmem:[%s18347_s0 + $0x3b0] sm:$0xff]  ;;  %v9057_v3 = vld [vmem:[%s18347_s0 + $0x3b8] sm:$0xff]  ;;  %v9191_v53 = vld [vmem:[%s18347_s0 + $0x668] sm:$0xff] }
  0x5b   :  { %v1235_v10 = vpack.c.bf16 %v9057_v3, %v9056_v2  ;;  %v9110_v2 = vld [vmem:[%s18347_s0 + $0x4e0] sm:$0xff]  ;;  %v9111_v3 = vld [vmem:[%s18347_s0 + $0x4e8] sm:$0xff] }
  0x61   :  { %10123 = vmatmul.mubr.msk.bf16.gmra.mrb[40].mxu0 %vm143_vm0, %v868_v12  ;;  %10143 = vmatmul.mubr.msk.bf16.vlgmr.msra.gmra.mrb[40].mxu1 %vm143_vm0, %v1225_v13  ;;  %v1236_v12 = vpack.c.bf16 %v9059_v7, %v9058_v6  ;;  %v1593_v13 = vpack.c.bf16 %v9091_v9, %v9090_v8  ;;  %v1603_v8 = vpack.c.bf16 %v9111_v3, %v9110_v2 }
  0x62   :  { %10211 = vmatpush3.bf16.msra.mxu1 %v11447_v0  ;;  %10126 = vmatprep.mubr.msk.bf16.mxu0 %vm143_vm0, %v869_v14  ;;  %v9060_v14 = vld [vmem:[%s18347_s0 + $0x3d0] sm:$0xff]  ;;  %v1960_v9 = vpack.c.bf16 %v9143_v5, %v9142_v4 }
  0x63   :  { %10146 = vmatprep.mubr.msk.bf16.mxu1 %vm143_vm0, %v1226_v15  ;;  %10212 = vmatprep.subr.bf16.mxu1 %v11452_v1  ;;  %v9061_v15 = vld [vmem:[%s18347_s0 + $0x3d8] sm:$0xff] }
  0x64   :  { %v1237_v22 = vpack.c.bf16 %v9061_v15, %v9060_v14  ;;  %v9146_v14 = vld [vmem:[%s18347_s0 + $0x580] sm:$0xff]  ;;  %v9147_v15 = vld [vmem:[%s18347_s0 + $0x588] sm:$0xff] }
  0x66   :  { %10213 = vmatpush3.bf16.msra.mxu1 %v11452_v1 }
  0x67   :  { %10282 = vmatprep.subr.bf16.mxu1 %v11447_v0 }
  0x69   :  { %10127 = vmatmul.mubr.msk.bf16.gmra.mrb[44].mxu0 %vm143_vm0, %v870_v24  ;;  %10147 = vmatmul.mubr.msk.bf16.gmra.mrb[44].mxu1 %vm143_vm0, %v1227_v25  ;;  %v1238_v24 = vpack.c.bf16 %v9063_v19, %v9062_v18  ;;  %v1595_v25 = vpack.c.bf16 %v9095_v21, %v9094_v20  ;;  %v1962_v20 = vpack.c.bf16 %v9147_v15, %v9146_v14 }
  0x6a   :  { %10130 = vmatprep.mubr.msk.bf16.mxu0 %vm143_vm0, %v871_v26  ;;  %10150 = vmatprep.mubr.msk.bf16.mxu1 %vm143_vm0, %v1228_v27  ;;  %v9064_v26 = vld [vmem:[%s18347_s0 + $0x3f0] sm:$0xff]  ;;  %v9065_v27 = vld [vmem:[%s18347_s0 + $0x3f8] sm:$0xff]  ;;  %v2319_v21 = vpack.c.bf16 %v9179_v17, %v9178_v16 }
  0x6b   :  { %v1239_v34 = vpack.c.bf16 %v9065_v27, %v9064_v26  ;;  %v9150_v26 = vld [vmem:[%s18347_s0 + $0x5a0] sm:$0xff]  ;;  %v9151_v27 = vld [vmem:[%s18347_s0 + $0x5a8] sm:$0xff] }
  0x71   :  { %10131 = vmatmul.mubr.msk.bf16.gmra.mrb[48].mxu0 %vm143_vm0, %v872_v36  ;;  %10151 = vmatmul.mubr.msk.bf16.gmra.mrb[48].mxu1 %vm143_vm0, %v1229_v37  ;;  %v1597_v36 = vpack.c.bf16 %v9099_v31, %v9098_v30  ;;  %v1954_v37 = vpack.c.bf16 %v9131_v33, %v9130_v32  ;;  %v1964_v32 = vpack.c.bf16 %v9151_v27, %v9150_v26  ;;  %v9235_v26 = vld [vmem:[%s18347_s0 + $0x748] sm:$0xff] }
  0x72   :  { %10134 = vmatprep.mubr.msk.bf16.mxu0 %vm143_vm0, %v873_v38  ;;  %10154 = vmatprep.mubr.msk.bf16.mxu1 %vm143_vm0, %v1230_v39  ;;  %v9100_v38 = vld [vmem:[%s18347_s0 + $0x490] sm:$0xff]  ;;  %v9101_v39 = vld [vmem:[%s18347_s0 + $0x498] sm:$0xff]  ;;  %v2321_v33 = vpack.c.bf16 %v9183_v29, %v9182_v28 }
  0x73   :  { %v1598_v46 = vpack.c.bf16 %v9101_v39, %v9100_v38  ;;  %v9154_v38 = vld [vmem:[%s18347_s0 + $0x5c0] sm:$0xff]  ;;  %v9155_v39 = vld [vmem:[%s18347_s0 + $0x5c8] sm:$0xff] }
  0x79   :  { %10135 = vmatmul.mubr.msk.bf16.gmra.mrb[52].mxu0 %vm143_vm0, %v874_v48  ;;  %10155 = vmatmul.mubr.msk.bf16.gmra.mrb[52].mxu1 %vm143_vm0, %v1231_v49  ;;  %v1599_v48 = vpack.c.bf16 %v9103_v43, %v9102_v42  ;;  %v1956_v49 = vpack.c.bf16 %v9135_v45, %v9134_v44  ;;  %v1966_v44 = vpack.c.bf16 %v9155_v39, %v9154_v38 }
  0x7a   :  { %10158 = vmatprep.mubr.msk.bf16.mxu1 %vm143_vm0, %v1232_v50  ;;  %10178 = vmatprep.mubr.msk.bf16.mxu0 %vm143_vm0, %v1589_v51  ;;  %v9104_v50 = vld [vmem:[%s18347_s0 + $0x4b0] sm:$0xff]  ;;  %v9105_v51 = vld [vmem:[%s18347_s0 + $0x4b8] sm:$0xff]  ;;  %v2323_v45 = vpack.c.bf16 %v9187_v41, %v9186_v40 }
  0x7b   :  { %v1600_v57 = vpack.c.bf16 %v9105_v51, %v9104_v50  ;;  %v9158_v50 = vld [vmem:[%s18347_s0 + $0x5e0] sm:$0xff]  ;;  %v9159_v51 = vld [vmem:[%s18347_s0 + $0x5e8] sm:$0xff] }
  0x81   :  { %10159 = vmatmul.mubr.msk.bf16.gmra.mrb[56].mxu1 %vm143_vm0, %v1233_v60  ;;  %10179 = vmatmul.mubr.msk.bf16.vlgmr.msra.gmra.mrb[56].mxu0 %vm143_vm0, %v1590_v61  ;;  %v1958_v60 = vpack.c.bf16 %v9139_v56, %v9138_v55  ;;  %v9108_v61 = vld [vmem:[%s18347_s0 + $0x4d0] sm:$0xff]  ;;  %v1968_v55 = vpack.c.bf16 %v9159_v51, %v9158_v50  ;;  %v2325_v56 = vpack.c.bf16 %v9191_v53, %v9190_v52  ;;  %v9205_v51 = vld [vmem:[%s18347_s0 + $0x6d8] sm:$0xff] }
  0x82   :  { %10162 = vmatprep.mubr.msk.bf16.mxu1 %vm143_vm0, %v1234_v62  ;;  %10182 = vmatprep.mubr.msk.bf16.mxu0 %vm143_vm0, %v1591_v63  ;;  %v9109_v62 = vld [vmem:[%s18347_s0 + $0x4d8] sm:$0xff]  ;;  %v9236_v52 = vld [vmem:[%s18347_s0 + $0x750] sm:$0xff] }
  0x83   :  { %10247 = vmatpush3.bf16.msra.mxu0 %v11447_v0  ;;  %v9141_v63 = vld [vmem:[%s18347_s0 + $0x558] sm:$0xff]  ;;  %v1602_v6 = vpack.c.bf16 %v9109_v62, %v9108_v61  ;;  %v9194_v61 = vld [vmem:[%s18347_s0 + $0x680] sm:$0xff]  ;;  %v9195_v62 = vld [vmem:[%s18347_s0 + $0x688] sm:$0xff] }
  0x84   :  { %10248 = vmatprep.subr.bf16.mxu0 %v11452_v1  ;;  %v2327_v4 = vpack.c.bf16 %v9195_v62, %v9194_v61  ;;  %v9237_v53 = vld [vmem:[%s18347_s0 + $0x758] sm:$0xff] }
  0x85   :  { %v2689_v62 = vpack.c.bf16 %v9237_v53, %v9236_v52 }
  0x87   :  { %10249 = vmatpush3.bf16.msra.mxu0 %v11452_v1 }
  0x89   :  { %10163 = vmatmul.mubr.msk.bf16.gmra.mrb[60].mxu1 %vm143_vm0, %v1235_v10  ;;  %10183 = vmatmul.mubr.msk.bf16.gmra.mrb[60].mxu0 %vm143_vm0, %v1592_v11  ;;  %v9112_v10 = vld [vmem:[%s18347_s0 + $0x4f0] sm:$0xff]  ;;  %v9113_v11 = vld [vmem:[%s18347_s0 + $0x4f8] sm:$0xff] }
  0x8a   :  { %10166 = vmatprep.mubr.msk.bf16.mxu1 %vm143_vm0, %v1236_v12  ;;  %10186 = vmatprep.mubr.msk.bf16.mxu0 %vm143_vm0, %v1593_v13  ;;  %v9144_v12 = vld [vmem:[%s18347_s0 + $0x570] sm:$0xff]  ;;  %v9145_v13 = vld [vmem:[%s18347_s0 + $0x578] sm:$0xff]  ;;  %v1604_v18 = vpack.c.bf16 %v9113_v11, %v9112_v10  ;;  %v9198_v10 = vld [vmem:[%s18347_s0 + $0x6a0] sm:$0xff] }
  0x8b   :  { %v1961_v19 = vpack.c.bf16 %v9145_v13, %v9144_v12  ;;  %v9199_v11 = vld [vmem:[%s18347_s0 + $0x6a8] sm:$0xff]  ;;  %v9230_v12 = vld [vmem:[%s18347_s0 + $0x720] sm:$0xff] }
  0x8c   :  { %v9231_v13 = vld [vmem:[%s18347_s0 + $0x728] sm:$0xff]  ;;  %v2329_v16 = vpack.c.bf16 %v9199_v11, %v9198_v10 }
  0x8d   :  { %v2686_v17 = vpack.c.bf16 %v9231_v13, %v9230_v12 }
  0x91   :  { %10167 = vmatmul.mubr.msk.bf16.gmra.mrb[64].mxu1 %vm143_vm0, %v1237_v22  ;;  %10187 = vmatmul.mubr.msk.bf16.gmra.mrb[64].mxu0 %vm143_vm0, %v1594_v23  ;;  %v9148_v22 = vld [vmem:[%s18347_s0 + $0x590] sm:$0xff]  ;;  %v9149_v23 = vld [vmem:[%s18347_s0 + $0x598] sm:$0xff] }
  0x92   :  { %10170 = vmatprep.mubr.msk.bf16.mxu1 %vm143_vm0, %v1238_v24  ;;  %10190 = vmatprep.mubr.msk.bf16.mxu0 %vm143_vm0, %v1595_v25  ;;  %v9180_v24 = vld [vmem:[%s18347_s0 + $0x610] sm:$0xff]  ;;  %v9181_v25 = vld [vmem:[%s18347_s0 + $0x618] sm:$0xff]  ;;  %v1963_v30 = vpack.c.bf16 %v9149_v23, %v9148_v22  ;;  %v9202_v23 = vld [vmem:[%s18347_s0 + $0x6c0] sm:$0xff] }
  0x93   :  { %v2320_v31 = vpack.c.bf16 %v9181_v25, %v9180_v24  ;;  %v9233_v22 = vld [vmem:[%s18347_s0 + $0x738] sm:$0xff]  ;;  %v9203_v24 = vld [vmem:[%s18347_s0 + $0x6c8] sm:$0xff]  ;;  %v9234_v25 = vld [vmem:[%s18347_s0 + $0x740] sm:$0xff] }
  0x94   :  { %v2688_v40 = vpack.c.bf16 %v9235_v26, %v9234_v25 }
  0x99   :  { %10171 = vmatmul.mubr.msk.bf16.gmra.mrb[68].mxu1 %vm143_vm0, %v1239_v34  ;;  %10191 = vmatmul.mubr.msk.bf16.gmra.mrb[68].mxu0 %vm143_vm0, %v1596_v35  ;;  %v9152_v34 = vld [vmem:[%s18347_s0 + $0x5b0] sm:$0xff]  ;;  %v9153_v35 = vld [vmem:[%s18347_s0 + $0x5b8] sm:$0xff] }
  0x9a   :  { %10194 = vmatprep.mubr.msk.bf16.mxu0 %vm143_vm0, %v1597_v36  ;;  %10214 = vmatprep.mubr.msk.bf16.mxu1 %vm143_vm0, %v1954_v37  ;;  %v9184_v36 = vld [vmem:[%s18347_s0 + $0x630] sm:$0xff]  ;;  %v9185_v37 = vld [vmem:[%s18347_s0 + $0x638] sm:$0xff]  ;;  %v1965_v42 = vpack.c.bf16 %v9153_v35, %v9152_v34  ;;  %v2331_v34 = vpack.c.bf16 %v9203_v24, %v9202_v23 }
  0x9b   :  { %v2322_v43 = vpack.c.bf16 %v9185_v37, %v9184_v36 }
  0xa1   :  { %10195 = vmatmul.mubr.msk.bf16.gmra.mrb[72].mxu0 %vm143_vm0, %v1598_v46  ;;  %10215 = vmatmul.mubr.msk.bf16.vlgmr.msra.gmra.mrb[72].mxu1 %vm143_vm0, %v1955_v47  ;;  %v9156_v46 = vld [vmem:[%s18347_s0 + $0x5d0] sm:$0xff]  ;;  %v9157_v47 = vld [vmem:[%s18347_s0 + $0x5d8] sm:$0xff] }
  0xa2   :  { %10283 = vmatpush3.bf16.msra.mxu1 %v11447_v0  ;;  %10198 = vmatprep.mubr.msk.bf16.mxu0 %vm143_vm0, %v1599_v48  ;;  %v9107_v0 = vld [vmem:[%s18347_s0 + $0x4c8] sm:$0xff]  ;;  %v9188_v48 = vld [vmem:[%s18347_s0 + $0x650] sm:$0xff] }
  0xa3   :  { %10218 = vmatprep.mubr.msk.bf16.mxu1 %vm143_vm0, %v1956_v49  ;;  %10284 = vmatprep.subr.bf16.mxu1 %v11452_v1  ;;  %v1601_v59 = vpack.c.bf16 %v9107_v0, %v9106_v54  ;;  %v9189_v49 = vld [vmem:[%s18347_s0 + $0x658] sm:$0xff]  ;;  %v1967_v54 = vpack.c.bf16 %v9157_v47, %v9156_v46  ;;  %v9204_v46 = vld [vmem:[%s18347_s0 + $0x6d0] sm:$0xff] }
  0xa4   :  { %v2324_v0 = vpack.c.bf16 %v9189_v49, %v9188_v48  ;;  %v2332_v61 = vpack.c.bf16 %v9205_v51, %v9204_v46 }
  0xa6   :  { %10285 = vmatpush3.bf16.msra.mxu1 %v11452_v1  ;;  %v9140_v1 = vld [vmem:[%s18347_s0 + $0x550] sm:$0xff] }
  0xa7   :  { %v1959_v7 = vpack.c.bf16 %v9141_v63, %v9140_v1  ;;  %v9226_v1 = vld [vmem:[%s18347_s0 + $0x700] sm:$0xff]  ;;  %v9227_v63 = vld [vmem:[%s18347_s0 + $0x708] sm:$0xff] }
  0xa8   :  { %v2684_v5 = vpack.c.bf16 %v9227_v63, %v9226_v1 }
  0xa9   :  { %10199 = vmatmul.mubr.msk.bf16.gmra.mrb[76].mxu0 %vm143_vm0, %v1600_v57  ;;  %10219 = vmatmul.mubr.msk.bf16.gmra.mrb[76].mxu1 %vm143_vm0, %v1957_v58  ;;  %v9160_v57 = vld [vmem:[%s18347_s0 + $0x5f0] sm:$0xff]  ;;  %v9161_v58 = vld [vmem:[%s18347_s0 + $0x5f8] sm:$0xff] }
  0xaa   :  { %10202 = vmatprep.mubr.msk.bf16.mxu0 %vm143_vm0, %v1601_v59  ;;  %10222 = vmatprep.mubr.msk.bf16.mxu1 %vm143_vm0, %v1958_v60  ;;  %v9192_v59 = vld [vmem:[%s18347_s0 + $0x670] sm:$0xff]  ;;  %v9193_v60 = vld [vmem:[%s18347_s0 + $0x678] sm:$0xff]  ;;  %v1969_v2 = vpack.c.bf16 %v9161_v58, %v9160_v57  ;;  %v9207_v58 = vld [vmem:[%s18347_s0 + $0x6e8] sm:$0xff] }
  0xab   :  { %v2326_v3 = vpack.c.bf16 %v9193_v60, %v9192_v59  ;;  %v9238_v59 = vld [vmem:[%s18347_s0 + $0x760] sm:$0xff]  ;;  %v9239_v60 = vld [vmem:[%s18347_s0 + $0x768] sm:$0xff] }
  0xac   :  { %v2690_v11 = vpack.c.bf16 %v9239_v60, %v9238_v59 }
  0xb1   :  { %10203 = vmatmul.mubr.msk.bf16.gmra.mrb[80].mxu0 %vm143_vm0, %v1602_v6  ;;  %10223 = vmatmul.mubr.msk.bf16.gmra.mrb[80].mxu1 %vm143_vm0, %v1959_v7  ;;  %v9196_v6 = vld [vmem:[%s18347_s0 + $0x690] sm:$0xff]  ;;  %v9197_v7 = vld [vmem:[%s18347_s0 + $0x698] sm:$0xff] }
  0xb2   :  { %10206 = vmatprep.mubr.msk.bf16.mxu0 %vm143_vm0, %v1603_v8  ;;  %10226 = vmatprep.mubr.msk.bf16.mxu1 %vm143_vm0, %v1960_v9  ;;  %v9228_v8 = vld [vmem:[%s18347_s0 + $0x710] sm:$0xff]  ;;  %v9229_v9 = vld [vmem:[%s18347_s0 + $0x718] sm:$0xff]  ;;  %v2328_v14 = vpack.c.bf16 %v9197_v7, %v9196_v6 }
  0xb3   :  { %v2685_v15 = vpack.c.bf16 %v9229_v9, %v9228_v8 }
  0xb9   :  { %10207 = vmatmul.mubr.msk.bf16.gmra.mrb[84].mxu0 %vm143_vm0, %v1604_v18  ;;  %10227 = vmatmul.mubr.msk.bf16.gmra.mrb[84].mxu1 %vm143_vm0, %v1961_v19  ;;  %v12259_v18 = vld [vmem:[%s18348_s27] ss:$0 sm:$0xff]  ;;  %v9200_v19 = vld [vmem:[%s18347_s0 + $0x6b0] sm:$0xff] }
  0xba   :  { %10230 = vmatprep.mubr.msk.bf16.mxu1 %vm143_vm0, %v1962_v20  ;;  %10250 = vmatprep.mubr.msk.bf16.mxu0 %vm143_vm0, %v2319_v21  ;;  %v9201_v20 = vld [vmem:[%s18347_s0 + $0x6b8] sm:$0xff]  ;;  %v9232_v21 = vld [vmem:[%s18347_s0 + $0x730] sm:$0xff] }
  0xc1   :  { %10231 = vmatmul.mubr.msk.bf16.gmra.mrb[88].mxu1 %vm143_vm0, %v1963_v30  ;;  %10251 = vmatmul.mubr.msk.bf16.vlgmr.msra.gmra.mrb[88].mxu0 %vm143_vm0, %v2320_v31 }
  0xc2   :  { %10234 = vmatprep.mubr.msk.bf16.mxu1 %vm143_vm0, %v1964_v32  ;;  %10254 = vmatprep.mubr.msk.bf16.mxu0 %vm143_vm0, %v2321_v33  ;;  %v2330_v32 = vpack.c.bf16 %v9201_v20, %v9200_v19  ;;  %v2687_v33 = vpack.c.bf16 %v9233_v22, %v9232_v21 }
  0xc9   :  { %10235 = vmatmul.mubr.msk.bf16.gmra.mrb[92].mxu1 %vm143_vm0, %v1965_v42  ;;  %10255 = vmatmul.mubr.msk.bf16.gmra.mrb[92].mxu0 %vm143_vm0, %v2322_v43 }
  0xca   :  { %10238 = vmatprep.mubr.msk.bf16.mxu1 %vm143_vm0, %v1966_v44  ;;  %10258 = vmatprep.mubr.msk.bf16.mxu0 %vm143_vm0, %v2323_v45 }
  0xd1   :  { %10239 = vmatmul.mubr.msk.bf16.gmra.mrb[96].mxu1 %vm143_vm0, %v1967_v54  ;;  %10259 = vmatmul.mubr.msk.bf16.gmra.mrb[96].mxu0 %vm143_vm0, %v2324_v0  ;;  %v9206_v0 = vld [vmem:[%s18347_s0 + $0x6e0] sm:$0xff] }
  0xd2   :  { %10242 = vmatprep.mubr.msk.bf16.mxu1 %vm143_vm0, %v1968_v55  ;;  %10262 = vmatprep.mubr.msk.bf16.mxu0 %vm143_vm0, %v2325_v56  ;;  %v2333_v10 = vpack.c.bf16 %v9207_v58, %v9206_v0 }
  0xd9   :  { %10243 = vmatmul.mubr.msk.bf16.gmra.mrb[100].mxu1 %vm143_vm0, %v1969_v2  ;;  %10263 = vmatmul.mubr.msk.bf16.gmra.mrb[100].mxu0 %vm143_vm0, %v2326_v3 }
  0xda   :  { %10266 = vmatprep.mubr.msk.bf16.mxu0 %vm143_vm0, %v2327_v4  ;;  %10286 = vmatprep.mubr.msk.bf16.mxu1 %vm143_vm0, %v2684_v5 }
  0xe1   :  { %10267 = vmatmul.mubr.msk.bf16.gmra.mrb[104].mxu0 %vm143_vm0, %v2328_v14  ;;  %10287 = vmatmul.mubr.msk.bf16.vlgmr.msra.gmra.mrb[104].mxu1 %vm143_vm0, %v2685_v15 }
  0xe2   :  { %10270 = vmatprep.mubr.msk.bf16.mxu0 %vm143_vm0, %v2329_v16  ;;  %10290 = vmatprep.mubr.msk.bf16.mxu1 %vm143_vm0, %v2686_v17 }
  0xe4   :  { %v10036_v27 = vpop.f32.mrb[0].mxu0  ;;  %v10060_v28 = vpop.f32.mrb[0].mxu1 }
  0xe5   :  { %v12290_v29 = vadd.f32 %v10060_v28, %v12259_v18  ;;  %v226_v30 = vpop.f32.mrb[1].mxu0  ;;  %v322_v31 = vpop.f32.mrb[1].mxu1  ;;  %v235_v35 = vadd.f32 %v10036_v27, %v12259_v18 }
  0xe6   :  { %v12294_v36 = vadd.f32 %v12259_v18, %v226_v30  ;;  %v12297_v37 = vadd.f32 %v12259_v18, %v322_v31  ;;  %v10037_v38 = vpop.f32.mrb[2].mxu0  ;;  %v10061_v39 = vpop.f32.mrb[2].mxu1 }
  0xe7   :  { %v379_v41 = vmax.f32 %v12290_v29, 0.0  ;;  %v12301_v42 = vadd.f32 %v10037_v38, %v12259_v18  ;;  %v12304_v43 = vadd.f32 %v10061_v39, %v12259_v18  ;;  %v229_v44 = vpop.f32.mrb[3].mxu0  ;;  %v325_v45 = vpop.f32.mrb[3].mxu1  ;;  %v355_v55 = vmax.f32 %v235_v35, 0.0 }
  0xe8   :  { %v353_v47 = vmax.f32 %v12294_v36, 0.0  ;;  %v377_v48 = vmax.f32 %v12297_v37, 0.0  ;;  %v12312_v49 = vadd.f32 %v12259_v18, %v229_v44  ;;  %v12315_v50 = vadd.f32 %v12259_v18, %v325_v45 }
  0xe9   :  { %v380_v54 = vmax.f32 %v12304_v43, 0.0  ;;  %10271 = vmatmul.mubr.msk.bf16.gmra.mrb[108].mxu0 %vm143_vm0, %v2330_v32  ;;  %10291 = vmatmul.mubr.msk.bf16.gmra.mrb[108].mxu1 %vm143_vm0, %v2687_v33  ;;  %v356_v1 = vmax.f32 %v12301_v42, 0.0  ;;  %v9208_v33 = vld [vmem:[%s18347_s0 + $0x6f0] sm:$0xff]  ;;  %v9241_v42 = vld [vmem:[%s18347_s0 + $0x778] sm:$0xff] }
  0xea   :  { %v407_v56 = vmax.f32 %v377_v48, %v379_v41  ;;  %v354_v57 = vmax.f32 %v12312_v49, 0.0  ;;  %10274 = vmatprep.mubr.msk.bf16.mxu0 %vm143_vm0, %v2331_v34  ;;  %10294 = vmatprep.mubr.msk.bf16.mxu1 %vm143_vm0, %v2688_v40  ;;  %v378_v3 = vmax.f32 %v12315_v50, 0.0  ;;  %v9209_v34 = vld [vmem:[%s18347_s0 + $0x6f8] sm:$0xff]  ;;  %v9240_v40 = vld [vmem:[%s18347_s0 + $0x770] sm:$0xff]  ;;  %v9243_v49 = vld [vmem:[%s18347_s0 + $0x788] sm:$0xff] }
  0xec   :  { %v411_v63 = vmax.f32 %v407_v56, %v380_v54  ;;  %v422_v2 = vadd.f32 %v354_v57, %v353_v47  ;;  %v10040_v4 = vpop.f32.mrb[4].mxu0  ;;  %v10064_v5 = vpop.f32.mrb[4].mxu1 }
  0xed   :  { %v251_v6 = vadd.f32 %v10040_v4, %v12259_v18  ;;  %v12354_v7 = vadd.f32 %v10064_v5, %v12259_v18  ;;  %v242_v8 = vpop.f32.mrb[5].mxu0  ;;  %v338_v9 = vpop.f32.mrb[5].mxu1 }
  0xee   :  { %v423_v12 = vadd.f32 %v422_v2, %v355_v55  ;;  %v405_v13 = vmax.f32 %v378_v3, %v411_v63  ;;  %v243_v14 = vadd.f32 %v12259_v18, %v242_v8  ;;  %v12360_v15 = vadd.f32 %v12259_v18, %v338_v9  ;;  %v10041_v16 = vpop.f32.mrb[6].mxu0  ;;  %v10065_v17 = vpop.f32.mrb[6].mxu1 }
  0xef   :  { %v359_v19 = vmax.f32 %v251_v6, 0.0  ;;  %v383_v20 = vmax.f32 %v12354_v7, 0.0  ;;  %v254_v21 = vadd.f32 %v10041_v16, %v12259_v18  ;;  %v12365_v22 = vadd.f32 %v10065_v17, %v12259_v18  ;;  %v245_v23 = vpop.f32.mrb[7].mxu0  ;;  %v341_v24 = vpop.f32.mrb[7].mxu1  ;;  %v9244_v16 = vld [vmem:[%s18347_s0 + $0x790] sm:$0xff] }
  0xf0   :  { %v357_v25 = vmax.f32 %v243_v14, 0.0  ;;  %v424_v26 = vadd.f32 %v423_v12, %v356_v1  ;;  %v381_v27 = vmax.f32 %v12360_v15, 0.0  ;;  %v246_v28 = vadd.f32 %v12259_v18, %v245_v23 }
  0xf1   :  { %v387_v30 = vmax.f32 %v355_v55, %v359_v19  ;;  %v409_v31 = vmax.f32 %v405_v13, %v383_v20  ;;  %v360_v32 = vmax.f32 %v254_v21, 0.0  ;;  %10275 = vmatmul.mubr.msk.bf16.gmra.mrb[112].mxu0 %vm143_vm0, %v2332_v61  ;;  %10295 = vmatmul.mubr.msk.bf16.gmra.mrb[112].mxu1 %vm143_vm0, %v2689_v62  ;;  %v12380_v39 = vadd.f32 %v12259_v18, %v341_v24  ;;  %v9245_v24 = vld [vmem:[%s18347_s0 + $0x798] sm:$0xff] }
  0xf2   :  { %v385_v35 = vmax.f32 %v353_v47, %v357_v25  ;;  %v425_v36 = vadd.f32 %v424_v26, %v357_v25  ;;  %v358_v38 = vmax.f32 %v246_v28, 0.0  ;;  %10278 = vmatprep.mubr.msk.bf16.mxu0 %vm143_vm0, %v2333_v10  ;;  %10298 = vmatprep.mubr.msk.bf16.mxu1 %vm143_vm0, %v2690_v11  ;;  %v384_v46 = vmax.f32 %v12365_v22, 0.0  ;;  %v9242_v47 = vld [vmem:[%s18347_s0 + $0x780] sm:$0xff]  ;;  %v9247_v26 = vld [vmem:[%s18347_s0 + $0x7a8] sm:$0xff] }
  0xf3   :  { %v408_v44 = vmax.f32 %v381_v27, %v409_v31  ;;  %v388_v45 = vmax.f32 %v356_v1, %v360_v32  ;;  %v2334_v55 = vpack.c.bf16 %v9209_v34, %v9208_v33  ;;  %v382_v58 = vmax.f32 %v12380_v39, 0.0  ;;  %v9246_v25 = vld [vmem:[%s18347_s0 + $0x7a0] sm:$0xff] }
  0xf4   :  { %v386_v51 = vmax.f32 %v354_v57, %v358_v38  ;;  %v426_v52 = vadd.f32 %v425_v36, %v358_v38  ;;  %v10044_v53 = vpop.f32.mrb[8].mxu0  ;;  %v10072_v0 = vpop.f32.mrb[8].mxu1  ;;  %v2691_v62 = vpack.c.bf16 %v9241_v42, %v9240_v40  ;;  %v2692_v57 = vpack.c.bf16 %v9243_v49, %v9242_v47 }
  0xf5   :  { %v412_v56 = vmax.f32 %v408_v44, %v384_v46  ;;  %v267_v59 = vadd.f32 %v10044_v53, %v12259_v18  ;;  %v258_v60 = vpop.f32.mrb[9].mxu0  ;;  %v592_v61 = vpop.f32.mrb[9].mxu1  ;;  %v601_v12 = vadd.f32 %v10072_v0, %v12259_v18  ;;  %v2693_v44 = vpack.c.bf16 %v9245_v24, %v9244_v16  ;;  %v9248_v16 = vld [vmem:[%s18347_s0 + $0x7b0] sm:$0xff] }
  0xf6   :  { %v427_v1 = vadd.f32 %v426_v52, %v359_v19  ;;  %v259_v63 = vadd.f32 %v12259_v18, %v258_v60  ;;  %v10045_v2 = vpop.f32.mrb[10].mxu0  ;;  %v10073_v4 = vpop.f32.mrb[10].mxu1  ;;  %v593_v8 = vadd.f32 %v12259_v18, %v592_v61  ;;  %v2694_v47 = vpack.c.bf16 %v9247_v26, %v9246_v25 }
  0xf7   :  { %v12406_v5 = vmax.f32 %v382_v58, %v412_v56  ;;  %v363_v6 = vmax.f32 %v267_v59, 0.0  ;;  %v270_v9 = vadd.f32 %v10045_v2, %v12259_v18  ;;  %v261_v10 = vpop.f32.mrb[11].mxu0  ;;  %v595_v11 = vpop.f32.mrb[11].mxu1  ;;  %v604_v31 = vadd.f32 %v10073_v4, %v12259_v18 }
  0xf8   :  { %v361_v13 = vmax.f32 %v259_v63, 0.0  ;;  %v428_v14 = vadd.f32 %v427_v1, %v360_v32  ;;  %v262_v21 = vadd.f32 %v12259_v18, %v261_v10  ;;  %v12416_v23 = vadd.f32 %v12259_v18, %v595_v11 }
  0xf9   :  { %v391_v17 = vmax.f32 %v387_v30, %v363_v6  ;;  %v364_v19 = vmax.f32 %v270_v9, 0.0  ;;  %10279 = vmatmul.mubr.msk.bf16.gmra.mrb[116].mxu0 %vm143_vm0, %v2334_v55  ;;  %10299 = vmatmul.mubr.msk.bf16.gmra.mrb[116].mxu1 %vm143_vm0, %v2691_v62  ;;  %v719_v32 = vmax.f32 %v593_v8, 0.0  ;;  %v721_v38 = vmax.f32 %v601_v12, 0.0 }
  0xfa   :  { %v389_v28 = vmax.f32 %v385_v35, %v361_v13  ;;  %v429_v30 = vadd.f32 %v428_v14, %v361_v13  ;;  %10302 = vmatprep.mubr.msk.bf16.mxu1 %vm143_vm0, %v2692_v57  ;;  %v362_v34 = vmax.f32 %v262_v21, 0.0  ;;  %v720_v36 = vmax.f32 %v12416_v23, 0.0  ;;  %v9249_v21 = vld [vmem:[%s18347_s0 + $0x7b8] sm:$0xff]  ;;  %v12503_v23 = vld [vmem:[%s18347_s0 + $0x7f0] sm:$0xff] }
  0xfb   :  { %v392_v33 = vmax.f32 %v388_v45, %v364_v19  ;;  %v722_v56 = vmax.f32 %v604_v31, 0.0 }
  0xfc   :  { %v10048_v40 = vpop.f32.mrb[12].mxu0  ;;  %v10076_v42 = vpop.f32.mrb[12].mxu1  ;;  %v390_v49 = vmax.f32 %v386_v51, %v362_v34  ;;  %v430_v52 = vadd.f32 %v429_v30, %v362_v34  ;;  %v788_v35 = vadd.f32 %v720_v36, %v719_v32 }
  0xfd   :  { %v12435_v53 = vadd.f32 %v10048_v40, %v12259_v18  ;;  %v274_v0 = vpop.f32.mrb[13].mxu0  ;;  %v608_v55 = vpop.f32.mrb[13].mxu1  ;;  %v12438_v45 = vadd.f32 %v10076_v42, %v12259_v18 }
  0xfe   :  { %v275_v59 = vadd.f32 %v12259_v18, %v274_v0  ;;  %v609_v60 = vadd.f32 %v12259_v18, %v608_v55  ;;  %v10049_v61 = vpop.f32.mrb[14].mxu0  ;;  %v10077_v62 = vpop.f32.mrb[14].mxu1  ;;  %v431_v51 = vadd.f32 %v430_v52, %v363_v6  ;;  %v789_v1 = vadd.f32 %v788_v35, %v721_v38 }
  0xff   :  { %v367_v63 = vmax.f32 %v12435_v53, 0.0  ;;  %v12444_v2 = vadd.f32 %v10049_v61, %v12259_v18  ;;  %v277_v4 = vpop.f32.mrb[15].mxu0  ;;  %v611_v57 = vpop.f32.mrb[15].mxu1  ;;  %v725_v8 = vmax.f32 %v12438_v45, 0.0  ;;  %v12448_v11 = vadd.f32 %v10077_v62, %v12259_v18 }
 0x100   :  { %v365_v9 = vmax.f32 %v275_v59, 0.0  ;;  %v723_v10 = vmax.f32 %v609_v60, 0.0  ;;  %v432_v13 = vadd.f32 %v431_v51, %v364_v19  ;;  %v790_v14 = vadd.f32 %v789_v1, %v722_v56  ;;  %v9251_v19 = vld [vmem:[%s18347_s0 + $0x7c8] sm:$0xff] }
 0x101   :  { %v395_v12 = vmax.f32 %v391_v17, %v367_v63  ;;  %v368_v6 = vmax.f32 %v12444_v2, 0.0  ;;  %10303 = vmatmul.mubr.msk.bf16.gmra.mrb[120].mxu1 %vm143_vm0, %v2693_v44  ;;  %v753_v24 = vmax.f32 %v721_v38, %v725_v8  ;;  %v726_v30 = vmax.f32 %v12448_v11, 0.0  ;;  %v9250_v17 = vld [vmem:[%s18347_s0 + $0x7c0] sm:$0xff] }
 0x102   :  { %v393_v25 = vmax.f32 %v389_v28, %v365_v9  ;;  %v751_v26 = vmax.f32 %v719_v32, %v723_v10  ;;  %10306 = vmatprep.mubr.msk.bf16.mxu1 %vm143_vm0, %v2694_v47  ;;  %v433_v31 = vadd.f32 %v432_v13, %v365_v9  ;;  %v791_v34 = vadd.f32 %v790_v14, %v723_v10  ;;  %v12470_v28 = vld [vmem:[%s18347_s0 + $0x7d0] sm:$0xff]  ;;  %v12475_v32 = vld [vmem:[%s18347_s0 + $0x7d8] sm:$0xff] }
 0x103   :  { %v396_v40 = vmax.f32 %v392_v33, %v368_v6  ;;  %v278_v42 = vadd.f32 %v12259_v18, %v277_v4  ;;  %v754_v38 = vmax.f32 %v722_v56, %v726_v30  ;;  %v612_v44 = vadd.f32 %v12259_v18, %v611_v57 }
 0x104   :  { %v10052_v47 = vpop.f32.mrb[16].mxu0  ;;  %v10080_v52 = vpop.f32.mrb[16].mxu1  ;;  %v2695_v35 = vpack.c.bf16 %v9249_v21, %v9248_v16  ;;  %v2696_v59 = vpack.c.bf16 %v9251_v19, %v9250_v17  ;;  %v2697_v1 = vpack.c.bf16 %v12475_v32, %v12470_v28  ;;  %v9254_v17 = vld [vmem:[%s18347_s0 + $0x7e0] sm:$0xff]  ;;  %v9255_v28 = vld [vmem:[%s18347_s0 + $0x7e8] sm:$0xff] }
 0x105   :  { %v366_v53 = vmax.f32 %v278_v42, 0.0  ;;  %v12479_v33 = vadd.f32 %v10052_v47, %v12259_v18  ;;  %v12482_v0 = vadd.f32 %v10080_v52, %v12259_v18  ;;  %v290_v55 = vpop.f32.mrb[17].mxu0  ;;  %v624_v45 = vpop.f32.mrb[17].mxu1  ;;  %v724_v60 = vmax.f32 %v612_v44, 0.0 }
 0x106   :  { %v291_v61 = vadd.f32 %v12259_v18, %v290_v55  ;;  %v625_v56 = vadd.f32 %v12259_v18, %v624_v45  ;;  %v10053_v62 = vpop.f32.mrb[18].mxu0  ;;  %v10081_v51 = vpop.f32.mrb[18].mxu1  ;;  %v2698_v55 = vpack.c.bf16 %v9255_v28, %v9254_v17 }
 0x107   :  { %v394_v2 = vmax.f32 %v390_v49, %v366_v53  ;;  %v434_v4 = vadd.f32 %v433_v31, %v366_v53  ;;  %v371_v57 = vmax.f32 %v12479_v33, 0.0  ;;  %v729_v9 = vmax.f32 %v12482_v0, 0.0  ;;  %v293_v10 = vpop.f32.mrb[19].mxu0  ;;  %v627_v11 = vpop.f32.mrb[19].mxu1 }
 0x108   :  { %v752_v13 = vmax.f32 %v720_v36, %v724_v60  ;;  %v792_v14 = vadd.f32 %v791_v34, %v724_v60  ;;  %v369_v16 = vmax.f32 %v291_v61, 0.0  ;;  %v727_v21 = vmax.f32 %v625_v56, 0.0  ;;  %v12508_v36 = vld [vmem:[%s18347_s0 + $0x7f8] sm:$0xff] }
 0x109   :  { %v435_v19 = vadd.f32 %v434_v4, %v367_v63  ;;  %v399_v42 = vmax.f32 %v395_v12, %v371_v57  ;;  %v757_v49 = vmax.f32 %v753_v24, %v729_v9  ;;  %v302_v31 = vadd.f32 %v10053_v62, %v12259_v18  ;;  %10307 = vmatmul.mubr.msk.bf16.gmra.mrb[124].mxu1 %vm143_vm0, %v2695_v35 }
 0x10a   :  { %v793_v63 = vadd.f32 %v792_v14, %v725_v8  ;;  %v397_v12 = vmax.f32 %v393_v25, %v369_v16  ;;  %v755_v24 = vmax.f32 %v751_v26, %v727_v21  ;;  %v636_v34 = vadd.f32 %v10081_v51, %v12259_v18  ;;  %10310 = vmatprep.mubr.msk.bf16.mxu1 %vm143_vm0, %v2696_v59 }
 0x10b   :  { %v436_v32 = vadd.f32 %v435_v19, %v368_v6  ;;  %v372_v44 = vmax.f32 %v302_v31, 0.0  ;;  %v294_v47 = vadd.f32 %v12259_v18, %v293_v10  ;;  %v628_v52 = vadd.f32 %v12259_v18, %v627_v11 }
 0x10c   :  { %v794_v35 = vadd.f32 %v793_v63, %v726_v30  ;;  %v730_v53 = vmax.f32 %v636_v34, 0.0  ;;  %v10056_v33 = vpop.f32.mrb[20].mxu0  ;;  %v10084_v0 = vpop.f32.mrb[20].mxu1  ;;  %v2699_v8 = vpack.c.bf16 %v12508_v36, %v12503_v23 }
 0x10d   :  { %v437_v25 = vadd.f32 %v436_v32, %v369_v16  ;;  %v400_v26 = vmax.f32 %v396_v40, %v372_v44  ;;  %v370_v45 = vmax.f32 %v294_v47, 0.0  ;;  %v728_v60 = vmax.f32 %v628_v52, 0.0  ;;  %v306_v61 = vpop.f32.mrb[21].mxu0  ;;  %v640_v59 = vpop.f32.mrb[21].mxu1 }
 0x10e   :  { %v795_v6 = vadd.f32 %v794_v35, %v727_v21  ;;  %v758_v56 = vmax.f32 %v754_v38, %v730_v53  ;;  %v12517_v62 = vadd.f32 %v10056_v33, %v12259_v18  ;;  %v12520_v30 = vadd.f32 %v10084_v0, %v12259_v18  ;;  %v10057_v51 = vpop.f32.mrb[22].mxu0  ;;  %v10085_v4 = vpop.f32.mrb[22].mxu1 }
 0x10f   :  { %v398_v10 = vmax.f32 %v394_v2, %v370_v45  ;;  %v438_v11 = vadd.f32 %v437_v25, %v370_v45  ;;  %v756_v14 = vmax.f32 %v752_v13, %v728_v60  ;;  %v307_v16 = vadd.f32 %v12259_v18, %v306_v61  ;;  %v309_v40 = vpop.f32.mrb[23].mxu0  ;;  %v643_v17 = vpop.f32.mrb[23].mxu1 }
 0x110   :  { %v796_v19 = vadd.f32 %v795_v6, %v728_v60  ;;  %v375_v31 = vmax.f32 %v12517_v62, 0.0  ;;  %v733_v38 = vmax.f32 %v12520_v30, 0.0  ;;  %v641_v21 = vadd.f32 %v12259_v18, %v640_v59 }
 0x111   :  { %v439_v28 = vadd.f32 %v438_v11, %v371_v57  ;;  %v373_v63 = vmax.f32 %v307_v16, 0.0  ;;  %v318_v34 = vadd.f32 %v10057_v51, %v12259_v18  ;;  %v652_v32 = vadd.f32 %v10085_v4, %v12259_v18  ;;  %10311 = vmatmul.mubr.msk.bf16.gmra.mrb[128].mxu1 %vm143_vm0, %v2697_v1 }
 0x112   :  { %v797_v2 = vadd.f32 %v796_v19, %v729_v9  ;;  %v403_v13 = vmax.f32 %v399_v42, %v375_v31  ;;  %v761_v47 = vmax.f32 %v757_v49, %v733_v38  ;;  %v731_v52 = vmax.f32 %v641_v21, 0.0  ;;  %10314 = vmatprep.mubr.msk.bf16.mxu1 %vm143_vm0, %v2698_v55 }
 0x113   :  { %v401_v35 = vmax.f32 %v397_v12, %v373_v63  ;;  %v440_v33 = vadd.f32 %v439_v28, %v372_v44  ;;  %v376_v0 = vmax.f32 %v318_v34, 0.0  ;;  %v734_v25 = vmax.f32 %v652_v32, 0.0 }
 0x114   :  { %v406_v45 = vmax.f32 %v403_v13, %v12406_v5  ;;  %v759_v57 = vmax.f32 %v755_v24, %v731_v52  ;;  %v798_v60 = vadd.f32 %v797_v2, %v730_v53  ;;  %v310_v61 = vadd.f32 %v12259_v18, %v309_v40  ;;  %v10088_v59 = vpop.f32.mrb[24].mxu1  ;;  %v10108_v6 = vpop.f32.mrb[24].mxu0 }
 0x115   :  { %v441_v62 = vadd.f32 %v440_v33, %v373_v63  ;;  %v404_v1 = vmax.f32 %v400_v26, %v376_v0  ;;  %v762_v9 = vmax.f32 %v758_v56, %v734_v25  ;;  %v644_v42 = vadd.f32 %v12259_v18, %v643_v17  ;;  %v656_v49 = vpop.f32.mrb[25].mxu1  ;;  %v957_v30 = vpop.f32.mrb[25].mxu0 }
 0x116   :  { %v410_v55 = vmax.f32 %v406_v45, %v401_v35  ;;  %v799_v12 = vadd.f32 %v798_v60, %v731_v52  ;;  %v374_v44 = vmax.f32 %v310_v61, 0.0  ;;  %v12534_v51 = vadd.f32 %v10088_v59, %v12259_v18  ;;  %v10089_v5 = vpop.f32.mrb[26].mxu1  ;;  %v10109_v24 = vpop.f32.mrb[26].mxu0 }
 0x117   :  { %v732_v53 = vmax.f32 %v644_v42, 0.0  ;;  %v966_v4 = vadd.f32 %v10108_v6, %v12259_v18  ;;  %v657_v11 = vadd.f32 %v12259_v18, %v656_v49  ;;  %v12539_v26 = vadd.f32 %v12259_v18, %v957_v30  ;;  %v659_v56 = vpop.f32.mrb[27].mxu1  ;;  %v960_v16 = vpop.f32.mrb[27].mxu0 }
 0x118   :  { %v413_v40 = vmax.f32 %v404_v1, %v410_v55  ;;  %v402_v17 = vmax.f32 %v398_v10, %v374_v44  ;;  %v442_v19 = vadd.f32 %v441_v62, %v374_v44  ;;  %v737_v21 = vmax.f32 %v12534_v51, 0.0 }
 0x119   :  { %v760_v28 = vmax.f32 %v756_v14, %v732_v53  ;;  %v800_v63 = vadd.f32 %v799_v12, %v732_v53  ;;  %v1086_v34 = vmax.f32 %v966_v4, 0.0  ;;  %v735_v32 = vmax.f32 %v657_v11, 0.0  ;;  %10315 = vmatmul.mubr.msk.bf16.gmra.mrb[132].mxu1 %vm143_vm0, %v2699_v8 }
 0x11a   :  { %v415_v2 = vmax.f32 %v413_v40, %v402_v17  ;;  %v443_v13 = vadd.f32 %v442_v19, %v375_v31  ;;  %v765_v52 = vmax.f32 %v761_v47, %v737_v21  ;;  %v1084_v35 = vmax.f32 %v12539_v26, 0.0 }
 0x11b   :  { %v801_v33 = vadd.f32 %v800_v63, %v733_v38  ;;  %v763_v45 = vmax.f32 %v759_v57, %v735_v32  ;;  %v668_v10 = vadd.f32 %v10089_v5, %v12259_v18  ;;  %v12549_v60 = vadd.f32 %v10109_v24, %v12259_v18 }
 0x11c   :  { %v416_v14 = vrot.slane %v415_v2, 4  ;;  %v444_v61 = vadd.f32 %v443_v13, %v376_v0  ;;  %v660_v59 = vadd.f32 %v12259_v18, %v659_v56  ;;  %v12553_v23 = vadd.f32 %v12259_v18, %v960_v16  ;;  %v10092_v36 = vpop.f32.mrb[28].mxu1  ;;  %v10112_v8 = vpop.f32.mrb[28].mxu0 }
 0x11d   :  { %v802_v31 = vadd.f32 %v801_v33, %v734_v25  ;;  %v738_v47 = vmax.f32 %v668_v10, 0.0  ;;  %v1087_v6 = vmax.f32 %v12549_v60, 0.0  ;;  %v12557_v38 = vadd.f32 %v10092_v36, %v12259_v18  ;;  %v672_v57 = vpop.f32.mrb[29].mxu1  ;;  %v973_v62 = vpop.f32.mrb[29].mxu0 }
 0x11e   :  { %v417_v1 = vmax.f32 %v415_v2, %v416_v14  ;;  %v445_v0 = vadd.f32 %v444_v61, %v377_v48  ;;  %v736_v42 = vmax.f32 %v660_v59, 0.0  ;;  %v1085_v49 = vmax.f32 %v12553_v23, 0.0  ;;  %v10093_v30 = vpop.f32.mrb[30].mxu1  ;;  %v10113_v55 = vpop.f32.mrb[30].mxu0 }
 0x11f   :  { %v803_v12 = vadd.f32 %v802_v31, %v735_v32  ;;  %v766_v44 = vmax.f32 %v762_v9, %v738_v47  ;;  %v741_v25 = vmax.f32 %v12557_v38, 0.0  ;;  %v12564_v51 = vadd.f32 %v10112_v8, %v12259_v18  ;;  %v675_v5 = vpop.f32.mrb[31].mxu1  ;;  %v976_v24 = vpop.f32.mrb[31].mxu0 }
 0x120   :  { %v418_v53 = vrot.slane %v417_v1, 2  ;;  %v446_v4 = vadd.f32 %v445_v0, %v378_v3  ;;  %v764_v37 = vmax.f32 %v760_v28, %v736_v42  ;;  %v1153_v48 = vadd.f32 %v1085_v49, %v1084_v35 }
 0x121   :  { %v804_v11 = vadd.f32 %v803_v12, %v736_v42  ;;  %v769_v26 = vmax.f32 %v765_v52, %v741_v25  ;;  %v1090_v9 = vmax.f32 %v12564_v51, 0.0  ;;  %v673_v56 = vadd.f32 %v12259_v18, %v672_v57 }
 0x122   :  { %v419_v16 = vmax.f32 %v417_v1, %v418_v53  ;;  %v447_v40 = vadd.f32 %v446_v4, %v379_v41  ;;  %v1154_v17 = vadd.f32 %v1153_v48, %v1086_v34  ;;  %v974_v50 = vadd.f32 %v12259_v18, %v973_v62 }
 0x123   :  { %v805_v3 = vadd.f32 %v804_v11, %v737_v21  ;;  %v1118_v19 = vmax.f32 %v1086_v34, %v1090_v9  ;;  %v739_v28 = vmax.f32 %v673_v56, 0.0  ;;  %v684_v63 = vadd.f32 %v10093_v30, %v12259_v18 }
 0x124   :  { %v420_v32 = vrot.slane %v419_v16, 1  ;;  %v448_v2 = vadd.f32 %v447_v40, %v380_v54  ;;  %v1088_v13 = vmax.f32 %v974_v50, 0.0  ;;  %v1155_v52 = vadd.f32 %v1154_v17, %v1087_v6  ;;  %v10096_v33 = vpop.f32.mrb[32].mxu1  ;;  %v10116_v10 = vpop.f32.mrb[32].mxu0 }
 0x125   :  { %v767_v29 = vmax.f32 %v763_v45, %v739_v28  ;;  %v806_v41 = vadd.f32 %v805_v3, %v738_v47  ;;  %v742_v60 = vmax.f32 %v684_v63, 0.0  ;;  %v985_v14 = vadd.f32 %v10113_v55, %v12259_v18  ;;  %v688_v21 = vpop.f32.mrb[33].mxu1  ;;  %v989_v61 = vpop.f32.mrb[33].mxu0 }
 0x126   :  { %v12583_v59 = vmax.f32 %v419_v16, %v420_v32  ;;  %v449_v34 = vadd.f32 %v448_v2, %v381_v27  ;;  %v1116_v36 = vmax.f32 %v1084_v35, %v1088_v13  ;;  %v1156_v8 = vadd.f32 %v1155_v52, %v1088_v13  ;;  %v10097_v43 = vpop.f32.mrb[34].mxu1  ;;  %v10117_v54 = vpop.f32.mrb[34].mxu0 }
 0x127   :  { %v807_v31 = vadd.f32 %v806_v41, %v739_v28  ;;  %v770_v57 = vmax.f32 %v766_v44, %v742_v60  ;;  %v1091_v62 = vmax.f32 %v985_v14, 0.0  ;;  %v676_v45 = vadd.f32 %v12259_v18, %v675_v5  ;;  %v691_v47 = vpop.f32.mrb[35].mxu1  ;;  %v992_v1 = vpop.f32.mrb[35].mxu0 }
 0x128   :  { %v450_v0 = vadd.f32 %v449_v34, %v382_v58  ;;  %v977_v42 = vadd.f32 %v12259_v18, %v976_v24  ;;  %v697_v30 = vadd.f32 %v10096_v33, %v12259_v18  ;;  %v12593_v15 = vadd.f32 %v10116_v10, %v12259_v18 }
 0x129   :  { %v1119_v27 = vmax.f32 %v1087_v6, %v1091_v62  ;;  %v740_v35 = vmax.f32 %v676_v45, 0.0  ;;  %v689_v55 = vadd.f32 %v12259_v18, %v688_v21  ;;  %v990_v12 = vadd.f32 %v12259_v18, %v989_v61 }
 0x12a   :  { %v451_v44 = vadd.f32 %v450_v0, %v383_v20  ;;  %v1089_v5 = vmax.f32 %v977_v42, 0.0  ;;  %v745_v53 = vmax.f32 %v697_v30, 0.0  ;;  %v1094_v39 = vmax.f32 %v12593_v15, 0.0 }
 0x12b   :  { %v768_v58 = vmax.f32 %v764_v37, %v740_v35  ;;  %v808_v24 = vadd.f32 %v807_v31, %v740_v35  ;;  %v743_v4 = vmax.f32 %v689_v55, 0.0  ;;  %v1092_v48 = vmax.f32 %v990_v12, 0.0 }
 0x12c   :  { %v452_v11 = vadd.f32 %v451_v44, %v384_v46  ;;  %v1117_v6 = vmax.f32 %v1085_v49, %v1089_v5  ;;  %v1157_v56 = vadd.f32 %v1156_v8, %v1089_v5  ;;  %v773_v16 = vmax.f32 %v769_v26, %v745_v53  ;;  %v10100_v40 = vpop.f32.mrb[36].mxu1  ;;  %v10120_v17 = vpop.f32.mrb[36].mxu0 }
 0x12d   :  { %v809_v7 = vadd.f32 %v808_v24, %v741_v25  ;;  %v1122_v20 = vmax.f32 %v1118_v19, %v1094_v39  ;;  %v771_v50 = vmax.f32 %v767_v29, %v743_v4  ;;  %v1120_v3 = vmax.f32 %v1116_v36, %v1092_v48  ;;  %v704_v37 = vpop.f32.mrb[37].mxu1  ;;  %v1005_v28 = vpop.f32.mrb[37].mxu0 }
 0x12e   :  { %v453_v63 = vrot.slane %v452_v11, 4  ;;  %v1158_v22 = vadd.f32 %v1157_v56, %v1090_v9  ;;  %v700_v46 = vadd.f32 %v10097_v43, %v12259_v18  ;;  %v1001_v23 = vadd.f32 %v10117_v54, %v12259_v18  ;;  %v10101_v49 = vpop.f32.mrb[38].mxu1  ;;  %v10121_v26 = vpop.f32.mrb[38].mxu0 }
 0x12f   :  { %v810_v32 = vadd.f32 %v809_v7, %v742_v60  ;;  %v692_v2 = vadd.f32 %v12259_v18, %v691_v47  ;;  %v993_v38 = vadd.f32 %v12259_v18, %v992_v1  ;;  %v12613_v25 = vadd.f32 %v10100_v40, %v12259_v18  ;;  %v707_v19 = vpop.f32.mrb[39].mxu1  ;;  %v1008_v13 = vpop.f32.mrb[39].mxu0 }
 0x130   :  { %v454_v52 = vadd.f32 %v453_v63, %v452_v11  ;;  %v1159_v33 = vadd.f32 %v1158_v22, %v1091_v62  ;;  %v746_v51 = vmax.f32 %v700_v46, 0.0  ;;  %v1095_v9 = vmax.f32 %v1001_v23, 0.0 }
 0x131   :  { %v811_v10 = vadd.f32 %v810_v32, %v743_v4  ;;  %v744_v29 = vmax.f32 %v692_v2, 0.0  ;;  %v1093_v41 = vmax.f32 %v993_v38, 0.0  ;;  %v749_v14 = vmax.f32 %v12613_v25, 0.0  ;;  %v12676_v25 = vld [vmem:[%s18348_s27] ss:$0 sm:$0xff] }
 0x132   :  { %v455_v21 = vrot.slane %v454_v52, 2  ;;  %v1160_v60 = vadd.f32 %v1159_v33, %v1092_v48  ;;  %v774_v61 = vmax.f32 %v770_v57, %v746_v51  ;;  %v1123_v34 = vmax.f32 %v1119_v27, %v1095_v9 }
 0x133   :  { %v772_v36 = vmax.f32 %v768_v58, %v744_v29  ;;  %v812_v8 = vadd.f32 %v811_v10, %v744_v29  ;;  %v1121_v43 = vmax.f32 %v1117_v6, %v1093_v41  ;;  %v12618_v54 = vmax.f32 %v773_v16, %v749_v14 }
 0x134   :  { %v1161_v31 = vadd.f32 %v1160_v60, %v1093_v41  ;;  %v12621_v62 = vadd.f32 %v10120_v17, %v12259_v18  ;;  %v705_v45 = vadd.f32 %v12259_v18, %v704_v37  ;;  %v1006_v47 = vadd.f32 %v12259_v18, %v1005_v28  ;;  %v10124_v1 = vpop.f32.mrb[40].mxu0  ;;  %v10144_v0 = vpop.f32.mrb[40].mxu1 }
 0x135   :  { %v813_v42 = vadd.f32 %v812_v8, %v745_v53  ;;  %v12626_v57 = vadd.f32 %v10101_v49, %v12259_v18  ;;  %v12629_v30 = vadd.f32 %v10121_v26, %v12259_v18  ;;  %v456_v15 = vadd.f32 %v455_v21, %v454_v52  ;;  %v1021_v27 = vpop.f32.mrb[41].mxu0  ;;  %v1322_v35 = vpop.f32.mrb[41].mxu1 }
 0x136   :  { %v1162_v55 = vadd.f32 %v1161_v31, %v1094_v39  ;;  %v1098_v12 = vmax.f32 %v12621_v62, 0.0  ;;  %v747_v44 = vmax.f32 %v705_v45, 0.0  ;;  %v1096_v5 = vmax.f32 %v1006_v47, 0.0  ;;  %v10125_v58 = vpop.f32.mrb[42].mxu0  ;;  %v10145_v24 = vpop.f32.mrb[42].mxu1 }
 0x137   :  { %v814_v4 = vadd.f32 %v813_v42, %v746_v51  ;;  %v750_v48 = vmax.f32 %v12626_v57, 0.0  ;;  %v1099_v53 = vmax.f32 %v12629_v30, 0.0  ;;  %v457_v11 = vrot.slane %v456_v15, 1  ;;  %v1024_v6 = vpop.f32.mrb[43].mxu0  ;;  %v1325_v56 = vpop.f32.mrb[43].mxu1 }
 0x138   :  { %v1126_v16 = vmax.f32 %v1122_v20, %v1098_v12  ;;  %v775_v40 = vmax.f32 %v771_v50, %v747_v44  ;;  %v1124_v17 = vmax.f32 %v1120_v3, %v1096_v5  ;;  %v1163_v7 = vadd.f32 %v1162_v55, %v1095_v9 }
 0x139   :  { %v815_v37 = vadd.f32 %v814_v4, %v747_v44  ;;  %v778_v39 = vmax.f32 %v774_v61, %v750_v48  ;;  %v1127_v28 = vmax.f32 %v1123_v34, %v1099_v53  ;;  %v458_v63 = vadd.f32 %v457_v11, %v456_v15 }
 0x13a   :  { %v1164_v22 = vadd.f32 %v1163_v7, %v1096_v5  ;;  %v708_v46 = vadd.f32 %v12259_v18, %v707_v19  ;;  %v1009_v23 = vadd.f32 %v12259_v18, %v1008_v13  ;;  %v12637_v49 = vadd.f32 %v10124_v1, %v12259_v18 }
 0x13b   :  { %v780_v26 = vmax.f32 %v12618_v54, %v778_v39  ;;  %v12640_v32 = vmul.f32 0.00390625, %v458_v63  ;;  %v12643_v20 = vadd.f32 %v10144_v0, %v12259_v18  ;;  %v1022_v50 = vadd.f32 %v12259_v18, %v1021_v27 }
 0x13c   :  { %v748_v3 = vmax.f32 %v708_v46, 0.0  ;;  %v1097_v2 = vmax.f32 %v1009_v23, 0.0  ;;  %v1102_v38 = vmax.f32 %v12637_v49, 0.0  ;;  %v12648_v19 = vadd.f32 %v12259_v18, %v1322_v35  ;;  %v10128_v13 = vpop.f32.mrb[44].mxu0  ;;  %v10148_v52 = vpop.f32.mrb[44].mxu1 }
 0x13d   :  { %v1451_v33 = vmax.f32 %v12643_v20, 0.0  ;;  %v1100_v51 = vmax.f32 %v1022_v50, 0.0  ;;  %v12652_v9 = vadd.f32 %v10125_v58, %v12259_v18  ;;  %v12655_v10 = vadd.f32 %v10145_v24, %v12259_v18  ;;  %v1037_v29 = vpop.f32.mrb[45].mxu0  ;;  %v1338_v41 = vpop.f32.mrb[45].mxu1 }
 0x13e   :  { %v776_v21 = vmax.f32 %v772_v36, %v748_v3  ;;  %v816_v60 = vadd.f32 %v815_v37, %v748_v3  ;;  %v1125_v61 = vmax.f32 %v1121_v43, %v1097_v2  ;;  %v1165_v34 = vadd.f32 %v1164_v22, %v1097_v2  ;;  %v10129_v8 = vpop.f32.mrb[46].mxu0  ;;  %v10149_v54 = vpop.f32.mrb[46].mxu1 }
 0x13f   :  { %v1130_v31 = vmax.f32 %v1126_v16, %v1102_v38  ;;  %v1128_v62 = vmax.f32 %v1124_v17, %v1100_v51  ;;  %v1449_v45 = vmax.f32 %v12648_v19, 0.0  ;;  %v1103_v47 = vmax.f32 %v12652_v9, 0.0  ;;  %v1040_v1 = vpop.f32.mrb[47].mxu0  ;;  %v12661_v0 = vpop.f32.mrb[47].mxu1 }
 0x140   :  { %v779_v42 = vmax.f32 %v775_v40, %v776_v21  ;;  %v817_v36 = vadd.f32 %v816_v60, %v749_v14  ;;  %v1166_v57 = vadd.f32 %v1165_v34, %v1098_v12  ;;  %v1452_v43 = vmax.f32 %v12655_v10, 0.0 }
 0x141   :  { %v1131_v30 = vmax.f32 %v1127_v28, %v1103_v47  ;;  %v1025_v15 = vadd.f32 %v12259_v18, %v1024_v6  ;;  %v12668_v27 = vadd.f32 %v12259_v18, %v1325_v56  ;;  %v12671_v35 = vadd.f32 %v10128_v13, %v12259_v18 }
 0x142   :  { %v781_v55 = vmax.f32 %v779_v42, %v780_v26  ;;  %v818_v44 = vadd.f32 %v817_v36, %v750_v48  ;;  %v1167_v5 = vadd.f32 %v1166_v57, %v1099_v53  ;;  %v12679_v14 = vadd.f32 %v12676_v25, %v10148_v52 }
 0x143   :  { %v1101_v12 = vmax.f32 %v1025_v15, 0.0  ;;  %v1450_v58 = vmax.f32 %v12668_v27, 0.0  ;;  %v1106_v24 = vmax.f32 %v12671_v35, 0.0  ;;  %v1038_v4 = vadd.f32 %v12676_v25, %v1037_v29 }
 0x144   :  { %v782_v18 = vrot.slane %v781_v55, 4  ;;  %v819_v11 = vrot.slane %v818_v44, 4  ;;  %v1168_v6 = vadd.f32 %v1167_v5, %v1100_v51  ;;  %v1455_v48 = vmax.f32 %v12679_v14, 0.0  ;;  %v10132_v53 = vpop.f32.mrb[48].mxu0  ;;  %v10152_v56 = vpop.f32.mrb[48].mxu1 }
 0x145   :  { %v1129_v16 = vmax.f32 %v1125_v61, %v1101_v12  ;;  %v1518_v40 = vadd.f32 %v1450_v58, %v1449_v45  ;;  %v12689_v17 = vmax.f32 %v1130_v31, %v1106_v24  ;;  %v1104_v7 = vmax.f32 %v1038_v4, 0.0  ;;  %v1053_v37 = vpop.f32.mrb[49].mxu0  ;;  %v1354_v39 = vpop.f32.mrb[49].mxu1 }
 0x146   :  { %v783_v28 = vmax.f32 %v781_v55, %v782_v18  ;;  %v820_v63 = vadd.f32 %v819_v11, %v818_v44  ;;  %v1169_v22 = vadd.f32 %v1168_v6, %v1101_v12  ;;  %v1483_v46 = vmax.f32 %v1451_v33, %v1455_v48  ;;  %v12693_v23 = vpop.f32.mrb[50].mxu0  ;;  %v12695_v26 = vpop.f32.mrb[50].mxu1 }
 0x147   :  { %v1519_v20 = vadd.f32 %v1518_v40, %v1451_v33  ;;  %v1132_v50 = vmax.f32 %v1128_v62, %v1104_v7  ;;  %v1339_v3 = vadd.f32 %v12676_v25, %v1338_v41  ;;  %v1049_v2 = vadd.f32 %v12676_v25, %v10129_v8  ;;  %v1056_v19 = vpop.f32.mrb[51].mxu0  ;;  %v1357_v13 = vpop.f32.mrb[51].mxu1 }
 0x148   :  { %v784_v52 = vrot.slane %v783_v28, 2  ;;  %v821_v51 = vrot.slane %v820_v63, 2  ;;  %v1170_v9 = vadd.f32 %v1169_v22, %v1102_v38  ;;  %v1350_v10 = vadd.f32 %v12676_v25, %v10149_v54 }
 0x149   :  { %v1453_v29 = vmax.f32 %v1339_v3, 0.0  ;;  %v1520_v21 = vadd.f32 %v1519_v20, %v1452_v43  ;;  %v1107_v60 = vmax.f32 %v1049_v2, 0.0  ;;  %v1041_v61 = vadd.f32 %v12676_v25, %v1040_v1 }
 0x14a   :  { %v785_v33 = vmax.f32 %v783_v28, %v784_v52  ;;  %v822_v34 = vadd.f32 %v821_v51, %v820_v63  ;;  %v1171_v31 = vadd.f32 %v1170_v9, %v1103_v47  ;;  %v1456_v41 = vmax.f32 %v1350_v10, 0.0 }
 0x14b   :  { %v1481_v62 = vmax.f32 %v1449_v45, %v1453_v29  ;;  %v1521_v8 = vadd.f32 %v1520_v21, %v1453_v29  ;;  %v1135_v42 = vmax.f32 %v1131_v30, %v1107_v60  ;;  %v1105_v36 = vmax.f32 %v1041_v61, 0.0 }
 0x14c   :  { %v786_v57 = vrot.slane %v785_v33, 1  ;;  %v823_v15 = vrot.slane %v822_v34, 1  ;;  %v1172_v55 = vadd.f32 %v1171_v31, %v1104_v7  ;;  %v1484_v49 = vmax.f32 %v1452_v43, %v1456_v41  ;;  %v10136_v38 = vpop.f32.mrb[52].mxu0  ;;  %v10156_v44 = vpop.f32.mrb[52].mxu1 }
 0x14d   :  { %v1133_v54 = vmax.f32 %v1129_v16, %v1105_v36  ;;  %v1342_v5 = vadd.f32 %v12676_v25, %v12661_v0  ;;  %v12706_v1 = vadd.f32 %v12676_v25, %v10132_v53  ;;  %v12709_v47 = vadd.f32 %v12676_v25, %v10152_v56  ;;  %v1069_v45 = vpop.f32.mrb[53].mxu0  ;;  %v1370_v12 = vpop.f32.mrb[53].mxu1 }
 0x14e   :  { %v787_v30 = vmax.f32 %v785_v33, %v786_v57  ;;  %v824_v4 = vadd.f32 %v823_v15, %v822_v34  ;;  %v1173_v18 = vadd.f32 %v1172_v55, %v1105_v36  ;;  %v1054_v11 = vadd.f32 %v12676_v25, %v1053_v37  ;;  %v10137_v43 = vpop.f32.mrb[54].mxu0  ;;  %v10157_v6 = vpop.f32.mrb[54].mxu1 }
 0x14f   :  { %v1454_v40 = vmax.f32 %v1342_v5, 0.0  ;;  %v1110_v16 = vmax.f32 %v12706_v1, 0.0  ;;  %v1459_v0 = vmax.f32 %v12709_v47, 0.0  ;;  %v1355_v53 = vadd.f32 %v12676_v25, %v1354_v39  ;;  %v1072_v7 = vpop.f32.mrb[55].mxu0  ;;  %v12715_v28 = vpop.f32.mrb[55].mxu1 }
 0x150   :  { %v825_v56 = vmul.f32 0.00390625, %v824_v4  ;;  %v3018_v63 = vrot.slane %v787_v30, 7  ;;  %v1174_v22 = vadd.f32 %v1173_v18, %v1106_v24  ;;  %v1108_v20 = vmax.f32 %v1054_v11, 0.0 }
 0x151   :  { %v1482_v37 = vmax.f32 %v1450_v58, %v1454_v40  ;;  %v1522_v3 = vadd.f32 %v1521_v8, %v1454_v40  ;;  %v1138_v2 = vmax.f32 %v12689_v17, %v1110_v16  ;;  %v1487_v52 = vmax.f32 %v1483_v46, %v1459_v0 }
 0x152   :  { %v3019_v51 = vrot.slane %v825_v56, 7  ;;  %v12724_v39 = vsel %vm3058_vm1, %v12583_v59, %v3018_v63  ;;  %v1136_v9 = vmax.f32 %v1132_v50, %v1108_v20  ;;  %v1175_v10 = vadd.f32 %v1174_v22, %v1107_v60 }
 0x153   :  { %v1523_v29 = vadd.f32 %v1522_v3, %v1455_v48  ;;  %v1457_v35 = vmax.f32 %v1355_v53, 0.0  ;;  %v1065_v24 = vadd.f32 %v12676_v25, %v12693_v23  ;;  %v1366_v27 = vadd.f32 %v12676_v25, %v12695_v26 }
 0x154   :  { %v12734_v58 = vsel %vm3058_vm1, %v12640_v32, %v3019_v51  ;;  %v1176_v17 = vadd.f32 %v1175_v10, %v1108_v20  ;;  %v1057_v59 = vadd.f32 %v12676_v25, %v1056_v19  ;;  %v1358_v46 = vadd.f32 %v12676_v25, %v1357_v13  ;;  %v10160_v50 = vpop.f32.mrb[56].mxu1  ;;  %v10180_v21 = vpop.f32.mrb[56].mxu0 }
 0x155   :  { %v1485_v14 = vmax.f32 %v1481_v62, %v1457_v35  ;;  %v1524_v48 = vadd.f32 %v1523_v29, %v1456_v41  ;;  %v1111_v60 = vmax.f32 %v1065_v24, 0.0  ;;  %v1460_v61 = vmax.f32 %v1366_v27, 0.0  ;;  %v1386_v33 = vpop.f32.mrb[57].mxu1  ;;  %v12738_v23 = vpop.f32.mrb[57].mxu0 }
 0x156   :  { %v1109_v34 = vmax.f32 %v1057_v59, 0.0  ;;  %v1458_v26 = vmax.f32 %v1358_v46, 0.0  ;;  %v1078_v31 = vadd.f32 %v12676_v25, %v10136_v38  ;;  %v1379_v32 = vadd.f32 %v12676_v25, %v10156_v44  ;;  %v10161_v8 = vpop.f32.mrb[58].mxu1  ;;  %v10181_v36 = vpop.f32.mrb[58].mxu0 }
 0x157   :  { %v1525_v19 = vadd.f32 %v1524_v48, %v1457_v35  ;;  %v1139_v57 = vmax.f32 %v1135_v42, %v1111_v60  ;;  %v1488_v13 = vmax.f32 %v1484_v49, %v1460_v61  ;;  %v1070_v15 = vadd.f32 %v12676_v25, %v1069_v45  ;;  %v1389_v62 = vpop.f32.mrb[59].mxu1  ;;  %v12743_v41 = vpop.f32.mrb[59].mxu0 }
 0x158   :  { %v1137_v55 = vmax.f32 %v1133_v54, %v1109_v34  ;;  %v1177_v5 = vadd.f32 %v1176_v17, %v1109_v34  ;;  %v1486_v1 = vmax.f32 %v1482_v37, %v1458_v26  ;;  %v1114_v47 = vmax.f32 %v1078_v31, 0.0 }
 0x159   :  { %v1526_v30 = vadd.f32 %v1525_v19, %v1458_v26  ;;  %v1463_v4 = vmax.f32 %v1379_v32, 0.0  ;;  %v1112_v18 = vmax.f32 %v1070_v15, 0.0  ;;  %v1371_v38 = vadd.f32 %v12676_v25, %v1370_v12 }
 0x15a   :  { %v1178_v44 = vadd.f32 %v1177_v5, %v1110_v16  ;;  %v1142_v11 = vmax.f32 %v1138_v2, %v1114_v47  ;;  %v1081_v40 = vadd.f32 %v12676_v25, %v10137_v43  ;;  %v1382_v42 = vadd.f32 %v12676_v25, %v10157_v6 }
 0x15b   :  { %v1527_v49 = vadd.f32 %v1526_v30, %v1459_v0  ;;  %v1491_v45 = vmax.f32 %v1487_v52, %v1463_v4  ;;  %v1140_v53 = vmax.f32 %v1136_v9, %v1112_v18  ;;  %v1461_v56 = vmax.f32 %v1371_v38, 0.0 }
 0x15c   :  { %v1179_v63 = vadd.f32 %v1178_v44, %v1111_v60  ;;  %v1115_v54 = vmax.f32 %v1081_v40, 0.0  ;;  %v1464_v22 = vmax.f32 %v1382_v42, 0.0  ;;  %v1073_v20 = vadd.f32 %v12676_v25, %v1072_v7  ;;  %v10164_v37 = vpop.f32.mrb[60].mxu1  ;;  %v10184_v3 = vpop.f32.mrb[60].mxu0 }
 0x15d   :  { %v1489_v51 = vmax.f32 %v1485_v14, %v1461_v56  ;;  %v1528_v10 = vadd.f32 %v1527_v49, %v1460_v61  ;;  %v1374_v12 = vadd.f32 %v12676_v25, %v12715_v28  ;;  %v12752_v43 = vadd.f32 %v12676_v25, %v10160_v50  ;;  %v1402_v6 = vpop.f32.mrb[61].mxu1  ;;  %v1703_v16 = vpop.f32.mrb[61].mxu0 }
 0x15e   :  { %v1180_v0 = vadd.f32 %v1179_v63, %v1112_v18  ;;  %v1143_v2 = vmax.f32 %v1139_v57, %v1115_v54  ;;  %v1492_v52 = vmax.f32 %v1488_v13, %v1464_v22  ;;  %v1113_v9 = vmax.f32 %v1073_v20, 0.0  ;;  %v12754_v29 = vpop.f32.mrb[62].mxu1  ;;  %v12756_v35 = vpop.f32.mrb[62].mxu0 }
 0x15f   :  { %v1529_v7 = vadd.f32 %v1528_v10, %v1461_v56  ;;  %v1462_v24 = vmax.f32 %v1374_v12, 0.0  ;;  %v1467_v27 = vmax.f32 %v12752_v43, 0.0  ;;  %v12760_v17 = vadd.f32 %v12676_v25, %v10180_v21  ;;  %v12762_v28 = vpop.f32.mrb[63].mxu1  ;;  %v12764_v59 = vpop.f32.mrb[63].mxu0 }
 0x160   :  { %v1145_v46 = vmax.f32 %v1142_v11, %v1143_v2  ;;  %v1141_v50 = vmax.f32 %v1137_v55, %v1113_v9  ;;  %v1181_v14 = vadd.f32 %v1180_v0, %v1113_v9  ;;  %v1387_v48 = vadd.f32 %v12676_v25, %v1386_v33 }
 0x161   :  { %v1490_v60 = vmax.f32 %v1486_v1, %v1462_v24  ;;  %v1530_v61 = vadd.f32 %v1529_v7, %v1462_v24  ;;  %v1495_v34 = vmax.f32 %v1491_v45, %v1467_v27  ;;  %v1816_v26 = vmax.f32 %v12760_v17, 0.0 }
 0x162   :  { %v1144_v31 = vmax.f32 %v1140_v53, %v1141_v50  ;;  %v1182_v32 = vadd.f32 %v1181_v14, %v1114_v47  ;;  %v1465_v19 = vmax.f32 %v1387_v48, 0.0  ;;  %v1688_v21 = vadd.f32 %v12676_v25, %v12738_v23 }
 0x163   :  { %v1531_v57 = vadd.f32 %v1530_v61, %v1463_v4  ;;  %v1398_v13 = vadd.f32 %v12676_v25, %v10161_v8  ;;  %v12772_v15 = vadd.f32 %v12676_v25, %v10181_v36  ;;  %v1390_v55 = vadd.f32 %v12676_v25, %v1389_v62 }
 0x164   :  { %v1146_v33 = vmax.f32 %v1144_v31, %v1145_v46  ;;  %v1183_v5 = vadd.f32 %v1182_v32, %v1115_v54  ;;  %v1493_v1 = vmax.f32 %v1489_v51, %v1465_v19  ;;  %v1814_v30 = vmax.f32 %v1688_v21, 0.0  ;;  %v12775_v18 = vpop.f32.mrb[64].mxu1  ;;  %v12777_v38 = vpop.f32.mrb[64].mxu0  ;;  %v10527_v21 = vld [vmem:[%s18349_s25] ss:$16 sps:$4 sm:$0xff]  }
 0x165   :  { %v1532_v47 = vadd.f32 %v1531_v57, %v1464_v22  ;;  %v1468_v44 = vmax.f32 %v1398_v13, 0.0  ;;  %v1817_v23 = vmax.f32 %v12772_v15, 0.0  ;;  %v1466_v4 = vmax.f32 %v1390_v55, 0.0  ;;  %v12780_v11 = vpop.f32.mrb[65].mxu1  ;;  %v12782_v8 = vpop.f32.mrb[65].mxu0 }
 0x166   :  { %v1147_v36 = vrot.slane %v1146_v33, 4  ;;  %v1184_v40 = vrot.slane %v1183_v5, 4  ;;  %v12786_v62 = vadd.f32 %v12676_v25, %v12743_v41  ;;  %v12789_v42 = vadd.f32 %v12676_v25, %v10164_v37  ;;  %v12791_v49 = vpop.f32.mrb[66].mxu1  ;;  %v12793_v45 = vpop.f32.mrb[66].mxu0 }
 0x167   :  { %v1533_v53 = vadd.f32 %v1532_v47, %v1465_v19  ;;  %v1496_v56 = vmax.f32 %v1492_v52, %v1468_v44  ;;  %v12795_v63 = vmax.f32 %v1490_v60, %v1466_v4  ;;  %v12798_v54 = vadd.f32 %v12676_v25, %v10184_v3  ;;  %v12800_v22 = vpop.f32.mrb[67].mxu1  ;;  %v12802_v20 = vpop.f32.mrb[67].mxu0 }
 0x168   :  { %v1148_v41 = vmax.f32 %v1146_v33, %v1147_v36  ;;  %v1185_v51 = vadd.f32 %v1184_v40, %v1183_v5  ;;  %v1815_v37 = vmax.f32 %v12786_v62, 0.0  ;;  %v1471_v10 = vmax.f32 %v12789_v42, 0.0  ;;  %v10530_v40 = vld [vmem:[%s18349_s25 + $0x8] ss:$16 sps:$4 sm:$0xff]  }
 0x169   :  { %v1534_v12 = vadd.f32 %v1533_v53, %v1466_v4  ;;  %v1820_v43 = vmax.f32 %v12798_v54, 0.0  ;;  %v1403_v0 = vadd.f32 %v12676_v25, %v1402_v6  ;;  %v1704_v2 = vadd.f32 %v12676_v25, %v1703_v16 }
 0x16a   :  { %v1149_v3 = vrot.slane %v1148_v41, 2  ;;  %v1186_v52 = vrot.slane %v1185_v51, 2  ;;  %v1883_v9 = vadd.f32 %v1815_v37, %v1814_v30  ;;  %v12813_v7 = vmax.f32 %v1495_v34, %v1471_v10 }
 0x16b   :  { %v1535_v24 = vadd.f32 %v1534_v12, %v1467_v27  ;;  %v12817_v17 = vmax.f32 %v1816_v26, %v1820_v43  ;;  %v1469_v46 = vmax.f32 %v1403_v0, 0.0  ;;  %v1818_v50 = vmax.f32 %v1704_v2, 0.0  ;;  %v10529_v27 = vld [vmem:[%s18349_s25 + $0x4] ss:$16 sps:$4 sm:$0xff]  }
 0x16c   :  { %v1150_v14 = vmax.f32 %v1148_v41, %v1149_v3  ;;  %v1187_v6 = vadd.f32 %v1186_v52, %v1185_v51  ;;  %v1884_v48 = vadd.f32 %v1883_v9, %v1816_v26  ;;  %v12821_v16 = vadd.f32 %v12676_v25, %v12754_v29  ;;  %v12823_v60 = vpop.f32.mrb[68].mxu1  ;;  %v12825_v61 = vpop.f32.mrb[68].mxu0  ;;  %3529 = vmatprep.subr.bf16.mxu0 %v10529_v27 }
 0x16d   :  { %v12830_v34 = vmax.f32 %v1493_v1, %v1469_v46  ;;  %v1536_v31 = vadd.f32 %v1535_v24, %v1468_v44  ;;  %v12832_v32 = vmax.f32 %v1814_v30, %v1818_v50  ;;  %v12836_v26 = vadd.f32 %v12676_v25, %v12756_v35  ;;  %v12838_v19 = vpop.f32.mrb[69].mxu1  ;;  %v12840_v29 = vpop.f32.mrb[69].mxu0  ;;  %3530 = vmatpush1.bf16.msra.mxu0 %v10527_v21 }
 0x16e   :  { %v1151_v57 = vrot.slane %v1150_v14, 1  ;;  %v1188_v13 = vrot.slane %v1187_v6, 1  ;;  %v1885_v55 = vadd.f32 %v1884_v48, %v1817_v23  ;;  %v1472_v33 = vmax.f32 %v12821_v16, 0.0  ;;  %v12848_v5 = vpop.f32.mrb[70].mxu1  ;;  %v12850_v1 = vpop.f32.mrb[70].mxu0 }
 0x16f   :  { %v1537_v35 = vadd.f32 %v1536_v31, %v1469_v46  ;;  %v1821_v30 = vmax.f32 %v12836_v26, 0.0  ;;  %v1406_v47 = vadd.f32 %v12676_v25, %v12762_v28  ;;  %v1707_v44 = vadd.f32 %v12676_v25, %v12764_v59  ;;  %v12857_v4 = vpop.f32.mrb[71].mxu1  ;;  %v12859_v36 = vpop.f32.mrb[71].mxu0  ;;  %v10532_v28 = vld [vmem:[%s18349_s25 + $0xc] ss:$16 sps:$4 sm:$0xff]  }
 0x170   :  { %v1152_v53 = vmax.f32 %v1150_v14, %v1151_v57  ;;  %v1189_v41 = vadd.f32 %v1188_v13, %v1187_v6  ;;  %v1886_v51 = vadd.f32 %v1885_v55, %v1818_v50  ;;  %v12864_v12 = vmax.f32 %v1496_v56, %v1472_v33  ;;  %v10535_v59 = vld [vmem:[%s18349_s25 + $0x24] ss:$16 sps:$4 sm:$0xff]   ;;  %v10533_v56 = vld [vmem:[%s18349_s25 + $0x20] ss:$16 sps:$4 sm:$0xff]   ;;  %3570 = vmatprep.subr.bf16.mxu1 %v10532_v28  ;;  %v10550_v28 = vld [vmem:[%s18349_s25 + $0x6c] ss:$16 sps:$4 sm:$0xff]  }
 0x171   :  { %v12874_v0 = vmax.f32 %v1817_v23, %v1821_v30  ;;  %v1470_v2 = vmax.f32 %v1406_v47, 0.0  ;;  %v1819_v3 = vmax.f32 %v1707_v44, 0.0  ;;  %v12878_v52 = vadd.f32 %v12676_v25, %v12775_v18  ;;  %3531 = vmatprep.subr.bf16.mxu0 %v10535_v59  ;;  %v10536_v18 = vld [vmem:[%s18349_s25 + $0x28] ss:$16 sps:$4 sm:$0xff]   ;;  %v10538_v23 = vld [vmem:[%s18349_s25 + $0x2c] ss:$16 sps:$4 sm:$0xff]   ;;  %3571 = vmatpush1.bf16.msra.mxu1 %v10530_v40 }
 0x172   :  { %v1190_v9 = vmul.f32 0.00390625, %v1189_v41  ;;  %v3024_v24 = vrot.slane %v1152_v53, 6  ;;  %v12885_v46 = vadd.f32 %v12676_v25, %v12777_v38  ;;  %v1419_v15 = vadd.f32 %v12676_v25, %v12780_v11  ;;  %3572 = vmatprep.subr.bf16.mxu1 %v10538_v23  ;;  %3532 = vmatpush1.bf16.msra.mxu0 %v10533_v56  ;;  %v10539_v13 = vld [vmem:[%s18349_s25 + $0x40] ss:$16 sps:$4 sm:$0xff]   ;;  %v10544_v53 = vld [vmem:[%s18349_s25 + $0x4c] ss:$16 sps:$4 sm:$0xff]  }
 0x173   :  { %v1498_v50 = vmax.f32 %v12795_v63, %v1470_v2  ;;  %v1538_v14 = vadd.f32 %v1537_v35, %v1470_v2  ;;  %v1847_v38 = vmax.f32 %v1815_v37, %v1819_v3  ;;  %v1887_v6 = vadd.f32 %v1886_v51, %v1819_v3 }
 0x174   :  { %v3025_v48 = vrot.slane %v1190_v9, 6  ;;  %v12900_v11 = vsel %vm3061_vm2, %v12724_v39, %v3024_v24  ;;  %v1475_v16 = vmax.f32 %v12878_v52, 0.0  ;;  %v1824_v27 = vmax.f32 %v12885_v46, 0.0  ;;  %v12904_v31 = vpop.f32.mrb[72].mxu0  ;;  %v12906_v26 = vpop.f32.mrb[72].mxu1 }
 0x175   :  { %v1539_v62 = vadd.f32 %v1538_v14, %v1471_v10  ;;  %v1888_v63 = vadd.f32 %v1887_v6, %v1820_v43  ;;  %v1473_v37 = vmax.f32 %v1419_v15, 0.0  ;;  %v1720_v39 = vadd.f32 %v12676_v25, %v12782_v8  ;;  %v12914_v21 = vpop.f32.mrb[73].mxu0  ;;  %v12916_v57 = vpop.f32.mrb[73].mxu1  ;;  %3573 = vmatpush1.bf16.msra.mxu1 %v10536_v18 }
 0x176   :  { %v12923_v55 = vsel %vm3061_vm2, %v12734_v58, %v3025_v48  ;;  %v1503_v42 = vmax.f32 %v12813_v7, %v1475_v16  ;;  %v12931_v8 = vmax.f32 %v12817_v17, %v1824_v27  ;;  %v12935_v54 = vadd.f32 %v12676_v25, %v12791_v49  ;;  %v12937_v10 = vpop.f32.mrb[74].mxu0  ;;  %v12939_v43 = vpop.f32.mrb[74].mxu1  ;;  %v10541_v58 = vld [vmem:[%s18349_s25 + $0x44] ss:$16 sps:$4 sm:$0xff]   ;;  %v10542_v7 = vld [vmem:[%s18349_s25 + $0x48] ss:$16 sps:$4 sm:$0xff]   ;;  %3574 = vmatprep.subr.bf16.mxu1 %v10544_v53 }
 0x177   :  { %v1501_v35 = vmax.f32 %v12830_v34, %v1473_v37  ;;  %v1540_v17 = vadd.f32 %v1539_v62, %v1472_v33  ;;  %v1822_v47 = vmax.f32 %v1720_v39, 0.0  ;;  %v1889_v44 = vadd.f32 %v1888_v63, %v1821_v30  ;;  %v12948_v40 = vpop.f32.mrb[75].mxu0  ;;  %v12950_v49 = vpop.f32.mrb[75].mxu1  ;;  %3533 = vmatprep.subr.bf16.mxu0 %v10541_v58  ;;  %v10547_v30 = vld [vmem:[%s18349_s25 + $0x64] ss:$16 sps:$4 sm:$0xff]  }
 0x178   :  { %v1476_v41 = vmax.f32 %v12935_v54, 0.0  ;;  %v12958_v51 = vadd.f32 %v12676_v25, %v12793_v45  ;;  %v1422_v34 = vadd.f32 %v12676_v25, %v12800_v22  ;;  %v1723_v33 = vadd.f32 %v12676_v25, %v12802_v20  ;;  %v10545_v22 = vld [vmem:[%s18349_s25 + $0x60] ss:$16 sps:$4 sm:$0xff]   ;;  %v10548_v20 = vld [vmem:[%s18349_s25 + $0x68] ss:$16 sps:$4 sm:$0xff]   ;;  %3534 = vmatpush1.bf16.msra.mxu0 %v10539_v13 }
 0x179   :  { %v1541_v59 = vadd.f32 %v1540_v17, %v1473_v37  ;;  %v1850_v2 = vmax.f32 %v12832_v32, %v1822_v47  ;;  %v1890_v45 = vadd.f32 %v1889_v44, %v1822_v47  ;;  %v12973_v3 = vadd.f32 %v12676_v25, %v12823_v60  ;;  %3575 = vmatpush1.bf16.msra.mxu1 %v10542_v7  ;;  %v10551_v13 = vld [vmem:[%s18349_s25 + $0x80] ss:$16 sps:$4 sm:$0xff]   ;;  %v10554_v44 = vld [vmem:[%s18349_s25 + $0x88] ss:$16 sps:$4 sm:$0xff]  }
 0x17a   :  { %v1504_v56 = vmax.f32 %v12864_v12, %v1476_v41  ;;  %v1825_v9 = vmax.f32 %v12958_v51, 0.0  ;;  %v1474_v24 = vmax.f32 %v1422_v34, 0.0  ;;  %v1823_v32 = vmax.f32 %v1723_v33, 0.0  ;;  %3535 = vmatprep.subr.bf16.mxu0 %v10547_v30  ;;  %3576 = vmatprep.subr.bf16.mxu1 %v10550_v28  ;;  %v10557_v28 = vld [vmem:[%s18349_s25 + $0xa0] ss:$16 sps:$4 sm:$0xff]  }
 0x17b   :  { %v1479_v15 = vmax.f32 %v12973_v3, 0.0  ;;  %v12986_v60 = vadd.f32 %v12676_v25, %v12825_v61  ;;  %v1435_v18 = vadd.f32 %v12676_v25, %v12838_v19  ;;  %v1736_v23 = vadd.f32 %v12676_v25, %v12840_v29  ;;  %v10553_v61 = vld [vmem:[%s18349_s25 + $0x84] ss:$16 sps:$4 sm:$0xff]   ;;  %v10556_v19 = vld [vmem:[%s18349_s25 + $0x8c] ss:$16 sps:$4 sm:$0xff]  }
 0x17c   :  { %v1853_v12 = vmax.f32 %v12874_v0, %v1825_v9  ;;  %v1502_v14 = vmax.f32 %v1498_v50, %v1474_v24  ;;  %v1542_v6 = vadd.f32 %v1541_v59, %v1474_v24  ;;  %v1851_v48 = vmax.f32 %v1847_v38, %v1823_v32  ;;  %v12993_v62 = vpop.f32.mrb[76].mxu0  ;;  %v12995_v63 = vpop.f32.mrb[76].mxu1  ;;  %3536 = vmatpush1.bf16.msra.mxu0 %v10545_v22  ;;  %v10560_v59 = vld [vmem:[%s18349_s25 + $0xa8] ss:$16 sps:$4 sm:$0xff]  }
 0x17d   :  { %v1891_v29 = vadd.f32 %v1890_v45, %v1823_v32  ;;  %v13005_v0 = vmax.f32 %v1503_v42, %v1479_v15  ;;  %v1828_v50 = vmax.f32 %v12986_v60, 0.0  ;;  %v1477_v38 = vmax.f32 %v1435_v18, 0.0  ;;  %v13008_v37 = vpop.f32.mrb[77].mxu0  ;;  %v13010_v39 = vpop.f32.mrb[77].mxu1  ;;  %3577 = vmatpush1.bf16.msra.mxu1 %v10548_v20  ;;  %3537 = vmatprep.subr.bf16.mxu0 %v10553_v61 }
 0x17e   :  { %v1543_v54 = vadd.f32 %v1542_v6, %v1475_v16  ;;  %v1826_v58 = vmax.f32 %v1736_v23, 0.0  ;;  %v13019_v7 = vadd.f32 %v12676_v25, %v12848_v5  ;;  %v13023_v42 = vadd.f32 %v12676_v25, %v12850_v1  ;;  %v13025_v17 = vpop.f32.mrb[78].mxu0  ;;  %v13027_v47 = vpop.f32.mrb[78].mxu1  ;;  %3578 = vmatprep.subr.bf16.mxu1 %v10556_v19 }
 0x17f   :  { %v1892_v52 = vadd.f32 %v1891_v29, %v1824_v27  ;;  %v1856_v5 = vmax.f32 %v12931_v8, %v1828_v50  ;;  %v1505_v16 = vmax.f32 %v1501_v35, %v1477_v38  ;;  %v1438_v1 = vadd.f32 %v12676_v25, %v12857_v4  ;;  %v13039_v53 = vpop.f32.mrb[79].mxu0  ;;  %v13041_v51 = vpop.f32.mrb[79].mxu1  ;;  %v10559_v27 = vld [vmem:[%s18349_s25 + $0xa4] ss:$16 sps:$4 sm:$0xff]   ;;  %v10562_v4 = vld [vmem:[%s18349_s25 + $0xac] ss:$16 sps:$4 sm:$0xff]  }
 0x180   :  { %v1544_v34 = vadd.f32 %v1543_v54, %v1476_v41  ;;  %v1854_v33 = vmax.f32 %v1850_v2, %v1826_v58  ;;  %v1480_v30 = vmax.f32 %v13019_v7, 0.0  ;;  %v1829_v46 = vmax.f32 %v13023_v42, 0.0  ;;  %3538 = vmatpush1.bf16.msra.mxu0 %v10551_v13 }
 0x181   :  { %v1893_v8 = vadd.f32 %v1892_v52, %v1825_v9  ;;  %v1478_v35 = vmax.f32 %v1438_v1, 0.0  ;;  %v1739_v41 = vadd.f32 %v12676_v25, %v12859_v36  ;;  %v13061_v20 = vadd.f32 %v12676_v25, %v12904_v31  ;;  %3579 = vmatpush1.bf16.msra.mxu1 %v10554_v44  ;;  %3539 = vmatprep.subr.bf16.mxu0 %v10559_v27  ;;  %v10566_v44 = vld [vmem:[%s18349_s25 + $0xc8] ss:$16 sps:$4 sm:$0xff]   ;;  %v10568_v1 = vld [vmem:[%s18349_s25 + $0xcc] ss:$16 sps:$4 sm:$0xff]  }
 0x182   :  { %v1545_v2 = vadd.f32 %v1544_v34, %v1477_v38  ;;  %v1508_v45 = vmax.f32 %v1504_v56, %v1480_v30  ;;  %v1857_v22 = vmax.f32 %v1853_v12, %v1829_v46  ;;  %v13065_v36 = vadd.f32 %v12676_v25, %v12906_v26  ;;  %3580 = vmatprep.subr.bf16.mxu1 %v10562_v4  ;;  %v10565_v26 = vld [vmem:[%s18349_s25 + $0xc4] ss:$16 sps:$4 sm:$0xff]   ;;  %v10574_v27 = vld [vmem:[%s18349_s25 + $0xec] ss:$16 sps:$4 sm:$0xff]  }
 0x183   :  { %v1894_v9 = vadd.f32 %v1893_v8, %v1826_v58  ;;  %v1506_v24 = vmax.f32 %v1502_v14, %v1478_v35  ;;  %v1827_v32 = vmax.f32 %v1739_v41, 0.0  ;;  %v1832_v56 = vmax.f32 %v13061_v20, 0.0 }
 0x184   :  { %v1510_v18 = vmax.f32 %v13005_v0, %v1508_v45  ;;  %v1546_v23 = vadd.f32 %v1545_v2, %v1478_v35  ;;  %v1752_v12 = vadd.f32 %v12676_v25, %v12914_v21  ;;  %v13071_v31 = vpop.f32.mrb[80].mxu0  ;;  %v13073_v6 = vpop.f32.mrb[80].mxu1  ;;  %v2181_v29 = vmax.f32 %v13065_v36, 0.0  ;;  %v10563_v21 = vld [vmem:[%s18349_s25 + $0xc0] ss:$16 sps:$4 sm:$0xff]   ;;  %3540 = vmatpush1.bf16.msra.mxu0 %v10557_v28 }
 0x185   :  { %v1509_v14 = vmax.f32 %v1505_v16, %v1506_v24  ;;  %v1855_v61 = vmax.f32 %v1851_v48, %v1827_v32  ;;  %v1895_v19 = vadd.f32 %v1894_v9, %v1827_v32  ;;  %v13079_v0 = vpop.f32.mrb[81].mxu0  ;;  %v13081_v38 = vpop.f32.mrb[81].mxu1  ;;  %v1860_v54 = vmax.f32 %v1856_v5, %v1832_v56  ;;  %3581 = vmatpush1.bf16.msra.mxu1 %v10560_v59  ;;  %v13222_v36 = vld [vmem:[%s18348_s27] ss:$0 sm:$0xff] }
 0x186   :  { %v1547_v13 = vadd.f32 %v1546_v23, %v1479_v15  ;;  %v1830_v58 = vmax.f32 %v1752_v12, 0.0  ;;  %v13092_v48 = vadd.f32 %v12676_v25, %v12916_v57  ;;  %v13094_v7 = vpop.f32.mrb[82].mxu0  ;;  %v13096_v42 = vpop.f32.mrb[82].mxu1  ;;  %v13105_v15 = vadd.f32 %v12676_v25, %v12937_v10  ;;  %3541 = vmatprep.subr.bf16.mxu0 %v10565_v26  ;;  %3582 = vmatprep.subr.bf16.mxu1 %v10568_v1  ;;  %v10578_v1 = vld [vmem:[%s18349_s25 + $0x108] ss:$16 sps:$4 sm:$0xff]  }
 0x187   :  { %v1511_v52 = vmax.f32 %v1509_v14, %v1510_v18  ;;  %v1896_v3 = vadd.f32 %v1895_v19, %v1828_v50  ;;  %v13109_v57 = vadd.f32 %v12676_v25, %v12939_v43  ;;  %v13111_v5 = vpop.f32.mrb[83].mxu0  ;;  %v13113_v16 = vpop.f32.mrb[83].mxu1  ;;  %v1755_v10 = vadd.f32 %v12676_v25, %v12948_v40  ;;  %v10571_v43 = vld [vmem:[%s18349_s25 + $0xe4] ss:$16 sps:$4 sm:$0xff]   ;;  %v10569_v40 = vld [vmem:[%s18349_s25 + $0xe0] ss:$16 sps:$4 sm:$0xff]  }
 0x188   :  { %v1548_v34 = vadd.f32 %v1547_v13, %v1480_v30  ;;  %v13118_v60 = vmax.f32 %v1854_v33, %v1830_v58  ;;  %v2179_v50 = vmax.f32 %v13092_v48, 0.0  ;;  %v1833_v30 = vmax.f32 %v13105_v15, 0.0  ;;  %3542 = vmatpush1.bf16.msra.mxu0 %v10563_v21  ;;  %v10575_v13 = vld [vmem:[%s18349_s25 + $0x100] ss:$16 sps:$4 sm:$0xff]  }
 0x189   :  { %v1512_v4 = vrot.slane %v1511_v52, 4  ;;  %v1897_v8 = vadd.f32 %v1896_v3, %v1829_v46  ;;  %v2182_v33 = vmax.f32 %v13109_v57, 0.0  ;;  %v1831_v41 = vmax.f32 %v1755_v10, 0.0  ;;  %v10572_v46 = vld [vmem:[%s18349_s25 + $0xe8] ss:$16 sps:$4 sm:$0xff]   ;;  %3583 = vmatpush1.bf16.msra.mxu1 %v10566_v44  ;;  %3543 = vmatprep.subr.bf16.mxu0 %v10571_v43 }
 0x18a   :  { %v1549_v35 = vrot.slane %v1548_v34, 4  ;;  %v13136_v28 = vadd.f32 %v12676_v25, %v12950_v49  ;;  %v13140_v59 = vadd.f32 %v12676_v25, %v12993_v62  ;;  %v13145_v9 = vmax.f32 %v1857_v22, %v1833_v30  ;;  %3584 = vmatprep.subr.bf16.mxu1 %v10574_v27 }
 0x18b   :  { %v1513_v2 = vmax.f32 %v1511_v52, %v1512_v4  ;;  %v1898_v45 = vadd.f32 %v1897_v8, %v1830_v58  ;;  %v13149_v24 = vadd.f32 %v12676_v25, %v12995_v63  ;;  %v13151_v32 = vmax.f32 %v1855_v61, %v1831_v41  ;;  %v10577_v63 = vld [vmem:[%s18349_s25 + $0x104] ss:$16 sps:$4 sm:$0xff]   ;;  %v10580_v4 = vld [vmem:[%s18349_s25 + $0x10c] ss:$16 sps:$4 sm:$0xff]  }
 0x18c   :  { %v1550_v49 = vadd.f32 %v1549_v35, %v1548_v34  ;;  %v2180_v62 = vmax.f32 %v13136_v28, 0.0  ;;  %v1836_v18 = vmax.f32 %v13140_v59, 0.0  ;;  %v13155_v23 = vpop.f32.mrb[84].mxu0  ;;  %v13157_v12 = vpop.f32.mrb[84].mxu1  ;;  %v1768_v61 = vadd.f32 %v12676_v25, %v13008_v37  ;;  %3544 = vmatpush1.bf16.msra.mxu0 %v10569_v40  ;;  %v10583_v35 = vld [vmem:[%s18349_s25 + $0x124] ss:$16 sps:$4 sm:$0xff]  }
 0x18d   :  { %v1514_v22 = vrot.slane %v1513_v2, 2  ;;  %v1899_v26 = vadd.f32 %v1898_v45, %v1831_v41  ;;  %v2185_v14 = vmax.f32 %v13149_v24, 0.0  ;;  %v13165_v19 = vpop.f32.mrb[85].mxu0  ;;  %v13167_v21 = vpop.f32.mrb[85].mxu1  ;;  %v2069_v37 = vadd.f32 %v12676_v25, %v13010_v39  ;;  %3585 = vmatpush1.bf16.msra.mxu1 %v10572_v46  ;;  %3545 = vmatprep.subr.bf16.mxu0 %v10577_v63  ;;  %v10586_v41 = vld [vmem:[%s18349_s25 + $0x12c] ss:$16 sps:$4 sm:$0xff]  }
 0x18e   :  { %v1551_v58 = vrot.slane %v1550_v49, 2  ;;  %v2248_v44 = vadd.f32 %v2180_v62, %v2179_v50  ;;  %v13178_v52 = vmax.f32 %v1860_v54, %v1836_v18  ;;  %v13182_v3 = vpop.f32.mrb[86].mxu0  ;;  %v13184_v15 = vpop.f32.mrb[86].mxu1  ;;  %v1834_v39 = vmax.f32 %v1768_v61, 0.0  ;;  %3586 = vmatprep.subr.bf16.mxu1 %v10580_v4 }
 0x18f   :  { %v1515_v34 = vmax.f32 %v1513_v2, %v1514_v22  ;;  %v1900_v10 = vadd.f32 %v1899_v26, %v1832_v56  ;;  %v13195_v54 = vmax.f32 %v2181_v29, %v2185_v14  ;;  %v13197_v43 = vpop.f32.mrb[87].mxu0  ;;  %v13199_v27 = vpop.f32.mrb[87].mxu1  ;;  %v2183_v56 = vmax.f32 %v2069_v37, 0.0 }
 0x190   :  { %v1552_v8 = vadd.f32 %v1551_v58, %v1550_v49  ;;  %v2249_v20 = vadd.f32 %v2248_v44, %v2181_v29  ;;  %v13208_v40 = vadd.f32 %v12676_v25, %v13025_v17  ;;  %v13217_v2 = vmax.f32 %v13118_v60, %v1834_v39  ;;  %v10581_v17 = vld [vmem:[%s18349_s25 + $0x120] ss:$16 sps:$4 sm:$0xff]   ;;  %v10584_v29 = vld [vmem:[%s18349_s25 + $0x128] ss:$16 sps:$4 sm:$0xff]   ;;  %3546 = vmatpush1.bf16.msra.mxu0 %v10575_v13 }
 0x191   :  { %v1516_v46 = vrot.slane %v1515_v34, 1  ;;  %v1901_v45 = vadd.f32 %v1900_v10, %v1833_v30  ;;  %v13226_v25 = vadd.f32 %v13222_v36, %v13027_v47  ;;  %v13236_v30 = vmax.f32 %v2179_v50, %v2183_v56  ;;  %3587 = vmatpush1.bf16.msra.mxu1 %v10578_v1  ;;  %3547 = vmatprep.subr.bf16.mxu0 %v10583_v35  ;;  %v10590_v35 = vld [vmem:[%s18349_s25 + $0x148] ss:$16 sps:$4 sm:$0xff]  }
 0x192   :  { %v1553_v60 = vrot.slane %v1552_v8, 1  ;;  %v2250_v49 = vadd.f32 %v2249_v20, %v2182_v33  ;;  %v1837_v47 = vmax.f32 %v13208_v40, 0.0  ;;  %v1771_v61 = vadd.f32 %v13222_v36, %v13039_v53  ;;  %3588 = vmatprep.subr.bf16.mxu1 %v10586_v41  ;;  %v10592_v53 = vld [vmem:[%s18349_s25 + $0x14c] ss:$16 sps:$4 sm:$0xff]  }
 0x193   :  { %v1517_v63 = vmax.f32 %v1515_v34, %v1516_v46  ;;  %v1902_v22 = vadd.f32 %v1901_v45, %v1834_v39  ;;  %v2186_v26 = vmax.f32 %v13226_v25, 0.0  ;;  %v2072_v50 = vadd.f32 %v13222_v36, %v13041_v51  ;;  %v10589_v34 = vld [vmem:[%s18349_s25 + $0x144] ss:$16 sps:$4 sm:$0xff]  }
 0x194   :  { %v1554_v58 = vadd.f32 %v1553_v60, %v1552_v8  ;;  %v2251_v44 = vadd.f32 %v2250_v49, %v2183_v56  ;;  %v13245_v48 = vmax.f32 %v13145_v9, %v1837_v47  ;;  %v13249_v37 = vpop.f32.mrb[88].mxu1  ;;  %v13251_v13 = vpop.f32.mrb[88].mxu0  ;;  %v1835_v10 = vmax.f32 %v1771_v61, 0.0  ;;  %v10587_v8 = vld [vmem:[%s18349_s25 + $0x140] ss:$16 sps:$4 sm:$0xff]   ;;  %3548 = vmatpush1.bf16.msra.mxu0 %v10581_v17 }
 0x195   :  { %v3030_v1 = vrot.slane %v1517_v63, 5  ;;  %v13261_v9 = vmax.f32 %v2182_v33, %v2186_v26  ;;  %v13265_v51 = vadd.f32 %v13222_v36, %v13071_v31  ;;  %v13267_v39 = vpop.f32.mrb[89].mxu1  ;;  %v13269_v4 = vpop.f32.mrb[89].mxu0  ;;  %v2184_v56 = vmax.f32 %v2072_v50, 0.0  ;;  %3589 = vmatpush1.bf16.msra.mxu1 %v10584_v29  ;;  %3549 = vmatprep.subr.bf16.mxu0 %v10589_v34  ;;  %v10598_v63 = vld [vmem:[%s18349_s25 + $0x16c] ss:$16 sps:$4 sm:$0xff]  }
 0x196   :  { %v13274_v20 = vmul.f32 0.00390625, %v1554_v58  ;;  %v13278_v57 = vadd.f32 %v13222_v36, %v13073_v6  ;;  %v1784_v33 = vadd.f32 %v13222_v36, %v13079_v0  ;;  %v13282_v31 = vpop.f32.mrb[90].mxu1  ;;  %v13284_v40 = vpop.f32.mrb[90].mxu0  ;;  %v1863_v46 = vmax.f32 %v13151_v32, %v1835_v10  ;;  %3590 = vmatprep.subr.bf16.mxu1 %v10592_v53  ;;  %v10595_v32 = vld [vmem:[%s18349_s25 + $0x164] ss:$16 sps:$4 sm:$0xff]  }
 0x197   :  { %v13291_v41 = vsel %vm3064_vm3, %v12900_v11, %v3030_v1  ;;  %v1903_v6 = vadd.f32 %v1902_v22, %v1835_v10  ;;  %v1840_v45 = vmax.f32 %v13265_v51, 0.0  ;;  %v13295_v25 = vpop.f32.mrb[91].mxu1  ;;  %v13297_v0 = vpop.f32.mrb[91].mxu0  ;;  %v2212_v60 = vmax.f32 %v2180_v62, %v2184_v56  ;;  %v10593_v61 = vld [vmem:[%s18349_s25 + $0x160] ss:$16 sps:$4 sm:$0xff]  }
 0x198   :  { %v2252_v49 = vadd.f32 %v2251_v44, %v2184_v56  ;;  %v2189_v11 = vmax.f32 %v13278_v57, 0.0  ;;  %v1838_v62 = vmax.f32 %v1784_v33, 0.0  ;;  %v2085_v22 = vadd.f32 %v13222_v36, %v13081_v38  ;;  %3550 = vmatpush1.bf16.msra.mxu0 %v10587_v8  ;;  %v10599_v56 = vld [vmem:[%s18349_s25 + $0x180] ss:$16 sps:$4 sm:$0xff]  }
 0x199   :  { %v1904_v29 = vadd.f32 %v1903_v6, %v1836_v18  ;;  %v1868_v28 = vmax.f32 %v13178_v52, %v1840_v45  ;;  %v1795_v18 = vadd.f32 %v13222_v36, %v13094_v7  ;;  %v13328_v52 = vadd.f32 %v13222_v36, %v13096_v42  ;;  %3591 = vmatpush1.bf16.msra.mxu1 %v10590_v35 }
 0x19a   :  { %v2253_v58 = vadd.f32 %v2252_v49, %v2185_v14  ;;  %v2217_v59 = vmax.f32 %v13195_v54, %v2189_v11  ;;  %v13331_v38 = vmax.f32 %v13217_v2, %v1838_v62  ;;  %v2187_v50 = vmax.f32 %v2085_v22, 0.0  ;;  %3551 = vmatprep.subr.bf16.mxu0 %v10595_v32  ;;  %v10596_v14 = vld [vmem:[%s18349_s25 + $0x168] ss:$16 sps:$4 sm:$0xff]   ;;  %3592 = vmatprep.subr.bf16.mxu1 %v10598_v63 }
 0x19b   :  { %v1905_v44 = vadd.f32 %v1904_v29, %v1837_v47  ;;  %v1787_v24 = vadd.f32 %v13222_v36, %v13111_v5  ;;  %v1841_v54 = vmax.f32 %v1795_v18, 0.0  ;;  %v2190_v42 = vmax.f32 %v13328_v52, 0.0  ;;  %v10601_v5 = vld [vmem:[%s18349_s25 + $0x184] ss:$16 sps:$4 sm:$0xff]  }
 0x19c   :  { %v2254_v7 = vadd.f32 %v2253_v58, %v2186_v26  ;;  %v2088_v34 = vadd.f32 %v13222_v36, %v13113_v16  ;;  %v13341_v2 = vpop.f32.mrb[92].mxu1  ;;  %v13343_v47 = vpop.f32.mrb[92].mxu0  ;;  %v2215_v1 = vmax.f32 %v13236_v30, %v2187_v50  ;;  %v13351_v26 = vadd.f32 %v13222_v36, %v13155_v23  ;;  %3552 = vmatpush1.bf16.msra.mxu0 %v10593_v61  ;;  %v10602_v23 = vld [vmem:[%s18349_s25 + $0x188] ss:$16 sps:$4 sm:$0xff]   ;;  %v10604_v61 = vld [vmem:[%s18349_s25 + $0x18c] ss:$16 sps:$4 sm:$0xff]  }
 0x19d   :  { %v1906_v53 = vadd.f32 %v1905_v44, %v1838_v62  ;;  %v1839_v10 = vmax.f32 %v1787_v24, 0.0  ;;  %v13353_v8 = vpop.f32.mrb[93].mxu1  ;;  %v13355_v16 = vpop.f32.mrb[93].mxu0  ;;  %v1869_v35 = vmax.f32 %v13245_v48, %v1841_v54  ;;  %v2218_v6 = vmax.f32 %v13261_v9, %v2190_v42  ;;  %3593 = vmatpush1.bf16.msra.mxu1 %v10596_v14  ;;  %3553 = vmatprep.subr.bf16.mxu0 %v10601_v5  ;;  %v10607_v52 = vld [vmem:[%s18349_s25 + $0x1a4] ss:$16 sps:$4 sm:$0xff]  }
 0x19e   :  { %v2255_v33 = vadd.f32 %v2254_v7, %v2187_v50  ;;  %v2188_v49 = vmax.f32 %v2088_v34, 0.0  ;;  %v13362_v30 = vpop.f32.mrb[94].mxu1  ;;  %v13364_v32 = vpop.f32.mrb[94].mxu0  ;;  %v1844_v62 = vmax.f32 %v13351_v26, 0.0  ;;  %v13372_v22 = vadd.f32 %v13222_v36, %v13157_v12  ;;  %3594 = vmatprep.subr.bf16.mxu1 %v10604_v61 }
 0x19f   :  { %v1867_v63 = vmax.f32 %v1863_v46, %v1839_v10  ;;  %v1907_v29 = vadd.f32 %v1906_v53, %v1839_v10  ;;  %v13374_v48 = vpop.f32.mrb[95].mxu1  ;;  %v13376_v9 = vpop.f32.mrb[95].mxu0  ;;  %v1800_v18 = vadd.f32 %v13222_v36, %v13165_v19  ;;  %v2101_v12 = vadd.f32 %v13222_v36, %v13167_v21  ;;  %v10610_v19 = vld [vmem:[%s18349_s25 + $0x1ac] ss:$16 sps:$4 sm:$0xff]  }
 0x1a0   :  { %v13381_v58 = vmax.f32 %v2212_v60, %v2188_v49  ;;  %v2256_v46 = vadd.f32 %v2255_v33, %v2188_v49  ;;  %v13394_v50 = vmax.f32 %v1868_v28, %v1844_v62  ;;  %v2193_v60 = vmax.f32 %v13372_v22, 0.0  ;;  %3554 = vmatpush1.bf16.msra.mxu0 %v10599_v56 }
 0x1a1   :  { %v1908_v44 = vadd.f32 %v1907_v29, %v1840_v45  ;;  %v13399_v24 = vadd.f32 %v13222_v36, %v13182_v3  ;;  %v1842_v51 = vmax.f32 %v1800_v18, 0.0  ;;  %v2191_v45 = vmax.f32 %v2101_v12, 0.0  ;;  %v10605_v3 = vld [vmem:[%s18349_s25 + $0x1a0] ss:$16 sps:$4 sm:$0xff]   ;;  %3595 = vmatpush1.bf16.msra.mxu1 %v10602_v23  ;;  %3555 = vmatprep.subr.bf16.mxu0 %v10607_v52 }
 0x1a2   :  { %v2257_v21 = vadd.f32 %v2256_v46, %v2189_v11  ;;  %v13408_v28 = vadd.f32 %v13222_v36, %v13184_v15  ;;  %v2221_v14 = vmax.f32 %v2217_v59, %v2193_v60  ;;  %v1803_v57 = vadd.f32 %v13222_v36, %v13197_v43  ;;  %v10608_v15 = vld [vmem:[%s18349_s25 + $0x1a8] ss:$16 sps:$4 sm:$0xff]   ;;  %v10613_v11 = vld [vmem:[%s18349_s25 + $0x1c4] ss:$16 sps:$4 sm:$0xff]   ;;  %3596 = vmatprep.subr.bf16.mxu1 %v10610_v19  ;;  %v10616_v43 = vld [vmem:[%s18349_s25 + $0x1cc] ss:$16 sps:$4 sm:$0xff]  }
 0x1a3   :  { %v1909_v7 = vadd.f32 %v1908_v44, %v1841_v54  ;;  %v1845_v34 = vmax.f32 %v13399_v24, 0.0  ;;  %v1870_v5 = vmax.f32 %v13331_v38, %v1842_v51  ;;  %v2219_v53 = vmax.f32 %v2215_v1, %v2191_v45 }
 0x1a4   :  { %v2258_v59 = vadd.f32 %v2257_v21, %v2190_v42  ;;  %v2194_v54 = vmax.f32 %v13408_v28, 0.0  ;;  %v13426_v10 = vpop.f32.mrb[96].mxu1  ;;  %v13428_v56 = vpop.f32.mrb[96].mxu0  ;;  %v1843_v23 = vmax.f32 %v1803_v57, 0.0  ;;  %v2104_v29 = vadd.f32 %v13222_v36, %v13199_v27  ;;  %3556 = vmatpush1.bf16.msra.mxu0 %v10605_v3  ;;  %v10611_v27 = vld [vmem:[%s18349_s25 + $0x1c0] ss:$16 sps:$4 sm:$0xff]  }
 0x1a5   :  { %v1910_v33 = vadd.f32 %v1909_v7, %v1842_v51  ;;  %v1873_v49 = vmax.f32 %v1869_v35, %v1845_v34  ;;  %v13435_v38 = vpop.f32.mrb[97].mxu1  ;;  %v13437_v42 = vpop.f32.mrb[97].mxu0  ;;  %v13441_v46 = vadd.f32 %v13222_v36, %v13249_v37  ;;  %v13445_v18 = vadd.f32 %v13222_v36, %v13251_v13  ;;  %3597 = vmatpush1.bf16.msra.mxu1 %v10608_v15  ;;  %v10614_v13 = vld [vmem:[%s18349_s25 + $0x1c8] ss:$16 sps:$4 sm:$0xff]   ;;  %v10622_v28 = vld [vmem:[%s18349_s25 + $0x1ec] ss:$16 sps:$4 sm:$0xff]  }
 0x1a6   :  { %v2259_v1 = vadd.f32 %v2258_v59, %v2191_v45  ;;  %v2222_v61 = vmax.f32 %v2218_v6, %v2194_v54  ;;  %v13447_v12 = vpop.f32.mrb[98].mxu1  ;;  %v13449_v35 = vpop.f32.mrb[98].mxu0  ;;  %v1871_v6 = vmax.f32 %v1867_v63, %v1843_v23  ;;  %v2192_v24 = vmax.f32 %v2104_v29, 0.0  ;;  %3557 = vmatprep.subr.bf16.mxu0 %v10613_v11  ;;  %3598 = vmatprep.subr.bf16.mxu1 %v10616_v43  ;;  %v10619_v45 = vld [vmem:[%s18349_s25 + $0x1e4] ss:$16 sps:$4 sm:$0xff]  }
 0x1a7   :  { %v1875_v52 = vmax.f32 %v13394_v50, %v1873_v49  ;;  %v1911_v44 = vadd.f32 %v1910_v33, %v1843_v23  ;;  %v13455_v37 = vpop.f32.mrb[99].mxu1  ;;  %v13457_v19 = vpop.f32.mrb[99].mxu0  ;;  %v2197_v21 = vmax.f32 %v13441_v46, 0.0  ;;  %v2546_v51 = vmax.f32 %v13445_v18, 0.0 }
 0x1a8   :  { %v2117_v50 = vadd.f32 %v13222_v36, %v13267_v39  ;;  %v13468_v63 = vadd.f32 %v13222_v36, %v13269_v4  ;;  %v1874_v3 = vmax.f32 %v1870_v5, %v1871_v6  ;;  %v2220_v57 = vmax.f32 %v13381_v58, %v2192_v24  ;;  %3558 = vmatpush1.bf16.msra.mxu0 %v10611_v27  ;;  %v10617_v5 = vld [vmem:[%s18349_s25 + $0x1e0] ss:$16 sps:$4 sm:$0xff]  }
 0x1a9   :  { %v1912_v7 = vadd.f32 %v1911_v44, %v1844_v62  ;;  %v2260_v39 = vadd.f32 %v2259_v1, %v2192_v24  ;;  %v2225_v4 = vmax.f32 %v2221_v14, %v2197_v21  ;;  %v13484_v59 = vadd.f32 %v13222_v36, %v13282_v31  ;;  %3599 = vmatpush1.bf16.msra.mxu1 %v10614_v13  ;;  %v10620_v31 = vld [vmem:[%s18349_s25 + $0x1e8] ss:$16 sps:$4 sm:$0xff]  }
 0x1aa   :  { %v2195_v15 = vmax.f32 %v2117_v50, 0.0  ;;  %v2544_v11 = vmax.f32 %v13468_v63, 0.0  ;;  %v1876_v26 = vmax.f32 %v1874_v3, %v1875_v52  ;;  %v13493_v14 = vadd.f32 %v13222_v36, %v13284_v40  ;;  %3559 = vmatprep.subr.bf16.mxu0 %v10619_v45  ;;  %3600 = vmatprep.subr.bf16.mxu1 %v10622_v28 }
 0x1ab   :  { %v1913_v62 = vadd.f32 %v1912_v7, %v1845_v34  ;;  %v2261_v58 = vadd.f32 %v2260_v39, %v2193_v60  ;;  %v2198_v33 = vmax.f32 %v13484_v59, 0.0  ;;  %v2120_v49 = vadd.f32 %v13222_v36, %v13295_v25 }
 0x1ac   :  { %v2223_v43 = vmax.f32 %v2219_v53, %v2195_v15  ;;  %v13503_v34 = vadd.f32 %v13222_v36, %v13297_v0  ;;  %v13505_v22 = vpop.f32.mrb[100].mxu1  ;;  %v13507_v60 = vpop.f32.mrb[100].mxu0  ;;  %v1877_v40 = vrot.slane %v1876_v26, 4  ;;  %v2547_v53 = vmax.f32 %v13493_v14, 0.0  ;;  %3560 = vmatpush1.bf16.msra.mxu0 %v10617_v5 }
 0x1ad   :  { %v1914_v23 = vrot.slane %v1913_v62, 4  ;;  %v2262_v29 = vadd.f32 %v2261_v58, %v2194_v54  ;;  %v13510_v1 = vpop.f32.mrb[101].mxu1  ;;  %v13512_v27 = vpop.f32.mrb[101].mxu0  ;;  %v2226_v25 = vmax.f32 %v2222_v61, %v2198_v33  ;;  %v2196_v52 = vmax.f32 %v2120_v49, 0.0  ;;  %3601 = vmatpush1.bf16.msra.mxu1 %v10620_v31 }
 0x1ae   :  { %v2545_v0 = vmax.f32 %v13503_v34, 0.0  ;;  %v13517_v6 = vadd.f32 %v13222_v36, %v13341_v2  ;;  %v13519_v44 = vpop.f32.mrb[102].mxu1  ;;  %v13521_v24 = vpop.f32.mrb[102].mxu0  ;;  %v1878_v54 = vmax.f32 %v1876_v26, %v1877_v40  ;;  %v13525_v45 = vadd.f32 %v13222_v36, %v13343_v47  ;;  %v10623_v47 = vld [vmem:[%s18350_s11 + $0x40] sm:$0xff]  }
 0x1af   :  { %v1915_v13 = vadd.f32 %v1914_v23, %v1913_v62  ;;  %v2263_v50 = vadd.f32 %v2262_v29, %v2195_v15  ;;  %v13527_v61 = vpop.f32.mrb[103].mxu1  ;;  %v13529_v28 = vpop.f32.mrb[103].mxu0  ;;  %v2224_v3 = vmax.f32 %v2220_v57, %v2196_v52  ;;  %v2133_v39 = vadd.f32 %v13222_v36, %v13353_v8  ;;  %v10624_v57 = vld [vmem:[%s18350_s11 + $0xc0] sm:$0xff]   ;;  %9814 = vmatprep.subr.bf16.mxu0 %v10623_v47 }
 0x1b0   :  { %v2613_v2 = vadd.f32 %v2545_v0, %v2544_v11  ;;  %v2201_v7 = vmax.f32 %v13517_v6, 0.0  ;;  %v1879_v15 = vrot.slane %v1878_v54, 2  ;;  %v2550_v26 = vmax.f32 %v13525_v45, 0.0  ;;  %9836 = vmatprep.subr.bf16.mxu1 %v10624_v57 }
 0x1b1   :  { %v1916_v59 = vrot.slane %v1915_v13, 2  ;;  %v2264_v5 = vadd.f32 %v2263_v50, %v2196_v52  ;;  %v2199_v31 = vmax.f32 %v2133_v39, 0.0  ;;  %v2434_v8 = vadd.f32 %v13222_v36, %v13355_v16 }
 0x1b2   :  { %v2614_v62 = vadd.f32 %v2613_v2, %v2546_v51  ;;  %v2229_v58 = vmax.f32 %v2225_v4, %v2201_v7  ;;  %v1880_v49 = vmax.f32 %v1878_v54, %v1879_v15  ;;  %v2578_v29 = vmax.f32 %v2546_v51, %v2550_v26 }
 0x1b3   :  { %v1917_v40 = vadd.f32 %v1916_v59, %v1915_v13  ;;  %v2265_v23 = vadd.f32 %v2264_v5, %v2197_v21  ;;  %v2227_v52 = vmax.f32 %v2223_v43, %v2199_v31  ;;  %v2548_v6 = vmax.f32 %v2434_v8, 0.0 }
 0x1b4   :  { %v2615_v4 = vadd.f32 %v2614_v62, %v2547_v53  ;;  %v2144_v16 = vadd.f32 %v13222_v36, %v13362_v30  ;;  %v13559_v50 = vpop.f32.mrb[104].mxu0  ;;  %v13561_v54 = vpop.f32.mrb[104].mxu1  ;;  %v1881_v46 = vrot.slane %v1880_v49, 1  ;;  %v2445_v18 = vadd.f32 %v13222_v36, %v13364_v32 }
 0x1b5   :  { %v1918_v21 = vrot.slane %v1917_v40, 1  ;;  %v2266_v13 = vadd.f32 %v2265_v23, %v2198_v33  ;;  %v13565_v51 = vpop.f32.mrb[105].mxu0  ;;  %v13567_v43 = vpop.f32.mrb[105].mxu1  ;;  %v2576_v2 = vmax.f32 %v2544_v11, %v2548_v6  ;;  %v2136_v30 = vadd.f32 %v13222_v36, %v13374_v48 }
 0x1b6   :  { %v2616_v39 = vadd.f32 %v2615_v4, %v2548_v6  ;;  %v2202_v47 = vmax.f32 %v2144_v16, 0.0  ;;  %v13573_v15 = vpop.f32.mrb[106].mxu0  ;;  %v13575_v59 = vpop.f32.mrb[106].mxu1  ;;  %v13577_v33 = vmax.f32 %v1880_v49, %v1881_v46  ;;  %v2551_v57 = vmax.f32 %v2445_v18, 0.0 }
 0x1b7   :  { %v1919_v5 = vadd.f32 %v1918_v21, %v1917_v40  ;;  %v2267_v32 = vadd.f32 %v2266_v13, %v2199_v31  ;;  %v13579_v62 = vpop.f32.mrb[107].mxu0  ;;  %v13581_v8 = vpop.f32.mrb[107].mxu1  ;;  %v2200_v11 = vmax.f32 %v2136_v30, 0.0  ;;  %v2437_v23 = vadd.f32 %v13222_v36, %v13376_v9 }
 0x1b8   :  { %v2230_v63 = vmax.f32 %v2226_v25, %v2202_v47  ;;  %v2157_v48 = vadd.f32 %v13222_v36, %v13426_v10  ;;  %v2579_v31 = vmax.f32 %v2547_v53, %v2551_v57  ;;  %v2458_v40 = vadd.f32 %v13222_v36, %v13428_v56 }
 0x1b9   :  { %v13587_v6 = vmul.f32 0.00390625, %v1919_v5  ;;  %v2228_v4 = vmax.f32 %v2224_v3, %v2200_v11  ;;  %v2268_v16 = vadd.f32 %v2267_v32, %v2200_v11  ;;  %v2549_v25 = vmax.f32 %v2437_v23, 0.0 }
 0x1ba   :  { %v2205_v46 = vmax.f32 %v2157_v48, 0.0  ;;  %v2554_v9 = vmax.f32 %v2458_v40, 0.0  ;;  %v2149_v10 = vadd.f32 %v13222_v36, %v13435_v38  ;;  %v2450_v13 = vadd.f32 %v13222_v36, %v13437_v42 }
 0x1bb   :  { %v2269_v18 = vadd.f32 %v2268_v16, %v2201_v7  ;;  %v2577_v14 = vmax.f32 %v2545_v0, %v2549_v25  ;;  %v2617_v53 = vadd.f32 %v2616_v39, %v2549_v25  ;;  %v2160_v23 = vadd.f32 %v13222_v36, %v13447_v12 }
 0x1bc   :  { %v2233_v30 = vmax.f32 %v2229_v58, %v2205_v46  ;;  %v13601_v56 = vpop.f32.mrb[108].mxu0  ;;  %v13603_v3 = vpop.f32.mrb[108].mxu1  ;;  %v2582_v5 = vmax.f32 %v2578_v29, %v2554_v9  ;;  %v2203_v32 = vmax.f32 %v2149_v10, 0.0  ;;  %v2552_v11 = vmax.f32 %v2450_v13, 0.0 }
 0x1bd   :  { %v13607_v38 = vpop.f32.mrb[109].mxu0  ;;  %v13609_v48 = vpop.f32.mrb[109].mxu1  ;;  %v2618_v42 = vadd.f32 %v2617_v53, %v2550_v26  ;;  %v2270_v34 = vadd.f32 %v2269_v18, %v2202_v47  ;;  %v2461_v0 = vadd.f32 %v13222_v36, %v13449_v35  ;;  %v2152_v7 = vadd.f32 %v13222_v36, %v13455_v37 }
 0x1be   :  { %v13617_v58 = vpop.f32.mrb[110].mxu0  ;;  %v13619_v29 = vpop.f32.mrb[110].mxu1  ;;  %v2231_v39 = vmax.f32 %v2227_v52, %v2203_v32  ;;  %v2580_v12 = vmax.f32 %v2576_v2, %v2552_v11  ;;  %v2206_v40 = vmax.f32 %v2160_v23, 0.0  ;;  %v2453_v16 = vadd.f32 %v13222_v36, %v13457_v19 }
 0x1bf   :  { %v13623_v25 = vpop.f32.mrb[111].mxu0  ;;  %v13625_v45 = vpop.f32.mrb[111].mxu1  ;;  %v2271_v26 = vadd.f32 %v2270_v34, %v2203_v32  ;;  %v2619_v47 = vadd.f32 %v2618_v42, %v2551_v57  ;;  %v2555_v35 = vmax.f32 %v2461_v0, 0.0  ;;  %v2204_v10 = vmax.f32 %v2152_v7, 0.0 }
 0x1c0   :  { %v2234_v13 = vmax.f32 %v2230_v63, %v2206_v40  ;;  %v2553_v37 = vmax.f32 %v2453_v16, 0.0  ;;  %v2173_v18 = vadd.f32 %v13222_v36, %v13505_v22  ;;  %v2474_v52 = vadd.f32 %v13222_v36, %v13507_v60 }
 0x1c1   :  { %v2620_v2 = vadd.f32 %v2619_v47, %v2552_v11  ;;  %v2583_v53 = vmax.f32 %v2579_v31, %v2555_v35  ;;  %v2232_v23 = vmax.f32 %v2228_v4, %v2204_v10  ;;  %v2272_v19 = vadd.f32 %v2271_v26, %v2204_v10 }
 0x1c2   :  { %v2581_v21 = vmax.f32 %v2577_v14, %v2553_v37  ;;  %v2209_v49 = vmax.f32 %v2173_v18, 0.0  ;;  %v2558_v17 = vmax.f32 %v2474_v52, 0.0  ;;  %v2165_v57 = vadd.f32 %v13222_v36, %v13510_v1 }
 0x1c3   :  { %v2273_v32 = vadd.f32 %v2272_v19, %v2205_v46  ;;  %v2621_v42 = vadd.f32 %v2620_v2, %v2553_v37  ;;  %v2466_v63 = vadd.f32 %v13222_v36, %v13512_v27  ;;  %v2176_v22 = vadd.f32 %v13222_v36, %v13519_v44 }
 0x1c4   :  { %v13637_v34 = vpop.f32.mrb[112].mxu0  ;;  %v13639_v60 = vpop.f32.mrb[112].mxu1  ;;  %v2237_v31 = vmax.f32 %v2233_v30, %v2209_v49  ;;  %v2586_v4 = vmax.f32 %v2582_v5, %v2558_v17  ;;  %v2207_v14 = vmax.f32 %v2165_v57, 0.0  ;;  %v2477_v11 = vadd.f32 %v13222_v36, %v13521_v24 }
 0x1c5   :  { %v13643_v0 = vpop.f32.mrb[113].mxu0  ;;  %v13645_v1 = vpop.f32.mrb[113].mxu1  ;;  %v2622_v46 = vadd.f32 %v2621_v42, %v2554_v9  ;;  %v2274_v7 = vadd.f32 %v2273_v32, %v2206_v40  ;;  %v2556_v27 = vmax.f32 %v2466_v63, 0.0  ;;  %v2210_v16 = vmax.f32 %v2176_v22, 0.0 }
 0x1c6   :  { %v13647_v26 = vpop.f32.mrb[114].mxu0  ;;  %v13649_v44 = vpop.f32.mrb[114].mxu1  ;;  %v2235_v47 = vmax.f32 %v2231_v39, %v2207_v14  ;;  %v2559_v10 = vmax.f32 %v2477_v11, 0.0  ;;  %v2168_v30 = vadd.f32 %v13222_v36, %v13527_v61  ;;  %v2469_v24 = vadd.f32 %v13222_v36, %v13529_v28 }
 0x1c7   :  { %v13655_v5 = vpop.f32.mrb[115].mxu0  ;;  %v13657_v37 = vpop.f32.mrb[115].mxu1  ;;  %v2275_v9 = vadd.f32 %v2274_v7, %v2207_v14  ;;  %v2584_v40 = vmax.f32 %v2580_v12, %v2556_v27  ;;  %v2623_v18 = vadd.f32 %v2622_v46, %v2555_v35  ;;  %v2238_v52 = vmax.f32 %v2234_v13, %v2210_v16 }
 0x1c8   :  { %v2587_v2 = vmax.f32 %v2583_v53, %v2559_v10  ;;  %v2208_v19 = vmax.f32 %v2168_v30, 0.0  ;;  %v2557_v57 = vmax.f32 %v2469_v24, 0.0  ;;  %v2490_v39 = vadd.f32 %v13222_v36, %v13559_v50 }
 0x1c9   :  { %v2624_v32 = vadd.f32 %v2623_v18, %v2556_v27  ;;  %v2240_v42 = vmax.f32 %v2237_v31, %v2238_v52  ;;  %v2791_v61 = vadd.f32 %v13222_v36, %v13561_v54  ;;  %v2482_v28 = vadd.f32 %v13222_v36, %v13565_v51 }
 0x1ca   :  { %v2236_v63 = vmax.f32 %v2232_v23, %v2208_v19  ;;  %v2276_v22 = vadd.f32 %v2275_v9, %v2208_v19  ;;  %v2585_v14 = vmax.f32 %v2581_v21, %v2557_v57  ;;  %v2562_v12 = vmax.f32 %v2490_v39, 0.0 }
 0x1cb   :  { %v2625_v35 = vadd.f32 %v2624_v32, %v2557_v57  ;;  %v2911_v13 = vmax.f32 %v2791_v61, 0.0  ;;  %v2560_v53 = vmax.f32 %v2482_v28, 0.0  ;;  %v13667_v11 = vadd.f32 %v13222_v36, %v13567_v43 }
 0x1cc   :  { %v13669_v50 = vpop.f32.mrb[116].mxu0  ;;  %v13671_v31 = vpop.f32.mrb[116].mxu1  ;;  %v2239_v46 = vmax.f32 %v2235_v47, %v2236_v63  ;;  %v2277_v54 = vadd.f32 %v2276_v22, %v2209_v49  ;;  %v2590_v7 = vmax.f32 %v2586_v4, %v2562_v12  ;;  %v2493_v51 = vadd.f32 %v13222_v36, %v13573_v15 }
 0x1cd   :  { %v13675_v23 = vpop.f32.mrb[117].mxu0  ;;  %v13677_v21 = vpop.f32.mrb[117].mxu1  ;;  %v2626_v27 = vadd.f32 %v2625_v35, %v2558_v17  ;;  %v2588_v30 = vmax.f32 %v2584_v40, %v2560_v53  ;;  %v2909_v24 = vmax.f32 %v13667_v11, 0.0  ;;  %v2794_v43 = vadd.f32 %v13222_v36, %v13575_v59 }
 0x1ce   :  { %v13682_v9 = vpop.f32.mrb[118].mxu0  ;;  %v13684_v18 = vpop.f32.mrb[118].mxu1  ;;  %v2241_v49 = vmax.f32 %v2239_v46, %v2240_v42  ;;  %v2278_v4 = vadd.f32 %v2277_v54, %v2210_v16  ;;  %v2563_v47 = vmax.f32 %v2493_v51, 0.0  ;;  %v2485_v15 = vadd.f32 %v13222_v36, %v13579_v62 }
 0x1cf   :  { %v13688_v52 = vpop.f32.mrb[119].mxu0  ;;  %v13690_v19 = vpop.f32.mrb[119].mxu1  ;;  %v2627_v17 = vadd.f32 %v2626_v27, %v2559_v10  ;;  %v2912_v40 = vmax.f32 %v2794_v43, 0.0  ;;  %v13694_v57 = vadd.f32 %v13222_v36, %v13581_v8  ;;  %v13698_v59 = vadd.f32 %v13222_v36, %v13601_v56 }
 0x1d0   :  { %v2242_v39 = vrot.slane %v2241_v49, 4  ;;  %v2279_v16 = vrot.slane %v2278_v4, 4  ;;  %v2591_v32 = vmax.f32 %v2587_v2, %v2563_v47  ;;  %v2561_v42 = vmax.f32 %v2485_v15, 0.0 }
 0x1d1   :  { %v2628_v61 = vadd.f32 %v2627_v17, %v2560_v53  ;;  %v2910_v62 = vmax.f32 %v13694_v57, 0.0  ;;  %v2566_v28 = vmax.f32 %v13698_v59, 0.0  ;;  %v13704_v10 = vadd.f32 %v13222_v36, %v13603_v3 }
 0x1d2   :  { %v2243_v63 = vmax.f32 %v2241_v49, %v2242_v39  ;;  %v2280_v8 = vadd.f32 %v2279_v16, %v2278_v4  ;;  %v2589_v22 = vmax.f32 %v2585_v14, %v2561_v42  ;;  %v2498_v56 = vadd.f32 %v13222_v36, %v13607_v38 }
 0x1d3   :  { %v2629_v35 = vadd.f32 %v2628_v61, %v2561_v42  ;;  %v2978_v2 = vadd.f32 %v2910_v62, %v2909_v24  ;;  %v2594_v11 = vmax.f32 %v2590_v7, %v2566_v28  ;;  %v2915_v53 = vmax.f32 %v13704_v10, 0.0 }
 0x1d4   :  { %v13711_v46 = vpop.f32.mrb[120].mxu1  ;;  %v2244_v54 = vrot.slane %v2243_v63, 2  ;;  %v2281_v51 = vrot.slane %v2280_v8, 2  ;;  %v2564_v27 = vmax.f32 %v2498_v56, 0.0  ;;  %v2799_v3 = vadd.f32 %v13222_v36, %v13609_v48 }
 0x1d5   :  { %v13715_v43 = vpop.f32.mrb[121].mxu1  ;;  %v2630_v14 = vadd.f32 %v2629_v35, %v2562_v12  ;;  %v2979_v49 = vadd.f32 %v2978_v2, %v2911_v13  ;;  %v2943_v38 = vmax.f32 %v2911_v13, %v2915_v53  ;;  %v2509_v4 = vadd.f32 %v13222_v36, %v13617_v58 }
 0x1d6   :  { %v13719_v15 = vpop.f32.mrb[122].mxu1  ;;  %v2245_v7 = vmax.f32 %v2243_v63, %v2244_v54  ;;  %v2282_v17 = vadd.f32 %v2281_v51, %v2280_v8  ;;  %v2592_v59 = vmax.f32 %v2588_v30, %v2564_v27  ;;  %v2913_v39 = vmax.f32 %v2799_v3, 0.0 }
 0x1d7   :  { %v13721_v16 = vpop.f32.mrb[123].mxu1  ;;  %v2631_v42 = vadd.f32 %v2630_v14, %v2563_v47  ;;  %v2980_v61 = vadd.f32 %v2979_v49, %v2912_v40  ;;  %v2567_v10 = vmax.f32 %v2509_v4, 0.0  ;;  %v2810_v48 = vadd.f32 %v13222_v36, %v13619_v29 }
 0x1d8   :  { %v2246_v12 = vrot.slane %v2245_v7, 1  ;;  %v2283_v56 = vrot.slane %v2282_v17, 1  ;;  %v2941_v13 = vmax.f32 %v2909_v24, %v2913_v39  ;;  %v2501_v58 = vadd.f32 %v13222_v36, %v13623_v25 }
 0x1d9   :  { %v2632_v35 = vadd.f32 %v2631_v42, %v2564_v27  ;;  %v2981_v2 = vadd.f32 %v2980_v61, %v2913_v39  ;;  %v2595_v63 = vmax.f32 %v2591_v32, %v2567_v10  ;;  %v2916_v8 = vmax.f32 %v2810_v48, 0.0 }
 0x1da   :  { %v13727_v30 = vmax.f32 %v2245_v7, %v2246_v12  ;;  %v2284_v54 = vadd.f32 %v2283_v56, %v2282_v17  ;;  %v2565_v51 = vmax.f32 %v2501_v58, 0.0  ;;  %v2802_v47 = vadd.f32 %v13222_v36, %v13625_v45 }
 0x1db   :  { %v2944_v3 = vmax.f32 %v2912_v40, %v2916_v8  ;;  %v2522_v29 = vadd.f32 %v13222_v36, %v13637_v34  ;;  %v13735_v24 = vadd.f32 %v13222_v36, %v13639_v60  ;;  %v2514_v25 = vadd.f32 %v13222_v36, %v13643_v0  ;;  %v13753_v0 = vld [vmem:[%s18348_s27] ss:$0 sm:$0xff] }
 0x1dc   :  { %v13739_v32 = vpop.f32.mrb[124].mxu1  ;;  %v13741_v27 = vmul.f32 0.00390625, %v2284_v54  ;;  %v3042_v14 = vrot.slane %v13727_v30, 3  ;;  %v2593_v49 = vmax.f32 %v2589_v22, %v2565_v51  ;;  %v2633_v4 = vadd.f32 %v2632_v35, %v2565_v51 }
 0x1dd   :  { %v13744_v45 = vpop.f32.mrb[125].mxu1  ;;  %v2914_v40 = vmax.f32 %v2802_v47, 0.0  ;;  %v2570_v7 = vmax.f32 %v2522_v29, 0.0  ;;  %v2919_v34 = vmax.f32 %v13735_v24, 0.0  ;;  %v2568_v17 = vmax.f32 %v2514_v25, 0.0 }
 0x1de   :  { %v13747_v60 = vpop.f32.mrb[126].mxu1  ;;  %v3043_v39 = vrot.slane %v13741_v27, 3  ;;  %v2634_v36 = vadd.f32 %v2633_v4, %v2566_v28  ;;  %v2815_v22 = vadd.f32 %v13753_v0, %v13645_v1  ;;  %v2525_v42 = vadd.f32 %v13753_v0, %v13647_v26 }
 0x1df   :  { %v13759_v61 = vpop.f32.mrb[127].mxu1  ;;  %v2942_v48 = vmax.f32 %v2910_v62, %v2914_v40  ;;  %v2982_v12 = vadd.f32 %v2981_v2, %v2914_v40  ;;  %v2598_v56 = vmax.f32 %v2594_v11, %v2570_v7  ;;  %v2947_v58 = vmax.f32 %v2943_v38, %v2919_v34 }
 0x1e0   :  { %v2596_v28 = vmax.f32 %v2592_v59, %v2568_v17  ;;  %v2635_v35 = vadd.f32 %v2634_v36, %v2567_v10  ;;  %v2917_v54 = vmax.f32 %v2815_v22, 0.0  ;;  %v2571_v51 = vmax.f32 %v2525_v42, 0.0 }
 0x1e1   :  { %v2983_v47 = vadd.f32 %v2982_v12, %v2915_v53  ;;  %v2826_v29 = vadd.f32 %v13753_v0, %v13649_v44  ;;  %v2517_v1 = vadd.f32 %v13753_v0, %v13655_v5  ;;  %v2818_v26 = vadd.f32 %v13753_v0, %v13657_v37 }
 0x1e2   :  { %v2636_v24 = vadd.f32 %v2635_v35, %v2568_v17  ;;  %v2945_v57 = vmax.f32 %v2941_v13, %v2917_v54  ;;  %v2599_v62 = vmax.f32 %v2595_v63, %v2571_v51  ;;  %v2538_v11 = vadd.f32 %v13753_v0, %v13669_v50 }
 0x1e3   :  { %v2984_v38 = vadd.f32 %v2983_v47, %v2916_v8  ;;  %v2920_v59 = vmax.f32 %v2826_v29, 0.0  ;;  %v2569_v10 = vmax.f32 %v2517_v1, 0.0  ;;  %v2918_v2 = vmax.f32 %v2818_v26, 0.0 }
 0x1e4   :  { %v13771_v53 = vpop.f32.mrb[128].mxu1  ;;  %v2574_v25 = vmax.f32 %v2538_v11, 0.0  ;;  %v2839_v44 = vadd.f32 %v13753_v0, %v13671_v31  ;;  %v2530_v5 = vadd.f32 %v13753_v0, %v13675_v23  ;;  %v2831_v37 = vadd.f32 %v13753_v0, %v13677_v21 }
 0x1e5   :  { %v13779_v13 = vpop.f32.mrb[129].mxu1  ;;  %v2985_v63 = vadd.f32 %v2984_v38, %v2917_v54  ;;  %v2948_v50 = vmax.f32 %v2944_v3, %v2920_v59  ;;  %v2597_v8 = vmax.f32 %v2593_v49, %v2569_v10  ;;  %v2637_v4 = vadd.f32 %v2636_v24, %v2569_v10 }
 0x1e6   :  { %v13781_v40 = vpop.f32.mrb[130].mxu1  ;;  %v2946_v17 = vmax.f32 %v2942_v48, %v2918_v2  ;;  %v2602_v36 = vmax.f32 %v2598_v56, %v2574_v25  ;;  %v2923_v22 = vmax.f32 %v2839_v44, 0.0  ;;  %v2572_v42 = vmax.f32 %v2530_v5, 0.0 }
 0x1e7   :  { %v13783_v12 = vpop.f32.mrb[131].mxu1  ;;  %v2638_v31 = vadd.f32 %v2637_v4, %v2570_v7  ;;  %v2986_v35 = vadd.f32 %v2985_v63, %v2918_v2  ;;  %v2921_v23 = vmax.f32 %v2831_v37, 0.0  ;;  %v2541_v21 = vadd.f32 %v13753_v0, %v13682_v9 }
 0x1e8   :  { %v2951_v47 = vmax.f32 %v2947_v58, %v2923_v22  ;;  %v2600_v29 = vmax.f32 %v2596_v28, %v2572_v42  ;;  %v2842_v3 = vadd.f32 %v13753_v0, %v13684_v18  ;;  %v2533_v49 = vadd.f32 %v13753_v0, %v13688_v52 }
 0x1e9   :  { %v2987_v48 = vadd.f32 %v2986_v35, %v2919_v34  ;;  %v2639_v56 = vadd.f32 %v2638_v31, %v2571_v51  ;;  %v2949_v54 = vmax.f32 %v2945_v57, %v2921_v23  ;;  %v2575_v1 = vmax.f32 %v2541_v21, 0.0 }
 0x1ea   :  { %v2924_v26 = vmax.f32 %v2842_v3, 0.0  ;;  %v2573_v24 = vmax.f32 %v2533_v49, 0.0  ;;  %v2834_v7 = vadd.f32 %v13753_v0, %v13690_v19  ;;  %v13795_v9 = vadd.f32 %v13753_v0, %v13711_v46 }
 0x1eb   :  { %v2640_v58 = vadd.f32 %v2639_v56, %v2572_v42  ;;  %v2988_v28 = vadd.f32 %v2987_v48, %v2920_v59  ;;  %v2603_v11 = vmax.f32 %v2599_v62, %v2575_v1  ;;  %v2847_v18 = vadd.f32 %v13753_v0, %v13715_v43 }
 0x1ec   :  { %v13799_v52 = vpop.f32.mrb[132].mxu1  ;;  %v2952_v34 = vmax.f32 %v2948_v50, %v2924_v26  ;;  %v2601_v51 = vmax.f32 %v2597_v8, %v2573_v24  ;;  %v2922_v57 = vmax.f32 %v2834_v7, 0.0  ;;  %v2927_v38 = vmax.f32 %v13795_v9, 0.0 }
 0x1ed   :  { %v2894_v10 = vpop.f32.mrb[133].mxu1  ;;  %v2989_v2 = vadd.f32 %v2988_v28, %v2921_v23  ;;  %v2605_v19 = vmax.f32 %v2602_v36, %v2603_v11  ;;  %v2641_v44 = vadd.f32 %v2640_v58, %v2573_v24  ;;  %v2925_v5 = vmax.f32 %v2847_v18, 0.0 }
 0x1ee   :  { %v10317_v46 = vpop.f32.mrb[134].mxu1  ;;  %v2604_v37 = vmax.f32 %v2600_v29, %v2601_v51  ;;  %v2950_v63 = vmax.f32 %v2946_v17, %v2922_v57  ;;  %v2955_v59 = vmax.f32 %v2951_v47, %v2927_v38  ;;  %v2858_v62 = vadd.f32 %v13753_v0, %v13719_v15 }
 0x1ef   :  { %v2897_v43 = vpop.f32.mrb[135].mxu1  ;;  %v2642_v4 = vadd.f32 %v2641_v44, %v2574_v25  ;;  %v2990_v42 = vadd.f32 %v2989_v2, %v2922_v57  ;;  %v2953_v50 = vmax.f32 %v2949_v54, %v2925_v5  ;;  %v2850_v8 = vadd.f32 %v13753_v0, %v13721_v16 }
 0x1f0   :  { %v2606_v31 = vmax.f32 %v2604_v37, %v2605_v19  ;;  %v2928_v35 = vmax.f32 %v2858_v62, 0.0  ;;  %v13808_v36 = vadd.f32 %v13753_v0, %v13739_v32  ;;  %v2863_v17 = vadd.f32 %v13753_v0, %v13744_v45 }
 0x1f1   :  { %v2643_v23 = vadd.f32 %v2642_v4, %v2575_v1  ;;  %v2991_v21 = vadd.f32 %v2990_v42, %v2923_v22  ;;  %v2926_v47 = vmax.f32 %v2850_v8, 0.0  ;;  %v13814_v15 = vadd.f32 %v13753_v0, %v13747_v60 }
 0x1f2   :  { %v2607_v25 = vrot.slane %v2606_v31, 4  ;;  %v2956_v29 = vmax.f32 %v2952_v34, %v2928_v35  ;;  %v2931_v16 = vmax.f32 %v13808_v36, 0.0  ;;  %v2929_v3 = vmax.f32 %v2863_v17, 0.0 }
 0x1f3   :  { %v2644_v49 = vrot.slane %v2643_v23, 4  ;;  %v2992_v48 = vadd.f32 %v2991_v21, %v2924_v26  ;;  %v2954_v56 = vmax.f32 %v2950_v63, %v2926_v47  ;;  %v2932_v32 = vmax.f32 %v13814_v15, 0.0 }
 0x1f4   :  { %v2608_v54 = vmax.f32 %v2606_v31, %v2607_v25  ;;  %v2959_v24 = vmax.f32 %v2955_v59, %v2931_v16  ;;  %v2957_v45 = vmax.f32 %v2953_v50, %v2929_v3  ;;  %v2866_v22 = vadd.f32 %v13753_v0, %v13759_v61 }
 0x1f5   :  { %v2645_v1 = vadd.f32 %v2644_v49, %v2643_v23  ;;  %v2993_v7 = vadd.f32 %v2992_v48, %v2925_v5  ;;  %v2960_v60 = vmax.f32 %v2956_v29, %v2932_v32  ;;  %v2887_v9 = vadd.f32 %v13753_v0, %v13771_v53 }
 0x1f6   :  { %v2609_v58 = vrot.slane %v2608_v54, 2  ;;  %v2930_v28 = vmax.f32 %v2866_v22, 0.0  ;;  %v2879_v26 = vadd.f32 %v13753_v0, %v13779_v13  ;;  %v2890_v11 = vadd.f32 %v13753_v0, %v13781_v40 }
 0x1f7   :  { %v2646_v18 = vrot.slane %v2645_v1, 2  ;;  %v2994_v34 = vadd.f32 %v2993_v7, %v2926_v47  ;;  %v2935_v51 = vmax.f32 %v2887_v9, 0.0  ;;  %v2882_v61 = vadd.f32 %v13753_v0, %v13783_v12 }
 0x1f8   :  { %v2610_v57 = vmax.f32 %v2608_v54, %v2609_v58  ;;  %v2958_v2 = vmax.f32 %v2954_v56, %v2930_v28  ;;  %v2933_v19 = vmax.f32 %v2879_v26, 0.0  ;;  %v2936_v44 = vmax.f32 %v2890_v11, 0.0 }
 0x1f9   :  { %v2647_v5 = vadd.f32 %v2646_v18, %v2645_v1  ;;  %v2995_v53 = vadd.f32 %v2994_v34, %v2927_v38  ;;  %v2963_v37 = vmax.f32 %v2959_v24, %v2935_v51  ;;  %v2934_v63 = vmax.f32 %v2882_v61, 0.0 }
 0x1fa   :  { %v2611_v59 = vrot.slane %v2610_v57, 1  ;;  %v2961_v62 = vmax.f32 %v2957_v45, %v2933_v19  ;;  %v2964_v13 = vmax.f32 %v2960_v60, %v2936_v44  ;;  %v2903_v40 = vadd.f32 %v13753_v0, %v13799_v52 }
 0x1fb   :  { %v2648_v4 = vrot.slane %v2647_v5, 1  ;;  %v2996_v42 = vadd.f32 %v2995_v53, %v2928_v35  ;;  %v2962_v50 = vmax.f32 %v2958_v2, %v2934_v63  ;;  %v2895_v8 = vadd.f32 %v13753_v0, %v2894_v10 }
 0x1fc   :  { %v2612_v12 = vmax.f32 %v2610_v57, %v2611_v59  ;;  %v2939_v31 = vmax.f32 %v2903_v40, 0.0  ;;  %v2906_v36 = vadd.f32 %v13753_v0, %v10317_v46  ;;  %v2898_v17 = vadd.f32 %v13753_v0, %v2897_v43 }
 0x1fd   :  { %v2649_v38 = vadd.f32 %v2648_v4, %v2647_v5  ;;  %v2997_v23 = vadd.f32 %v2996_v42, %v2929_v3  ;;  %v2937_v21 = vmax.f32 %v2895_v8, 0.0  ;;  %v18351_v47 = vrot.slane %v13274_v20, 5 }
 0x1fe   :  { %v3048_v52 = vrot.slane %v2612_v12, 2  ;;  %v2967_v25 = vmax.f32 %v2963_v37, %v2939_v31  ;;  %v2940_v35 = vmax.f32 %v2906_v36, 0.0  ;;  %v2938_v29 = vmax.f32 %v2898_v17, 0.0 }
 0x1ff   :  { %v3066_v15 = vsel %vm3064_vm3, %v12923_v55, %v18351_v47  ;;  %v2650_v49 = vmul.f32 0.00390625, %v2649_v38  ;;  %v2998_v10 = vadd.f32 %v2997_v23, %v2930_v28  ;;  %v2965_v48 = vmax.f32 %v2961_v62, %v2937_v21 }
 0x200   :  { %v2968_v56 = vmax.f32 %v2964_v13, %v2940_v35  ;;  %v2966_v46 = vmax.f32 %v2962_v50, %v2938_v29  ;;  %v18352_v0 = vrot.slane %v13577_v33, 4  ;;  %v18353_v3 = vrot.slane %v13587_v6, 4 }
 0x201   :  { %v3049_v54 = vrot.slane %v2650_v49, 2  ;;  %v2999_v24 = vadd.f32 %v2998_v10, %v2931_v16  ;;  %v3081_v30 = vlaneseq  ;;  %v10625_v49 = vld [vmem:[%s18350_s11] sm:$0xff]  }
 0x202   :  { %v3068_v43 = vsel %vm3067_vm4, %v13291_v41, %v18352_v0  ;;  %v3069_v20 = vsel %vm3067_vm4, %v3066_v15, %v18353_v3  ;;  %v2970_v55 = vmax.f32 %v2967_v25, %v2968_v56  ;;  %v2969_v45 = vmax.f32 %v2965_v48, %v2966_v46  ;;  %v10626_v10 = vld [vmem:[%s18350_s11 + $0x80] sm:$0xff]   ;;  %v10627_v56 = vld [vmem:[%s18350_s11 + $0x48] sm:$0xff]   ;;  %v10631_v3 = vld [vmem:[%s18350_s11 + $0x50] sm:$0xff]  }
 0x203   :  { %v3071_v22 = vsel %vm3070_vm5, %v3068_v43, %v3042_v14  ;;  %v3072_v1 = vsel %vm3070_vm5, %v3069_v20, %v3043_v39  ;;  %v3000_v7 = vadd.f32 %v2999_v24, %v2932_v32  ;;  %v13846_v32 = vshrl.u32 %v3081_v30, 7  ;;  %v10628_v46 = vld [vmem:[%s18350_s11 + $0xc8] sm:$0xff]   ;;  %v10632_v20 = vld [vmem:[%s18350_s11 + $0xd0] sm:$0xff]   ;;  %v10654_v30 = vld [vmem:[%s18350_s11 + $0xb8] sm:$0xff]  }
 0x204   :  { %v3074_v60 = vsel %vm3073_vm6, %v3071_v22, %v3048_v52  ;;  %v3075_v33 = vsel %vm3073_vm6, %v3072_v1, %v3049_v54  ;;  %v2971_v9 = vmax.f32 %v2969_v45, %v2970_v55  ;;  %v10629_v0 = vld [vmem:[%s18350_s11 + $0x8] sm:$0xff]   ;;  %v10633_v54 = vld [vmem:[%s18350_s11 + $0x10] sm:$0xff]   ;;  %v10635_v55 = vld [vmem:[%s18350_s11 + $0x58] sm:$0xff]  }
 0x205   :  { %v3001_v41 = vadd.f32 %v3000_v7, %v2933_v19  ;;  %v13860_v13 = vsub.s32 1, %v13846_v32  ;;  %v13863_v40 = vsub.s32 3, %v13846_v32  ;;  %v10630_v43 = vld [vmem:[%s18350_s11 + $0x88] sm:$0xff]   ;;  %v10634_v24 = vld [vmem:[%s18350_s11 + $0x90] sm:$0xff]   ;;  %v10636_v45 = vld [vmem:[%s18350_s11 + $0xd8] sm:$0xff]  }
 0x206   :  { %v2972_v58 = vrot.slane %v2971_v9, 4  ;;  %v10637_v22 = vld [vmem:[%s18350_s11 + $0x18] sm:$0xff]   ;;  %v10639_v7 = vld [vmem:[%s18350_s11 + $0x60] sm:$0xff]  }
 0x207   :  { %v3002_v6 = vadd.f32 %v3001_v41, %v2934_v63  ;;  %v13856_v63 = vsub.s32 2, %v13846_v32  ;;  %18357 = vst [vmem:[#allocation5_spill] sm:$0xff] %v13860_v13  ;;  %18358 = vst [vmem:[#allocation6_spill] sm:$0xff] %v13863_v40  ;;  %v10638_v1 = vld [vmem:[%s18350_s11 + $0x98] sm:$0xff]   ;;  %v10643_v41 = vld [vmem:[%s18350_s11 + $0x68] sm:$0xff]  }
 0x208   :  { %v2973_v28 = vmax.f32 %v2971_v9, %v2972_v58  ;;  %v10642_v9 = vld [vmem:[%s18350_s11 + $0xa0] sm:$0xff]   ;;  %v10644_v58 = vld [vmem:[%s18350_s11 + $0xe8] sm:$0xff]  }
 0x209   :  { %v3003_v26 = vadd.f32 %v3002_v6, %v2935_v51  ;;  %v13850_v51 = vsub.s32 0, %v13846_v32  ;;  %18356 = vst [vmem:[#allocation4_spill] sm:$0xff] %v13856_v63  ;;  %v10645_v6 = vld [vmem:[%s18350_s11 + $0x28] sm:$0xff]  }
 0x20a   :  { %v2974_v16 = vrot.slane %v2973_v28, 2 }
 0x20b   :  { %v3004_v11 = vadd.f32 %v3003_v26, %v2936_v44  ;;  %18354 = vst [vmem:[#allocation3_spill] sm:$0xff] %v13850_v51  ;;  %v3079_v44 = vld [vmem:[%s18355_s30] sm:$0xf]  ;;  %v10647_v26 = vld [vmem:[%s18350_s11 + $0x70] sm:$0xff]  }
 0x20c   :  { %v2975_v18 = vmax.f32 %v2973_v28, %v2974_v16  ;;  %v3084_v62 = vrot.slane %v3079_v44, %v13850_v51  ;;  %v3088_v42 = vrot.slane %v3079_v44, %v13856_v63  ;;  %v3104_v12 = vrot.slane %v3079_v44, %v13860_v13  ;;  %v10646_v28 = vld [vmem:[%s18350_s11 + $0xa8] sm:$0xff]   ;;  %v10648_v16 = vld [vmem:[%s18350_s11 + $0xf0] sm:$0xff]  }
 0x20d   :  { %v3005_v34 = vadd.f32 %v3004_v11, %v2937_v21  ;;  %v10649_v11 = vld [vmem:[%s18350_s11 + $0x30] sm:$0xff]  }
 0x20e   :  { %v2976_v61 = vrot.slane %v2975_v18, 1  ;;  %v3094_v8 = vrot.slane %v3084_v62, %v13850_v51  ;;  %v3098_v17 = vrot.slane %v3088_v42, %v13850_v51  ;;  %v3114_v21 = vrot.slane %v3104_v12, %v13860_v13 }
 0x20f   :  { %v3006_v57 = vadd.f32 %v3005_v34, %v2938_v29  ;;  %v10651_v34 = vld [vmem:[%s18350_s11 + $0x78] sm:$0xff]  }
 0x210   :  { %v2977_v14 = vmax.f32 %v2975_v18, %v2976_v61  ;;  %v10650_v18 = vld [vmem:[%s18350_s11 + $0xb0] sm:$0xff]   ;;  %v10652_v61 = vld [vmem:[%s18350_s11 + $0xf8] sm:$0xff]  }
 0x211   :  { %v3007_v2 = vadd.f32 %v3006_v57, %v2939_v31  ;;  %v3108_v31 = vrot.slane %v3079_v44, %v13863_v40  ;;  %v10653_v57 = vld [vmem:[%s18350_s11 + $0x38] sm:$0xff]   ;;  %v13991_v44 = vsub.s32 7, %v13846_v32 }
 0x212   :  { %v3054_v27 = vrot.slane %v2977_v14, 1  ;;  %v13966_v14 = vld [vmem:[%s18359_s24 + $0x4] ss:$16 sps:$4 sm:$0xff]  }
 0x213   :  { %v3008_v39 = vadd.f32 %v3007_v2, %v2940_v35  ;;  %v3118_v47 = vrot.slane %v3108_v31, %v13860_v13  ;;  %v13971_v2 = vld [vmem:[%s18359_s24 + $0xc] ss:$16 sps:$4 sm:$0xff]   ;;  %18363 = vst [vmem:[#allocation10_spill] sm:$0xff] %v13991_v44 }
 0x214   :  { %v3077_v19 = vsel %vm3076_vm7, %v3074_v60, %v3054_v27  ;;  %v10640_v60 = vld [vmem:[%s18350_s11 + $0xe0] sm:$0xff]   ;;  %v13976_v27 = vsub.s32 4, %v13846_v32 }
 0x215   :  { %v3009_v5 = vrot.slane %v3008_v39, 4  ;;  %v3099_v23 = vmul.f32 %v3094_v8, %v3077_v19  ;;  %v3615_v19 = vld [vmem:[%s17883_s8] sm:$0xff] }
 0x216   :  { %18360 = vst [vmem:[#allocation7_spill] sm:$0xff] %v13976_v27  ;;  %v3660_v31 = vrot.slane %v3615_v19, %v13860_v13 }
 0x217   :  { %v3010_v53 = vadd.f32 %v3009_v5, %v3008_v39  ;;  %v3119_v25 = vadd.f32 %v3114_v21, %v3099_v23  ;;  %v3185_v39 = vld [vmem:[%s17882_s7] sm:$0xf]  ;;  %v13985_v5 = vsub.s32 6, %v13846_v32  ;;  %v3672_v23 = vrot.slane %v3615_v19, %v13991_v44  ;;  %v14609_v44 = vld [vmem:[%s17884_s12 + $0x1cc] ss:$16 sps:$4 sm:$0xff]  }
 0x218   :  { %v3200_v62 = vrot.slane %v3185_v39, %v13856_v63  ;;  %v3196_v42 = vrot.slane %v3185_v39, %v13860_v13  ;;  %v3204_v8 = vrot.slane %v3185_v39, %v13863_v40  ;;  %18392 = vst [vmem:[#allocation39_spill] sm:$0xff] %v14609_v44 }
 0x219   :  { %v3011_v37 = vrot.slane %v3010_v53, 2  ;;  %v3186_v48 = vpack.c.bf16 %v3119_v25, %v3119_v25  ;;  %18361 = vst [vmem:[#allocation8_spill] sm:$0xff] %v13985_v5  ;;  %v3632_v12 = vrot.slane %v3615_v19, %v13985_v5  ;;  %v14616_v5 = vld [vmem:[%s17884_s12 + $0x1c0] ss:$16 sps:$4 sm:$0xff]  }
 0x21a   :  { %18393 = vst [vmem:[#allocation40_spill] sm:$0xff] %v14616_v5 }
 0x21b   :  { %v3012_v59 = vadd.f32 %v3011_v37, %v3010_v53  ;;  %v13988_v53 = vsub.s32 5, %v13846_v32  ;;  %v3192_v37 = vrot.slane %v3185_v39, %v13850_v51  ;;  %v14036_v39 = vld [vmem:[%s18359_s24 + $0x20] ss:$16 sps:$4 sm:$0xff]  }
 0x21d   :  { %v3013_v4 = vrot.slane %v3012_v59, 1  ;;  %18362 = vst [vmem:[#allocation9_spill] sm:$0xff] %v13988_v53  ;;  %v3668_v32 = vrot.slane %v3615_v19, %v13988_v53  ;;  %v14604_v53 = vld [vmem:[%s17884_s12 + $0x1c4] ss:$16 sps:$4 sm:$0xff]  }
 0x21e   :  { %18391 = vst [vmem:[#allocation38_spill] sm:$0xff] %v14604_v53 }
 0x21f   :  { %v3014_v50 = vadd.f32 %v3013_v4, %v3012_v59  ;;  %v3620_v59 = vrot.slane %v3615_v19, %v13850_v51  ;;  %v3628_v4 = vrot.slane %v3615_v19, %v13976_v27  ;;  %v14621_v27 = vld [vmem:[%s17884_s12 + $0x1c8] ss:$16 sps:$4 sm:$0xff]  }
 0x220   :  { %18394 = vst [vmem:[#allocation41_spill] sm:$0xff] %v14621_v27 }
 0x221   :  { %v3015_v36 = vmul.f32 0.00390625, %v3014_v50  ;;  %v3624_v50 = vrot.slane %v3615_v19, %v13856_v63  ;;  %v14628_v63 = vld [vmem:[%s17884_s12 + $0x1e4] ss:$16 sps:$4 sm:$0xff]  }
 0x222   :  { %18395 = vst [vmem:[#allocation42_spill] sm:$0xff] %v14628_v63 }
 0x223   :  { %v3055_v38 = vrot.slane %v3015_v36, 1 }
 0x225   :  { %v3078_v15 = vsel %vm3076_vm7, %v3075_v33, %v3055_v38  ;;  %v10641_v33 = vld [vmem:[%s18350_s11 + $0x20] sm:$0xff]   ;;  %v3664_v38 = vrot.slane %v3615_v19, %v13863_v40  ;;  %v14043_v19 = vld [vmem:[%s18359_s24 + $0x28] ss:$16 sps:$4 sm:$0xff]   ;;  %v14633_v40 = vld [vmem:[%s17884_s12 + $0x1ec] ss:$16 sps:$4 sm:$0xff]  }
 0x226   :  { %v3100_v52 = vmul.f32 %v3098_v17, %v3078_v15  ;;  %18396 = vst [vmem:[#allocation43_spill] sm:$0xff] %v14633_v40 }
 0x228   :  { %v3120_v35 = vadd.f32 %v3118_v47, %v3100_v52  ;;  %v3640_v47 = vrot.slane %v3620_v59, %v13850_v51  ;;  %v3648_v52 = vrot.slane %v3628_v4, %v13850_v51  ;;  %v14055_v59 = vld [vmem:[%s18359_s24 + $0x4c] ss:$16 sps:$4 sm:$0xff]   ;;  %v14064_v4 = vld [vmem:[%s18359_s24 + $0x40] ss:$16 sps:$4 sm:$0xff]  }
 0x22a   :  { %v3187_v29 = vpack.c.bf16 %v3120_v35, %v3120_v35 }
 0x22c   :  { %3561 = vmatprep.mubr.bf16.mxu0 %v3187_v29  ;;  %3602 = vmatprep.mubr.bf16.mxu1 %v3187_v29 }
 0x22d   :  { %3562 = vmatmul.mubr.bf16.vlgmr.msra.gmra.mrb[120].mxu0 %v3186_v48  ;;  %3603 = vmatmul.mubr.bf16.vlgmr.msra.gmra.mrb[136].mxu1 %v3186_v48  ;;  %v3652_v48 = vrot.slane %v3632_v12, %v13850_v51  ;;  %v14086_v12 = vld [vmem:[%s18359_s24 + $0x60] ss:$16 sps:$4 sm:$0xff]  }
 0x22e   :  { %9815 = vmatpush3.bf16.msra.mxu0 %v10625_v49  ;;  %9837 = vmatpush3.bf16.msra.mxu1 %v10626_v10  ;;  %v3644_v49 = vrot.slane %v3624_v50, %v13850_v51  ;;  %v14076_v50 = vld [vmem:[%s18359_s24 + $0x64] ss:$16 sps:$4 sm:$0xff]   ;;  %v14645_v51 = vld [vmem:[%s17884_s12 + $0x1e8] ss:$16 sps:$4 sm:$0xff]  }
 0x22f   :  { %9816 = vmatprep.subr.bf16.mxu0 %v10627_v56  ;;  %9838 = vmatprep.subr.bf16.mxu1 %v10628_v46  ;;  %18398 = vst [vmem:[#allocation45_spill] sm:$0xff] %v14645_v51 }
 0x232   :  { %9817 = vmatpush3.bf16.msra.mxu0 %v10629_v0  ;;  %9839 = vmatpush3.bf16.msra.mxu1 %v10630_v43  ;;  %v3680_v43 = vrot.slane %v3660_v31, %v13860_v13  ;;  %v14093_v31 = vld [vmem:[%s18359_s24 + $0x68] ss:$16 sps:$4 sm:$0xff]  }
 0x233   :  { %9818 = vmatprep.subr.bf16.mxu0 %v10631_v3  ;;  %9840 = vmatprep.subr.bf16.mxu1 %v10632_v20  ;;  %v3688_v20 = vrot.slane %v3668_v32, %v13860_v13  ;;  %v4061_v32 = vld [vmem:[%s17885_s1] sm:$0xff] }
 0x236   :  { %9819 = vmatpush3.bf16.msra.mxu0 %v10633_v54  ;;  %9841 = vmatpush3.bf16.msra.mxu1 %v10634_v24 }
 0x237   :  { %9820 = vmatprep.subr.bf16.mxu0 %v10635_v55  ;;  %9842 = vmatprep.subr.bf16.mxu1 %v10636_v45 }
 0x23a   :  { %9821 = vmatpush3.bf16.msra.mxu0 %v10637_v22  ;;  %9843 = vmatpush3.bf16.msra.mxu1 %v10638_v1  ;;  %v3684_v22 = vrot.slane %v3664_v38, %v13860_v13  ;;  %v3692_v1 = vrot.slane %v3672_v23, %v13860_v13  ;;  %v9392_v23 = vld [vmem:[%s17885_s1 + $0x10] sm:$0xff] }
 0x23b   :  { %9822 = vmatprep.subr.bf16.mxu0 %v10639_v7  ;;  %9844 = vmatprep.subr.bf16.mxu1 %v10640_v60  ;;  %v14640_v13 = vld [vmem:[%s17884_s12 + $0x1e0] ss:$16 sps:$4 sm:$0xff]  }
 0x23c   :  { %18397 = vst [vmem:[#allocation44_spill] sm:$0xff] %v14640_v13 }
 0x23e   :  { %9823 = vmatpush3.bf16.msra.mxu0 %v10641_v33  ;;  %9845 = vmatpush3.bf16.msra.mxu1 %v10642_v9 }
 0x23f   :  { %9824 = vmatprep.subr.bf16.mxu0 %v10643_v41  ;;  %9846 = vmatprep.subr.bf16.mxu1 %v10644_v58 }
 0x242   :  { %9825 = vmatpush3.bf16.msra.mxu0 %v10645_v6  ;;  %9847 = vmatpush3.bf16.msra.mxu1 %v10646_v28 }
 0x243   :  { %9826 = vmatprep.subr.bf16.mxu0 %v10647_v26  ;;  %9848 = vmatprep.subr.bf16.mxu1 %v10648_v16 }
 0x246   :  { %9827 = vmatpush3.bf16.msra.mxu0 %v10649_v11  ;;  %9849 = vmatpush3.bf16.msra.mxu1 %v10650_v18  ;;  %v14016_v11 = vld [vmem:[%s18359_s24] ss:$16 sps:$4 sm:$0xff]   ;;  %v14021_v18 = vld [vmem:[%s18359_s24 + $0x8] ss:$16 sps:$4 sm:$0xff]  }
 0x247   :  { %9828 = vmatprep.subr.bf16.mxu0 %v10651_v34  ;;  %9850 = vmatprep.subr.bf16.mxu1 %v10652_v61  ;;  %v14026_v34 = vld [vmem:[%s18359_s24 + $0x24] ss:$16 sps:$4 sm:$0xff]  }
 0x24a   :  { %9829 = vmatpush3.bf16.msra.mxu0 %v10653_v57  ;;  %9851 = vmatpush3.bf16.msra.mxu1 %v10654_v30  ;;  %v14031_v30 = vld [vmem:[%s18359_s24 + $0x2c] ss:$16 sps:$4 sm:$0xff]  }
 0x24b   :  { %4168 = vmatprep.subr.bf16.mxu0 %v13966_v14  ;;  %4209 = vmatprep.subr.bf16.mxu1 %v13971_v2 }
 0x300   :  { %v3563_v36 = vpop.f32.mrb[120].mxu0  ;;  %v3604_v17 = vpop.f32.mrb[136].mxu1 }
 0x301   :  { %v3564_v21 = vadd.f32 %v3563_v36, %v3192_v37  ;;  %v3605_v15 = vadd.f32 %v3604_v17, %v3200_v62  ;;  %v3565_v25 = vpop.f32.mrb[121].mxu0  ;;  %v3606_v35 = vpop.f32.mrb[137].mxu1  ;;  %v14048_v37 = vld [vmem:[%s18359_s24 + $0x44] ss:$16 sps:$4 sm:$0xff]   ;;  %v17904_v62 = vmov 0   ;;  %v4062_v36 = vpack.c.bf16 %v4061_v32, %v4061_v32  ;;  %v9389_v17 = vld [vmem:[%s17885_s1 + $0x8] sm:$0xff] }
 0x302   :  { %v3566_v29 = vadd.f32 %v3565_v25, %v3196_v42  ;;  %v3607_v10 = vadd.f32 %v3606_v35, %v3204_v8  ;;  %v3567_v56 = vpop.f32.mrb[122].mxu0  ;;  %v3608_v46 = vpop.f32.mrb[138].mxu1  ;;  %v14069_v42 = vld [vmem:[%s18359_s24 + $0x48] ss:$16 sps:$4 sm:$0xff]   ;;  %v14081_v8 = vld [vmem:[%s18359_s24 + $0x6c] ss:$16 sps:$4 sm:$0xff]   ;;  %v4256_v38 = vpack.c.bf16 %v9389_v17, %v9389_v17 }
 0x303   :  { %v3611_v0 = vmax.f32 %v3564_v21, 0.0  ;;  %v3613_v3 = vmax.f32 %v3605_v15, 0.0  ;;  %v3568_v54 = vpop.f32.mrb[123].mxu0  ;;  %v3609_v24 = vpop.f32.mrb[139].mxu1  ;;  %v4349_v21 = vpack.c.bf16 %v9392_v23, %v9392_v23  ;;  %v9401_v35 = vld [vmem:[%s17885_s1 + $0x28] sm:$0xff] }
 0x304   :  { %v3612_v55 = vmax.f32 %v3566_v29, 0.0  ;;  %v3614_v45 = vmax.f32 %v3607_v10, 0.0  ;;  %v4628_v29 = vpack.c.bf16 %v9401_v35, %v9401_v35  ;;  %v14276_v46 = vld [vmem:[%s17884_s12] ss:$16 sps:$4 sm:$0xff]   ;;  %v14307_v54 = vld [vmem:[%s17884_s12 + $0x28] ss:$16 sps:$4 sm:$0xff]  }
 0x305   :  { %v3653_v7 = vmul.f32 %v3640_v47, %v3611_v0  ;;  %v3655_v60 = vmul.f32 %v3648_v52, %v3613_v3  ;;  %v9395_v47 = vld [vmem:[%s17885_s1 + $0x18] sm:$0xff]  ;;  %v9398_v52 = vld [vmem:[%s17885_s1 + $0x20] sm:$0xff] }
 0x306   :  { %v3654_v33 = vmul.f32 %v3644_v49, %v3612_v55  ;;  %v3656_v9 = vmul.f32 %v3652_v48, %v3614_v45  ;;  %v4442_v15 = vpack.c.bf16 %v9395_v47, %v9395_v47  ;;  %v4535_v25 = vpack.c.bf16 %v9398_v52, %v9398_v52  ;;  %v9404_v49 = vld [vmem:[%s17885_s1 + $0x30] sm:$0xff]  ;;  %v14269_v48 = vld [vmem:[%s17884_s12 + $0xc] ss:$16 sps:$4 sm:$0xff]   ;;  %v14281_v0 = vld [vmem:[%s17884_s12 + $0x8] ss:$16 sps:$4 sm:$0xff]  }
 0x307   :  { %v3693_v41 = vadd.f32 %v3680_v43, %v3653_v7  ;;  %v3695_v58 = vadd.f32 %v3688_v20, %v3655_v60  ;;  %v4721_v10 = vpack.c.bf16 %v9404_v49, %v9404_v49  ;;  %v14288_v43 = vld [vmem:[%s17884_s12 + $0x24] ss:$16 sps:$4 sm:$0xff]   ;;  %v14293_v3 = vld [vmem:[%s17884_s12 + $0x2c] ss:$16 sps:$4 sm:$0xff]   ;;  %v14302_v20 = vld [vmem:[%s17884_s12 + $0x20] ss:$16 sps:$4 sm:$0xff]  }
 0x308   :  { %v3694_v6 = vadd.f32 %v3684_v22, %v3654_v33  ;;  %v3696_v28 = vadd.f32 %v3692_v1, %v3656_v9  ;;  %v14314_v24 = vld [vmem:[%s17884_s12 + $0x44] ss:$16 sps:$4 sm:$0xff]   ;;  %v14319_v55 = vld [vmem:[%s17884_s12 + $0x4c] ss:$16 sps:$4 sm:$0xff]   ;;  %v14328_v45 = vld [vmem:[%s17884_s12 + $0x40] ss:$16 sps:$4 sm:$0xff]  }
 0x309   :  { %v3762_v61 = vpack.c.bf16 %v3693_v41, %v3693_v41  ;;  %v3764_v57 = vpack.c.bf16 %v3695_v58, %v3695_v58  ;;  %v14333_v22 = vld [vmem:[%s17884_s12 + $0x48] ss:$16 sps:$4 sm:$0xff]   ;;  %v14340_v1 = vld [vmem:[%s17884_s12 + $0x64] ss:$16 sps:$4 sm:$0xff]   ;;  %v14345_v7 = vld [vmem:[%s17884_s12 + $0x6c] ss:$16 sps:$4 sm:$0xff]  }
 0x30a   :  { %v3763_v26 = vpack.c.bf16 %v3694_v6, %v3694_v6  ;;  %v3765_v16 = vpack.c.bf16 %v3696_v28, %v3696_v28  ;;  %v14352_v60 = vld [vmem:[%s17884_s12 + $0x60] ss:$16 sps:$4 sm:$0xff]   ;;  %v14357_v33 = vld [vmem:[%s17884_s12 + $0x68] ss:$16 sps:$4 sm:$0xff]   ;;  %v14364_v9 = vld [vmem:[%s17884_s12 + $0x84] ss:$16 sps:$4 sm:$0xff]  }
 0x30b   :  { %v14369_v41 = vld [vmem:[%s17884_s12 + $0x8c] ss:$16 sps:$4 sm:$0xff]   ;;  %v14376_v58 = vld [vmem:[%s17884_s12 + $0x80] ss:$16 sps:$4 sm:$0xff]   ;;  %v14381_v6 = vld [vmem:[%s17884_s12 + $0x88] ss:$16 sps:$4 sm:$0xff]  }
 0x30c   :  { %3996 = vmatprep.mubr.bf16.mxu0 %v3763_v26  ;;  %4036 = vmatprep.mubr.bf16.mxu1 %v3765_v16  ;;  %v14388_v28 = vld [vmem:[%s17884_s12 + $0xa4] ss:$16 sps:$4 sm:$0xff]   ;;  %v14393_v26 = vld [vmem:[%s17884_s12 + $0xac] ss:$16 sps:$4 sm:$0xff]   ;;  %v14400_v16 = vld [vmem:[%s17884_s12 + $0xa0] ss:$16 sps:$4 sm:$0xff]  }
 0x30d   :  { %3997 = vmatmul.mubr.bf16.vlgmr.msra.gmra.mrb[124].mxu0 %v3762_v61  ;;  %4037 = vmatmul.mubr.bf16.vlgmr.msra.gmra.mrb[140].mxu1 %v3764_v57  ;;  %v14424_v61 = vld [vmem:[%s17884_s12 + $0xc0] ss:$16 sps:$4 sm:$0xff]   ;;  %v14429_v57 = vld [vmem:[%s17884_s12 + $0xc8] ss:$16 sps:$4 sm:$0xff]   ;;  %v14513_v17 = vld [vmem:[%s17884_s12 + $0x14c] ss:$16 sps:$4 sm:$0xff]  }
 0x30e   :  { %4169 = vmatpush1.bf16.msra.mxu0 %v14016_v11  ;;  %4210 = vmatpush1.bf16.msra.mxu1 %v14021_v18  ;;  %v14501_v32 = vld [vmem:[%s17884_s12 + $0x128] ss:$16 sps:$4 sm:$0xff]   ;;  %18376 = vst [vmem:[#allocation23_spill] sm:$0xff] %v14513_v17  ;;  %v14537_v47 = vld [vmem:[%s17884_s12 + $0x16c] ss:$16 sps:$4 sm:$0xff]  }
 0x30f   :  { %4170 = vmatprep.subr.bf16.mxu0 %v14026_v34  ;;  %4211 = vmatprep.subr.bf16.mxu1 %v14031_v30  ;;  %18374 = vst [vmem:[#allocation21_spill] sm:$0xff] %v14501_v32  ;;  %v14525_v23 = vld [vmem:[%s17884_s12 + $0x148] ss:$16 sps:$4 sm:$0xff]   ;;  %18380 = vst [vmem:[#allocation27_spill] sm:$0xff] %v14537_v47  ;;  %v14561_v35 = vld [vmem:[%s17884_s12 + $0x18c] ss:$16 sps:$4 sm:$0xff]  }
 0x310   :  { %4200 = vmatprep.mubr.bf16.mxu0 %v17904_v62  ;;  %4241 = vmatprep.mubr.bf16.mxu1 %v17904_v62  ;;  %18378 = vst [vmem:[#allocation25_spill] sm:$0xff] %v14525_v23  ;;  %v14549_v52 = vld [vmem:[%s17884_s12 + $0x168] ss:$16 sps:$4 sm:$0xff]   ;;  %18384 = vst [vmem:[#allocation31_spill] sm:$0xff] %v14561_v35 }
 0x311   :  { %18382 = vst [vmem:[#allocation29_spill] sm:$0xff] %v14549_v52  ;;  %v14573_v49 = vld [vmem:[%s17884_s12 + $0x188] ss:$16 sps:$4 sm:$0xff]  }
 0x312   :  { %4171 = vmatpush1.bf16.msra.mxu0 %v14036_v39  ;;  %4212 = vmatpush1.bf16.msra.mxu1 %v14043_v19  ;;  %18386 = vst [vmem:[#allocation33_spill] sm:$0xff] %v14573_v49 }
 0x313   :  { %4172 = vmatprep.subr.bf16.mxu0 %v14048_v37  ;;  %4213 = vmatprep.subr.bf16.mxu1 %v14055_v59 }
 0x316   :  { %4173 = vmatpush1.bf16.msra.mxu0 %v14064_v4  ;;  %4214 = vmatpush1.bf16.msra.mxu1 %v14069_v42 }
 0x317   :  { %4174 = vmatprep.subr.bf16.mxu0 %v14076_v50  ;;  %4215 = vmatprep.subr.bf16.mxu1 %v14081_v8 }
 0x31a   :  { %4175 = vmatpush1.bf16.msra.mxu0 %v14086_v12  ;;  %4216 = vmatpush1.bf16.msra.mxu1 %v14093_v31 }
 0x31b   :  { %4260 = vmatprep.subr.bf16.mxu0 %v13966_v14  ;;  %4301 = vmatprep.subr.bf16.mxu1 %v13971_v2 }
 0x31d   :  { %9387 = vmatmul.mubr.msk.bf16.vlgmr.msra.gmra.mrb[128].mxu0 %vm4164_vm8, %v4062_v36  ;;  %9388 = vmatmul.mubr.msk.bf16.vlgmr.msra.gmra.mrb[144].mxu1 %vm4164_vm8, %v4062_v36  ;;  %v14508_v36 = vld [vmem:[%s17884_s12 + $0x144] ss:$16 sps:$4 sm:$0xff]  }
 0x31e   :  { %4261 = vmatpush1.bf16.msra.mxu0 %v14016_v11  ;;  %4302 = vmatpush1.bf16.msra.mxu1 %v14021_v18  ;;  %18375 = vst [vmem:[#allocation22_spill] sm:$0xff] %v14508_v36 }
 0x31f   :  { %4262 = vmatprep.subr.bf16.mxu0 %v14026_v34  ;;  %4303 = vmatprep.subr.bf16.mxu1 %v14031_v30 }
 0x320   :  { %4292 = vmatprep.mubr.bf16.mxu0 %v17904_v62  ;;  %4333 = vmatprep.mubr.bf16.mxu1 %v17904_v62 }
 0x322   :  { %4263 = vmatpush1.bf16.msra.mxu0 %v14036_v39  ;;  %4304 = vmatpush1.bf16.msra.mxu1 %v14043_v19 }
 0x323   :  { %4264 = vmatprep.subr.bf16.mxu0 %v14048_v37  ;;  %4305 = vmatprep.subr.bf16.mxu1 %v14055_v59 }
 0x326   :  { %4265 = vmatpush1.bf16.msra.mxu0 %v14064_v4  ;;  %4306 = vmatpush1.bf16.msra.mxu1 %v14069_v42 }
 0x327   :  { %4266 = vmatprep.subr.bf16.mxu0 %v14076_v50  ;;  %4307 = vmatprep.subr.bf16.mxu1 %v14081_v8 }
 0x32a   :  { %4267 = vmatpush1.bf16.msra.mxu0 %v14086_v12  ;;  %4308 = vmatpush1.bf16.msra.mxu1 %v14093_v31 }
 0x32b   :  { %4353 = vmatprep.subr.bf16.mxu0 %v13966_v14  ;;  %4394 = vmatprep.subr.bf16.mxu1 %v13971_v2 }
 0x32d   :  { %9390 = vmatmul.mubr.msk.bf16.vlgmr.msra.gmra.mrb[132].mxu0 %vm4164_vm8, %v4256_v38  ;;  %9391 = vmatmul.mubr.msk.bf16.vlgmr.msra.gmra.mrb[148].mxu1 %vm4164_vm8, %v4256_v38  ;;  %v14520_v38 = vld [vmem:[%s17884_s12 + $0x140] ss:$16 sps:$4 sm:$0xff]  }
 0x32e   :  { %4354 = vmatpush1.bf16.msra.mxu0 %v14016_v11  ;;  %4395 = vmatpush1.bf16.msra.mxu1 %v14021_v18  ;;  %18377 = vst [vmem:[#allocation24_spill] sm:$0xff] %v14520_v38 }
 0x32f   :  { %4355 = vmatprep.subr.bf16.mxu0 %v14026_v34  ;;  %4396 = vmatprep.subr.bf16.mxu1 %v14031_v30 }
 0x330   :  { %4385 = vmatprep.mubr.bf16.mxu0 %v17904_v62  ;;  %4426 = vmatprep.mubr.bf16.mxu1 %v17904_v62 }
 0x332   :  { %4356 = vmatpush1.bf16.msra.mxu0 %v14036_v39  ;;  %4397 = vmatpush1.bf16.msra.mxu1 %v14043_v19 }
 0x333   :  { %4357 = vmatprep.subr.bf16.mxu0 %v14048_v37  ;;  %4398 = vmatprep.subr.bf16.mxu1 %v14055_v59 }
 0x336   :  { %4358 = vmatpush1.bf16.msra.mxu0 %v14064_v4  ;;  %4399 = vmatpush1.bf16.msra.mxu1 %v14069_v42 }
 0x337   :  { %4359 = vmatprep.subr.bf16.mxu0 %v14076_v50  ;;  %4400 = vmatprep.subr.bf16.mxu1 %v14081_v8 }
 0x33a   :  { %4360 = vmatpush1.bf16.msra.mxu0 %v14086_v12  ;;  %4401 = vmatpush1.bf16.msra.mxu1 %v14093_v31 }
 0x33b   :  { %4446 = vmatprep.subr.bf16.mxu0 %v13966_v14  ;;  %4487 = vmatprep.subr.bf16.mxu1 %v13971_v2 }
 0x33d   :  { %9393 = vmatmul.mubr.msk.bf16.vlgmr.msra.gmra.mrb[136].mxu0 %vm4164_vm8, %v4349_v21  ;;  %9394 = vmatmul.mubr.msk.bf16.vlgmr.msra.gmra.mrb[152].mxu1 %vm4164_vm8, %v4349_v21  ;;  %v14532_v21 = vld [vmem:[%s17884_s12 + $0x164] ss:$16 sps:$4 sm:$0xff]  }
 0x33e   :  { %4447 = vmatpush1.bf16.msra.mxu0 %v14016_v11  ;;  %4488 = vmatpush1.bf16.msra.mxu1 %v14021_v18  ;;  %18379 = vst [vmem:[#allocation26_spill] sm:$0xff] %v14532_v21 }
 0x33f   :  { %4448 = vmatprep.subr.bf16.mxu0 %v14026_v34  ;;  %4489 = vmatprep.subr.bf16.mxu1 %v14031_v30 }
 0x340   :  { %4478 = vmatprep.mubr.bf16.mxu0 %v17904_v62  ;;  %4519 = vmatprep.mubr.bf16.mxu1 %v17904_v62 }
 0x342   :  { %4449 = vmatpush1.bf16.msra.mxu0 %v14036_v39  ;;  %4490 = vmatpush1.bf16.msra.mxu1 %v14043_v19 }
 0x343   :  { %4450 = vmatprep.subr.bf16.mxu0 %v14048_v37  ;;  %4491 = vmatprep.subr.bf16.mxu1 %v14055_v59 }
 0x346   :  { %4451 = vmatpush1.bf16.msra.mxu0 %v14064_v4  ;;  %4492 = vmatpush1.bf16.msra.mxu1 %v14069_v42 }
 0x347   :  { %4452 = vmatprep.subr.bf16.mxu0 %v14076_v50  ;;  %4493 = vmatprep.subr.bf16.mxu1 %v14081_v8 }
 0x34a   :  { %4453 = vmatpush1.bf16.msra.mxu0 %v14086_v12  ;;  %4494 = vmatpush1.bf16.msra.mxu1 %v14093_v31 }
 0x34b   :  { %4539 = vmatprep.subr.bf16.mxu0 %v13966_v14  ;;  %4580 = vmatprep.subr.bf16.mxu1 %v13971_v2 }
 0x34d   :  { %9396 = vmatmul.mubr.msk.bf16.vlgmr.msra.gmra.mrb[140].mxu0 %vm4164_vm8, %v4442_v15  ;;  %9397 = vmatmul.mubr.msk.bf16.vlgmr.msra.gmra.mrb[156].mxu1 %vm4164_vm8, %v4442_v15  ;;  %v14544_v15 = vld [vmem:[%s17884_s12 + $0x160] ss:$16 sps:$4 sm:$0xff]  }
 0x34e   :  { %4540 = vmatpush1.bf16.msra.mxu0 %v14016_v11  ;;  %4581 = vmatpush1.bf16.msra.mxu1 %v14021_v18  ;;  %18381 = vst [vmem:[#allocation28_spill] sm:$0xff] %v14544_v15 }
 0x34f   :  { %4541 = vmatprep.subr.bf16.mxu0 %v14026_v34  ;;  %4582 = vmatprep.subr.bf16.mxu1 %v14031_v30 }
 0x350   :  { %4571 = vmatprep.mubr.bf16.mxu0 %v17904_v62  ;;  %4612 = vmatprep.mubr.bf16.mxu1 %v17904_v62 }
 0x352   :  { %4542 = vmatpush1.bf16.msra.mxu0 %v14036_v39  ;;  %4583 = vmatpush1.bf16.msra.mxu1 %v14043_v19 }
 0x353   :  { %4543 = vmatprep.subr.bf16.mxu0 %v14048_v37  ;;  %4584 = vmatprep.subr.bf16.mxu1 %v14055_v59 }
 0x356   :  { %4544 = vmatpush1.bf16.msra.mxu0 %v14064_v4  ;;  %4585 = vmatpush1.bf16.msra.mxu1 %v14069_v42 }
 0x357   :  { %4545 = vmatprep.subr.bf16.mxu0 %v14076_v50  ;;  %4586 = vmatprep.subr.bf16.mxu1 %v14081_v8 }
 0x35a   :  { %4546 = vmatpush1.bf16.msra.mxu0 %v14086_v12  ;;  %4587 = vmatpush1.bf16.msra.mxu1 %v14093_v31 }
 0x35b   :  { %4632 = vmatprep.subr.bf16.mxu0 %v13966_v14  ;;  %4673 = vmatprep.subr.bf16.mxu1 %v13971_v2 }
 0x35d   :  { %9399 = vmatmul.mubr.msk.bf16.vlgmr.msra.gmra.mrb[144].mxu0 %vm4164_vm8, %v4535_v25  ;;  %9400 = vmatmul.mubr.msk.bf16.vlgmr.msra.gmra.mrb[160].mxu1 %vm4164_vm8, %v4535_v25  ;;  %v14556_v25 = vld [vmem:[%s17884_s12 + $0x184] ss:$16 sps:$4 sm:$0xff]  }
 0x35e   :  { %4633 = vmatpush1.bf16.msra.mxu0 %v14016_v11  ;;  %4674 = vmatpush1.bf16.msra.mxu1 %v14021_v18  ;;  %18383 = vst [vmem:[#allocation30_spill] sm:$0xff] %v14556_v25 }
 0x35f   :  { %4634 = vmatprep.subr.bf16.mxu0 %v14026_v34  ;;  %4675 = vmatprep.subr.bf16.mxu1 %v14031_v30 }
 0x360   :  { %4664 = vmatprep.mubr.bf16.mxu0 %v17904_v62  ;;  %4705 = vmatprep.mubr.bf16.mxu1 %v17904_v62 }
 0x362   :  { %4635 = vmatpush1.bf16.msra.mxu0 %v14036_v39  ;;  %4676 = vmatpush1.bf16.msra.mxu1 %v14043_v19 }
 0x363   :  { %4636 = vmatprep.subr.bf16.mxu0 %v14048_v37  ;;  %4677 = vmatprep.subr.bf16.mxu1 %v14055_v59 }
 0x366   :  { %4637 = vmatpush1.bf16.msra.mxu0 %v14064_v4  ;;  %4678 = vmatpush1.bf16.msra.mxu1 %v14069_v42 }
 0x367   :  { %4638 = vmatprep.subr.bf16.mxu0 %v14076_v50  ;;  %4679 = vmatprep.subr.bf16.mxu1 %v14081_v8 }
 0x36a   :  { %4639 = vmatpush1.bf16.msra.mxu0 %v14086_v12  ;;  %4680 = vmatpush1.bf16.msra.mxu1 %v14093_v31 }
 0x36b   :  { %4725 = vmatprep.subr.bf16.mxu0 %v13966_v14  ;;  %4766 = vmatprep.subr.bf16.mxu1 %v13971_v2 }
 0x36d   :  { %9402 = vmatmul.mubr.msk.bf16.vlgmr.msra.gmra.mrb[148].mxu0 %vm4164_vm8, %v4628_v29  ;;  %9403 = vmatmul.mubr.msk.bf16.vlgmr.msra.gmra.mrb[164].mxu1 %vm4164_vm8, %v4628_v29  ;;  %v14568_v29 = vld [vmem:[%s17884_s12 + $0x180] ss:$16 sps:$4 sm:$0xff]  }
 0x36e   :  { %4726 = vmatpush1.bf16.msra.mxu0 %v14016_v11  ;;  %4767 = vmatpush1.bf16.msra.mxu1 %v14021_v18  ;;  %18385 = vst [vmem:[#allocation32_spill] sm:$0xff] %v14568_v29 }
 0x36f   :  { %4727 = vmatprep.subr.bf16.mxu0 %v14026_v34  ;;  %4768 = vmatprep.subr.bf16.mxu1 %v14031_v30 }
 0x370   :  { %4757 = vmatprep.mubr.bf16.mxu0 %v17904_v62  ;;  %4798 = vmatprep.mubr.bf16.mxu1 %v17904_v62 }
 0x372   :  { %4728 = vmatpush1.bf16.msra.mxu0 %v14036_v39  ;;  %4769 = vmatpush1.bf16.msra.mxu1 %v14043_v19 }
 0x373   :  { %4729 = vmatprep.subr.bf16.mxu0 %v14048_v37  ;;  %4770 = vmatprep.subr.bf16.mxu1 %v14055_v59 }
 0x376   :  { %4730 = vmatpush1.bf16.msra.mxu0 %v14064_v4  ;;  %4771 = vmatpush1.bf16.msra.mxu1 %v14069_v42 }
 0x377   :  { %4731 = vmatprep.subr.bf16.mxu0 %v14076_v50  ;;  %4772 = vmatprep.subr.bf16.mxu1 %v14081_v8 }
 0x37a   :  { %4732 = vmatpush1.bf16.msra.mxu0 %v14086_v12  ;;  %4773 = vmatpush1.bf16.msra.mxu1 %v14093_v31 }
 0x37b   :  { %4818 = vmatprep.subr.bf16.mxu0 %v13966_v14  ;;  %4859 = vmatprep.subr.bf16.mxu1 %v13971_v2  ;;  %v9407_v14 = vld [vmem:[%s17885_s1 + $0x38] sm:$0xff]  ;;  %v14264_v2 = vld [vmem:[%s17884_s12 + $0x4] ss:$16 sps:$4 sm:$0xff]  }
 0x37c   :  { %v4814_v56 = vpack.c.bf16 %v9407_v14, %v9407_v14  ;;  %v14585_v14 = vld [vmem:[%s17884_s12 + $0x1ac] ss:$16 sps:$4 sm:$0xff]  }
 0x37d   :  { %9405 = vmatmul.mubr.msk.bf16.vlgmr.msra.gmra.mrb[152].mxu0 %vm4164_vm8, %v4721_v10  ;;  %9406 = vmatmul.mubr.msk.bf16.vlgmr.msra.gmra.mrb[168].mxu1 %vm4164_vm8, %v4721_v10  ;;  %v14580_v10 = vld [vmem:[%s17884_s12 + $0x1a4] ss:$16 sps:$4 sm:$0xff]   ;;  %18388 = vst [vmem:[#allocation35_spill] sm:$0xff] %v14585_v14 }
 0x37e   :  { %4819 = vmatpush1.bf16.msra.mxu0 %v14016_v11  ;;  %4860 = vmatpush1.bf16.msra.mxu1 %v14021_v18  ;;  %v14405_v11 = vld [vmem:[%s17884_s12 + $0xa8] ss:$16 sps:$4 sm:$0xff]   ;;  %v14412_v18 = vld [vmem:[%s17884_s12 + $0xc4] ss:$16 sps:$4 sm:$0xff]   ;;  %18387 = vst [vmem:[#allocation34_spill] sm:$0xff] %v14580_v10 }
 0x37f   :  { %4820 = vmatprep.subr.bf16.mxu0 %v14026_v34  ;;  %4861 = vmatprep.subr.bf16.mxu1 %v14031_v30  ;;  %v14417_v34 = vld [vmem:[%s17884_s12 + $0xcc] ss:$16 sps:$4 sm:$0xff]   ;;  %v14436_v30 = vld [vmem:[%s17884_s12 + $0xe4] ss:$16 sps:$4 sm:$0xff]  }
 0x380   :  { %4850 = vmatprep.mubr.bf16.mxu0 %v17904_v62  ;;  %4891 = vmatprep.mubr.bf16.mxu1 %v17904_v62 }
 0x382   :  { %4821 = vmatpush1.bf16.msra.mxu0 %v14036_v39  ;;  %4862 = vmatpush1.bf16.msra.mxu1 %v14043_v19  ;;  %v14441_v39 = vld [vmem:[%s17884_s12 + $0xec] ss:$16 sps:$4 sm:$0xff]   ;;  %v14448_v19 = vld [vmem:[%s17884_s12 + $0xe0] ss:$16 sps:$4 sm:$0xff]  }
 0x383   :  { %4822 = vmatprep.subr.bf16.mxu0 %v14048_v37  ;;  %4863 = vmatprep.subr.bf16.mxu1 %v14055_v59  ;;  %18364 = vst [vmem:[#allocation11_spill] sm:$0xff] %v14441_v39  ;;  %18365 = vst [vmem:[#allocation12_spill] sm:$0xff] %v14448_v19  ;;  %v14453_v37 = vld [vmem:[%s17884_s12 + $0xe8] ss:$16 sps:$4 sm:$0xff]   ;;  %v14460_v59 = vld [vmem:[%s17884_s12 + $0x104] ss:$16 sps:$4 sm:$0xff]  }
 0x384   :  { %18366 = vst [vmem:[#allocation13_spill] sm:$0xff] %v14453_v37  ;;  %18367 = vst [vmem:[#allocation14_spill] sm:$0xff] %v14460_v59 }
 0x386   :  { %4823 = vmatpush1.bf16.msra.mxu0 %v14064_v4  ;;  %4864 = vmatpush1.bf16.msra.mxu1 %v14069_v42  ;;  %v14465_v4 = vld [vmem:[%s17884_s12 + $0x10c] ss:$16 sps:$4 sm:$0xff]   ;;  %v14472_v42 = vld [vmem:[%s17884_s12 + $0x100] ss:$16 sps:$4 sm:$0xff]  }
 0x387   :  { %4824 = vmatprep.subr.bf16.mxu0 %v14076_v50  ;;  %4865 = vmatprep.subr.bf16.mxu1 %v14081_v8  ;;  %18368 = vst [vmem:[#allocation15_spill] sm:$0xff] %v14465_v4  ;;  %18369 = vst [vmem:[#allocation16_spill] sm:$0xff] %v14472_v42  ;;  %v14477_v50 = vld [vmem:[%s17884_s12 + $0x108] ss:$16 sps:$4 sm:$0xff]   ;;  %v14484_v8 = vld [vmem:[%s17884_s12 + $0x124] ss:$16 sps:$4 sm:$0xff]  }
 0x388   :  { %18370 = vst [vmem:[#allocation17_spill] sm:$0xff] %v14477_v50  ;;  %18371 = vst [vmem:[#allocation18_spill] sm:$0xff] %v14484_v8 }
 0x38a   :  { %4825 = vmatpush1.bf16.msra.mxu0 %v14086_v12  ;;  %4866 = vmatpush1.bf16.msra.mxu1 %v14093_v31  ;;  %v14489_v12 = vld [vmem:[%s17884_s12 + $0x12c] ss:$16 sps:$4 sm:$0xff]   ;;  %v14496_v31 = vld [vmem:[%s17884_s12 + $0x120] ss:$16 sps:$4 sm:$0xff]  }
 0x38b   :  { %5677 = vmatprep.subr.bf16.mxu0 %v14264_v2  ;;  %5759 = vmatprep.subr.bf16.mxu1 %v14269_v48  ;;  %18372 = vst [vmem:[#allocation19_spill] sm:$0xff] %v14489_v12  ;;  %18373 = vst [vmem:[#allocation20_spill] sm:$0xff] %v14496_v31 }
 0x38d   :  { %9408 = vmatmul.mubr.msk.bf16.vlgmr.msra.gmra.mrb[156].mxu0 %vm4164_vm8, %v4814_v56  ;;  %9409 = vmatmul.mubr.msk.bf16.vlgmr.msra.gmra.mrb[172].mxu1 %vm4164_vm8, %v4814_v56  ;;  %v14592_v56 = vld [vmem:[%s17884_s12 + $0x1a0] ss:$16 sps:$4 sm:$0xff]  }
 0x38e   :  { %5678 = vmatpush1.bf16.msra.mxu0 %v14276_v46  ;;  %5760 = vmatpush1.bf16.msra.mxu1 %v14281_v0  ;;  %18389 = vst [vmem:[#allocation36_spill] sm:$0xff] %v14592_v56 }
 0x38f   :  { %5679 = vmatprep.subr.bf16.mxu0 %v14288_v43  ;;  %5761 = vmatprep.subr.bf16.mxu1 %v14293_v3 }
 0x390   :  { %5709 = vmatprep.mubr.bf16.mxu0 %v17904_v62  ;;  %5791 = vmatprep.mubr.bf16.mxu1 %v17904_v62  ;;  %v14597_v62 = vld [vmem:[%s17884_s12 + $0x1a8] ss:$16 sps:$4 sm:$0xff]  }
 0x391   :  { %18390 = vst [vmem:[#allocation37_spill] sm:$0xff] %v14597_v62 }
 0x392   :  { %5680 = vmatpush1.bf16.msra.mxu0 %v14302_v20  ;;  %5762 = vmatpush1.bf16.msra.mxu1 %v14307_v54 }
 0x393   :  { %5681 = vmatprep.subr.bf16.mxu0 %v14314_v24  ;;  %5763 = vmatprep.subr.bf16.mxu1 %v14319_v55 }
 0x396   :  { %5682 = vmatpush1.bf16.msra.mxu0 %v14328_v45  ;;  %5764 = vmatpush1.bf16.msra.mxu1 %v14333_v22 }
 0x397   :  { %5683 = vmatprep.subr.bf16.mxu0 %v14340_v1  ;;  %5765 = vmatprep.subr.bf16.mxu1 %v14345_v7 }
 0x39a   :  { %5684 = vmatpush1.bf16.msra.mxu0 %v14352_v60  ;;  %5766 = vmatpush1.bf16.msra.mxu1 %v14357_v33 }
 0x39b   :  { %5685 = vmatprep.subr.bf16.mxu0 %v14364_v9  ;;  %5767 = vmatprep.subr.bf16.mxu1 %v14369_v41 }
 0x39e   :  { %5686 = vmatpush1.bf16.msra.mxu0 %v14376_v58  ;;  %5768 = vmatpush1.bf16.msra.mxu1 %v14381_v6 }
 0x39f   :  { %5687 = vmatprep.subr.bf16.mxu0 %v14388_v28  ;;  %5769 = vmatprep.subr.bf16.mxu1 %v14393_v26 }
 0x3a2   :  { %5688 = vmatpush1.bf16.msra.mxu0 %v14400_v16  ;;  %5770 = vmatpush1.bf16.msra.mxu1 %v14405_v11 }
 0x3a3   :  { %5689 = vmatprep.subr.bf16.mxu0 %v14412_v18  ;;  %5771 = vmatprep.subr.bf16.mxu1 %v14417_v34 }
 0x3a6   :  { %5690 = vmatpush1.bf16.msra.mxu0 %v14424_v61  ;;  %5772 = vmatpush1.bf16.msra.mxu1 %v14429_v57 }
 0x3a7   :  { %5691 = vmatprep.subr.bf16.mxu0 %v14436_v30  ;;  %5773 = vmatprep.subr.bf16.mxu1 %v14441_v39 }
 0x3aa   :  { %5692 = vmatpush1.bf16.msra.mxu0 %v14448_v19  ;;  %5774 = vmatpush1.bf16.msra.mxu1 %v14453_v37 }
 0x3ab   :  { %5693 = vmatprep.subr.bf16.mxu0 %v14460_v59  ;;  %5775 = vmatprep.subr.bf16.mxu1 %v14465_v4 }
 0x3ae   :  { %5694 = vmatpush1.bf16.msra.mxu0 %v14472_v42  ;;  %5776 = vmatpush1.bf16.msra.mxu1 %v14477_v50 }
 0x3af   :  { %5695 = vmatprep.subr.bf16.mxu0 %v14484_v8  ;;  %5777 = vmatprep.subr.bf16.mxu1 %v14489_v12 }
 0x3b2   :  { %5696 = vmatpush1.bf16.msra.mxu0 %v14496_v31  ;;  %5778 = vmatpush1.bf16.msra.mxu1 %v14501_v32 }
 0x3b3   :  { %5697 = vmatprep.subr.bf16.mxu0 %v14508_v36  ;;  %5779 = vmatprep.subr.bf16.mxu1 %v14513_v17 }
 0x3b6   :  { %5698 = vmatpush1.bf16.msra.mxu0 %v14520_v38  ;;  %5780 = vmatpush1.bf16.msra.mxu1 %v14525_v23 }
 0x3b7   :  { %5699 = vmatprep.subr.bf16.mxu0 %v14532_v21  ;;  %5781 = vmatprep.subr.bf16.mxu1 %v14537_v47 }
 0x3ba   :  { %5700 = vmatpush1.bf16.msra.mxu0 %v14544_v15  ;;  %5782 = vmatpush1.bf16.msra.mxu1 %v14549_v52 }
 0x3bb   :  { %5701 = vmatprep.subr.bf16.mxu0 %v14556_v25  ;;  %5783 = vmatprep.subr.bf16.mxu1 %v14561_v35  ;;  %v14815_v35 = vld [vmem:[%s17884_s12 + $0x2c0] ss:$16 sps:$4 sm:$0xff]   ;;  %v14820_v25 = vld [vmem:[%s17884_s12 + $0x2c8] ss:$16 sps:$4 sm:$0xff]  }
 0x3bc   :  { %18426 = vst [vmem:[#allocation72_spill] sm:$0xff] %v14815_v35  ;;  %18427 = vst [vmem:[#allocation73_spill] sm:$0xff] %v14820_v25 }
 0x3be   :  { %5702 = vmatpush1.bf16.msra.mxu0 %v14568_v29  ;;  %5784 = vmatpush1.bf16.msra.mxu1 %v14573_v49 }
 0x3bf   :  { %5703 = vmatprep.subr.bf16.mxu0 %v14580_v10  ;;  %5785 = vmatprep.subr.bf16.mxu1 %v14585_v14 }
 0x3c2   :  { %5704 = vmatpush1.bf16.msra.mxu0 %v14592_v56  ;;  %5786 = vmatpush1.bf16.msra.mxu1 %v14597_v62  ;;  %v9338_v56 = vld [vmem:[%s17886_s10] ss:$0 sm:$0xff] }
 0x3c3   :  { %5705 = vmatprep.subr.bf16.mxu0 %v14604_v53  ;;  %5787 = vmatprep.subr.bf16.mxu1 %v14609_v44  ;;  %v18405_v44 = vmov 0  }
 0x3c6   :  { %5706 = vmatpush1.bf16.msra.mxu0 %v14616_v5  ;;  %5788 = vmatpush1.bf16.msra.mxu1 %v14621_v27  ;;  %v14652_v5 = vld [vmem:[%s17884_s12 + $0x204] ss:$16 sps:$4 sm:$0xff]   ;;  %v14657_v27 = vld [vmem:[%s17884_s12 + $0x20c] ss:$16 sps:$4 sm:$0xff]  }
 0x3c7   :  { %5707 = vmatprep.subr.bf16.mxu0 %v14628_v63  ;;  %5789 = vmatprep.subr.bf16.mxu1 %v14633_v40  ;;  %18399 = vst [vmem:[#allocation46_spill] sm:$0xff] %v14652_v5  ;;  %18400 = vst [vmem:[#allocation47_spill] sm:$0xff] %v14657_v27  ;;  %v14664_v63 = vld [vmem:[%s17884_s12 + $0x200] ss:$16 sps:$4 sm:$0xff]   ;;  %v14669_v40 = vld [vmem:[%s17884_s12 + $0x208] ss:$16 sps:$4 sm:$0xff]  }
 0x3c8   :  { %18401 = vst [vmem:[#allocation48_spill] sm:$0xff] %v14664_v63  ;;  %18402 = vst [vmem:[#allocation49_spill] sm:$0xff] %v14669_v40 }
 0x3ca   :  { %5708 = vmatpush1.bf16.msra.mxu0 %v14640_v13  ;;  %5790 = vmatpush1.bf16.msra.mxu1 %v14645_v51  ;;  %v14676_v13 = vld [vmem:[%s17884_s12 + $0x224] ss:$16 sps:$4 sm:$0xff]   ;;  %v14681_v51 = vld [vmem:[%s17884_s12 + $0x22c] ss:$16 sps:$4 sm:$0xff]  }
 0x3cb   :  { %5718 = vmatprep.subr.bf16.mxu0 %v14652_v5  ;;  %5800 = vmatprep.subr.bf16.mxu1 %v14657_v27  ;;  %18403 = vst [vmem:[#allocation50_spill] sm:$0xff] %v14676_v13  ;;  %18404 = vst [vmem:[#allocation51_spill] sm:$0xff] %v14681_v51  ;;  %v14690_v27 = vld [vmem:[%s17884_s12 + $0x220] ss:$16 sps:$4 sm:$0xff]   ;;  %v14695_v5 = vld [vmem:[%s17884_s12 + $0x228] ss:$16 sps:$4 sm:$0xff]  }
 0x3cc   :  { %18406 = vst [vmem:[#allocation52_spill] sm:$0xff] %v14690_v27  ;;  %18407 = vst [vmem:[#allocation53_spill] sm:$0xff] %v14695_v5 }
 0x3cd   :  { %5710 = vmatmul.mubr.bf16.vlgmr.msra.gmra.mrb[128].mxu0 %v18405_v44  ;;  %5792 = vmatmul.mubr.bf16.vlgmr.msra.gmra.mrb[144].mxu1 %v18405_v44 }
 0x3ce   :  { %5719 = vmatpush1.bf16.msra.mxu0 %v14664_v63  ;;  %5801 = vmatpush1.bf16.msra.mxu1 %v14669_v40  ;;  %v14702_v63 = vld [vmem:[%s17884_s12 + $0x244] ss:$16 sps:$4 sm:$0xff]   ;;  %v14707_v40 = vld [vmem:[%s17884_s12 + $0x24c] ss:$16 sps:$4 sm:$0xff]  }
 0x3cf   :  { %5720 = vmatprep.subr.bf16.mxu0 %v14676_v13  ;;  %5802 = vmatprep.subr.bf16.mxu1 %v14681_v51  ;;  %18408 = vst [vmem:[#allocation54_spill] sm:$0xff] %v14702_v63  ;;  %18409 = vst [vmem:[#allocation55_spill] sm:$0xff] %v14707_v40  ;;  %v14716_v51 = vld [vmem:[%s17884_s12 + $0x240] ss:$16 sps:$4 sm:$0xff]   ;;  %v14721_v13 = vld [vmem:[%s17884_s12 + $0x248] ss:$16 sps:$4 sm:$0xff]  }
 0x3d0   :  { %5750 = vmatprep.mubr.bf16.mxu0 %v18405_v44  ;;  %5832 = vmatprep.mubr.bf16.mxu1 %v18405_v44  ;;  %18410 = vst [vmem:[#allocation56_spill] sm:$0xff] %v14716_v51  ;;  %18411 = vst [vmem:[#allocation57_spill] sm:$0xff] %v14721_v13 }
 0x3d2   :  { %5721 = vmatpush1.bf16.msra.mxu0 %v14690_v27  ;;  %5803 = vmatpush1.bf16.msra.mxu1 %v14695_v5  ;;  %v14728_v27 = vld [vmem:[%s17884_s12 + $0x264] ss:$16 sps:$4 sm:$0xff]   ;;  %v14733_v5 = vld [vmem:[%s17884_s12 + $0x26c] ss:$16 sps:$4 sm:$0xff]  }
 0x3d3   :  { %5722 = vmatprep.subr.bf16.mxu0 %v14702_v63  ;;  %5804 = vmatprep.subr.bf16.mxu1 %v14707_v40  ;;  %18412 = vst [vmem:[#allocation58_spill] sm:$0xff] %v14728_v27  ;;  %18413 = vst [vmem:[#allocation59_spill] sm:$0xff] %v14733_v5  ;;  %v14740_v63 = vld [vmem:[%s17884_s12 + $0x260] ss:$16 sps:$4 sm:$0xff]   ;;  %v14745_v40 = vld [vmem:[%s17884_s12 + $0x268] ss:$16 sps:$4 sm:$0xff]  }
 0x3d4   :  { %18414 = vst [vmem:[#allocation60_spill] sm:$0xff] %v14740_v63  ;;  %18415 = vst [vmem:[#allocation61_spill] sm:$0xff] %v14745_v40 }
 0x3d6   :  { %5723 = vmatpush1.bf16.msra.mxu0 %v14716_v51  ;;  %5805 = vmatpush1.bf16.msra.mxu1 %v14721_v13  ;;  %v14752_v51 = vld [vmem:[%s17884_s12 + $0x284] ss:$16 sps:$4 sm:$0xff]   ;;  %v14757_v13 = vld [vmem:[%s17884_s12 + $0x28c] ss:$16 sps:$4 sm:$0xff]  }
 0x3d7   :  { %5724 = vmatprep.subr.bf16.mxu0 %v14728_v27  ;;  %5806 = vmatprep.subr.bf16.mxu1 %v14733_v5  ;;  %18416 = vst [vmem:[#allocation62_spill] sm:$0xff] %v14752_v51  ;;  %18417 = vst [vmem:[#allocation63_spill] sm:$0xff] %v14757_v13  ;;  %v14764_v27 = vld [vmem:[%s17884_s12 + $0x280] ss:$16 sps:$4 sm:$0xff]   ;;  %v14769_v5 = vld [vmem:[%s17884_s12 + $0x288] ss:$16 sps:$4 sm:$0xff]  }
 0x3d8   :  { %18418 = vst [vmem:[#allocation64_spill] sm:$0xff] %v14764_v27  ;;  %18419 = vst [vmem:[#allocation65_spill] sm:$0xff] %v14769_v5 }
 0x3da   :  { %5725 = vmatpush1.bf16.msra.mxu0 %v14740_v63  ;;  %5807 = vmatpush1.bf16.msra.mxu1 %v14745_v40  ;;  %v14776_v63 = vld [vmem:[%s17884_s12 + $0x2a4] ss:$16 sps:$4 sm:$0xff]   ;;  %v14781_v40 = vld [vmem:[%s17884_s12 + $0x2ac] ss:$16 sps:$4 sm:$0xff]  }
 0x3db   :  { %5726 = vmatprep.subr.bf16.mxu0 %v14752_v51  ;;  %5808 = vmatprep.subr.bf16.mxu1 %v14757_v13  ;;  %18420 = vst [vmem:[#allocation66_spill] sm:$0xff] %v14776_v63  ;;  %18421 = vst [vmem:[#allocation67_spill] sm:$0xff] %v14781_v40  ;;  %v14788_v51 = vld [vmem:[%s17884_s12 + $0x2a0] ss:$16 sps:$4 sm:$0xff]   ;;  %v14793_v13 = vld [vmem:[%s17884_s12 + $0x2a8] ss:$16 sps:$4 sm:$0xff]  }
 0x3dc   :  { %18422 = vst [vmem:[#allocation68_spill] sm:$0xff] %v14788_v51  ;;  %18423 = vst [vmem:[#allocation69_spill] sm:$0xff] %v14793_v13 }
 0x3de   :  { %5727 = vmatpush1.bf16.msra.mxu0 %v14764_v27  ;;  %5809 = vmatpush1.bf16.msra.mxu1 %v14769_v5  ;;  %v14800_v27 = vld [vmem:[%s17884_s12 + $0x2c4] ss:$16 sps:$4 sm:$0xff]   ;;  %v14805_v5 = vld [vmem:[%s17884_s12 + $0x2cc] ss:$16 sps:$4 sm:$0xff]  }
 0x3df   :  { %5728 = vmatprep.subr.bf16.mxu0 %v14776_v63  ;;  %5810 = vmatprep.subr.bf16.mxu1 %v14781_v40  ;;  %18424 = vst [vmem:[#allocation70_spill] sm:$0xff] %v14800_v27  ;;  %18425 = vst [vmem:[#allocation71_spill] sm:$0xff] %v14805_v5 }
 0x3e0   :  { %v9830_v53 = vpop.f32.mrb[124].mxu0  ;;  %v9852_v62 = vpop.f32.mrb[140].mxu1 }
 0x3e1   :  { %v9831_v14 = vpop.f32.mrb[125].mxu0  ;;  %v9853_v63 = vpop.f32.mrb[141].mxu1 }
 0x3e2   :  { %v9832_v10 = vadd.f32 %v9831_v14, %v9830_v53  ;;  %v9854_v40 = vadd.f32 %v9853_v63, %v9852_v62  ;;  %5729 = vmatpush1.bf16.msra.mxu0 %v14788_v51  ;;  %5811 = vmatpush1.bf16.msra.mxu1 %v14793_v13  ;;  %v9833_v49 = vpop.f32.mrb[126].mxu0  ;;  %v9855_v29 = vpop.f32.mrb[142].mxu1  ;;  %v14827_v63 = vld [vmem:[%s17884_s12 + $0x2e4] ss:$16 sps:$4 sm:$0xff]   ;;  %v14832_v53 = vld [vmem:[%s17884_s12 + $0x2ec] ss:$16 sps:$4 sm:$0xff]  }
 0x3e3   :  { %v9834_v52 = vpop.f32.mrb[127].mxu0  ;;  %v9856_v15 = vpop.f32.mrb[143].mxu1  ;;  %5730 = vmatprep.subr.bf16.mxu0 %v14800_v27  ;;  %5812 = vmatprep.subr.bf16.mxu1 %v14805_v5  ;;  %18428 = vst [vmem:[#allocation74_spill] sm:$0xff] %v14827_v63  ;;  %18429 = vst [vmem:[#allocation75_spill] sm:$0xff] %v14832_v53  ;;  %v14858_v49 = vld [vmem:[%s17884_s12 + $0x30c] ss:$16 sps:$4 sm:$0xff]  }
 0x3e4   :  { %v3999_v62 = vadd.f32 %v9832_v10, %v9338_v56  ;;  %v14841_v15 = vld [vmem:[%s17884_s12 + $0x2e0] ss:$16 sps:$4 sm:$0xff]   ;;  %v14846_v52 = vld [vmem:[%s17884_s12 + $0x2e8] ss:$16 sps:$4 sm:$0xff]   ;;  %18434 = vst [vmem:[#allocation80_spill] sm:$0xff] %v14858_v49 }
 0x3e5   :  { %18431 = vst [vmem:[#allocation77_spill] sm:$0xff] %v14841_v15  ;;  %18432 = vst [vmem:[#allocation78_spill] sm:$0xff] %v14846_v52  ;;  %v14865_v10 = vld [vmem:[%s17884_s12 + $0x300] ss:$16 sps:$4 sm:$0xff]   ;;  %v14870_v14 = vld [vmem:[%s17884_s12 + $0x308] ss:$16 sps:$4 sm:$0xff]  }
 0x3e6   :  { %v14834_v29 = vadd.f32 %v9854_v40, %v3999_v62  ;;  %5731 = vmatpush1.bf16.msra.mxu0 %v14815_v35  ;;  %5813 = vmatpush1.bf16.msra.mxu1 %v14820_v25  ;;  %v14853_v40 = vld [vmem:[%s17884_s12 + $0x304] ss:$16 sps:$4 sm:$0xff]   ;;  %18435 = vst [vmem:[#allocation81_spill] sm:$0xff] %v14865_v10  ;;  %18436 = vst [vmem:[#allocation82_spill] sm:$0xff] %v14870_v14  ;;  %v14882_v62 = vld [vmem:[%s17884_s12 + $0x32c] ss:$16 sps:$4 sm:$0xff]  }
 0x3e7   :  { %5732 = vmatprep.subr.bf16.mxu0 %v14827_v63  ;;  %5814 = vmatprep.subr.bf16.mxu1 %v14832_v53  ;;  %18433 = vst [vmem:[#allocation79_spill] sm:$0xff] %v14853_v40  ;;  %v14877_v56 = vld [vmem:[%s17884_s12 + $0x324] ss:$16 sps:$4 sm:$0xff]   ;;  %18438 = vst [vmem:[#allocation84_spill] sm:$0xff] %v14882_v62 }
 0x3e8   :  { %18430 = vst [vmem:[#allocation76_spill] sm:$0xff] %v14834_v29  ;;  %18437 = vst [vmem:[#allocation83_spill] sm:$0xff] %v14877_v56  ;;  %v14889_v29 = vld [vmem:[%s17884_s12 + $0x320] ss:$16 sps:$4 sm:$0xff]  }
 0x3e9   :  { %18439 = vst [vmem:[#allocation85_spill] sm:$0xff] %v14889_v29 }
 0x3ea   :  { %5733 = vmatpush1.bf16.msra.mxu0 %v14841_v15  ;;  %5815 = vmatpush1.bf16.msra.mxu1 %v14846_v52 }
 0x3eb   :  { %5734 = vmatprep.subr.bf16.mxu0 %v14853_v40  ;;  %5816 = vmatprep.subr.bf16.mxu1 %v14858_v49  ;;  %v14894_v49 = vld [vmem:[%s17884_s12 + $0x328] ss:$16 sps:$4 sm:$0xff]  }
 0x3ec   :  { %18440 = vst [vmem:[#allocation86_spill] sm:$0xff] %v14894_v49 }
 0x3ee   :  { %5735 = vmatpush1.bf16.msra.mxu0 %v14865_v10  ;;  %5817 = vmatpush1.bf16.msra.mxu1 %v14870_v14  ;;  %v14901_v10 = vld [vmem:[%s17884_s12 + $0x344] ss:$16 sps:$4 sm:$0xff]   ;;  %v14906_v14 = vld [vmem:[%s17884_s12 + $0x34c] ss:$16 sps:$4 sm:$0xff]  }
 0x3ef   :  { %5736 = vmatprep.subr.bf16.mxu0 %v14877_v56  ;;  %5818 = vmatprep.subr.bf16.mxu1 %v14882_v62  ;;  %18441 = vst [vmem:[#allocation87_spill] sm:$0xff] %v14901_v10  ;;  %18442 = vst [vmem:[#allocation88_spill] sm:$0xff] %v14906_v14  ;;  %v14913_v56 = vld [vmem:[%s17884_s12 + $0x340] ss:$16 sps:$4 sm:$0xff]   ;;  %v14918_v62 = vld [vmem:[%s17884_s12 + $0x348] ss:$16 sps:$4 sm:$0xff]  }
 0x3f0   :  { %18443 = vst [vmem:[#allocation89_spill] sm:$0xff] %v14913_v56  ;;  %18444 = vst [vmem:[#allocation90_spill] sm:$0xff] %v14918_v62 }
 0x3f2   :  { %5737 = vmatpush1.bf16.msra.mxu0 %v14889_v29  ;;  %5819 = vmatpush1.bf16.msra.mxu1 %v14894_v49  ;;  %v14925_v29 = vld [vmem:[%s17884_s12 + $0x364] ss:$16 sps:$4 sm:$0xff]   ;;  %v14930_v49 = vld [vmem:[%s17884_s12 + $0x36c] ss:$16 sps:$4 sm:$0xff]  }
 0x3f3   :  { %5738 = vmatprep.subr.bf16.mxu0 %v14901_v10  ;;  %5820 = vmatprep.subr.bf16.mxu1 %v14906_v14  ;;  %18445 = vst [vmem:[#allocation91_spill] sm:$0xff] %v14925_v29  ;;  %18446 = vst [vmem:[#allocation92_spill] sm:$0xff] %v14930_v49  ;;  %v14937_v10 = vld [vmem:[%s17884_s12 + $0x360] ss:$16 sps:$4 sm:$0xff]   ;;  %v14942_v14 = vld [vmem:[%s17884_s12 + $0x368] ss:$16 sps:$4 sm:$0xff]  }
 0x3f4   :  { %18447 = vst [vmem:[#allocation93_spill] sm:$0xff] %v14937_v10  ;;  %18448 = vst [vmem:[#allocation94_spill] sm:$0xff] %v14942_v14 }
 0x3f6   :  { %5739 = vmatpush1.bf16.msra.mxu0 %v14913_v56  ;;  %5821 = vmatpush1.bf16.msra.mxu1 %v14918_v62  ;;  %v14949_v56 = vld [vmem:[%s17884_s12 + $0x384] ss:$16 sps:$4 sm:$0xff]   ;;  %v14954_v62 = vld [vmem:[%s17884_s12 + $0x38c] ss:$16 sps:$4 sm:$0xff]  }
 0x3f7   :  { %5740 = vmatprep.subr.bf16.mxu0 %v14925_v29  ;;  %5822 = vmatprep.subr.bf16.mxu1 %v14930_v49  ;;  %18449 = vst [vmem:[#allocation95_spill] sm:$0xff] %v14949_v56  ;;  %18450 = vst [vmem:[#allocation96_spill] sm:$0xff] %v14954_v62  ;;  %v14961_v29 = vld [vmem:[%s17884_s12 + $0x380] ss:$16 sps:$4 sm:$0xff]   ;;  %v14966_v49 = vld [vmem:[%s17884_s12 + $0x388] ss:$16 sps:$4 sm:$0xff]  }
 0x3f8   :  { %18451 = vst [vmem:[#allocation97_spill] sm:$0xff] %v14961_v29  ;;  %18452 = vst [vmem:[#allocation98_spill] sm:$0xff] %v14966_v49 }
 0x3fa   :  { %5741 = vmatpush1.bf16.msra.mxu0 %v14937_v10  ;;  %5823 = vmatpush1.bf16.msra.mxu1 %v14942_v14  ;;  %v14973_v10 = vld [vmem:[%s17884_s12 + $0x3a4] ss:$16 sps:$4 sm:$0xff]   ;;  %v14978_v14 = vld [vmem:[%s17884_s12 + $0x3ac] ss:$16 sps:$4 sm:$0xff]  }
 0x3fb   :  { %5742 = vmatprep.subr.bf16.mxu0 %v14949_v56  ;;  %5824 = vmatprep.subr.bf16.mxu1 %v14954_v62  ;;  %18453 = vst [vmem:[#allocation99_spill] sm:$0xff] %v14973_v10  ;;  %18454 = vst [vmem:[#allocation100_spill] sm:$0xff] %v14978_v14  ;;  %v14985_v56 = vld [vmem:[%s17884_s12 + $0x3a0] ss:$16 sps:$4 sm:$0xff]   ;;  %v14990_v62 = vld [vmem:[%s17884_s12 + $0x3a8] ss:$16 sps:$4 sm:$0xff]  }
 0x3fc   :  { %18455 = vst [vmem:[#allocation101_spill] sm:$0xff] %v14985_v56  ;;  %18456 = vst [vmem:[#allocation102_spill] sm:$0xff] %v14990_v62 }
 0x3fe   :  { %5743 = vmatpush1.bf16.msra.mxu0 %v14961_v29  ;;  %5825 = vmatpush1.bf16.msra.mxu1 %v14966_v49  ;;  %v14997_v29 = vld [vmem:[%s17884_s12 + $0x3c4] ss:$16 sps:$4 sm:$0xff]   ;;  %v15002_v49 = vld [vmem:[%s17884_s12 + $0x3cc] ss:$16 sps:$4 sm:$0xff]  }
 0x3ff   :  { %5744 = vmatprep.subr.bf16.mxu0 %v14973_v10  ;;  %5826 = vmatprep.subr.bf16.mxu1 %v14978_v14  ;;  %18457 = vst [vmem:[#allocation103_spill] sm:$0xff] %v14997_v29  ;;  %18458 = vst [vmem:[#allocation104_spill] sm:$0xff] %v15002_v49  ;;  %v15009_v10 = vld [vmem:[%s17884_s12 + $0x3c0] ss:$16 sps:$4 sm:$0xff]   ;;  %v15014_v14 = vld [vmem:[%s17884_s12 + $0x3c8] ss:$16 sps:$4 sm:$0xff]  }
 0x402   :  { %5745 = vmatpush1.bf16.msra.mxu0 %v14985_v56  ;;  %5827 = vmatpush1.bf16.msra.mxu1 %v14990_v62  ;;  %v15021_v56 = vld [vmem:[%s17884_s12 + $0x3e4] ss:$16 sps:$4 sm:$0xff]   ;;  %v15026_v62 = vld [vmem:[%s17884_s12 + $0x3ec] ss:$16 sps:$4 sm:$0xff]  }
 0x403   :  { %5746 = vmatprep.subr.bf16.mxu0 %v14997_v29  ;;  %5828 = vmatprep.subr.bf16.mxu1 %v15002_v49  ;;  %v15033_v29 = vld [vmem:[%s17884_s12 + $0x3e0] ss:$16 sps:$4 sm:$0xff]   ;;  %v15038_v49 = vld [vmem:[%s17884_s12 + $0x3e8] ss:$16 sps:$4 sm:$0xff]  }
 0x406   :  { %5747 = vmatpush1.bf16.msra.mxu0 %v15009_v10  ;;  %5829 = vmatpush1.bf16.msra.mxu1 %v15014_v14 }
 0x407   :  { %5748 = vmatprep.subr.bf16.mxu0 %v15021_v56  ;;  %5830 = vmatprep.subr.bf16.mxu1 %v15026_v62 }
 0x40a   :  { %5749 = vmatpush1.bf16.msra.mxu0 %v15033_v29  ;;  %5831 = vmatpush1.bf16.msra.mxu1 %v15038_v49 }
 0x40b   :  { %5861 = vmatprep.subr.bf16.mxu0 %v14264_v2  ;;  %5943 = vmatprep.subr.bf16.mxu1 %v14269_v48 }
 0x40d   :  { %5751 = vmatmul.mubr.bf16.vlgmr.msra.gmra.mrb[128].mxu0 %v18405_v44  ;;  %5833 = vmatmul.mubr.bf16.vlgmr.msra.gmra.mrb[144].mxu1 %v18405_v44  ;;  %v18459_v44 = vld [vmem:[#allocation28_spill] sm:$0xff] }
 0x40e   :  { %5862 = vmatpush1.bf16.msra.mxu0 %v14276_v46  ;;  %5944 = vmatpush1.bf16.msra.mxu1 %v14281_v0 }
 0x40f   :  { %5863 = vmatprep.subr.bf16.mxu0 %v14288_v43  ;;  %5945 = vmatprep.subr.bf16.mxu1 %v14293_v3 }
 0x412   :  { %5864 = vmatpush1.bf16.msra.mxu0 %v14302_v20  ;;  %5946 = vmatpush1.bf16.msra.mxu1 %v14307_v54 }
 0x413   :  { %5865 = vmatprep.subr.bf16.mxu0 %v14314_v24  ;;  %5947 = vmatprep.subr.bf16.mxu1 %v14319_v55 }
 0x416   :  { %5866 = vmatpush1.bf16.msra.mxu0 %v14328_v45  ;;  %5948 = vmatpush1.bf16.msra.mxu1 %v14333_v22 }
 0x417   :  { %5867 = vmatprep.subr.bf16.mxu0 %v14340_v1  ;;  %5949 = vmatprep.subr.bf16.mxu1 %v14345_v7 }
 0x41a   :  { %5868 = vmatpush1.bf16.msra.mxu0 %v14352_v60  ;;  %5950 = vmatpush1.bf16.msra.mxu1 %v14357_v33 }
 0x41b   :  { %5869 = vmatprep.subr.bf16.mxu0 %v14364_v9  ;;  %5951 = vmatprep.subr.bf16.mxu1 %v14369_v41 }
 0x41e   :  { %5870 = vmatpush1.bf16.msra.mxu0 %v14376_v58  ;;  %5952 = vmatpush1.bf16.msra.mxu1 %v14381_v6 }
 0x41f   :  { %5871 = vmatprep.subr.bf16.mxu0 %v14388_v28  ;;  %5953 = vmatprep.subr.bf16.mxu1 %v14393_v26 }
 0x422   :  { %5872 = vmatpush1.bf16.msra.mxu0 %v14400_v16  ;;  %5954 = vmatpush1.bf16.msra.mxu1 %v14405_v11 }
 0x423   :  { %5873 = vmatprep.subr.bf16.mxu0 %v14412_v18  ;;  %5955 = vmatprep.subr.bf16.mxu1 %v14417_v34 }
 0x426   :  { %5874 = vmatpush1.bf16.msra.mxu0 %v14424_v61  ;;  %5956 = vmatpush1.bf16.msra.mxu1 %v14429_v57 }
 0x427   :  { %5875 = vmatprep.subr.bf16.mxu0 %v14436_v30  ;;  %5957 = vmatprep.subr.bf16.mxu1 %v14441_v39 }
 0x42a   :  { %5876 = vmatpush1.bf16.msra.mxu0 %v14448_v19  ;;  %5958 = vmatpush1.bf16.msra.mxu1 %v14453_v37 }
 0x42b   :  { %5877 = vmatprep.subr.bf16.mxu0 %v14460_v59  ;;  %5959 = vmatprep.subr.bf16.mxu1 %v14465_v4 }
 0x42e   :  { %5878 = vmatpush1.bf16.msra.mxu0 %v14472_v42  ;;  %5960 = vmatpush1.bf16.msra.mxu1 %v14477_v50 }
 0x42f   :  { %5879 = vmatprep.subr.bf16.mxu0 %v14484_v8  ;;  %5961 = vmatprep.subr.bf16.mxu1 %v14489_v12  ;;  %v18460_v8 = vld [vmem:[#allocation29_spill] sm:$0xff]  ;;  %v18461_v12 = vld [vmem:[#allocation30_spill] sm:$0xff] }
 0x432   :  { %5880 = vmatpush1.bf16.msra.mxu0 %v14496_v31  ;;  %5962 = vmatpush1.bf16.msra.mxu1 %v14501_v32  ;;  %v18462_v31 = vld [vmem:[#allocation31_spill] sm:$0xff]  ;;  %v18463_v32 = vld [vmem:[#allocation32_spill] sm:$0xff] }
 0x433   :  { %5881 = vmatprep.subr.bf16.mxu0 %v14508_v36  ;;  %5963 = vmatprep.subr.bf16.mxu1 %v14513_v17  ;;  %v18464_v36 = vld [vmem:[#allocation33_spill] sm:$0xff]  ;;  %v18465_v17 = vld [vmem:[#allocation34_spill] sm:$0xff] }
 0x436   :  { %5882 = vmatpush1.bf16.msra.mxu0 %v14520_v38  ;;  %5964 = vmatpush1.bf16.msra.mxu1 %v14525_v23  ;;  %v18466_v38 = vld [vmem:[#allocation35_spill] sm:$0xff]  ;;  %v18467_v23 = vld [vmem:[#allocation36_spill] sm:$0xff] }
 0x437   :  { %5883 = vmatprep.subr.bf16.mxu0 %v14532_v21  ;;  %5965 = vmatprep.subr.bf16.mxu1 %v14537_v47  ;;  %v18468_v21 = vld [vmem:[#allocation37_spill] sm:$0xff]  ;;  %v18469_v47 = vld [vmem:[#allocation38_spill] sm:$0xff] }
 0x43a   :  { %5884 = vmatpush1.bf16.msra.mxu0 %v18459_v44  ;;  %5966 = vmatpush1.bf16.msra.mxu1 %v18460_v8  ;;  %v18470_v44 = vld [vmem:[#allocation39_spill] sm:$0xff]  ;;  %v18471_v8 = vld [vmem:[#allocation40_spill] sm:$0xff] }
 0x43b   :  { %5885 = vmatprep.subr.bf16.mxu0 %v18461_v12  ;;  %5967 = vmatprep.subr.bf16.mxu1 %v18462_v31  ;;  %v18472_v12 = vld [vmem:[#allocation41_spill] sm:$0xff]  ;;  %v18473_v31 = vld [vmem:[#allocation42_spill] sm:$0xff] }
 0x43e   :  { %5886 = vmatpush1.bf16.msra.mxu0 %v18463_v32  ;;  %5968 = vmatpush1.bf16.msra.mxu1 %v18464_v36  ;;  %v18474_v32 = vld [vmem:[#allocation43_spill] sm:$0xff]  ;;  %v18475_v36 = vld [vmem:[#allocation44_spill] sm:$0xff] }
 0x43f   :  { %5887 = vmatprep.subr.bf16.mxu0 %v18465_v17  ;;  %5969 = vmatprep.subr.bf16.mxu1 %v18466_v38  ;;  %v18476_v17 = vld [vmem:[#allocation45_spill] sm:$0xff]  ;;  %v18477_v38 = vld [vmem:[#allocation46_spill] sm:$0xff] }
 0x442   :  { %5888 = vmatpush1.bf16.msra.mxu0 %v18467_v23  ;;  %5970 = vmatpush1.bf16.msra.mxu1 %v18468_v21  ;;  %v18478_v23 = vld [vmem:[#allocation47_spill] sm:$0xff] }
 0x443   :  { %5889 = vmatprep.subr.bf16.mxu0 %v18469_v47  ;;  %5971 = vmatprep.subr.bf16.mxu1 %v18470_v44  ;;  %v15115_v44 = vld [vmem:[%s17887_s13] sm:$0xf] }
 0x446   :  { %5890 = vmatpush1.bf16.msra.mxu0 %v18471_v8  ;;  %5972 = vmatpush1.bf16.msra.mxu1 %v18472_v12  ;;  %v18479_v8 = vld [vmem:[#allocation3_spill] sm:$0xff] }
 0x447   :  { %5891 = vmatprep.subr.bf16.mxu0 %v18473_v31  ;;  %5973 = vmatprep.subr.bf16.mxu1 %v18474_v32  ;;  %v15119_v12 = vrot.slane %v15115_v44, %v18479_v8  ;;  %v18480_v31 = vld [vmem:[#allocation5_spill] sm:$0xff] }
 0x448   :  { %v15123_v32 = vrot.slane %v15115_v44, %v18480_v31 }
 0x44a   :  { %5892 = vmatpush1.bf16.msra.mxu0 %v18475_v36  ;;  %5974 = vmatpush1.bf16.msra.mxu1 %v18476_v17  ;;  %v18481_v36 = vld [vmem:[#allocation6_spill] sm:$0xff] }
 0x44b   :  { %5902 = vmatprep.subr.bf16.mxu0 %v18477_v38  ;;  %5984 = vmatprep.subr.bf16.mxu1 %v18478_v23  ;;  %v15127_v17 = vrot.slane %v15115_v44, %v18481_v36 }
 0x44d   :  { %18482 = vst [vmem:[#allocation105_spill] sm:$0xff] %v15127_v17 }
 0x4e0   :  { %v5752_v38 = vpop.f32.mrb[128].mxu0  ;;  %v15129_v47 = vpop.f32.mrb[144].mxu1 }
 0x4e1   :  { %v10362_v23 = vadd.f32 %v5752_v38, %v15119_v12  ;;  %v5754_v21 = vpop.f32.mrb[129].mxu0  ;;  %v5836_v50 = vpop.f32.mrb[145].mxu1 }
 0x4e2   :  { %v10363_v42 = vadd.f32 %v5754_v21, %v15123_v32  ;;  %v10365_v8 = vadd.f32 %v5836_v50, %v15127_v17  ;;  %v5756_v4 = vpop.f32.mrb[130].mxu0  ;;  %v5838_v59 = vpop.f32.mrb[146].mxu1  ;;  %v18489_v50 = vld [vmem:[#allocation51_spill] sm:$0xff] }
 0x4e3   :  { %v5757_v37 = vpop.f32.mrb[131].mxu0  ;;  %v5839_v31 = vpop.f32.mrb[147].mxu1  ;;  %10999 = vtanh.f32 %v10362_v23  ;;  %v18486_v59 = vld [vmem:[#allocation48_spill] sm:$0xff]  ;;  %v18487_v4 = vld [vmem:[#allocation49_spill] sm:$0xff]  ;;  %v18492_v23 = vld [vmem:[#allocation54_spill] sm:$0xff] }
 0x4e4   :  { %11001 = vtanh.f32 %v10363_v42  ;;  %v18488_v42 = vld [vmem:[#allocation50_spill] sm:$0xff]  ;;  %v18491_v31 = vld [vmem:[#allocation53_spill] sm:$0xff] }
 0x4e5   :  { %11003 = vtanh.f32 %v10365_v8  ;;  %v18490_v8 = vld [vmem:[#allocation52_spill] sm:$0xff] }
 0x4ed   :  { %v15134_v36 = vpop.eup %10999 }
 0x4ee   :  { %18483 = vst [vmem:[#allocation106_spill] sm:$0xff] %v15134_v36  ;;  %v15136_v19 = vpop.eup %11001  ;;  %v5857_v21 = vpack.c.bf16 %v15134_v36, %v15134_v36  ;;  %v18497_v36 = vld [vmem:[#allocation59_spill] sm:$0xff] }
 0x4ef   :  { %18484 = vst [vmem:[#allocation107_spill] sm:$0xff] %v15136_v19  ;;  %v15138_v39 = vpop.eup %11003  ;;  %v5858_v38 = vpack.c.bf16 %v15136_v19, %v15136_v19  ;;  %v18496_v19 = vld [vmem:[#allocation58_spill] sm:$0xff] }
 0x4f0   :  { %18485 = vst [vmem:[#allocation108_spill] sm:$0xff] %v15138_v39  ;;  %v5860_v37 = vpack.c.bf16 %v15138_v39, %v15138_v39  ;;  %v18495_v39 = vld [vmem:[#allocation57_spill] sm:$0xff] }
 0x4f1   :  { %5893 = vmatprep.mubr.bf16.mxu0 %v5858_v38  ;;  %5975 = vmatprep.mubr.bf16.mxu1 %v5858_v38  ;;  %v18493_v38 = vld [vmem:[#allocation55_spill] sm:$0xff] }
 0x4f2   :  { %5894 = vmatmul.mubr.bf16.vlgmr.msra.gmra.mrb[132].mxu0 %v5857_v21  ;;  %5976 = vmatmul.mubr.bf16.vlgmr.msra.gmra.mrb[148].mxu1 %v5857_v21  ;;  %v18494_v21 = vld [vmem:[#allocation56_spill] sm:$0xff] }
 0x4f3   :  { %5903 = vmatpush1.bf16.msra.mxu0 %v18486_v59  ;;  %5985 = vmatpush1.bf16.msra.mxu1 %v18487_v4 }
 0x4f4   :  { %5934 = vmatprep.mubr.bf16.mxu0 %v5860_v37  ;;  %6016 = vmatprep.mubr.bf16.mxu1 %v5860_v37  ;;  %v18498_v37 = vld [vmem:[#allocation60_spill] sm:$0xff] }
 0x4f5   :  { %5904 = vmatprep.subr.bf16.mxu0 %v18488_v42  ;;  %5986 = vmatprep.subr.bf16.mxu1 %v18489_v50  ;;  %v18499_v42 = vld [vmem:[#allocation61_spill] sm:$0xff]  ;;  %v18500_v50 = vld [vmem:[#allocation62_spill] sm:$0xff] }
 0x4f7   :  { %5905 = vmatpush1.bf16.msra.mxu0 %v18490_v8  ;;  %5987 = vmatpush1.bf16.msra.mxu1 %v18491_v31  ;;  %v18501_v8 = vld [vmem:[#allocation63_spill] sm:$0xff]  ;;  %v18502_v31 = vld [vmem:[#allocation64_spill] sm:$0xff] }
 0x4f8   :  { %5906 = vmatprep.subr.bf16.mxu0 %v18492_v23  ;;  %5988 = vmatprep.subr.bf16.mxu1 %v18493_v38  ;;  %v18503_v23 = vld [vmem:[#allocation65_spill] sm:$0xff]  ;;  %v18504_v38 = vld [vmem:[#allocation66_spill] sm:$0xff] }
 0x4fb   :  { %5907 = vmatpush1.bf16.msra.mxu0 %v18494_v21  ;;  %5989 = vmatpush1.bf16.msra.mxu1 %v18495_v39  ;;  %v18505_v21 = vld [vmem:[#allocation67_spill] sm:$0xff] }
 0x4fc   :  { %5908 = vmatprep.subr.bf16.mxu0 %v18496_v19  ;;  %5990 = vmatprep.subr.bf16.mxu1 %v18497_v36 }
 0x4ff   :  { %5909 = vmatpush1.bf16.msra.mxu0 %v18498_v37  ;;  %5991 = vmatpush1.bf16.msra.mxu1 %v18499_v42 }
 0x500   :  { %5910 = vmatprep.subr.bf16.mxu0 %v18500_v50  ;;  %5992 = vmatprep.subr.bf16.mxu1 %v18501_v8 }
 0x503   :  { %5911 = vmatpush1.bf16.msra.mxu0 %v18502_v31  ;;  %5993 = vmatpush1.bf16.msra.mxu1 %v18503_v23 }
 0x504   :  { %5912 = vmatprep.subr.bf16.mxu0 %v18504_v38  ;;  %5994 = vmatprep.subr.bf16.mxu1 %v18505_v21 }
 0x507   :  { %5913 = vmatpush1.bf16.msra.mxu0 %v14788_v51  ;;  %5995 = vmatpush1.bf16.msra.mxu1 %v14793_v13  ;;  %v18506_v51 = vld [vmem:[#allocation80_spill] sm:$0xff]  ;;  %v18507_v13 = vld [vmem:[#allocation81_spill] sm:$0xff] }
 0x508   :  { %5914 = vmatprep.subr.bf16.mxu0 %v14800_v27  ;;  %5996 = vmatprep.subr.bf16.mxu1 %v14805_v5  ;;  %v18508_v27 = vld [vmem:[#allocation82_spill] sm:$0xff]  ;;  %v18509_v5 = vld [vmem:[#allocation83_spill] sm:$0xff] }
 0x50b   :  { %5915 = vmatpush1.bf16.msra.mxu0 %v14815_v35  ;;  %5997 = vmatpush1.bf16.msra.mxu1 %v14820_v25  ;;  %v18510_v35 = vld [vmem:[#allocation84_spill] sm:$0xff]  ;;  %v18511_v25 = vld [vmem:[#allocation85_spill] sm:$0xff] }
 0x50c   :  { %5916 = vmatprep.subr.bf16.mxu0 %v14827_v63  ;;  %5998 = vmatprep.subr.bf16.mxu1 %v14832_v53  ;;  %v18512_v63 = vld [vmem:[#allocation86_spill] sm:$0xff]  ;;  %v18513_v53 = vld [vmem:[#allocation87_spill] sm:$0xff] }
 0x50f   :  { %5917 = vmatpush1.bf16.msra.mxu0 %v14841_v15  ;;  %5999 = vmatpush1.bf16.msra.mxu1 %v14846_v52  ;;  %v18514_v15 = vld [vmem:[#allocation88_spill] sm:$0xff] }
 0x510   :  { %5918 = vmatprep.subr.bf16.mxu0 %v14853_v40  ;;  %6000 = vmatprep.subr.bf16.mxu1 %v18506_v51  ;;  %v18515_v52 = vld [vmem:[#allocation4_spill] sm:$0xff]  ;;  %v18517_v51 = vld [vmem:[#allocation89_spill] sm:$0xff] }
 0x511   :  { %v15188_v40 = vrot.slane %v15115_v44, %v18515_v52  ;;  %v18525_v44 = vld [vmem:[#allocation97_spill] sm:$0xff]  ;;  %v18526_v52 = vld [vmem:[#allocation98_spill] sm:$0xff] }
 0x513   :  { %5919 = vmatpush1.bf16.msra.mxu0 %v18507_v13  ;;  %6001 = vmatpush1.bf16.msra.mxu1 %v18508_v27  ;;  %18516 = vst [vmem:[#allocation48_spill] sm:$0xff] %v15188_v40  ;;  %v18518_v13 = vld [vmem:[#allocation90_spill] sm:$0xff]  ;;  %v18519_v27 = vld [vmem:[#allocation91_spill] sm:$0xff] }
 0x514   :  { %5920 = vmatprep.subr.bf16.mxu0 %v18509_v5  ;;  %6002 = vmatprep.subr.bf16.mxu1 %v18510_v35  ;;  %v18520_v5 = vld [vmem:[#allocation92_spill] sm:$0xff] }
 0x515   :  { %v18524_v35 = vld [vmem:[#allocation96_spill] sm:$0xff] }
 0x517   :  { %5921 = vmatpush1.bf16.msra.mxu0 %v18511_v25  ;;  %6003 = vmatpush1.bf16.msra.mxu1 %v18512_v63  ;;  %v10364_v25 = vadd.f32 %v15129_v47, %v15188_v40  ;;  %v18521_v63 = vld [vmem:[#allocation93_spill] sm:$0xff]  ;;  %v18530_v47 = vld [vmem:[#allocation102_spill] sm:$0xff] }
 0x518   :  { %5922 = vmatprep.subr.bf16.mxu0 %v18513_v53  ;;  %6004 = vmatprep.subr.bf16.mxu1 %v18514_v15  ;;  %v18522_v53 = vld [vmem:[#allocation94_spill] sm:$0xff]  ;;  %v18523_v15 = vld [vmem:[#allocation95_spill] sm:$0xff] }
 0x519   :  { %11005 = vtanh.f32 %v10364_v25 }
 0x51b   :  { %5923 = vmatpush1.bf16.msra.mxu0 %v18517_v51  ;;  %6005 = vmatpush1.bf16.msra.mxu1 %v18518_v13  ;;  %v18527_v13 = vld [vmem:[#allocation99_spill] sm:$0xff] }
 0x51c   :  { %5924 = vmatprep.subr.bf16.mxu0 %v18519_v27  ;;  %6006 = vmatprep.subr.bf16.mxu1 %v18520_v5  ;;  %v18528_v27 = vld [vmem:[#allocation100_spill] sm:$0xff]  ;;  %v18529_v5 = vld [vmem:[#allocation101_spill] sm:$0xff] }
 0x51f   :  { %5925 = vmatpush1.bf16.msra.mxu0 %v18521_v63  ;;  %6007 = vmatpush1.bf16.msra.mxu1 %v18522_v53  ;;  %v18531_v63 = vld [vmem:[#allocation103_spill] sm:$0xff]  ;;  %v18532_v53 = vld [vmem:[#allocation104_spill] sm:$0xff] }
 0x520   :  { %5926 = vmatprep.subr.bf16.mxu0 %v18523_v15  ;;  %6008 = vmatprep.subr.bf16.mxu1 %v18524_v35 }
 0x523   :  { %5927 = vmatpush1.bf16.msra.mxu0 %v18525_v44  ;;  %6009 = vmatpush1.bf16.msra.mxu1 %v18526_v52  ;;  %v15212_v25 = vpop.eup %11005 }
 0x524   :  { %5928 = vmatprep.subr.bf16.mxu0 %v18527_v13  ;;  %6010 = vmatprep.subr.bf16.mxu1 %v18528_v27 }
 0x527   :  { %5929 = vmatpush1.bf16.msra.mxu0 %v18529_v5  ;;  %6011 = vmatpush1.bf16.msra.mxu1 %v18530_v47  ;;  %v5859_v47 = vpack.c.bf16 %v15212_v25, %v15212_v25 }
 0x528   :  { %5930 = vmatprep.subr.bf16.mxu0 %v18531_v63  ;;  %6012 = vmatprep.subr.bf16.mxu1 %v18532_v53 }
 0x52b   :  { %5931 = vmatpush1.bf16.msra.mxu0 %v15009_v10  ;;  %6013 = vmatpush1.bf16.msra.mxu1 %v15014_v14 }
 0x52c   :  { %5932 = vmatprep.subr.bf16.mxu0 %v15021_v56  ;;  %6014 = vmatprep.subr.bf16.mxu1 %v15026_v62 }
 0x52f   :  { %5933 = vmatpush1.bf16.msra.mxu0 %v15033_v29  ;;  %6015 = vmatpush1.bf16.msra.mxu1 %v15038_v49 }
 0x530   :  { %6049 = vmatprep.subr.bf16.mxu0 %v14264_v2  ;;  %6131 = vmatprep.subr.bf16.mxu1 %v14269_v48  ;;  %v18533_v2 = vld [vmem:[#allocation11_spill] sm:$0xff]  ;;  %v18534_v48 = vld [vmem:[#allocation12_spill] sm:$0xff] }
 0x532   :  { %5935 = vmatmul.mubr.bf16.vlgmr.msra.gmra.mrb[132].mxu0 %v5859_v47  ;;  %6017 = vmatmul.mubr.bf16.vlgmr.msra.gmra.mrb[148].mxu1 %v5859_v47  ;;  %v18562_v47 = vld [vmem:[#allocation40_spill] sm:$0xff] }
 0x533   :  { %6050 = vmatpush1.bf16.msra.mxu0 %v14276_v46  ;;  %6132 = vmatpush1.bf16.msra.mxu1 %v14281_v0  ;;  %v18535_v46 = vld [vmem:[#allocation13_spill] sm:$0xff]  ;;  %v18536_v0 = vld [vmem:[#allocation14_spill] sm:$0xff] }
 0x534   :  { %6051 = vmatprep.subr.bf16.mxu0 %v14288_v43  ;;  %6133 = vmatprep.subr.bf16.mxu1 %v14293_v3  ;;  %v18537_v43 = vld [vmem:[#allocation15_spill] sm:$0xff]  ;;  %v18538_v3 = vld [vmem:[#allocation16_spill] sm:$0xff] }
 0x537   :  { %6052 = vmatpush1.bf16.msra.mxu0 %v14302_v20  ;;  %6134 = vmatpush1.bf16.msra.mxu1 %v14307_v54  ;;  %v18539_v20 = vld [vmem:[#allocation17_spill] sm:$0xff]  ;;  %v18540_v54 = vld [vmem:[#allocation18_spill] sm:$0xff] }
 0x538   :  { %6053 = vmatprep.subr.bf16.mxu0 %v14314_v24  ;;  %6135 = vmatprep.subr.bf16.mxu1 %v14319_v55  ;;  %v18541_v24 = vld [vmem:[#allocation19_spill] sm:$0xff]  ;;  %v18542_v55 = vld [vmem:[#allocation20_spill] sm:$0xff] }
 0x53b   :  { %6054 = vmatpush1.bf16.msra.mxu0 %v14328_v45  ;;  %6136 = vmatpush1.bf16.msra.mxu1 %v14333_v22  ;;  %v18543_v45 = vld [vmem:[#allocation21_spill] sm:$0xff]  ;;  %v18544_v22 = vld [vmem:[#allocation22_spill] sm:$0xff] }
 0x53c   :  { %6055 = vmatprep.subr.bf16.mxu0 %v14340_v1  ;;  %6137 = vmatprep.subr.bf16.mxu1 %v14345_v7  ;;  %v18545_v1 = vld [vmem:[#allocation23_spill] sm:$0xff]  ;;  %v18546_v7 = vld [vmem:[#allocation24_spill] sm:$0xff] }
 0x53f   :  { %6056 = vmatpush1.bf16.msra.mxu0 %v14352_v60  ;;  %6138 = vmatpush1.bf16.msra.mxu1 %v14357_v33  ;;  %v18547_v60 = vld [vmem:[#allocation25_spill] sm:$0xff]  ;;  %v18548_v33 = vld [vmem:[#allocation26_spill] sm:$0xff] }
 0x540   :  { %6057 = vmatprep.subr.bf16.mxu0 %v14364_v9  ;;  %6139 = vmatprep.subr.bf16.mxu1 %v14369_v41  ;;  %v18549_v9 = vld [vmem:[#allocation27_spill] sm:$0xff]  ;;  %v18550_v41 = vld [vmem:[#allocation28_spill] sm:$0xff] }
 0x543   :  { %6058 = vmatpush1.bf16.msra.mxu0 %v14376_v58  ;;  %6140 = vmatpush1.bf16.msra.mxu1 %v14381_v6  ;;  %v18551_v58 = vld [vmem:[#allocation29_spill] sm:$0xff]  ;;  %v18552_v6 = vld [vmem:[#allocation30_spill] sm:$0xff] }
 0x544   :  { %6059 = vmatprep.subr.bf16.mxu0 %v14388_v28  ;;  %6141 = vmatprep.subr.bf16.mxu1 %v14393_v26  ;;  %v18553_v28 = vld [vmem:[#allocation31_spill] sm:$0xff]  ;;  %v18554_v26 = vld [vmem:[#allocation32_spill] sm:$0xff] }
 0x547   :  { %6060 = vmatpush1.bf16.msra.mxu0 %v14400_v16  ;;  %6142 = vmatpush1.bf16.msra.mxu1 %v14405_v11  ;;  %v18555_v16 = vld [vmem:[#allocation33_spill] sm:$0xff]  ;;  %v18556_v11 = vld [vmem:[#allocation34_spill] sm:$0xff] }
 0x548   :  { %6061 = vmatprep.subr.bf16.mxu0 %v14412_v18  ;;  %6143 = vmatprep.subr.bf16.mxu1 %v14417_v34  ;;  %v18557_v18 = vld [vmem:[#allocation35_spill] sm:$0xff]  ;;  %v18558_v34 = vld [vmem:[#allocation36_spill] sm:$0xff] }
 0x54b   :  { %6062 = vmatpush1.bf16.msra.mxu0 %v14424_v61  ;;  %6144 = vmatpush1.bf16.msra.mxu1 %v14429_v57  ;;  %v18559_v61 = vld [vmem:[#allocation37_spill] sm:$0xff]  ;;  %v18560_v57 = vld [vmem:[#allocation38_spill] sm:$0xff] }
 0x54c   :  { %6063 = vmatprep.subr.bf16.mxu0 %v14436_v30  ;;  %6145 = vmatprep.subr.bf16.mxu1 %v18533_v2  ;;  %v18561_v30 = vld [vmem:[#allocation39_spill] sm:$0xff]  ;;  %v18563_v2 = vld [vmem:[#allocation41_spill] sm:$0xff] }
 0x54f   :  { %6064 = vmatpush1.bf16.msra.mxu0 %v18534_v48  ;;  %6146 = vmatpush1.bf16.msra.mxu1 %v18535_v46  ;;  %v18564_v48 = vld [vmem:[#allocation42_spill] sm:$0xff]  ;;  %v18565_v46 = vld [vmem:[#allocation43_spill] sm:$0xff] }
 0x550   :  { %6065 = vmatprep.subr.bf16.mxu0 %v18536_v0  ;;  %6147 = vmatprep.subr.bf16.mxu1 %v18537_v43  ;;  %v18566_v0 = vld [vmem:[#allocation44_spill] sm:$0xff]  ;;  %v18567_v43 = vld [vmem:[#allocation45_spill] sm:$0xff] }
 0x553   :  { %6066 = vmatpush1.bf16.msra.mxu0 %v18538_v3  ;;  %6148 = vmatpush1.bf16.msra.mxu1 %v18539_v20  ;;  %v18568_v3 = vld [vmem:[#allocation46_spill] sm:$0xff]  ;;  %v18569_v20 = vld [vmem:[#allocation47_spill] sm:$0xff] }
 0x554   :  { %6067 = vmatprep.subr.bf16.mxu0 %v18540_v54  ;;  %6149 = vmatprep.subr.bf16.mxu1 %v18541_v24 }
 0x557   :  { %6068 = vmatpush1.bf16.msra.mxu0 %v18542_v55  ;;  %6150 = vmatpush1.bf16.msra.mxu1 %v18543_v45 }
 0x558   :  { %6069 = vmatprep.subr.bf16.mxu0 %v18544_v22  ;;  %6151 = vmatprep.subr.bf16.mxu1 %v18545_v1 }
 0x55b   :  { %6070 = vmatpush1.bf16.msra.mxu0 %v18546_v7  ;;  %6152 = vmatpush1.bf16.msra.mxu1 %v18547_v60 }
 0x55c   :  { %6071 = vmatprep.subr.bf16.mxu0 %v18548_v33  ;;  %6153 = vmatprep.subr.bf16.mxu1 %v18549_v9 }
 0x55f   :  { %6072 = vmatpush1.bf16.msra.mxu0 %v18550_v41  ;;  %6154 = vmatpush1.bf16.msra.mxu1 %v18551_v58 }
 0x560   :  { %6073 = vmatprep.subr.bf16.mxu0 %v18552_v6  ;;  %6155 = vmatprep.subr.bf16.mxu1 %v18553_v28 }
 0x563   :  { %6074 = vmatpush1.bf16.msra.mxu0 %v18554_v26  ;;  %6156 = vmatpush1.bf16.msra.mxu1 %v18555_v16 }
 0x564   :  { %6075 = vmatprep.subr.bf16.mxu0 %v18556_v11  ;;  %6157 = vmatprep.subr.bf16.mxu1 %v18557_v18  ;;  %v18570_v18 = vld [vmem:[#allocation50_spill] sm:$0xff] }
 0x567   :  { %6076 = vmatpush1.bf16.msra.mxu0 %v18558_v34  ;;  %6158 = vmatpush1.bf16.msra.mxu1 %v18559_v61  ;;  %v18571_v34 = vld [vmem:[#allocation51_spill] sm:$0xff]  ;;  %v18572_v61 = vld [vmem:[#allocation52_spill] sm:$0xff] }
 0x568   :  { %6077 = vmatprep.subr.bf16.mxu0 %v18560_v57  ;;  %6159 = vmatprep.subr.bf16.mxu1 %v18561_v30  ;;  %v18573_v57 = vld [vmem:[#allocation53_spill] sm:$0xff]  ;;  %v18574_v30 = vld [vmem:[#allocation54_spill] sm:$0xff] }
 0x56b   :  { %6078 = vmatpush1.bf16.msra.mxu0 %v18562_v47  ;;  %6160 = vmatpush1.bf16.msra.mxu1 %v18563_v2  ;;  %v18575_v47 = vld [vmem:[#allocation55_spill] sm:$0xff]  ;;  %v18576_v2 = vld [vmem:[#allocation56_spill] sm:$0xff] }
 0x56c   :  { %6079 = vmatprep.subr.bf16.mxu0 %v18564_v48  ;;  %6161 = vmatprep.subr.bf16.mxu1 %v18565_v46  ;;  %v18590_v48 = vld [vmem:[#allocation82_spill] sm:$0xff]  ;;  %v18591_v46 = vld [vmem:[#allocation83_spill] sm:$0xff] }
 0x56f   :  { %6080 = vmatpush1.bf16.msra.mxu0 %v18566_v0  ;;  %6162 = vmatpush1.bf16.msra.mxu1 %v18567_v43  ;;  %v18592_v0 = vld [vmem:[#allocation84_spill] sm:$0xff]  ;;  %v18593_v43 = vld [vmem:[#allocation85_spill] sm:$0xff] }
 0x570   :  { %6090 = vmatprep.subr.bf16.mxu0 %v18568_v3  ;;  %6172 = vmatprep.subr.bf16.mxu1 %v18569_v20  ;;  %v18594_v3 = vld [vmem:[#allocation86_spill] sm:$0xff]  ;;  %v18595_v20 = vld [vmem:[#allocation87_spill] sm:$0xff] }
 0x605   :  { %v5936_v54 = vpop.f32.mrb[132].mxu0  ;;  %v15284_v24 = vpop.f32.mrb[148].mxu1 }
 0x606   :  { %v10366_v55 = vadd.f32 %v5936_v54, %v15119_v12  ;;  %v5938_v45 = vpop.f32.mrb[133].mxu0  ;;  %v6020_v22 = vpop.f32.mrb[149].mxu1  ;;  %v18596_v54 = vld [vmem:[#allocation88_spill] sm:$0xff] }
 0x607   :  { %v10367_v1 = vadd.f32 %v5938_v45, %v15123_v32  ;;  %v10369_v7 = vadd.f32 %v6020_v22, %v15127_v17  ;;  %v5940_v60 = vpop.f32.mrb[134].mxu0  ;;  %v6022_v33 = vpop.f32.mrb[150].mxu1  ;;  %v18598_v45 = vld [vmem:[#allocation91_spill] sm:$0xff]  ;;  %v18599_v22 = vld [vmem:[#allocation92_spill] sm:$0xff] }
 0x608   :  { %v5941_v9 = vpop.f32.mrb[135].mxu0  ;;  %v6023_v41 = vpop.f32.mrb[151].mxu1  ;;  %11007 = vtanh.f32 %v10366_v55  ;;  %v18597_v55 = vld [vmem:[#allocation90_spill] sm:$0xff]  ;;  %v15408_v33 = vld [vmem:[%s17884_s12 + $0x20] ss:$16 sps:$4 sm:$0xff]  }
 0x609   :  { %11009 = vtanh.f32 %v10367_v1  ;;  %v10368_v1 = vadd.f32 %v15284_v24, %v15188_v40  ;;  %v18601_v60 = vld [vmem:[#allocation94_spill] sm:$0xff]  ;;  %v15420_v41 = vld [vmem:[%s17884_s12 + $0x44] ss:$16 sps:$4 sm:$0xff]  }
 0x60a   :  { %11011 = vtanh.f32 %v10369_v7  ;;  %v18600_v7 = vld [vmem:[#allocation93_spill] sm:$0xff]  ;;  %v15402_v24 = vld [vmem:[%s17884_s12 + $0x2c] ss:$16 sps:$4 sm:$0xff]   ;;  %v15414_v9 = vld [vmem:[%s17884_s12 + $0x28] ss:$16 sps:$4 sm:$0xff]  }
 0x60b   :  { %11013 = vtanh.f32 %v10368_v1  ;;  %v15624_v1 = vld [vmem:[%s17884_s12 + $0x140] ss:$16 sps:$4 sm:$0xff]  }
 0x60c   :  { %18617 = vst [vmem:[#allocation96_spill] sm:$0xff] %v15624_v1 }
 0x612   :  { %v15289_v58 = vpop.eup %11007 }
 0x613   :  { %v15291_v6 = vpop.eup %11009  ;;  %v6045_v16 = vpack.c.bf16 %v15289_v58, %v15289_v58 }
 0x614   :  { %v15293_v28 = vpop.eup %11011  ;;  %v6046_v26 = vpack.c.bf16 %v15291_v6, %v15291_v6 }
 0x615   :  { %v6048_v11 = vpack.c.bf16 %v15293_v28, %v15293_v28 }
 0x616   :  { %6081 = vmatprep.mubr.bf16.mxu0 %v6046_v26  ;;  %6163 = vmatprep.mubr.bf16.mxu1 %v6046_v26  ;;  %v15426_v26 = vld [vmem:[%s17884_s12 + $0x4c] ss:$16 sps:$4 sm:$0xff]  }
 0x617   :  { %6082 = vmatmul.mubr.bf16.vlgmr.msra.gmra.mrb[136].mxu0 %v6045_v16  ;;  %6164 = vmatmul.mubr.bf16.vlgmr.msra.gmra.mrb[152].mxu1 %v6045_v16  ;;  %v15432_v16 = vld [vmem:[%s17884_s12 + $0x40] ss:$16 sps:$4 sm:$0xff]  }
 0x618   :  { %6091 = vmatpush1.bf16.msra.mxu0 %v18486_v59  ;;  %6173 = vmatpush1.bf16.msra.mxu1 %v18487_v4  ;;  %v18580_v59 = vld [vmem:[#allocation71_spill] sm:$0xff]  ;;  %v18581_v4 = vld [vmem:[#allocation72_spill] sm:$0xff] }
 0x619   :  { %6122 = vmatprep.mubr.bf16.mxu0 %v6048_v11  ;;  %6204 = vmatprep.mubr.bf16.mxu1 %v6048_v11  ;;  %v15438_v11 = vld [vmem:[%s17884_s12 + $0x48] ss:$16 sps:$4 sm:$0xff]  }
 0x61a   :  { %6092 = vmatprep.subr.bf16.mxu0 %v18570_v18  ;;  %6174 = vmatprep.subr.bf16.mxu1 %v18571_v34  ;;  %v15444_v18 = vld [vmem:[%s17884_s12 + $0x64] ss:$16 sps:$4 sm:$0xff]   ;;  %v15450_v34 = vld [vmem:[%s17884_s12 + $0x6c] ss:$16 sps:$4 sm:$0xff]  }
 0x61c   :  { %6093 = vmatpush1.bf16.msra.mxu0 %v18572_v61  ;;  %6175 = vmatpush1.bf16.msra.mxu1 %v18573_v57  ;;  %v15456_v61 = vld [vmem:[%s17884_s12 + $0x60] ss:$16 sps:$4 sm:$0xff]   ;;  %v15462_v57 = vld [vmem:[%s17884_s12 + $0x68] ss:$16 sps:$4 sm:$0xff]  }
 0x61d   :  { %6094 = vmatprep.subr.bf16.mxu0 %v18574_v30  ;;  %6176 = vmatprep.subr.bf16.mxu1 %v18575_v47  ;;  %v15468_v30 = vld [vmem:[%s17884_s12 + $0x84] ss:$16 sps:$4 sm:$0xff]   ;;  %v15474_v47 = vld [vmem:[%s17884_s12 + $0x8c] ss:$16 sps:$4 sm:$0xff]  }
 0x620   :  { %6095 = vmatpush1.bf16.msra.mxu0 %v18576_v2  ;;  %6177 = vmatpush1.bf16.msra.mxu1 %v18495_v39  ;;  %v18577_v39 = vld [vmem:[#allocation68_spill] sm:$0xff]  ;;  %v15480_v2 = vld [vmem:[%s17884_s12 + $0x80] ss:$16 sps:$4 sm:$0xff]  }
 0x621   :  { %6096 = vmatprep.subr.bf16.mxu0 %v18496_v19  ;;  %6178 = vmatprep.subr.bf16.mxu1 %v18497_v36  ;;  %v18578_v19 = vld [vmem:[#allocation69_spill] sm:$0xff]  ;;  %v18579_v36 = vld [vmem:[#allocation70_spill] sm:$0xff] }
 0x624   :  { %6097 = vmatpush1.bf16.msra.mxu0 %v18498_v37  ;;  %6179 = vmatpush1.bf16.msra.mxu1 %v18499_v42  ;;  %v18582_v42 = vld [vmem:[#allocation73_spill] sm:$0xff] }
 0x625   :  { %6098 = vmatprep.subr.bf16.mxu0 %v18500_v50  ;;  %6180 = vmatprep.subr.bf16.mxu1 %v18501_v8  ;;  %v18583_v50 = vld [vmem:[#allocation74_spill] sm:$0xff]  ;;  %v18584_v8 = vld [vmem:[#allocation75_spill] sm:$0xff]  ;;  %v18589_v37 = vld [vmem:[#allocation81_spill] sm:$0xff] }
 0x628   :  { %6099 = vmatpush1.bf16.msra.mxu0 %v18502_v31  ;;  %6181 = vmatpush1.bf16.msra.mxu1 %v18503_v23  ;;  %v18585_v31 = vld [vmem:[#allocation77_spill] sm:$0xff]  ;;  %v18586_v23 = vld [vmem:[#allocation78_spill] sm:$0xff] }
 0x629   :  { %6100 = vmatprep.subr.bf16.mxu0 %v18504_v38  ;;  %6182 = vmatprep.subr.bf16.mxu1 %v18505_v21  ;;  %v18587_v38 = vld [vmem:[#allocation79_spill] sm:$0xff]  ;;  %v18588_v21 = vld [vmem:[#allocation80_spill] sm:$0xff] }
 0x62c   :  { %6101 = vmatpush1.bf16.msra.mxu0 %v18577_v39  ;;  %6183 = vmatpush1.bf16.msra.mxu1 %v18578_v19  ;;  %v15486_v39 = vld [vmem:[%s17884_s12 + $0x88] ss:$16 sps:$4 sm:$0xff]   ;;  %v15492_v19 = vld [vmem:[%s17884_s12 + $0xa4] ss:$16 sps:$4 sm:$0xff]  }
 0x62d   :  { %6102 = vmatprep.subr.bf16.mxu0 %v18579_v36  ;;  %6184 = vmatprep.subr.bf16.mxu1 %v18580_v59  ;;  %v15498_v36 = vld [vmem:[%s17884_s12 + $0xac] ss:$16 sps:$4 sm:$0xff]   ;;  %v15504_v59 = vld [vmem:[%s17884_s12 + $0xa0] ss:$16 sps:$4 sm:$0xff]  }
 0x630   :  { %6103 = vmatpush1.bf16.msra.mxu0 %v18581_v4  ;;  %6185 = vmatpush1.bf16.msra.mxu1 %v18582_v42  ;;  %v15510_v4 = vld [vmem:[%s17884_s12 + $0xa8] ss:$16 sps:$4 sm:$0xff]   ;;  %v15516_v42 = vld [vmem:[%s17884_s12 + $0xc4] ss:$16 sps:$4 sm:$0xff]  }
 0x631   :  { %6104 = vmatprep.subr.bf16.mxu0 %v18583_v50  ;;  %6186 = vmatprep.subr.bf16.mxu1 %v18584_v8  ;;  %v15522_v50 = vld [vmem:[%s17884_s12 + $0xcc] ss:$16 sps:$4 sm:$0xff]   ;;  %v15528_v8 = vld [vmem:[%s17884_s12 + $0xc0] ss:$16 sps:$4 sm:$0xff]  }
 0x634   :  { %6105 = vmatpush1.bf16.msra.mxu0 %v18585_v31  ;;  %6187 = vmatpush1.bf16.msra.mxu1 %v18586_v23  ;;  %v15534_v31 = vld [vmem:[%s17884_s12 + $0xc8] ss:$16 sps:$4 sm:$0xff]   ;;  %v15540_v23 = vld [vmem:[%s17884_s12 + $0xe4] ss:$16 sps:$4 sm:$0xff]  }
 0x635   :  { %6106 = vmatprep.subr.bf16.mxu0 %v18587_v38  ;;  %6188 = vmatprep.subr.bf16.mxu1 %v18588_v21  ;;  %18603 = vst [vmem:[#allocation49_spill] sm:$0xff] %v15540_v23  ;;  %v15546_v38 = vld [vmem:[%s17884_s12 + $0xec] ss:$16 sps:$4 sm:$0xff]   ;;  %v15552_v21 = vld [vmem:[%s17884_s12 + $0xe0] ss:$16 sps:$4 sm:$0xff]  }
 0x636   :  { %18604 = vst [vmem:[#allocation57_spill] sm:$0xff] %v15546_v38  ;;  %18605 = vst [vmem:[#allocation58_spill] sm:$0xff] %v15552_v21 }
 0x638   :  { %6107 = vmatpush1.bf16.msra.mxu0 %v18589_v37  ;;  %6189 = vmatpush1.bf16.msra.mxu1 %v18590_v48  ;;  %v15558_v37 = vld [vmem:[%s17884_s12 + $0xe8] ss:$16 sps:$4 sm:$0xff]   ;;  %v15564_v48 = vld [vmem:[%s17884_s12 + $0x104] ss:$16 sps:$4 sm:$0xff]  }
 0x639   :  { %6108 = vmatprep.subr.bf16.mxu0 %v18591_v46  ;;  %6190 = vmatprep.subr.bf16.mxu1 %v18592_v0  ;;  %18606 = vst [vmem:[#allocation59_spill] sm:$0xff] %v15558_v37  ;;  %18607 = vst [vmem:[#allocation60_spill] sm:$0xff] %v15564_v48  ;;  %v15570_v46 = vld [vmem:[%s17884_s12 + $0x10c] ss:$16 sps:$4 sm:$0xff]   ;;  %v15576_v0 = vld [vmem:[%s17884_s12 + $0x100] ss:$16 sps:$4 sm:$0xff]  }
 0x63a   :  { %18608 = vst [vmem:[#allocation61_spill] sm:$0xff] %v15570_v46  ;;  %18609 = vst [vmem:[#allocation62_spill] sm:$0xff] %v15576_v0 }
 0x63c   :  { %6109 = vmatpush1.bf16.msra.mxu0 %v18593_v43  ;;  %6191 = vmatpush1.bf16.msra.mxu1 %v18594_v3  ;;  %v15582_v43 = vld [vmem:[%s17884_s12 + $0x108] ss:$16 sps:$4 sm:$0xff]   ;;  %v15588_v3 = vld [vmem:[%s17884_s12 + $0x124] ss:$16 sps:$4 sm:$0xff]  }
 0x63d   :  { %6110 = vmatprep.subr.bf16.mxu0 %v18595_v20  ;;  %6192 = vmatprep.subr.bf16.mxu1 %v18596_v54  ;;  %18610 = vst [vmem:[#allocation63_spill] sm:$0xff] %v15582_v43  ;;  %18611 = vst [vmem:[#allocation64_spill] sm:$0xff] %v15588_v3  ;;  %v15594_v20 = vld [vmem:[%s17884_s12 + $0x12c] ss:$16 sps:$4 sm:$0xff]   ;;  %v15600_v54 = vld [vmem:[%s17884_s12 + $0x120] ss:$16 sps:$4 sm:$0xff]  }
 0x63e   :  { %18612 = vst [vmem:[#allocation65_spill] sm:$0xff] %v15594_v20  ;;  %18613 = vst [vmem:[#allocation66_spill] sm:$0xff] %v15600_v54 }
 0x640   :  { %6111 = vmatpush1.bf16.msra.mxu0 %v18517_v51  ;;  %6193 = vmatpush1.bf16.msra.mxu1 %v18597_v55  ;;  %v18602_v51 = vld [vmem:[#allocation102_spill] sm:$0xff] }
 0x641   :  { %6112 = vmatprep.subr.bf16.mxu0 %v18598_v45  ;;  %6194 = vmatprep.subr.bf16.mxu1 %v18599_v22  ;;  %v15606_v55 = vld [vmem:[%s17884_s12 + $0x128] ss:$16 sps:$4 sm:$0xff]   ;;  %v15612_v45 = vld [vmem:[%s17884_s12 + $0x144] ss:$16 sps:$4 sm:$0xff]   ;;  %v15618_v22 = vld [vmem:[%s17884_s12 + $0x14c] ss:$16 sps:$4 sm:$0xff]  }
 0x642   :  { %18614 = vst [vmem:[#allocation67_spill] sm:$0xff] %v15606_v55  ;;  %18615 = vst [vmem:[#allocation89_spill] sm:$0xff] %v15612_v45 }
 0x643   :  { %18616 = vst [vmem:[#allocation95_spill] sm:$0xff] %v15618_v22 }
 0x644   :  { %6113 = vmatpush1.bf16.msra.mxu0 %v18600_v7  ;;  %6195 = vmatpush1.bf16.msra.mxu1 %v18601_v60  ;;  %v15630_v7 = vld [vmem:[%s17884_s12 + $0x148] ss:$16 sps:$4 sm:$0xff]   ;;  %v15636_v60 = vld [vmem:[%s17884_s12 + $0x164] ss:$16 sps:$4 sm:$0xff]  }
 0x645   :  { %6114 = vmatprep.subr.bf16.mxu0 %v18523_v15  ;;  %6196 = vmatprep.subr.bf16.mxu1 %v18524_v35  ;;  %v15363_v35 = vpop.eup %11013  ;;  %v15384_v15 = vld [vmem:[%s17884_s12] ss:$16 sps:$4 sm:$0xff]   ;;  %18618 = vst [vmem:[#allocation97_spill] sm:$0xff] %v15630_v7  ;;  %18619 = vst [vmem:[#allocation98_spill] sm:$0xff] %v15636_v60 }
 0x648   :  { %6115 = vmatpush1.bf16.msra.mxu0 %v18525_v44  ;;  %6197 = vmatpush1.bf16.msra.mxu1 %v18526_v52  ;;  %v15390_v52 = vld [vmem:[%s17884_s12 + $0x8] ss:$16 sps:$4 sm:$0xff]   ;;  %v15396_v44 = vld [vmem:[%s17884_s12 + $0x24] ss:$16 sps:$4 sm:$0xff]  }
 0x649   :  { %6116 = vmatprep.subr.bf16.mxu0 %v18527_v13  ;;  %6198 = vmatprep.subr.bf16.mxu1 %v18528_v27  ;;  %v6047_v13 = vpack.c.bf16 %v15363_v35, %v15363_v35  ;;  %v15372_v27 = vld [vmem:[%s17884_s12 + $0x4] ss:$16 sps:$4 sm:$0xff]  }
 0x64c   :  { %6117 = vmatpush1.bf16.msra.mxu0 %v18529_v5  ;;  %6199 = vmatpush1.bf16.msra.mxu1 %v18602_v51  ;;  %v15378_v5 = vld [vmem:[%s17884_s12 + $0xc] ss:$16 sps:$4 sm:$0xff]  }
 0x64d   :  { %6118 = vmatprep.subr.bf16.mxu0 %v18531_v63  ;;  %6200 = vmatprep.subr.bf16.mxu1 %v18532_v53  ;;  %v15642_v51 = vld [vmem:[%s17884_s12 + $0x16c] ss:$16 sps:$4 sm:$0xff]  }
 0x64e   :  { %18620 = vst [vmem:[#allocation99_spill] sm:$0xff] %v15642_v51 }
 0x650   :  { %6119 = vmatpush1.bf16.msra.mxu0 %v15009_v10  ;;  %6201 = vmatpush1.bf16.msra.mxu1 %v15014_v14 }
 0x651   :  { %6120 = vmatprep.subr.bf16.mxu0 %v15021_v56  ;;  %6202 = vmatprep.subr.bf16.mxu1 %v15026_v62 }
 0x654   :  { %6121 = vmatpush1.bf16.msra.mxu0 %v15033_v29  ;;  %6203 = vmatpush1.bf16.msra.mxu1 %v15038_v49 }
 0x655   :  { %6237 = vmatprep.subr.bf16.mxu0 %v15372_v27  ;;  %6319 = vmatprep.subr.bf16.mxu1 %v15378_v5 }
 0x657   :  { %6123 = vmatmul.mubr.bf16.vlgmr.msra.gmra.mrb[136].mxu0 %v6047_v13  ;;  %6205 = vmatmul.mubr.bf16.vlgmr.msra.gmra.mrb[152].mxu1 %v6047_v13  ;;  %v15648_v13 = vld [vmem:[%s17884_s12 + $0x160] ss:$16 sps:$4 sm:$0xff]  }
 0x658   :  { %6238 = vmatpush1.bf16.msra.mxu0 %v15384_v15  ;;  %6320 = vmatpush1.bf16.msra.mxu1 %v15390_v52  ;;  %18621 = vst [vmem:[#allocation100_spill] sm:$0xff] %v15648_v13 }
 0x659   :  { %6239 = vmatprep.subr.bf16.mxu0 %v15396_v44  ;;  %6321 = vmatprep.subr.bf16.mxu1 %v15402_v24 }
 0x65c   :  { %6240 = vmatpush1.bf16.msra.mxu0 %v15408_v33  ;;  %6322 = vmatpush1.bf16.msra.mxu1 %v15414_v9 }
 0x65d   :  { %6241 = vmatprep.subr.bf16.mxu0 %v15420_v41  ;;  %6323 = vmatprep.subr.bf16.mxu1 %v15426_v26 }
 0x660   :  { %6242 = vmatpush1.bf16.msra.mxu0 %v15432_v16  ;;  %6324 = vmatpush1.bf16.msra.mxu1 %v15438_v11 }
 0x661   :  { %6243 = vmatprep.subr.bf16.mxu0 %v15444_v18  ;;  %6325 = vmatprep.subr.bf16.mxu1 %v15450_v34 }
 0x664   :  { %6244 = vmatpush1.bf16.msra.mxu0 %v15456_v61  ;;  %6326 = vmatpush1.bf16.msra.mxu1 %v15462_v57 }
 0x665   :  { %6245 = vmatprep.subr.bf16.mxu0 %v15468_v30  ;;  %6327 = vmatprep.subr.bf16.mxu1 %v15474_v47 }
 0x668   :  { %6246 = vmatpush1.bf16.msra.mxu0 %v15480_v2  ;;  %6328 = vmatpush1.bf16.msra.mxu1 %v15486_v39 }
 0x669   :  { %6247 = vmatprep.subr.bf16.mxu0 %v15492_v19  ;;  %6329 = vmatprep.subr.bf16.mxu1 %v15498_v36 }
 0x66c   :  { %6248 = vmatpush1.bf16.msra.mxu0 %v15504_v59  ;;  %6330 = vmatpush1.bf16.msra.mxu1 %v15510_v4 }
 0x66d   :  { %6249 = vmatprep.subr.bf16.mxu0 %v15516_v42  ;;  %6331 = vmatprep.subr.bf16.mxu1 %v15522_v50 }
 0x670   :  { %6250 = vmatpush1.bf16.msra.mxu0 %v15528_v8  ;;  %6332 = vmatpush1.bf16.msra.mxu1 %v15534_v31 }
 0x671   :  { %6251 = vmatprep.subr.bf16.mxu0 %v15540_v23  ;;  %6333 = vmatprep.subr.bf16.mxu1 %v15546_v38 }
 0x674   :  { %6252 = vmatpush1.bf16.msra.mxu0 %v15552_v21  ;;  %6334 = vmatpush1.bf16.msra.mxu1 %v15558_v37 }
 0x675   :  { %6253 = vmatprep.subr.bf16.mxu0 %v15564_v48  ;;  %6335 = vmatprep.subr.bf16.mxu1 %v15570_v46 }
 0x678   :  { %6254 = vmatpush1.bf16.msra.mxu0 %v15576_v0  ;;  %6336 = vmatpush1.bf16.msra.mxu1 %v15582_v43 }
 0x679   :  { %6255 = vmatprep.subr.bf16.mxu0 %v15588_v3  ;;  %6337 = vmatprep.subr.bf16.mxu1 %v15594_v20 }
 0x67c   :  { %6256 = vmatpush1.bf16.msra.mxu0 %v15600_v54  ;;  %6338 = vmatpush1.bf16.msra.mxu1 %v15606_v55 }
 0x67d   :  { %6257 = vmatprep.subr.bf16.mxu0 %v15612_v45  ;;  %6339 = vmatprep.subr.bf16.mxu1 %v15618_v22 }
 0x680   :  { %6258 = vmatpush1.bf16.msra.mxu0 %v15624_v1  ;;  %6340 = vmatpush1.bf16.msra.mxu1 %v15630_v7  ;;  %v15654_v7 = vld [vmem:[%s17884_s12 + $0x168] ss:$16 sps:$4 sm:$0xff]  }
 0x681   :  { %6259 = vmatprep.subr.bf16.mxu0 %v15636_v60  ;;  %6341 = vmatprep.subr.bf16.mxu1 %v15642_v51  ;;  %18622 = vst [vmem:[#allocation101_spill] sm:$0xff] %v15654_v7  ;;  %v15660_v60 = vld [vmem:[%s17884_s12 + $0x184] ss:$16 sps:$4 sm:$0xff]   ;;  %v15666_v51 = vld [vmem:[%s17884_s12 + $0x18c] ss:$16 sps:$4 sm:$0xff]  }
 0x682   :  { %18623 = vst [vmem:[#allocation103_spill] sm:$0xff] %v15660_v60  ;;  %18624 = vst [vmem:[#allocation104_spill] sm:$0xff] %v15666_v51 }
 0x684   :  { %6260 = vmatpush1.bf16.msra.mxu0 %v15648_v13  ;;  %6342 = vmatpush1.bf16.msra.mxu1 %v15654_v7  ;;  %v15672_v13 = vld [vmem:[%s17884_s12 + $0x180] ss:$16 sps:$4 sm:$0xff]   ;;  %v15678_v7 = vld [vmem:[%s17884_s12 + $0x188] ss:$16 sps:$4 sm:$0xff]  }
 0x685   :  { %6261 = vmatprep.subr.bf16.mxu0 %v15660_v60  ;;  %6343 = vmatprep.subr.bf16.mxu1 %v15666_v51  ;;  %18625 = vst [vmem:[#allocation11_spill] sm:$0xff] %v15672_v13  ;;  %18626 = vst [vmem:[#allocation12_spill] sm:$0xff] %v15678_v7  ;;  %v15684_v60 = vld [vmem:[%s17884_s12 + $0x1a4] ss:$16 sps:$4 sm:$0xff]   ;;  %v15690_v51 = vld [vmem:[%s17884_s12 + $0x1ac] ss:$16 sps:$4 sm:$0xff]  }
 0x686   :  { %18627 = vst [vmem:[#allocation13_spill] sm:$0xff] %v15684_v60  ;;  %18628 = vst [vmem:[#allocation14_spill] sm:$0xff] %v15690_v51 }
 0x688   :  { %6262 = vmatpush1.bf16.msra.mxu0 %v15672_v13  ;;  %6344 = vmatpush1.bf16.msra.mxu1 %v15678_v7  ;;  %v15696_v13 = vld [vmem:[%s17884_s12 + $0x1a0] ss:$16 sps:$4 sm:$0xff]   ;;  %v15702_v7 = vld [vmem:[%s17884_s12 + $0x1a8] ss:$16 sps:$4 sm:$0xff]  }
 0x689   :  { %6263 = vmatprep.subr.bf16.mxu0 %v15684_v60  ;;  %6345 = vmatprep.subr.bf16.mxu1 %v15690_v51  ;;  %18629 = vst [vmem:[#allocation15_spill] sm:$0xff] %v15696_v13  ;;  %18630 = vst [vmem:[#allocation16_spill] sm:$0xff] %v15702_v7  ;;  %v15708_v60 = vld [vmem:[%s17884_s12 + $0x1c4] ss:$16 sps:$4 sm:$0xff]   ;;  %v15714_v51 = vld [vmem:[%s17884_s12 + $0x1cc] ss:$16 sps:$4 sm:$0xff]  }
 0x68a   :  { %18631 = vst [vmem:[#allocation17_spill] sm:$0xff] %v15708_v60  ;;  %18632 = vst [vmem:[#allocation18_spill] sm:$0xff] %v15714_v51 }
 0x68c   :  { %6264 = vmatpush1.bf16.msra.mxu0 %v15696_v13  ;;  %6346 = vmatpush1.bf16.msra.mxu1 %v15702_v7  ;;  %v15720_v13 = vld [vmem:[%s17884_s12 + $0x1c0] ss:$16 sps:$4 sm:$0xff]   ;;  %v15726_v7 = vld [vmem:[%s17884_s12 + $0x1c8] ss:$16 sps:$4 sm:$0xff]  }
 0x68d   :  { %6265 = vmatprep.subr.bf16.mxu0 %v15708_v60  ;;  %6347 = vmatprep.subr.bf16.mxu1 %v15714_v51  ;;  %18633 = vst [vmem:[#allocation19_spill] sm:$0xff] %v15720_v13  ;;  %18634 = vst [vmem:[#allocation20_spill] sm:$0xff] %v15726_v7  ;;  %v15732_v60 = vld [vmem:[%s17884_s12 + $0x1e4] ss:$16 sps:$4 sm:$0xff]   ;;  %v15738_v51 = vld [vmem:[%s17884_s12 + $0x1ec] ss:$16 sps:$4 sm:$0xff]  }
 0x68e   :  { %18635 = vst [vmem:[#allocation21_spill] sm:$0xff] %v15732_v60  ;;  %18636 = vst [vmem:[#allocation22_spill] sm:$0xff] %v15738_v51 }
 0x690   :  { %6266 = vmatpush1.bf16.msra.mxu0 %v15720_v13  ;;  %6348 = vmatpush1.bf16.msra.mxu1 %v15726_v7  ;;  %v15744_v13 = vld [vmem:[%s17884_s12 + $0x1e0] ss:$16 sps:$4 sm:$0xff]   ;;  %v15750_v7 = vld [vmem:[%s17884_s12 + $0x1e8] ss:$16 sps:$4 sm:$0xff]  }
 0x691   :  { %6267 = vmatprep.subr.bf16.mxu0 %v15732_v60  ;;  %6349 = vmatprep.subr.bf16.mxu1 %v15738_v51  ;;  %18637 = vst [vmem:[#allocation23_spill] sm:$0xff] %v15744_v13  ;;  %18638 = vst [vmem:[#allocation24_spill] sm:$0xff] %v15750_v7  ;;  %v15756_v60 = vld [vmem:[%s17884_s12 + $0x204] ss:$16 sps:$4 sm:$0xff]   ;;  %v15762_v51 = vld [vmem:[%s17884_s12 + $0x20c] ss:$16 sps:$4 sm:$0xff]  }
 0x692   :  { %18639 = vst [vmem:[#allocation25_spill] sm:$0xff] %v15756_v60  ;;  %18640 = vst [vmem:[#allocation26_spill] sm:$0xff] %v15762_v51 }
 0x694   :  { %6268 = vmatpush1.bf16.msra.mxu0 %v15744_v13  ;;  %6350 = vmatpush1.bf16.msra.mxu1 %v15750_v7 }
 0x695   :  { %6278 = vmatprep.subr.bf16.mxu0 %v15756_v60  ;;  %6360 = vmatprep.subr.bf16.mxu1 %v15762_v51  ;;  %v18641_v51 = vld [vmem:[#allocation106_spill] sm:$0xff] }
 0x696   :  { %v6033_v46 = vmax.f32 %v18641_v51, %v15289_v58 }
 0x72a   :  { %v6124_v13 = vpop.f32.mrb[136].mxu0  ;;  %v6206_v1 = vpop.f32.mrb[152].mxu1 }
 0x72b   :  { %v10370_v22 = vadd.f32 %v6124_v13, %v15119_v12  ;;  %v10372_v7 = vadd.f32 %v6206_v1, %v15188_v40  ;;  %v6126_v45 = vpop.f32.mrb[137].mxu0  ;;  %v6208_v55 = vpop.f32.mrb[153].mxu1  ;;  %v6037_v1 = vadd.f32 %v15289_v58, %v18641_v51 }
 0x72c   :  { %v10371_v54 = vadd.f32 %v6126_v45, %v15123_v32  ;;  %v10373_v20 = vadd.f32 %v6208_v55, %v15127_v17  ;;  %v6128_v60 = vpop.f32.mrb[138].mxu0  ;;  %v6210_v3 = vpop.f32.mrb[154].mxu1  ;;  %v6035_v45 = vmax.f32 %v15212_v25, %v15363_v35  ;;  %v6039_v55 = vadd.f32 %v15363_v35, %v15212_v25 }
 0x72d   :  { %11015 = vtanh.f32 %v10370_v22  ;;  %v6129_v43 = vpop.f32.mrb[139].mxu0  ;;  %v6211_v0 = vpop.f32.mrb[155].mxu1 }
 0x72e   :  { %11017 = vtanh.f32 %v10372_v7  ;;  %v18642_v0 = vld [vmem:[#allocation107_spill] sm:$0xff]  ;;  %v18645_v7 = vld [vmem:[#allocation108_spill] sm:$0xff] }
 0x72f   :  { %11019 = vtanh.f32 %v10371_v54  ;;  %v6034_v43 = vmax.f32 %v18642_v0, %v15291_v6  ;;  %v6036_v60 = vmax.f32 %v18645_v7, %v15293_v28  ;;  %v6040_v25 = vadd.f32 %v15293_v28, %v18645_v7  ;;  %v15808_v28 = vld [vmem:[%s17884_s12 + $0x200] ss:$16 sps:$4 sm:$0xff]   ;;  %v15850_v7 = vld [vmem:[%s17884_s12 + $0x24c] ss:$16 sps:$4 sm:$0xff]  }
 0x730   :  { %11021 = vtanh.f32 %v10373_v20  ;;  %v6038_v20 = vadd.f32 %v15291_v6, %v18642_v0  ;;  %18646 = vst [vmem:[#allocation29_spill] sm:$0xff] %v15850_v7 }
 0x737   :  { %v11016_v13 = vpop.eup %11015 }
 0x738   :  { %v15777_v3 = vpop.eup %11017  ;;  %v15781_v54 = vmax.f32 %v6033_v46, %v11016_v13  ;;  %v15785_v22 = vadd.f32 %v11016_v13, %v6037_v1  ;;  %v6233_v1 = vpack.c.bf16 %v11016_v13, %v11016_v13  ;;  %v15814_v13 = vld [vmem:[%s17884_s12 + $0x208] ss:$16 sps:$4 sm:$0xff]  }
 0x739   :  { %v11020_v58 = vpop.eup %11019  ;;  %v15790_v51 = vmax.f32 %v6035_v45, %v15777_v3  ;;  %v15795_v35 = vadd.f32 %v15777_v3, %v6039_v55  ;;  %v15820_v55 = vld [vmem:[%s17884_s12 + $0x224] ss:$16 sps:$4 sm:$0xff]  }
 0x73a   :  { %18643 = vst [vmem:[#allocation27_spill] sm:$0xff] %v15781_v54  ;;  %18644 = vst [vmem:[#allocation28_spill] sm:$0xff] %v15785_v22  ;;  %v11022_v46 = vpop.eup %11021  ;;  %v6234_v54 = vpack.c.bf16 %v11020_v58, %v11020_v58  ;;  %v15797_v17 = vmax.f32 %v6034_v43, %v11020_v58  ;;  %v15799_v6 = vadd.f32 %v11020_v58, %v6038_v20  ;;  %v15826_v43 = vld [vmem:[%s17884_s12 + $0x22c] ss:$16 sps:$4 sm:$0xff]   ;;  %v15838_v20 = vld [vmem:[%s17884_s12 + $0x228] ss:$16 sps:$4 sm:$0xff]  }
 0x73b   :  { %v15801_v0 = vmax.f32 %v6036_v60, %v11022_v46  ;;  %v15803_v22 = vadd.f32 %v11022_v46, %v6040_v25  ;;  %v6236_v45 = vpack.c.bf16 %v11022_v46, %v11022_v46  ;;  %v15844_v58 = vld [vmem:[%s17884_s12 + $0x244] ss:$16 sps:$4 sm:$0xff]   ;;  %v15856_v60 = vld [vmem:[%s17884_s12 + $0x240] ss:$16 sps:$4 sm:$0xff]   ;;  %v15862_v25 = vld [vmem:[%s17884_s12 + $0x248] ss:$16 sps:$4 sm:$0xff]  }
 0x73c   :  { %6269 = vmatprep.mubr.bf16.mxu0 %v6234_v54  ;;  %6351 = vmatprep.mubr.bf16.mxu1 %v6234_v54  ;;  %v15832_v54 = vld [vmem:[%s17884_s12 + $0x220] ss:$16 sps:$4 sm:$0xff]   ;;  %18647 = vst [vmem:[#allocation30_spill] sm:$0xff] %v15856_v60  ;;  %18648 = vst [vmem:[#allocation31_spill] sm:$0xff] %v15862_v25  ;;  %v15868_v46 = vld [vmem:[%s17884_s12 + $0x264] ss:$16 sps:$4 sm:$0xff]  }
 0x73d   :  { %6270 = vmatmul.mubr.bf16.vlgmr.msra.gmra.mrb[140].mxu0 %v6233_v1  ;;  %6352 = vmatmul.mubr.bf16.vlgmr.msra.gmra.mrb[156].mxu1 %v6233_v1  ;;  %18649 = vst [vmem:[#allocation32_spill] sm:$0xff] %v15868_v46  ;;  %v15874_v1 = vld [vmem:[%s17884_s12 + $0x26c] ss:$16 sps:$4 sm:$0xff]  }
 0x73e   :  { %6279 = vmatpush1.bf16.msra.mxu0 %v15808_v28  ;;  %6361 = vmatpush1.bf16.msra.mxu1 %v15814_v13  ;;  %18650 = vst [vmem:[#allocation33_spill] sm:$0xff] %v15874_v1 }
 0x73f   :  { %6310 = vmatprep.mubr.bf16.mxu0 %v6236_v45  ;;  %6392 = vmatprep.mubr.bf16.mxu1 %v6236_v45  ;;  %v15880_v45 = vld [vmem:[%s17884_s12 + $0x260] ss:$16 sps:$4 sm:$0xff]  }
 0x740   :  { %6280 = vmatprep.subr.bf16.mxu0 %v15820_v55  ;;  %6362 = vmatprep.subr.bf16.mxu1 %v15826_v43  ;;  %18651 = vst [vmem:[#allocation34_spill] sm:$0xff] %v15880_v45 }
 0x742   :  { %6281 = vmatpush1.bf16.msra.mxu0 %v15832_v54  ;;  %6363 = vmatpush1.bf16.msra.mxu1 %v15838_v20 }
 0x743   :  { %6282 = vmatprep.subr.bf16.mxu0 %v15844_v58  ;;  %6364 = vmatprep.subr.bf16.mxu1 %v15850_v7 }
 0x746   :  { %6283 = vmatpush1.bf16.msra.mxu0 %v15856_v60  ;;  %6365 = vmatpush1.bf16.msra.mxu1 %v15862_v25  ;;  %v15886_v25 = vld [vmem:[%s17884_s12 + $0x268] ss:$16 sps:$4 sm:$0xff]  }
 0x747   :  { %6284 = vmatprep.subr.bf16.mxu0 %v15868_v46  ;;  %6366 = vmatprep.subr.bf16.mxu1 %v15874_v1  ;;  %18652 = vst [vmem:[#allocation35_spill] sm:$0xff] %v15886_v25  ;;  %v15892_v46 = vld [vmem:[%s17884_s12 + $0x284] ss:$16 sps:$4 sm:$0xff]   ;;  %v15898_v1 = vld [vmem:[%s17884_s12 + $0x28c] ss:$16 sps:$4 sm:$0xff]  }
 0x748   :  { %18653 = vst [vmem:[#allocation36_spill] sm:$0xff] %v15892_v46  ;;  %18654 = vst [vmem:[#allocation37_spill] sm:$0xff] %v15898_v1 }
 0x74a   :  { %6285 = vmatpush1.bf16.msra.mxu0 %v15880_v45  ;;  %6367 = vmatpush1.bf16.msra.mxu1 %v15886_v25  ;;  %v15904_v45 = vld [vmem:[%s17884_s12 + $0x280] ss:$16 sps:$4 sm:$0xff]   ;;  %v15910_v25 = vld [vmem:[%s17884_s12 + $0x288] ss:$16 sps:$4 sm:$0xff]  }
 0x74b   :  { %6286 = vmatprep.subr.bf16.mxu0 %v15892_v46  ;;  %6368 = vmatprep.subr.bf16.mxu1 %v15898_v1  ;;  %18655 = vst [vmem:[#allocation38_spill] sm:$0xff] %v15904_v45  ;;  %18656 = vst [vmem:[#allocation39_spill] sm:$0xff] %v15910_v25  ;;  %v15916_v46 = vld [vmem:[%s17884_s12 + $0x2a4] ss:$16 sps:$4 sm:$0xff]   ;;  %v15922_v1 = vld [vmem:[%s17884_s12 + $0x2ac] ss:$16 sps:$4 sm:$0xff]  }
 0x74c   :  { %18657 = vst [vmem:[#allocation40_spill] sm:$0xff] %v15916_v46  ;;  %18658 = vst [vmem:[#allocation41_spill] sm:$0xff] %v15922_v1 }
 0x74e   :  { %6287 = vmatpush1.bf16.msra.mxu0 %v15904_v45  ;;  %6369 = vmatpush1.bf16.msra.mxu1 %v15910_v25  ;;  %v15928_v45 = vld [vmem:[%s17884_s12 + $0x2a0] ss:$16 sps:$4 sm:$0xff]   ;;  %v15934_v25 = vld [vmem:[%s17884_s12 + $0x2a8] ss:$16 sps:$4 sm:$0xff]  }
 0x74f   :  { %6288 = vmatprep.subr.bf16.mxu0 %v15916_v46  ;;  %6370 = vmatprep.subr.bf16.mxu1 %v15922_v1  ;;  %18659 = vst [vmem:[#allocation42_spill] sm:$0xff] %v15928_v45  ;;  %18660 = vst [vmem:[#allocation43_spill] sm:$0xff] %v15934_v25  ;;  %v15940_v46 = vld [vmem:[%s17884_s12 + $0x2c4] ss:$16 sps:$4 sm:$0xff]   ;;  %v15946_v1 = vld [vmem:[%s17884_s12 + $0x2cc] ss:$16 sps:$4 sm:$0xff]  }
 0x750   :  { %18661 = vst [vmem:[#allocation44_spill] sm:$0xff] %v15940_v46  ;;  %18662 = vst [vmem:[#allocation45_spill] sm:$0xff] %v15946_v1 }
 0x752   :  { %6289 = vmatpush1.bf16.msra.mxu0 %v15928_v45  ;;  %6371 = vmatpush1.bf16.msra.mxu1 %v15934_v25  ;;  %v15952_v45 = vld [vmem:[%s17884_s12 + $0x2c0] ss:$16 sps:$4 sm:$0xff]   ;;  %v15958_v25 = vld [vmem:[%s17884_s12 + $0x2c8] ss:$16 sps:$4 sm:$0xff]  }
 0x753   :  { %6290 = vmatprep.subr.bf16.mxu0 %v15940_v46  ;;  %6372 = vmatprep.subr.bf16.mxu1 %v15946_v1  ;;  %18663 = vst [vmem:[#allocation46_spill] sm:$0xff] %v15952_v45  ;;  %18664 = vst [vmem:[#allocation47_spill] sm:$0xff] %v15958_v25  ;;  %v15964_v46 = vld [vmem:[%s17884_s12 + $0x2e4] ss:$16 sps:$4 sm:$0xff]   ;;  %v15970_v1 = vld [vmem:[%s17884_s12 + $0x2ec] ss:$16 sps:$4 sm:$0xff]  }
 0x754   :  { %18665 = vst [vmem:[#allocation50_spill] sm:$0xff] %v15964_v46  ;;  %18666 = vst [vmem:[#allocation51_spill] sm:$0xff] %v15970_v1 }
 0x756   :  { %6291 = vmatpush1.bf16.msra.mxu0 %v15952_v45  ;;  %6373 = vmatpush1.bf16.msra.mxu1 %v15958_v25  ;;  %v15976_v45 = vld [vmem:[%s17884_s12 + $0x2e0] ss:$16 sps:$4 sm:$0xff]   ;;  %v15982_v25 = vld [vmem:[%s17884_s12 + $0x2e8] ss:$16 sps:$4 sm:$0xff]  }
 0x757   :  { %6292 = vmatprep.subr.bf16.mxu0 %v15964_v46  ;;  %6374 = vmatprep.subr.bf16.mxu1 %v15970_v1  ;;  %18667 = vst [vmem:[#allocation52_spill] sm:$0xff] %v15976_v45  ;;  %18668 = vst [vmem:[#allocation53_spill] sm:$0xff] %v15982_v25  ;;  %v15988_v46 = vld [vmem:[%s17884_s12 + $0x304] ss:$16 sps:$4 sm:$0xff]   ;;  %v15994_v1 = vld [vmem:[%s17884_s12 + $0x30c] ss:$16 sps:$4 sm:$0xff]  }
 0x758   :  { %18669 = vst [vmem:[#allocation54_spill] sm:$0xff] %v15988_v46  ;;  %18670 = vst [vmem:[#allocation55_spill] sm:$0xff] %v15994_v1 }
 0x75a   :  { %6293 = vmatpush1.bf16.msra.mxu0 %v15976_v45  ;;  %6375 = vmatpush1.bf16.msra.mxu1 %v15982_v25  ;;  %v16000_v45 = vld [vmem:[%s17884_s12 + $0x300] ss:$16 sps:$4 sm:$0xff]   ;;  %v16006_v25 = vld [vmem:[%s17884_s12 + $0x308] ss:$16 sps:$4 sm:$0xff]  }
 0x75b   :  { %6294 = vmatprep.subr.bf16.mxu0 %v15988_v46  ;;  %6376 = vmatprep.subr.bf16.mxu1 %v15994_v1  ;;  %18671 = vst [vmem:[#allocation56_spill] sm:$0xff] %v16000_v45  ;;  %18672 = vst [vmem:[#allocation68_spill] sm:$0xff] %v16006_v25  ;;  %v16012_v46 = vld [vmem:[%s17884_s12 + $0x324] ss:$16 sps:$4 sm:$0xff]   ;;  %v16018_v1 = vld [vmem:[%s17884_s12 + $0x32c] ss:$16 sps:$4 sm:$0xff]  }
 0x75c   :  { %18673 = vst [vmem:[#allocation69_spill] sm:$0xff] %v16012_v46  ;;  %18674 = vst [vmem:[#allocation70_spill] sm:$0xff] %v16018_v1 }
 0x75e   :  { %6295 = vmatpush1.bf16.msra.mxu0 %v16000_v45  ;;  %6377 = vmatpush1.bf16.msra.mxu1 %v16006_v25  ;;  %v16024_v45 = vld [vmem:[%s17884_s12 + $0x320] ss:$16 sps:$4 sm:$0xff]   ;;  %v16030_v25 = vld [vmem:[%s17884_s12 + $0x328] ss:$16 sps:$4 sm:$0xff]  }
 0x75f   :  { %6296 = vmatprep.subr.bf16.mxu0 %v16012_v46  ;;  %6378 = vmatprep.subr.bf16.mxu1 %v16018_v1  ;;  %18675 = vst [vmem:[#allocation71_spill] sm:$0xff] %v16024_v45  ;;  %18676 = vst [vmem:[#allocation72_spill] sm:$0xff] %v16030_v25  ;;  %v16036_v46 = vld [vmem:[%s17884_s12 + $0x344] ss:$16 sps:$4 sm:$0xff]   ;;  %v16042_v1 = vld [vmem:[%s17884_s12 + $0x34c] ss:$16 sps:$4 sm:$0xff]  }
 0x760   :  { %18677 = vst [vmem:[#allocation73_spill] sm:$0xff] %v16036_v46  ;;  %18678 = vst [vmem:[#allocation74_spill] sm:$0xff] %v16042_v1 }
 0x762   :  { %6297 = vmatpush1.bf16.msra.mxu0 %v16024_v45  ;;  %6379 = vmatpush1.bf16.msra.mxu1 %v16030_v25  ;;  %v16048_v45 = vld [vmem:[%s17884_s12 + $0x340] ss:$16 sps:$4 sm:$0xff]   ;;  %v16054_v25 = vld [vmem:[%s17884_s12 + $0x348] ss:$16 sps:$4 sm:$0xff]  }
 0x763   :  { %6298 = vmatprep.subr.bf16.mxu0 %v16036_v46  ;;  %6380 = vmatprep.subr.bf16.mxu1 %v16042_v1  ;;  %18679 = vst [vmem:[#allocation75_spill] sm:$0xff] %v16048_v45  ;;  %18680 = vst [vmem:[#allocation77_spill] sm:$0xff] %v16054_v25  ;;  %v16060_v46 = vld [vmem:[%s17884_s12 + $0x364] ss:$16 sps:$4 sm:$0xff]   ;;  %v16066_v1 = vld [vmem:[%s17884_s12 + $0x36c] ss:$16 sps:$4 sm:$0xff]  }
 0x764   :  { %18681 = vst [vmem:[#allocation78_spill] sm:$0xff] %v16060_v46  ;;  %18682 = vst [vmem:[#allocation79_spill] sm:$0xff] %v16066_v1 }
 0x766   :  { %6299 = vmatpush1.bf16.msra.mxu0 %v16048_v45  ;;  %6381 = vmatpush1.bf16.msra.mxu1 %v16054_v25  ;;  %v16072_v45 = vld [vmem:[%s17884_s12 + $0x360] ss:$16 sps:$4 sm:$0xff]   ;;  %v16078_v25 = vld [vmem:[%s17884_s12 + $0x368] ss:$16 sps:$4 sm:$0xff]  }
 0x767   :  { %6300 = vmatprep.subr.bf16.mxu0 %v16060_v46  ;;  %6382 = vmatprep.subr.bf16.mxu1 %v16066_v1  ;;  %18683 = vst [vmem:[#allocation80_spill] sm:$0xff] %v16072_v45  ;;  %18684 = vst [vmem:[#allocation81_spill] sm:$0xff] %v16078_v25  ;;  %v16084_v46 = vld [vmem:[%s17884_s12 + $0x384] ss:$16 sps:$4 sm:$0xff]   ;;  %v16090_v1 = vld [vmem:[%s17884_s12 + $0x38c] ss:$16 sps:$4 sm:$0xff]  }
 0x768   :  { %18685 = vst [vmem:[#allocation82_spill] sm:$0xff] %v16084_v46  ;;  %18686 = vst [vmem:[#allocation83_spill] sm:$0xff] %v16090_v1 }
 0x76a   :  { %6301 = vmatpush1.bf16.msra.mxu0 %v16072_v45  ;;  %6383 = vmatpush1.bf16.msra.mxu1 %v16078_v25  ;;  %v16096_v45 = vld [vmem:[%s17884_s12 + $0x380] ss:$16 sps:$4 sm:$0xff]   ;;  %v16102_v25 = vld [vmem:[%s17884_s12 + $0x388] ss:$16 sps:$4 sm:$0xff]  }
 0x76b   :  { %6302 = vmatprep.subr.bf16.mxu0 %v16084_v46  ;;  %6384 = vmatprep.subr.bf16.mxu1 %v16090_v1  ;;  %18687 = vst [vmem:[#allocation84_spill] sm:$0xff] %v16096_v45  ;;  %18688 = vst [vmem:[#allocation85_spill] sm:$0xff] %v16102_v25  ;;  %v16108_v46 = vld [vmem:[%s17884_s12 + $0x3a4] ss:$16 sps:$4 sm:$0xff]   ;;  %v16114_v1 = vld [vmem:[%s17884_s12 + $0x3ac] ss:$16 sps:$4 sm:$0xff]  }
 0x76c   :  { %18689 = vst [vmem:[#allocation86_spill] sm:$0xff] %v16108_v46  ;;  %18690 = vst [vmem:[#allocation87_spill] sm:$0xff] %v16114_v1 }
 0x76e   :  { %6303 = vmatpush1.bf16.msra.mxu0 %v16096_v45  ;;  %6385 = vmatpush1.bf16.msra.mxu1 %v16102_v25  ;;  %v16120_v45 = vld [vmem:[%s17884_s12 + $0x3a0] ss:$16 sps:$4 sm:$0xff]   ;;  %v16126_v25 = vld [vmem:[%s17884_s12 + $0x3a8] ss:$16 sps:$4 sm:$0xff]  }
 0x76f   :  { %6304 = vmatprep.subr.bf16.mxu0 %v16108_v46  ;;  %6386 = vmatprep.subr.bf16.mxu1 %v16114_v1  ;;  %18691 = vst [vmem:[#allocation88_spill] sm:$0xff] %v16120_v45  ;;  %18692 = vst [vmem:[#allocation90_spill] sm:$0xff] %v16126_v25 }
 0x772   :  { %6305 = vmatpush1.bf16.msra.mxu0 %v16120_v45  ;;  %6387 = vmatpush1.bf16.msra.mxu1 %v16126_v25  ;;  %v6235_v45 = vpack.c.bf16 %v15777_v3, %v15777_v3  ;;  %v18701_v3 = vld [vmem:[#allocation95_spill] sm:$0xff] }
 0x773   :  { %6306 = vmatprep.subr.bf16.mxu0 %v18531_v63  ;;  %6388 = vmatprep.subr.bf16.mxu1 %v18532_v53  ;;  %v18693_v63 = vld [vmem:[#allocation61_spill] sm:$0xff]  ;;  %v18694_v53 = vld [vmem:[#allocation62_spill] sm:$0xff] }
 0x776   :  { %6307 = vmatpush1.bf16.msra.mxu0 %v15009_v10  ;;  %6389 = vmatpush1.bf16.msra.mxu1 %v15014_v14  ;;  %v18697_v10 = vld [vmem:[#allocation65_spill] sm:$0xff]  ;;  %v18698_v14 = vld [vmem:[#allocation66_spill] sm:$0xff] }
 0x777   :  { %6308 = vmatprep.subr.bf16.mxu0 %v15021_v56  ;;  %6390 = vmatprep.subr.bf16.mxu1 %v15026_v62  ;;  %v18699_v56 = vld [vmem:[#allocation67_spill] sm:$0xff]  ;;  %v18700_v62 = vld [vmem:[#allocation89_spill] sm:$0xff] }
 0x77a   :  { %6309 = vmatpush1.bf16.msra.mxu0 %v15033_v29  ;;  %6391 = vmatpush1.bf16.msra.mxu1 %v15038_v49  ;;  %v18695_v29 = vld [vmem:[#allocation63_spill] sm:$0xff]  ;;  %v18696_v49 = vld [vmem:[#allocation64_spill] sm:$0xff] }
 0x77b   :  { %6425 = vmatprep.subr.bf16.mxu0 %v15372_v27  ;;  %6507 = vmatprep.subr.bf16.mxu1 %v15378_v5 }
 0x77d   :  { %6311 = vmatmul.mubr.bf16.vlgmr.msra.gmra.mrb[140].mxu0 %v6235_v45  ;;  %6393 = vmatmul.mubr.bf16.vlgmr.msra.gmra.mrb[156].mxu1 %v6235_v45  ;;  %v18702_v45 = vld [vmem:[#allocation96_spill] sm:$0xff] }
 0x77e   :  { %6426 = vmatpush1.bf16.msra.mxu0 %v15384_v15  ;;  %6508 = vmatpush1.bf16.msra.mxu1 %v15390_v52 }
 0x77f   :  { %6427 = vmatprep.subr.bf16.mxu0 %v15396_v44  ;;  %6509 = vmatprep.subr.bf16.mxu1 %v15402_v24 }
 0x782   :  { %6428 = vmatpush1.bf16.msra.mxu0 %v15408_v33  ;;  %6510 = vmatpush1.bf16.msra.mxu1 %v15414_v9 }
 0x783   :  { %6429 = vmatprep.subr.bf16.mxu0 %v15420_v41  ;;  %6511 = vmatprep.subr.bf16.mxu1 %v15426_v26 }
 0x786   :  { %6430 = vmatpush1.bf16.msra.mxu0 %v15432_v16  ;;  %6512 = vmatpush1.bf16.msra.mxu1 %v15438_v11 }
 0x787   :  { %6431 = vmatprep.subr.bf16.mxu0 %v15444_v18  ;;  %6513 = vmatprep.subr.bf16.mxu1 %v15450_v34 }
 0x78a   :  { %6432 = vmatpush1.bf16.msra.mxu0 %v15456_v61  ;;  %6514 = vmatpush1.bf16.msra.mxu1 %v15462_v57 }
 0x78b   :  { %6433 = vmatprep.subr.bf16.mxu0 %v15468_v30  ;;  %6515 = vmatprep.subr.bf16.mxu1 %v15474_v47 }
 0x78e   :  { %6434 = vmatpush1.bf16.msra.mxu0 %v15480_v2  ;;  %6516 = vmatpush1.bf16.msra.mxu1 %v15486_v39 }
 0x78f   :  { %6435 = vmatprep.subr.bf16.mxu0 %v15492_v19  ;;  %6517 = vmatprep.subr.bf16.mxu1 %v15498_v36 }
 0x792   :  { %6436 = vmatpush1.bf16.msra.mxu0 %v15504_v59  ;;  %6518 = vmatpush1.bf16.msra.mxu1 %v15510_v4 }
 0x793   :  { %6437 = vmatprep.subr.bf16.mxu0 %v15516_v42  ;;  %6519 = vmatprep.subr.bf16.mxu1 %v15522_v50 }
 0x796   :  { %6438 = vmatpush1.bf16.msra.mxu0 %v15528_v8  ;;  %6520 = vmatpush1.bf16.msra.mxu1 %v15534_v31 }
 0x797   :  { %6439 = vmatprep.subr.bf16.mxu0 %v15540_v23  ;;  %6521 = vmatprep.subr.bf16.mxu1 %v15546_v38 }
 0x79a   :  { %6440 = vmatpush1.bf16.msra.mxu0 %v15552_v21  ;;  %6522 = vmatpush1.bf16.msra.mxu1 %v15558_v37  ;;  %v18726_v21 = vld [vmem:[#allocation105_spill] sm:$0xff] }
 0x79b   :  { %6441 = vmatprep.subr.bf16.mxu0 %v15564_v48  ;;  %6523 = vmatprep.subr.bf16.mxu1 %v18693_v63  ;;  %v18703_v48 = vld [vmem:[#allocation97_spill] sm:$0xff]  ;;  %v18704_v63 = vld [vmem:[#allocation98_spill] sm:$0xff] }
 0x79e   :  { %6442 = vmatpush1.bf16.msra.mxu0 %v18694_v53  ;;  %6524 = vmatpush1.bf16.msra.mxu1 %v18695_v29  ;;  %v18705_v53 = vld [vmem:[#allocation99_spill] sm:$0xff]  ;;  %v18706_v29 = vld [vmem:[#allocation100_spill] sm:$0xff] }
 0x79f   :  { %6443 = vmatprep.subr.bf16.mxu0 %v18696_v49  ;;  %6525 = vmatprep.subr.bf16.mxu1 %v18697_v10  ;;  %v18707_v49 = vld [vmem:[#allocation101_spill] sm:$0xff]  ;;  %v18708_v10 = vld [vmem:[#allocation103_spill] sm:$0xff] }
 0x7a2   :  { %6444 = vmatpush1.bf16.msra.mxu0 %v18698_v14  ;;  %6526 = vmatpush1.bf16.msra.mxu1 %v18699_v56  ;;  %v18709_v14 = vld [vmem:[#allocation104_spill] sm:$0xff]  ;;  %v18710_v56 = vld [vmem:[#allocation11_spill] sm:$0xff] }
 0x7a3   :  { %6445 = vmatprep.subr.bf16.mxu0 %v18700_v62  ;;  %6527 = vmatprep.subr.bf16.mxu1 %v18701_v3  ;;  %v18711_v62 = vld [vmem:[#allocation12_spill] sm:$0xff]  ;;  %v18712_v3 = vld [vmem:[#allocation13_spill] sm:$0xff] }
 0x7a6   :  { %6446 = vmatpush1.bf16.msra.mxu0 %v18702_v45  ;;  %6528 = vmatpush1.bf16.msra.mxu1 %v18703_v48  ;;  %v18713_v45 = vld [vmem:[#allocation14_spill] sm:$0xff]  ;;  %v18714_v48 = vld [vmem:[#allocation15_spill] sm:$0xff] }
 0x7a7   :  { %6447 = vmatprep.subr.bf16.mxu0 %v18704_v63  ;;  %6529 = vmatprep.subr.bf16.mxu1 %v18705_v53  ;;  %v18715_v63 = vld [vmem:[#allocation16_spill] sm:$0xff]  ;;  %v18716_v53 = vld [vmem:[#allocation17_spill] sm:$0xff] }
 0x7aa   :  { %6448 = vmatpush1.bf16.msra.mxu0 %v18706_v29  ;;  %6530 = vmatpush1.bf16.msra.mxu1 %v18707_v49  ;;  %v18717_v29 = vld [vmem:[#allocation18_spill] sm:$0xff]  ;;  %v18718_v49 = vld [vmem:[#allocation19_spill] sm:$0xff] }
 0x7ab   :  { %6449 = vmatprep.subr.bf16.mxu0 %v18708_v10  ;;  %6531 = vmatprep.subr.bf16.mxu1 %v18709_v14  ;;  %v18719_v10 = vld [vmem:[#allocation20_spill] sm:$0xff]  ;;  %v18720_v14 = vld [vmem:[#allocation21_spill] sm:$0xff] }
 0x7ae   :  { %6450 = vmatpush1.bf16.msra.mxu0 %v18710_v56  ;;  %6532 = vmatpush1.bf16.msra.mxu1 %v18711_v62  ;;  %v18721_v56 = vld [vmem:[#allocation22_spill] sm:$0xff]  ;;  %v18722_v62 = vld [vmem:[#allocation23_spill] sm:$0xff] }
 0x7af   :  { %6451 = vmatprep.subr.bf16.mxu0 %v18712_v3  ;;  %6533 = vmatprep.subr.bf16.mxu1 %v18713_v45  ;;  %v18723_v3 = vld [vmem:[#allocation24_spill] sm:$0xff]  ;;  %v18724_v45 = vld [vmem:[#allocation25_spill] sm:$0xff] }
 0x7b2   :  { %6452 = vmatpush1.bf16.msra.mxu0 %v18714_v48  ;;  %6534 = vmatpush1.bf16.msra.mxu1 %v18715_v63  ;;  %v18725_v48 = vld [vmem:[#allocation26_spill] sm:$0xff] }
 0x7b3   :  { %6453 = vmatprep.subr.bf16.mxu0 %v18716_v53  ;;  %6535 = vmatprep.subr.bf16.mxu1 %v18717_v29 }
 0x7b6   :  { %6454 = vmatpush1.bf16.msra.mxu0 %v18718_v49  ;;  %6536 = vmatpush1.bf16.msra.mxu1 %v18719_v10 }
 0x7b7   :  { %6455 = vmatprep.subr.bf16.mxu0 %v18720_v14  ;;  %6537 = vmatprep.subr.bf16.mxu1 %v18721_v56 }
 0x7ba   :  { %6456 = vmatpush1.bf16.msra.mxu0 %v18722_v62  ;;  %6538 = vmatpush1.bf16.msra.mxu1 %v18723_v3 }
 0x7bb   :  { %6466 = vmatprep.subr.bf16.mxu0 %v18724_v45  ;;  %6548 = vmatprep.subr.bf16.mxu1 %v18725_v48 }
 0x850   :  { %v6312_v63 = vpop.f32.mrb[140].mxu0  ;;  %v6394_v53 = vpop.f32.mrb[156].mxu1 }
 0x851   :  { %v10374_v29 = vadd.f32 %v6312_v63, %v15119_v12  ;;  %v10376_v49 = vadd.f32 %v6394_v53, %v15188_v40  ;;  %v6314_v37 = vpop.f32.mrb[141].mxu0  ;;  %v6396_v10 = vpop.f32.mrb[157].mxu1  ;;  %v18727_v63 = vld [vmem:[#allocation27_spill] sm:$0xff]  ;;  %v18728_v40 = vld [vmem:[#allocation28_spill] sm:$0xff] }
 0x852   :  { %v10375_v14 = vadd.f32 %v6314_v37, %v15123_v32  ;;  %v10377_v56 = vadd.f32 %v6396_v10, %v18726_v21  ;;  %v6316_v38 = vpop.f32.mrb[142].mxu0  ;;  %v6398_v62 = vpop.f32.mrb[158].mxu1  ;;  %v18737_v53 = vld [vmem:[#allocation39_spill] sm:$0xff] }
 0x853   :  { %11023 = vtanh.f32 %v10374_v29  ;;  %v6317_v3 = vpop.f32.mrb[143].mxu0  ;;  %v6399_v23 = vpop.f32.mrb[159].mxu1  ;;  %v18734_v62 = vld [vmem:[#allocation36_spill] sm:$0xff]  ;;  %v18736_v38 = vld [vmem:[#allocation38_spill] sm:$0xff] }
 0x854   :  { %11025 = vtanh.f32 %v10376_v49 }
 0x855   :  { %11027 = vtanh.f32 %v10375_v14  ;;  %v18735_v14 = vld [vmem:[#allocation37_spill] sm:$0xff] }
 0x856   :  { %11029 = vtanh.f32 %v10377_v56 }
 0x85d   :  { %v16209_v48 = vpop.eup %11023 }
 0x85e   :  { %v16211_v45 = vpop.eup %11025  ;;  %v16217_v37 = vadd.f32 %v16209_v48, %v18728_v40  ;;  %v6421_v56 = vpack.c.bf16 %v16209_v48, %v16209_v48 }
 0x85f   :  { %v16219_v10 = vpop.eup %11027  ;;  %v16225_v23 = vadd.f32 %v16211_v45, %v15795_v35 }
 0x860   :  { %v16227_v29 = vpop.eup %11029  ;;  %v6422_v49 = vpack.c.bf16 %v16219_v10, %v16219_v10  ;;  %v16235_v40 = vadd.f32 %v16219_v10, %v15799_v6  ;;  %v18730_v6 = vld [vmem:[#allocation32_spill] sm:$0xff] }
 0x861   :  { %v16243_v35 = vadd.f32 %v16227_v29, %v15803_v22  ;;  %v6424_v3 = vpack.c.bf16 %v16227_v29, %v16227_v29  ;;  %v18729_v22 = vld [vmem:[#allocation31_spill] sm:$0xff] }
 0x862   :  { %6457 = vmatprep.mubr.bf16.mxu0 %v6422_v49  ;;  %6539 = vmatprep.mubr.bf16.mxu1 %v6422_v49  ;;  %v18731_v49 = vld [vmem:[#allocation33_spill] sm:$0xff] }
 0x863   :  { %6458 = vmatmul.mubr.bf16.vlgmr.msra.gmra.mrb[144].mxu0 %v6421_v56  ;;  %6540 = vmatmul.mubr.bf16.vlgmr.msra.gmra.mrb[160].mxu1 %v6421_v56  ;;  %v18732_v56 = vld [vmem:[#allocation34_spill] sm:$0xff] }
 0x864   :  { %6467 = vmatpush1.bf16.msra.mxu0 %v15808_v28  ;;  %6549 = vmatpush1.bf16.msra.mxu1 %v15814_v13 }
 0x865   :  { %6498 = vmatprep.mubr.bf16.mxu0 %v6424_v3  ;;  %6580 = vmatprep.mubr.bf16.mxu1 %v6424_v3  ;;  %v18733_v3 = vld [vmem:[#allocation35_spill] sm:$0xff] }
 0x866   :  { %6468 = vmatprep.subr.bf16.mxu0 %v15820_v55  ;;  %6550 = vmatprep.subr.bf16.mxu1 %v15826_v43 }
 0x868   :  { %6469 = vmatpush1.bf16.msra.mxu0 %v15832_v54  ;;  %6551 = vmatpush1.bf16.msra.mxu1 %v15838_v20 }
 0x869   :  { %6470 = vmatprep.subr.bf16.mxu0 %v15844_v58  ;;  %6552 = vmatprep.subr.bf16.mxu1 %v15850_v7  ;;  %v18738_v7 = vld [vmem:[#allocation40_spill] sm:$0xff] }
 0x86c   :  { %6471 = vmatpush1.bf16.msra.mxu0 %v15856_v60  ;;  %6553 = vmatpush1.bf16.msra.mxu1 %v18729_v22  ;;  %v18739_v60 = vld [vmem:[#allocation41_spill] sm:$0xff]  ;;  %v18740_v22 = vld [vmem:[#allocation42_spill] sm:$0xff] }
 0x86d   :  { %6472 = vmatprep.subr.bf16.mxu0 %v18730_v6  ;;  %6554 = vmatprep.subr.bf16.mxu1 %v18731_v49  ;;  %v18741_v6 = vld [vmem:[#allocation43_spill] sm:$0xff]  ;;  %v18742_v49 = vld [vmem:[#allocation44_spill] sm:$0xff] }
 0x870   :  { %6473 = vmatpush1.bf16.msra.mxu0 %v18732_v56  ;;  %6555 = vmatpush1.bf16.msra.mxu1 %v18733_v3  ;;  %v18743_v56 = vld [vmem:[#allocation45_spill] sm:$0xff]  ;;  %v18744_v3 = vld [vmem:[#allocation46_spill] sm:$0xff] }
 0x871   :  { %6474 = vmatprep.subr.bf16.mxu0 %v18734_v62  ;;  %6556 = vmatprep.subr.bf16.mxu1 %v18735_v14  ;;  %v18745_v62 = vld [vmem:[#allocation47_spill] sm:$0xff]  ;;  %v18746_v14 = vld [vmem:[#allocation50_spill] sm:$0xff] }
 0x874   :  { %6475 = vmatpush1.bf16.msra.mxu0 %v18736_v38  ;;  %6557 = vmatpush1.bf16.msra.mxu1 %v18737_v53  ;;  %v18747_v38 = vld [vmem:[#allocation51_spill] sm:$0xff]  ;;  %v18748_v53 = vld [vmem:[#allocation52_spill] sm:$0xff] }
 0x875   :  { %6476 = vmatprep.subr.bf16.mxu0 %v18738_v7  ;;  %6558 = vmatprep.subr.bf16.mxu1 %v18739_v60  ;;  %v18749_v7 = vld [vmem:[#allocation53_spill] sm:$0xff]  ;;  %v18750_v60 = vld [vmem:[#allocation54_spill] sm:$0xff] }
 0x878   :  { %6477 = vmatpush1.bf16.msra.mxu0 %v18740_v22  ;;  %6559 = vmatpush1.bf16.msra.mxu1 %v18741_v6  ;;  %v18751_v22 = vld [vmem:[#allocation55_spill] sm:$0xff]  ;;  %v18752_v6 = vld [vmem:[#allocation56_spill] sm:$0xff] }
 0x879   :  { %6478 = vmatprep.subr.bf16.mxu0 %v18742_v49  ;;  %6560 = vmatprep.subr.bf16.mxu1 %v18743_v56  ;;  %v18753_v49 = vld [vmem:[#allocation68_spill] sm:$0xff]  ;;  %v18754_v56 = vld [vmem:[#allocation69_spill] sm:$0xff] }
 0x87c   :  { %6479 = vmatpush1.bf16.msra.mxu0 %v18744_v3  ;;  %6561 = vmatpush1.bf16.msra.mxu1 %v18745_v62  ;;  %v18755_v3 = vld [vmem:[#allocation70_spill] sm:$0xff]  ;;  %v18756_v62 = vld [vmem:[#allocation71_spill] sm:$0xff] }
 0x87d   :  { %6480 = vmatprep.subr.bf16.mxu0 %v18746_v14  ;;  %6562 = vmatprep.subr.bf16.mxu1 %v18747_v38  ;;  %v18757_v14 = vld [vmem:[#allocation72_spill] sm:$0xff]  ;;  %v18758_v38 = vld [vmem:[#allocation73_spill] sm:$0xff] }
 0x880   :  { %6481 = vmatpush1.bf16.msra.mxu0 %v18748_v53  ;;  %6563 = vmatpush1.bf16.msra.mxu1 %v18749_v7  ;;  %v18759_v53 = vld [vmem:[#allocation74_spill] sm:$0xff]  ;;  %v18760_v7 = vld [vmem:[#allocation75_spill] sm:$0xff] }
 0x881   :  { %6482 = vmatprep.subr.bf16.mxu0 %v18750_v60  ;;  %6564 = vmatprep.subr.bf16.mxu1 %v18751_v22  ;;  %v18761_v60 = vld [vmem:[#allocation77_spill] sm:$0xff]  ;;  %v18762_v22 = vld [vmem:[#allocation78_spill] sm:$0xff] }
 0x884   :  { %6483 = vmatpush1.bf16.msra.mxu0 %v18752_v6  ;;  %6565 = vmatpush1.bf16.msra.mxu1 %v18753_v49  ;;  %v18763_v6 = vld [vmem:[#allocation79_spill] sm:$0xff]  ;;  %v18764_v49 = vld [vmem:[#allocation80_spill] sm:$0xff] }
 0x885   :  { %6484 = vmatprep.subr.bf16.mxu0 %v18754_v56  ;;  %6566 = vmatprep.subr.bf16.mxu1 %v18755_v3  ;;  %v18765_v56 = vld [vmem:[#allocation81_spill] sm:$0xff]  ;;  %v18766_v3 = vld [vmem:[#allocation82_spill] sm:$0xff] }
 0x888   :  { %6485 = vmatpush1.bf16.msra.mxu0 %v18756_v62  ;;  %6567 = vmatpush1.bf16.msra.mxu1 %v18757_v14  ;;  %v18767_v62 = vld [vmem:[#allocation83_spill] sm:$0xff]  ;;  %v18768_v14 = vld [vmem:[#allocation84_spill] sm:$0xff] }
 0x889   :  { %6486 = vmatprep.subr.bf16.mxu0 %v18758_v38  ;;  %6568 = vmatprep.subr.bf16.mxu1 %v18759_v53  ;;  %v18769_v38 = vld [vmem:[#allocation85_spill] sm:$0xff] }
 0x88c   :  { %6487 = vmatpush1.bf16.msra.mxu0 %v18760_v7  ;;  %6569 = vmatpush1.bf16.msra.mxu1 %v18761_v60  ;;  %v18770_v60 = vld [vmem:[#allocation88_spill] sm:$0xff] }
 0x88d   :  { %6488 = vmatprep.subr.bf16.mxu0 %v18762_v22  ;;  %6570 = vmatprep.subr.bf16.mxu1 %v18763_v6 }
 0x890   :  { %6489 = vmatpush1.bf16.msra.mxu0 %v18764_v49  ;;  %6571 = vmatpush1.bf16.msra.mxu1 %v18765_v56  ;;  %v16304_v56 = vld [vmem:[%s17884_s12 + $0x3c4] ss:$16 sps:$4 sm:$0xff]  }
 0x891   :  { %6490 = vmatprep.subr.bf16.mxu0 %v18766_v3  ;;  %6572 = vmatprep.subr.bf16.mxu1 %v18767_v62  ;;  %18771 = vst [vmem:[#allocation91_spill] sm:$0xff] %v16304_v56 }
 0x894   :  { %6491 = vmatpush1.bf16.msra.mxu0 %v18768_v14  ;;  %6573 = vmatpush1.bf16.msra.mxu1 %v18769_v38  ;;  %v16310_v14 = vld [vmem:[%s17884_s12 + $0x3cc] ss:$16 sps:$4 sm:$0xff]  }
 0x895   :  { %6492 = vmatprep.subr.bf16.mxu0 %v16108_v46  ;;  %6574 = vmatprep.subr.bf16.mxu1 %v16114_v1  ;;  %18772 = vst [vmem:[#allocation92_spill] sm:$0xff] %v16310_v14 }
 0x898   :  { %6493 = vmatpush1.bf16.msra.mxu0 %v18770_v60  ;;  %6575 = vmatpush1.bf16.msra.mxu1 %v16126_v25  ;;  %v16316_v60 = vld [vmem:[%s17884_s12 + $0x3c0] ss:$16 sps:$4 sm:$0xff]   ;;  %v16322_v25 = vld [vmem:[%s17884_s12 + $0x3c8] ss:$16 sps:$4 sm:$0xff]  }
 0x899   :  { %6494 = vmatprep.subr.bf16.mxu0 %v16304_v56  ;;  %6576 = vmatprep.subr.bf16.mxu1 %v16310_v14  ;;  %18773 = vst [vmem:[#allocation93_spill] sm:$0xff] %v16316_v60  ;;  %18774 = vst [vmem:[#allocation94_spill] sm:$0xff] %v16322_v25  ;;  %v16328_v56 = vld [vmem:[%s17884_s12 + $0x3e4] ss:$16 sps:$4 sm:$0xff]   ;;  %v16334_v14 = vld [vmem:[%s17884_s12 + $0x3ec] ss:$16 sps:$4 sm:$0xff]  }
 0x89a   :  { %18775 = vst [vmem:[#allocation102_spill] sm:$0xff] %v16328_v56  ;;  %18776 = vst [vmem:[#allocation106_spill] sm:$0xff] %v16334_v14 }
 0x89c   :  { %6495 = vmatpush1.bf16.msra.mxu0 %v16316_v60  ;;  %6577 = vmatpush1.bf16.msra.mxu1 %v16322_v25  ;;  %v16340_v60 = vld [vmem:[%s17884_s12 + $0x3e0] ss:$16 sps:$4 sm:$0xff]   ;;  %v16346_v25 = vld [vmem:[%s17884_s12 + $0x3e8] ss:$16 sps:$4 sm:$0xff]  }
 0x89d   :  { %6496 = vmatprep.subr.bf16.mxu0 %v16328_v56  ;;  %6578 = vmatprep.subr.bf16.mxu1 %v16334_v14  ;;  %18777 = vst [vmem:[#allocation107_spill] sm:$0xff] %v16340_v60  ;;  %18778 = vst [vmem:[#allocation108_spill] sm:$0xff] %v16346_v25  ;;  %v6423_v56 = vpack.c.bf16 %v16211_v45, %v16211_v45 }
 0x8a0   :  { %6497 = vmatpush1.bf16.msra.mxu0 %v16340_v60  ;;  %6579 = vmatpush1.bf16.msra.mxu1 %v16346_v25 }
 0x8a1   :  { %6613 = vmatprep.subr.bf16.mxu0 %v15372_v27  ;;  %6695 = vmatprep.subr.bf16.mxu1 %v15378_v5  ;;  %v18779_v27 = vld [vmem:[#allocation49_spill] sm:$0xff] }
 0x8a2   :  { %v18780_v5 = vld [vmem:[#allocation57_spill] sm:$0xff] }
 0x8a3   :  { %6499 = vmatmul.mubr.bf16.vlgmr.msra.gmra.mrb[144].mxu0 %v6423_v56  ;;  %6581 = vmatmul.mubr.bf16.vlgmr.msra.gmra.mrb[160].mxu1 %v6423_v56  ;;  %v18807_v56 = vld [vmem:[#allocation17_spill] sm:$0xff] }
 0x8a4   :  { %6614 = vmatpush1.bf16.msra.mxu0 %v15384_v15  ;;  %6696 = vmatpush1.bf16.msra.mxu1 %v15390_v52  ;;  %v18781_v15 = vld [vmem:[#allocation58_spill] sm:$0xff]  ;;  %v18782_v52 = vld [vmem:[#allocation59_spill] sm:$0xff] }
 0x8a5   :  { %6615 = vmatprep.subr.bf16.mxu0 %v15396_v44  ;;  %6697 = vmatprep.subr.bf16.mxu1 %v15402_v24  ;;  %v18783_v44 = vld [vmem:[#allocation60_spill] sm:$0xff]  ;;  %v18784_v24 = vld [vmem:[#allocation61_spill] sm:$0xff] }
 0x8a8   :  { %6616 = vmatpush1.bf16.msra.mxu0 %v15408_v33  ;;  %6698 = vmatpush1.bf16.msra.mxu1 %v15414_v9  ;;  %v18785_v33 = vld [vmem:[#allocation62_spill] sm:$0xff]  ;;  %v18786_v9 = vld [vmem:[#allocation63_spill] sm:$0xff] }
 0x8a9   :  { %6617 = vmatprep.subr.bf16.mxu0 %v15420_v41  ;;  %6699 = vmatprep.subr.bf16.mxu1 %v15426_v26  ;;  %v18787_v41 = vld [vmem:[#allocation64_spill] sm:$0xff]  ;;  %v18788_v26 = vld [vmem:[#allocation65_spill] sm:$0xff] }
 0x8ac   :  { %6618 = vmatpush1.bf16.msra.mxu0 %v15432_v16  ;;  %6700 = vmatpush1.bf16.msra.mxu1 %v15438_v11  ;;  %v18789_v16 = vld [vmem:[#allocation66_spill] sm:$0xff]  ;;  %v18790_v11 = vld [vmem:[#allocation67_spill] sm:$0xff] }
 0x8ad   :  { %6619 = vmatprep.subr.bf16.mxu0 %v15444_v18  ;;  %6701 = vmatprep.subr.bf16.mxu1 %v15450_v34  ;;  %v18791_v18 = vld [vmem:[#allocation89_spill] sm:$0xff]  ;;  %v18792_v34 = vld [vmem:[#allocation95_spill] sm:$0xff] }
 0x8b0   :  { %6620 = vmatpush1.bf16.msra.mxu0 %v15456_v61  ;;  %6702 = vmatpush1.bf16.msra.mxu1 %v15462_v57  ;;  %v18793_v61 = vld [vmem:[#allocation96_spill] sm:$0xff]  ;;  %v18794_v57 = vld [vmem:[#allocation97_spill] sm:$0xff] }
 0x8b1   :  { %6621 = vmatprep.subr.bf16.mxu0 %v15468_v30  ;;  %6703 = vmatprep.subr.bf16.mxu1 %v15474_v47  ;;  %v18795_v30 = vld [vmem:[#allocation98_spill] sm:$0xff]  ;;  %v18796_v47 = vld [vmem:[#allocation99_spill] sm:$0xff] }
 0x8b4   :  { %6622 = vmatpush1.bf16.msra.mxu0 %v15480_v2  ;;  %6704 = vmatpush1.bf16.msra.mxu1 %v15486_v39  ;;  %v18797_v2 = vld [vmem:[#allocation100_spill] sm:$0xff]  ;;  %v18798_v39 = vld [vmem:[#allocation101_spill] sm:$0xff] }
 0x8b5   :  { %6623 = vmatprep.subr.bf16.mxu0 %v15492_v19  ;;  %6705 = vmatprep.subr.bf16.mxu1 %v15498_v36  ;;  %v18799_v19 = vld [vmem:[#allocation103_spill] sm:$0xff]  ;;  %v18800_v36 = vld [vmem:[#allocation104_spill] sm:$0xff] }
 0x8b8   :  { %6624 = vmatpush1.bf16.msra.mxu0 %v15504_v59  ;;  %6706 = vmatpush1.bf16.msra.mxu1 %v15510_v4  ;;  %v18801_v59 = vld [vmem:[#allocation11_spill] sm:$0xff]  ;;  %v18802_v4 = vld [vmem:[#allocation12_spill] sm:$0xff] }
 0x8b9   :  { %6625 = vmatprep.subr.bf16.mxu0 %v15516_v42  ;;  %6707 = vmatprep.subr.bf16.mxu1 %v15522_v50  ;;  %v18803_v42 = vld [vmem:[#allocation13_spill] sm:$0xff]  ;;  %v18804_v50 = vld [vmem:[#allocation14_spill] sm:$0xff] }
 0x8bc   :  { %6626 = vmatpush1.bf16.msra.mxu0 %v15528_v8  ;;  %6708 = vmatpush1.bf16.msra.mxu1 %v15534_v31  ;;  %v18805_v8 = vld [vmem:[#allocation15_spill] sm:$0xff]  ;;  %v18806_v31 = vld [vmem:[#allocation16_spill] sm:$0xff] }
 0x8bd   :  { %6627 = vmatprep.subr.bf16.mxu0 %v18779_v27  ;;  %6709 = vmatprep.subr.bf16.mxu1 %v18780_v5  ;;  %v18808_v27 = vld [vmem:[#allocation18_spill] sm:$0xff]  ;;  %v18809_v5 = vld [vmem:[#allocation19_spill] sm:$0xff] }
 0x8c0   :  { %6628 = vmatpush1.bf16.msra.mxu0 %v18781_v15  ;;  %6710 = vmatpush1.bf16.msra.mxu1 %v18782_v52  ;;  %v18810_v15 = vld [vmem:[#allocation20_spill] sm:$0xff]  ;;  %v18811_v52 = vld [vmem:[#allocation21_spill] sm:$0xff] }
 0x8c1   :  { %6629 = vmatprep.subr.bf16.mxu0 %v18783_v44  ;;  %6711 = vmatprep.subr.bf16.mxu1 %v18784_v24  ;;  %v18812_v44 = vld [vmem:[#allocation22_spill] sm:$0xff]  ;;  %v18813_v24 = vld [vmem:[#allocation23_spill] sm:$0xff] }
 0x8c4   :  { %6630 = vmatpush1.bf16.msra.mxu0 %v18785_v33  ;;  %6712 = vmatpush1.bf16.msra.mxu1 %v18786_v9  ;;  %v18814_v33 = vld [vmem:[#allocation24_spill] sm:$0xff]  ;;  %v18815_v9 = vld [vmem:[#allocation25_spill] sm:$0xff] }
 0x8c5   :  { %6631 = vmatprep.subr.bf16.mxu0 %v18787_v41  ;;  %6713 = vmatprep.subr.bf16.mxu1 %v18788_v26  ;;  %v18816_v41 = vld [vmem:[#allocation26_spill] sm:$0xff] }
 0x8c8   :  { %6632 = vmatpush1.bf16.msra.mxu0 %v18789_v16  ;;  %6714 = vmatpush1.bf16.msra.mxu1 %v18790_v11 }
 0x8c9   :  { %6633 = vmatprep.subr.bf16.mxu0 %v18791_v18  ;;  %6715 = vmatprep.subr.bf16.mxu1 %v18792_v34  ;;  %v18817_v18 = vld [vmem:[#allocation48_spill] sm:$0xff] }
 0x8cc   :  { %6634 = vmatpush1.bf16.msra.mxu0 %v18793_v61  ;;  %6716 = vmatpush1.bf16.msra.mxu1 %v18794_v57 }
 0x8cd   :  { %6635 = vmatprep.subr.bf16.mxu0 %v18795_v30  ;;  %6717 = vmatprep.subr.bf16.mxu1 %v18796_v47 }
 0x8d0   :  { %6636 = vmatpush1.bf16.msra.mxu0 %v18797_v2  ;;  %6718 = vmatpush1.bf16.msra.mxu1 %v18798_v39 }
 0x8d1   :  { %6637 = vmatprep.subr.bf16.mxu0 %v18799_v19  ;;  %6719 = vmatprep.subr.bf16.mxu1 %v18800_v36 }
 0x8d4   :  { %6638 = vmatpush1.bf16.msra.mxu0 %v18801_v59  ;;  %6720 = vmatpush1.bf16.msra.mxu1 %v18802_v4 }
 0x8d5   :  { %6639 = vmatprep.subr.bf16.mxu0 %v18803_v42  ;;  %6721 = vmatprep.subr.bf16.mxu1 %v18804_v50  ;;  %v18818_v42 = vmax.f32 %v18727_v63, %v16209_v48  ;;  %v18820_v48 = vmax.f32 %v15797_v17, %v16219_v10  ;;  %v18822_v17 = vld [vmem:[#allocation29_spill] sm:$0xff]  ;;  %v18824_v10 = vld [vmem:[#allocation31_spill] sm:$0xff] }
 0x8d8   :  { %6640 = vmatpush1.bf16.msra.mxu0 %v18805_v8  ;;  %6722 = vmatpush1.bf16.msra.mxu1 %v18806_v31 }
 0x8d9   :  { %6641 = vmatprep.subr.bf16.mxu0 %v18807_v56  ;;  %6723 = vmatprep.subr.bf16.mxu1 %v18808_v27  ;;  %v18819_v56 = vmax.f32 %v15790_v51, %v16211_v45  ;;  %v18821_v51 = vmax.f32 %v15801_v0, %v16227_v29  ;;  %v18823_v0 = vld [vmem:[#allocation30_spill] sm:$0xff]  ;;  %v18825_v29 = vld [vmem:[#allocation32_spill] sm:$0xff] }
 0x8dc   :  { %6642 = vmatpush1.bf16.msra.mxu0 %v18809_v5  ;;  %6724 = vmatpush1.bf16.msra.mxu1 %v18810_v15 }
 0x8dd   :  { %6643 = vmatprep.subr.bf16.mxu0 %v18811_v52  ;;  %6725 = vmatprep.subr.bf16.mxu1 %v18812_v44 }
 0x8e0   :  { %6644 = vmatpush1.bf16.msra.mxu0 %v18813_v24  ;;  %6726 = vmatpush1.bf16.msra.mxu1 %v18814_v33  ;;  %v18828_v33 = vld [vmem:[#allocation35_spill] sm:$0xff] }
 0x8e1   :  { %6654 = vmatprep.subr.bf16.mxu0 %v18815_v9  ;;  %6736 = vmatprep.subr.bf16.mxu1 %v18816_v41  ;;  %v18829_v9 = vld [vmem:[#allocation36_spill] sm:$0xff]  ;;  %v18830_v41 = vld [vmem:[#allocation37_spill] sm:$0xff] }
 0x976   :  { %v6500_v26 = vpop.f32.mrb[144].mxu0  ;;  %v6582_v16 = vpop.f32.mrb[160].mxu1 }
 0x977   :  { %v10378_v11 = vadd.f32 %v6500_v26, %v15119_v12  ;;  %v10380_v34 = vadd.f32 %v6582_v16, %v18817_v18  ;;  %v6502_v61 = vpop.f32.mrb[145].mxu0  ;;  %v6584_v57 = vpop.f32.mrb[161].mxu1  ;;  %v18831_v26 = vld [vmem:[#allocation38_spill] sm:$0xff]  ;;  %v18832_v16 = vld [vmem:[#allocation39_spill] sm:$0xff] }
 0x978   :  { %v10379_v30 = vadd.f32 %v6502_v61, %v15123_v32  ;;  %v10381_v47 = vadd.f32 %v6584_v57, %v18726_v21  ;;  %v6504_v2 = vpop.f32.mrb[146].mxu0  ;;  %v6586_v39 = vpop.f32.mrb[162].mxu1  ;;  %v18835_v61 = vld [vmem:[#allocation42_spill] sm:$0xff]  ;;  %v18836_v57 = vld [vmem:[#allocation43_spill] sm:$0xff] }
 0x979   :  { %11031 = vtanh.f32 %v10378_v11  ;;  %v6505_v19 = vpop.f32.mrb[147].mxu0  ;;  %v6587_v36 = vpop.f32.mrb[163].mxu1  ;;  %v18833_v11 = vld [vmem:[#allocation40_spill] sm:$0xff]  ;;  %v18839_v2 = vld [vmem:[#allocation46_spill] sm:$0xff]  ;;  %v18840_v39 = vld [vmem:[#allocation47_spill] sm:$0xff] }
 0x97a   :  { %11033 = vtanh.f32 %v10380_v34  ;;  %v18834_v34 = vld [vmem:[#allocation41_spill] sm:$0xff]  ;;  %v18841_v19 = vld [vmem:[#allocation50_spill] sm:$0xff]  ;;  %v18842_v36 = vld [vmem:[#allocation51_spill] sm:$0xff] }
 0x97b   :  { %11035 = vtanh.f32 %v10379_v30  ;;  %v18837_v30 = vld [vmem:[#allocation44_spill] sm:$0xff] }
 0x97c   :  { %11037 = vtanh.f32 %v10381_v47  ;;  %v18838_v47 = vld [vmem:[#allocation45_spill] sm:$0xff] }
 0x983   :  { %v11032_v59 = vpop.eup %11031 }
 0x984   :  { %v16421_v4 = vpop.eup %11033  ;;  %v16426_v50 = vmax.f32 %v18818_v42, %v11032_v59  ;;  %v16429_v8 = vadd.f32 %v11032_v59, %v16217_v37  ;;  %v6609_v44 = vpack.c.bf16 %v11032_v59, %v11032_v59  ;;  %v18843_v59 = vld [vmem:[#allocation52_spill] sm:$0xff]  ;;  %v18844_v42 = vld [vmem:[#allocation53_spill] sm:$0xff] }
 0x985   :  { %v11036_v31 = vpop.eup %11035  ;;  %v16435_v27 = vmax.f32 %v18819_v56, %v16421_v4  ;;  %v16439_v5 = vadd.f32 %v16421_v4, %v16225_v23  ;;  %v18846_v56 = vld [vmem:[#allocation55_spill] sm:$0xff] }
 0x986   :  { %v11038_v15 = vpop.eup %11037  ;;  %v6610_v52 = vpack.c.bf16 %v11036_v31, %v11036_v31  ;;  %v16444_v63 = vmax.f32 %v18820_v48, %v11036_v31  ;;  %v16447_v37 = vadd.f32 %v11036_v31, %v16235_v40  ;;  %v18826_v40 = vld [vmem:[#allocation33_spill] sm:$0xff]  ;;  %v18845_v31 = vld [vmem:[#allocation54_spill] sm:$0xff] }
 0x987   :  { %v16452_v45 = vmax.f32 %v18821_v51, %v11038_v15  ;;  %v16455_v24 = vadd.f32 %v11038_v15, %v16243_v35  ;;  %v6612_v23 = vpack.c.bf16 %v11038_v15, %v11038_v15  ;;  %v18827_v35 = vld [vmem:[#allocation34_spill] sm:$0xff]  ;;  %v18847_v15 = vld [vmem:[#allocation56_spill] sm:$0xff]  ;;  %v18849_v48 = vld [vmem:[#allocation69_spill] sm:$0xff] }
 0x988   :  { %6645 = vmatprep.mubr.bf16.mxu0 %v6610_v52  ;;  %6727 = vmatprep.mubr.bf16.mxu1 %v6610_v52  ;;  %v18848_v52 = vld [vmem:[#allocation68_spill] sm:$0xff]  ;;  %v18851_v51 = vld [vmem:[#allocation71_spill] sm:$0xff] }
 0x989   :  { %6646 = vmatmul.mubr.bf16.vlgmr.msra.gmra.mrb[148].mxu0 %v6609_v44  ;;  %6728 = vmatmul.mubr.bf16.vlgmr.msra.gmra.mrb[164].mxu1 %v6609_v44  ;;  %v18850_v44 = vld [vmem:[#allocation70_spill] sm:$0xff] }
 0x98a   :  { %6655 = vmatpush1.bf16.msra.mxu0 %v15808_v28  ;;  %6737 = vmatpush1.bf16.msra.mxu1 %v15814_v13 }
 0x98b   :  { %6686 = vmatprep.mubr.bf16.mxu0 %v6612_v23  ;;  %6768 = vmatprep.mubr.bf16.mxu1 %v6612_v23  ;;  %v18852_v23 = vld [vmem:[#allocation72_spill] sm:$0xff] }
 0x98c   :  { %6656 = vmatprep.subr.bf16.mxu0 %v15820_v55  ;;  %6738 = vmatprep.subr.bf16.mxu1 %v15826_v43 }
 0x98e   :  { %6657 = vmatpush1.bf16.msra.mxu0 %v15832_v54  ;;  %6739 = vmatpush1.bf16.msra.mxu1 %v15838_v20 }
 0x98f   :  { %6658 = vmatprep.subr.bf16.mxu0 %v15844_v58  ;;  %6740 = vmatprep.subr.bf16.mxu1 %v18822_v17 }
 0x992   :  { %6659 = vmatpush1.bf16.msra.mxu0 %v18823_v0  ;;  %6741 = vmatpush1.bf16.msra.mxu1 %v18824_v10 }
 0x993   :  { %6660 = vmatprep.subr.bf16.mxu0 %v18825_v29  ;;  %6742 = vmatprep.subr.bf16.mxu1 %v18826_v40 }
 0x996   :  { %6661 = vmatpush1.bf16.msra.mxu0 %v18827_v35  ;;  %6743 = vmatpush1.bf16.msra.mxu1 %v18828_v33 }
 0x997   :  { %6662 = vmatprep.subr.bf16.mxu0 %v18829_v9  ;;  %6744 = vmatprep.subr.bf16.mxu1 %v18830_v41 }
 0x99a   :  { %6663 = vmatpush1.bf16.msra.mxu0 %v18831_v26  ;;  %6745 = vmatpush1.bf16.msra.mxu1 %v18832_v16 }
 0x99b   :  { %6664 = vmatprep.subr.bf16.mxu0 %v18833_v11  ;;  %6746 = vmatprep.subr.bf16.mxu1 %v18834_v34 }
 0x99e   :  { %6665 = vmatpush1.bf16.msra.mxu0 %v18835_v61  ;;  %6747 = vmatpush1.bf16.msra.mxu1 %v18836_v57 }
 0x99f   :  { %6666 = vmatprep.subr.bf16.mxu0 %v18837_v30  ;;  %6748 = vmatprep.subr.bf16.mxu1 %v18838_v47 }
 0x9a2   :  { %6667 = vmatpush1.bf16.msra.mxu0 %v18839_v2  ;;  %6749 = vmatpush1.bf16.msra.mxu1 %v18840_v39 }
 0x9a3   :  { %6668 = vmatprep.subr.bf16.mxu0 %v18841_v19  ;;  %6750 = vmatprep.subr.bf16.mxu1 %v18842_v36  ;;  %v18853_v36 = vld [vmem:[#allocation73_spill] sm:$0xff] }
 0x9a6   :  { %6669 = vmatpush1.bf16.msra.mxu0 %v18843_v59  ;;  %6751 = vmatpush1.bf16.msra.mxu1 %v18844_v42 }
 0x9a7   :  { %6670 = vmatprep.subr.bf16.mxu0 %v18845_v31  ;;  %6752 = vmatprep.subr.bf16.mxu1 %v18846_v56  ;;  %v18854_v31 = vld [vmem:[#allocation77_spill] sm:$0xff] }
 0x9aa   :  { %6671 = vmatpush1.bf16.msra.mxu0 %v18847_v15  ;;  %6753 = vmatpush1.bf16.msra.mxu1 %v18848_v52 }
 0x9ab   :  { %6672 = vmatprep.subr.bf16.mxu0 %v18849_v48  ;;  %6754 = vmatprep.subr.bf16.mxu1 %v18850_v44  ;;  %v18855_v48 = vld [vmem:[#allocation81_spill] sm:$0xff] }
 0x9ae   :  { %6673 = vmatpush1.bf16.msra.mxu0 %v18851_v51  ;;  %6755 = vmatpush1.bf16.msra.mxu1 %v18852_v23  ;;  %v18856_v23 = vld [vmem:[#allocation84_spill] sm:$0xff] }
 0x9af   :  { %6674 = vmatprep.subr.bf16.mxu0 %v18853_v36  ;;  %6756 = vmatprep.subr.bf16.mxu1 %v18759_v53 }
 0x9b2   :  { %6675 = vmatpush1.bf16.msra.mxu0 %v18760_v7  ;;  %6757 = vmatpush1.bf16.msra.mxu1 %v18854_v31  ;;  %v18857_v31 = vld [vmem:[#allocation88_spill] sm:$0xff] }
 0x9b3   :  { %6676 = vmatprep.subr.bf16.mxu0 %v18762_v22  ;;  %6758 = vmatprep.subr.bf16.mxu1 %v18763_v6  ;;  %v18858_v22 = vld [vmem:[#allocation90_spill] sm:$0xff]  ;;  %v18859_v6 = vld [vmem:[#allocation91_spill] sm:$0xff] }
 0x9b6   :  { %6677 = vmatpush1.bf16.msra.mxu0 %v18764_v49  ;;  %6759 = vmatpush1.bf16.msra.mxu1 %v18855_v48  ;;  %v18860_v49 = vld [vmem:[#allocation92_spill] sm:$0xff]  ;;  %v18861_v48 = vld [vmem:[#allocation93_spill] sm:$0xff] }
 0x9b7   :  { %6678 = vmatprep.subr.bf16.mxu0 %v18766_v3  ;;  %6760 = vmatprep.subr.bf16.mxu1 %v18767_v62  ;;  %v18862_v3 = vld [vmem:[#allocation94_spill] sm:$0xff] }
 0x9b8   :  { %v18863_v62 = vld [vmem:[#allocation102_spill] sm:$0xff] }
 0x9ba   :  { %6679 = vmatpush1.bf16.msra.mxu0 %v18856_v23  ;;  %6761 = vmatpush1.bf16.msra.mxu1 %v18769_v38 }
 0x9bb   :  { %6680 = vmatprep.subr.bf16.mxu0 %v16108_v46  ;;  %6762 = vmatprep.subr.bf16.mxu1 %v16114_v1 }
 0x9be   :  { %6681 = vmatpush1.bf16.msra.mxu0 %v18857_v31  ;;  %6763 = vmatpush1.bf16.msra.mxu1 %v18858_v22  ;;  %v6611_v31 = vpack.c.bf16 %v16421_v4, %v16421_v4  ;;  %v16536_v4 = vld [vmem:[%s17884_s12] ss:$16 sps:$4 sm:$0xff]  }
 0x9bf   :  { %6682 = vmatprep.subr.bf16.mxu0 %v18859_v6  ;;  %6764 = vmatprep.subr.bf16.mxu1 %v18860_v49  ;;  %v16524_v6 = vld [vmem:[%s17884_s12 + $0x4] ss:$16 sps:$4 sm:$0xff]   ;;  %18866 = vst [vmem:[#allocation28_spill] sm:$0xff] %v16536_v4 }
 0x9c0   :  { %18864 = vst [vmem:[#allocation105_spill] sm:$0xff] %v16524_v6 }
 0x9c2   :  { %6683 = vmatpush1.bf16.msra.mxu0 %v18861_v48  ;;  %6765 = vmatpush1.bf16.msra.mxu1 %v18862_v3 }
 0x9c3   :  { %6684 = vmatprep.subr.bf16.mxu0 %v18863_v62  ;;  %6766 = vmatprep.subr.bf16.mxu1 %v16334_v14  ;;  %v16530_v62 = vld [vmem:[%s17884_s12 + $0xc] ss:$16 sps:$4 sm:$0xff]  }
 0x9c4   :  { %18865 = vst [vmem:[#allocation27_spill] sm:$0xff] %v16530_v62 }
 0x9c6   :  { %6685 = vmatpush1.bf16.msra.mxu0 %v16340_v60  ;;  %6767 = vmatpush1.bf16.msra.mxu1 %v16346_v25 }
 0x9c7   :  { %6801 = vmatprep.subr.bf16.mxu0 %v16524_v6  ;;  %6883 = vmatprep.subr.bf16.mxu1 %v16530_v62  ;;  %v16542_v6 = vld [vmem:[%s17884_s12 + $0x8] ss:$16 sps:$4 sm:$0xff]   ;;  %v16548_v62 = vld [vmem:[%s17884_s12 + $0x24] ss:$16 sps:$4 sm:$0xff]  }
 0x9c8   :  { %18867 = vst [vmem:[#allocation74_spill] sm:$0xff] %v16542_v6  ;;  %18868 = vst [vmem:[#allocation75_spill] sm:$0xff] %v16548_v62 }
 0x9c9   :  { %6687 = vmatmul.mubr.bf16.vlgmr.msra.gmra.mrb[148].mxu0 %v6611_v31  ;;  %6769 = vmatmul.mubr.bf16.vlgmr.msra.gmra.mrb[164].mxu1 %v6611_v31  ;;  %v16554_v31 = vld [vmem:[%s17884_s12 + $0x2c] ss:$16 sps:$4 sm:$0xff]  }
 0x9ca   :  { %6802 = vmatpush1.bf16.msra.mxu0 %v16536_v4  ;;  %6884 = vmatpush1.bf16.msra.mxu1 %v16542_v6  ;;  %18869 = vst [vmem:[#allocation49_spill] sm:$0xff] %v16554_v31  ;;  %v16560_v4 = vld [vmem:[%s17884_s12 + $0x20] ss:$16 sps:$4 sm:$0xff]   ;;  %v16566_v6 = vld [vmem:[%s17884_s12 + $0x28] ss:$16 sps:$4 sm:$0xff]  }
 0x9cb   :  { %6803 = vmatprep.subr.bf16.mxu0 %v16548_v62  ;;  %6885 = vmatprep.subr.bf16.mxu1 %v16554_v31  ;;  %18870 = vst [vmem:[#allocation57_spill] sm:$0xff] %v16560_v4  ;;  %18871 = vst [vmem:[#allocation58_spill] sm:$0xff] %v16566_v6  ;;  %v16572_v62 = vld [vmem:[%s17884_s12 + $0x44] ss:$16 sps:$4 sm:$0xff]   ;;  %v16578_v31 = vld [vmem:[%s17884_s12 + $0x4c] ss:$16 sps:$4 sm:$0xff]  }
 0x9cc   :  { %18872 = vst [vmem:[#allocation59_spill] sm:$0xff] %v16572_v62  ;;  %18873 = vst [vmem:[#allocation60_spill] sm:$0xff] %v16578_v31 }
 0x9ce   :  { %6804 = vmatpush1.bf16.msra.mxu0 %v16560_v4  ;;  %6886 = vmatpush1.bf16.msra.mxu1 %v16566_v6  ;;  %v16584_v4 = vld [vmem:[%s17884_s12 + $0x40] ss:$16 sps:$4 sm:$0xff]   ;;  %v16590_v6 = vld [vmem:[%s17884_s12 + $0x48] ss:$16 sps:$4 sm:$0xff]  }
 0x9cf   :  { %6805 = vmatprep.subr.bf16.mxu0 %v16572_v62  ;;  %6887 = vmatprep.subr.bf16.mxu1 %v16578_v31  ;;  %18874 = vst [vmem:[#allocation61_spill] sm:$0xff] %v16584_v4  ;;  %18875 = vst [vmem:[#allocation62_spill] sm:$0xff] %v16590_v6  ;;  %v16596_v62 = vld [vmem:[%s17884_s12 + $0x64] ss:$16 sps:$4 sm:$0xff]   ;;  %v16602_v31 = vld [vmem:[%s17884_s12 + $0x6c] ss:$16 sps:$4 sm:$0xff]  }
 0x9d0   :  { %18876 = vst [vmem:[#allocation63_spill] sm:$0xff] %v16596_v62  ;;  %18877 = vst [vmem:[#allocation64_spill] sm:$0xff] %v16602_v31 }
 0x9d2   :  { %6806 = vmatpush1.bf16.msra.mxu0 %v16584_v4  ;;  %6888 = vmatpush1.bf16.msra.mxu1 %v16590_v6  ;;  %v16608_v4 = vld [vmem:[%s17884_s12 + $0x60] ss:$16 sps:$4 sm:$0xff]   ;;  %v16614_v6 = vld [vmem:[%s17884_s12 + $0x68] ss:$16 sps:$4 sm:$0xff]  }
 0x9d3   :  { %6807 = vmatprep.subr.bf16.mxu0 %v16596_v62  ;;  %6889 = vmatprep.subr.bf16.mxu1 %v16602_v31  ;;  %18878 = vst [vmem:[#allocation65_spill] sm:$0xff] %v16608_v4  ;;  %18879 = vst [vmem:[#allocation66_spill] sm:$0xff] %v16614_v6  ;;  %v16620_v62 = vld [vmem:[%s17884_s12 + $0x84] ss:$16 sps:$4 sm:$0xff]   ;;  %v16626_v31 = vld [vmem:[%s17884_s12 + $0x8c] ss:$16 sps:$4 sm:$0xff]  }
 0x9d4   :  { %18880 = vst [vmem:[#allocation67_spill] sm:$0xff] %v16620_v62  ;;  %18881 = vst [vmem:[#allocation89_spill] sm:$0xff] %v16626_v31 }
 0x9d6   :  { %6808 = vmatpush1.bf16.msra.mxu0 %v16608_v4  ;;  %6890 = vmatpush1.bf16.msra.mxu1 %v16614_v6  ;;  %v16632_v4 = vld [vmem:[%s17884_s12 + $0x80] ss:$16 sps:$4 sm:$0xff]   ;;  %v16638_v6 = vld [vmem:[%s17884_s12 + $0x88] ss:$16 sps:$4 sm:$0xff]  }
 0x9d7   :  { %6809 = vmatprep.subr.bf16.mxu0 %v16620_v62  ;;  %6891 = vmatprep.subr.bf16.mxu1 %v16626_v31  ;;  %18882 = vst [vmem:[#allocation95_spill] sm:$0xff] %v16632_v4  ;;  %18883 = vst [vmem:[#allocation96_spill] sm:$0xff] %v16638_v6  ;;  %v16644_v62 = vld [vmem:[%s17884_s12 + $0xa4] ss:$16 sps:$4 sm:$0xff]   ;;  %v16650_v31 = vld [vmem:[%s17884_s12 + $0xac] ss:$16 sps:$4 sm:$0xff]  }
 0x9d8   :  { %18884 = vst [vmem:[#allocation97_spill] sm:$0xff] %v16644_v62  ;;  %18885 = vst [vmem:[#allocation98_spill] sm:$0xff] %v16650_v31 }
 0x9da   :  { %6810 = vmatpush1.bf16.msra.mxu0 %v16632_v4  ;;  %6892 = vmatpush1.bf16.msra.mxu1 %v16638_v6  ;;  %v16656_v4 = vld [vmem:[%s17884_s12 + $0xa0] ss:$16 sps:$4 sm:$0xff]   ;;  %v16662_v6 = vld [vmem:[%s17884_s12 + $0xa8] ss:$16 sps:$4 sm:$0xff]  }
 0x9db   :  { %6811 = vmatprep.subr.bf16.mxu0 %v16644_v62  ;;  %6893 = vmatprep.subr.bf16.mxu1 %v16650_v31  ;;  %18886 = vst [vmem:[#allocation99_spill] sm:$0xff] %v16656_v4  ;;  %18887 = vst [vmem:[#allocation100_spill] sm:$0xff] %v16662_v6  ;;  %v16668_v62 = vld [vmem:[%s17884_s12 + $0xc4] ss:$16 sps:$4 sm:$0xff]   ;;  %v16674_v31 = vld [vmem:[%s17884_s12 + $0xcc] ss:$16 sps:$4 sm:$0xff]  }
 0x9dc   :  { %18888 = vst [vmem:[#allocation101_spill] sm:$0xff] %v16668_v62  ;;  %18889 = vst [vmem:[#allocation103_spill] sm:$0xff] %v16674_v31 }
 0x9de   :  { %6812 = vmatpush1.bf16.msra.mxu0 %v16656_v4  ;;  %6894 = vmatpush1.bf16.msra.mxu1 %v16662_v6  ;;  %v16680_v4 = vld [vmem:[%s17884_s12 + $0xc0] ss:$16 sps:$4 sm:$0xff]   ;;  %v16686_v6 = vld [vmem:[%s17884_s12 + $0xc8] ss:$16 sps:$4 sm:$0xff]  }
 0x9df   :  { %6813 = vmatprep.subr.bf16.mxu0 %v16668_v62  ;;  %6895 = vmatprep.subr.bf16.mxu1 %v16674_v31  ;;  %18890 = vst [vmem:[#allocation104_spill] sm:$0xff] %v16680_v4  ;;  %18891 = vst [vmem:[#allocation11_spill] sm:$0xff] %v16686_v6  ;;  %v16692_v62 = vld [vmem:[%s17884_s12 + $0xe4] ss:$16 sps:$4 sm:$0xff]   ;;  %v16698_v31 = vld [vmem:[%s17884_s12 + $0xec] ss:$16 sps:$4 sm:$0xff]  }
 0x9e0   :  { %18892 = vst [vmem:[#allocation12_spill] sm:$0xff] %v16692_v62  ;;  %18893 = vst [vmem:[#allocation13_spill] sm:$0xff] %v16698_v31 }
 0x9e2   :  { %6814 = vmatpush1.bf16.msra.mxu0 %v16680_v4  ;;  %6896 = vmatpush1.bf16.msra.mxu1 %v16686_v6  ;;  %v16704_v4 = vld [vmem:[%s17884_s12 + $0xe0] ss:$16 sps:$4 sm:$0xff]   ;;  %v16710_v6 = vld [vmem:[%s17884_s12 + $0xe8] ss:$16 sps:$4 sm:$0xff]  }
 0x9e3   :  { %6815 = vmatprep.subr.bf16.mxu0 %v16692_v62  ;;  %6897 = vmatprep.subr.bf16.mxu1 %v16698_v31  ;;  %18894 = vst [vmem:[#allocation14_spill] sm:$0xff] %v16704_v4  ;;  %18895 = vst [vmem:[#allocation15_spill] sm:$0xff] %v16710_v6  ;;  %v16716_v62 = vld [vmem:[%s17884_s12 + $0x104] ss:$16 sps:$4 sm:$0xff]   ;;  %v16722_v31 = vld [vmem:[%s17884_s12 + $0x10c] ss:$16 sps:$4 sm:$0xff]  }
 0x9e4   :  { %18896 = vst [vmem:[#allocation16_spill] sm:$0xff] %v16716_v62  ;;  %18897 = vst [vmem:[#allocation17_spill] sm:$0xff] %v16722_v31 }
 0x9e6   :  { %6816 = vmatpush1.bf16.msra.mxu0 %v16704_v4  ;;  %6898 = vmatpush1.bf16.msra.mxu1 %v16710_v6  ;;  %v16728_v4 = vld [vmem:[%s17884_s12 + $0x100] ss:$16 sps:$4 sm:$0xff]   ;;  %v16734_v6 = vld [vmem:[%s17884_s12 + $0x108] ss:$16 sps:$4 sm:$0xff]  }
 0x9e7   :  { %6817 = vmatprep.subr.bf16.mxu0 %v16716_v62  ;;  %6899 = vmatprep.subr.bf16.mxu1 %v16722_v31  ;;  %18898 = vst [vmem:[#allocation18_spill] sm:$0xff] %v16728_v4  ;;  %18899 = vst [vmem:[#allocation19_spill] sm:$0xff] %v16734_v6  ;;  %v16740_v62 = vld [vmem:[%s17884_s12 + $0x124] ss:$16 sps:$4 sm:$0xff]   ;;  %v16746_v31 = vld [vmem:[%s17884_s12 + $0x12c] ss:$16 sps:$4 sm:$0xff]  }
 0x9e8   :  { %18900 = vst [vmem:[#allocation20_spill] sm:$0xff] %v16740_v62  ;;  %18901 = vst [vmem:[#allocation21_spill] sm:$0xff] %v16746_v31 }
 0x9ea   :  { %6818 = vmatpush1.bf16.msra.mxu0 %v16728_v4  ;;  %6900 = vmatpush1.bf16.msra.mxu1 %v16734_v6  ;;  %v16752_v4 = vld [vmem:[%s17884_s12 + $0x120] ss:$16 sps:$4 sm:$0xff]   ;;  %v16758_v6 = vld [vmem:[%s17884_s12 + $0x128] ss:$16 sps:$4 sm:$0xff]  }
 0x9eb   :  { %6819 = vmatprep.subr.bf16.mxu0 %v16740_v62  ;;  %6901 = vmatprep.subr.bf16.mxu1 %v16746_v31  ;;  %18902 = vst [vmem:[#allocation22_spill] sm:$0xff] %v16752_v4  ;;  %18903 = vst [vmem:[#allocation23_spill] sm:$0xff] %v16758_v6  ;;  %v16764_v62 = vld [vmem:[%s17884_s12 + $0x144] ss:$16 sps:$4 sm:$0xff]   ;;  %v16770_v31 = vld [vmem:[%s17884_s12 + $0x14c] ss:$16 sps:$4 sm:$0xff]  }
 0x9ec   :  { %18904 = vst [vmem:[#allocation24_spill] sm:$0xff] %v16764_v62  ;;  %18905 = vst [vmem:[#allocation25_spill] sm:$0xff] %v16770_v31 }
 0x9ee   :  { %6820 = vmatpush1.bf16.msra.mxu0 %v16752_v4  ;;  %6902 = vmatpush1.bf16.msra.mxu1 %v16758_v6  ;;  %v16776_v4 = vld [vmem:[%s17884_s12 + $0x140] ss:$16 sps:$4 sm:$0xff]   ;;  %v16782_v6 = vld [vmem:[%s17884_s12 + $0x148] ss:$16 sps:$4 sm:$0xff]  }
 0x9ef   :  { %6821 = vmatprep.subr.bf16.mxu0 %v16764_v62  ;;  %6903 = vmatprep.subr.bf16.mxu1 %v16770_v31  ;;  %18906 = vst [vmem:[#allocation26_spill] sm:$0xff] %v16776_v4  ;;  %18907 = vst [vmem:[#allocation48_spill] sm:$0xff] %v16782_v6  ;;  %v16788_v62 = vld [vmem:[%s17884_s12 + $0x164] ss:$16 sps:$4 sm:$0xff]   ;;  %v16794_v31 = vld [vmem:[%s17884_s12 + $0x16c] ss:$16 sps:$4 sm:$0xff]  }
 0x9f0   :  { %18908 = vst [vmem:[#allocation29_spill] sm:$0xff] %v16788_v62  ;;  %18909 = vst [vmem:[#allocation30_spill] sm:$0xff] %v16794_v31 }
 0x9f2   :  { %6822 = vmatpush1.bf16.msra.mxu0 %v16776_v4  ;;  %6904 = vmatpush1.bf16.msra.mxu1 %v16782_v6  ;;  %v16800_v4 = vld [vmem:[%s17884_s12 + $0x160] ss:$16 sps:$4 sm:$0xff]   ;;  %v16806_v6 = vld [vmem:[%s17884_s12 + $0x168] ss:$16 sps:$4 sm:$0xff]  }
 0x9f3   :  { %6823 = vmatprep.subr.bf16.mxu0 %v16788_v62  ;;  %6905 = vmatprep.subr.bf16.mxu1 %v16794_v31  ;;  %18910 = vst [vmem:[#allocation31_spill] sm:$0xff] %v16800_v4  ;;  %18911 = vst [vmem:[#allocation32_spill] sm:$0xff] %v16806_v6  ;;  %v16812_v62 = vld [vmem:[%s17884_s12 + $0x184] ss:$16 sps:$4 sm:$0xff]   ;;  %v16818_v31 = vld [vmem:[%s17884_s12 + $0x18c] ss:$16 sps:$4 sm:$0xff]  }
 0x9f4   :  { %18912 = vst [vmem:[#allocation33_spill] sm:$0xff] %v16812_v62  ;;  %18913 = vst [vmem:[#allocation34_spill] sm:$0xff] %v16818_v31 }
 0x9f6   :  { %6824 = vmatpush1.bf16.msra.mxu0 %v16800_v4  ;;  %6906 = vmatpush1.bf16.msra.mxu1 %v16806_v6  ;;  %v16824_v4 = vld [vmem:[%s17884_s12 + $0x180] ss:$16 sps:$4 sm:$0xff]   ;;  %v16830_v6 = vld [vmem:[%s17884_s12 + $0x188] ss:$16 sps:$4 sm:$0xff]  }
 0x9f7   :  { %6825 = vmatprep.subr.bf16.mxu0 %v16812_v62  ;;  %6907 = vmatprep.subr.bf16.mxu1 %v16818_v31  ;;  %18914 = vst [vmem:[#allocation35_spill] sm:$0xff] %v16824_v4  ;;  %18915 = vst [vmem:[#allocation36_spill] sm:$0xff] %v16830_v6  ;;  %v16836_v62 = vld [vmem:[%s17884_s12 + $0x1a4] ss:$16 sps:$4 sm:$0xff]   ;;  %v16842_v31 = vld [vmem:[%s17884_s12 + $0x1ac] ss:$16 sps:$4 sm:$0xff]  }
 0x9f8   :  { %18916 = vst [vmem:[#allocation37_spill] sm:$0xff] %v16836_v62  ;;  %18917 = vst [vmem:[#allocation38_spill] sm:$0xff] %v16842_v31 }
 0x9fa   :  { %6826 = vmatpush1.bf16.msra.mxu0 %v16824_v4  ;;  %6908 = vmatpush1.bf16.msra.mxu1 %v16830_v6  ;;  %v16848_v4 = vld [vmem:[%s17884_s12 + $0x1a0] ss:$16 sps:$4 sm:$0xff]   ;;  %v16854_v6 = vld [vmem:[%s17884_s12 + $0x1a8] ss:$16 sps:$4 sm:$0xff]  }
 0x9fb   :  { %6827 = vmatprep.subr.bf16.mxu0 %v16836_v62  ;;  %6909 = vmatprep.subr.bf16.mxu1 %v16842_v31  ;;  %18918 = vst [vmem:[#allocation39_spill] sm:$0xff] %v16848_v4  ;;  %18919 = vst [vmem:[#allocation40_spill] sm:$0xff] %v16854_v6  ;;  %v16860_v62 = vld [vmem:[%s17884_s12 + $0x1c4] ss:$16 sps:$4 sm:$0xff]   ;;  %v16866_v31 = vld [vmem:[%s17884_s12 + $0x1cc] ss:$16 sps:$4 sm:$0xff]  }
 0x9fc   :  { %18920 = vst [vmem:[#allocation41_spill] sm:$0xff] %v16860_v62  ;;  %18921 = vst [vmem:[#allocation42_spill] sm:$0xff] %v16866_v31 }
 0x9fe   :  { %6828 = vmatpush1.bf16.msra.mxu0 %v16848_v4  ;;  %6910 = vmatpush1.bf16.msra.mxu1 %v16854_v6  ;;  %v16872_v4 = vld [vmem:[%s17884_s12 + $0x1c0] ss:$16 sps:$4 sm:$0xff]   ;;  %v16878_v6 = vld [vmem:[%s17884_s12 + $0x1c8] ss:$16 sps:$4 sm:$0xff]  }
 0x9ff   :  { %6829 = vmatprep.subr.bf16.mxu0 %v16860_v62  ;;  %6911 = vmatprep.subr.bf16.mxu1 %v16866_v31  ;;  %18922 = vst [vmem:[#allocation43_spill] sm:$0xff] %v16872_v4  ;;  %18923 = vst [vmem:[#allocation44_spill] sm:$0xff] %v16878_v6  ;;  %v16884_v62 = vld [vmem:[%s17884_s12 + $0x1e4] ss:$16 sps:$4 sm:$0xff]   ;;  %v16890_v31 = vld [vmem:[%s17884_s12 + $0x1ec] ss:$16 sps:$4 sm:$0xff]  }
 0xa00   :  { %18924 = vst [vmem:[#allocation45_spill] sm:$0xff] %v16884_v62  ;;  %18925 = vst [vmem:[#allocation46_spill] sm:$0xff] %v16890_v31 }
 0xa02   :  { %6830 = vmatpush1.bf16.msra.mxu0 %v16872_v4  ;;  %6912 = vmatpush1.bf16.msra.mxu1 %v16878_v6  ;;  %v16896_v4 = vld [vmem:[%s17884_s12 + $0x1e0] ss:$16 sps:$4 sm:$0xff]   ;;  %v16902_v6 = vld [vmem:[%s17884_s12 + $0x1e8] ss:$16 sps:$4 sm:$0xff]  }
 0xa03   :  { %6831 = vmatprep.subr.bf16.mxu0 %v16884_v62  ;;  %6913 = vmatprep.subr.bf16.mxu1 %v16890_v31  ;;  %18926 = vst [vmem:[#allocation47_spill] sm:$0xff] %v16896_v4  ;;  %18927 = vst [vmem:[#allocation50_spill] sm:$0xff] %v16902_v6  ;;  %v16908_v62 = vld [vmem:[%s17884_s12 + $0x204] ss:$16 sps:$4 sm:$0xff]   ;;  %v16914_v31 = vld [vmem:[%s17884_s12 + $0x20c] ss:$16 sps:$4 sm:$0xff]  }
 0xa04   :  { %18928 = vst [vmem:[#allocation52_spill] sm:$0xff] %v16908_v62  ;;  %18929 = vst [vmem:[#allocation53_spill] sm:$0xff] %v16914_v31 }
 0xa06   :  { %6832 = vmatpush1.bf16.msra.mxu0 %v16896_v4  ;;  %6914 = vmatpush1.bf16.msra.mxu1 %v16902_v6 }
 0xa07   :  { %6842 = vmatprep.subr.bf16.mxu0 %v16908_v62  ;;  %6924 = vmatprep.subr.bf16.mxu1 %v16914_v31 }
 0xa9c   :  { %v6688_v4 = vpop.f32.mrb[148].mxu0  ;;  %v6770_v25 = vpop.f32.mrb[164].mxu1 }
 0xa9d   :  { %v10382_v60 = vadd.f32 %v6688_v4, %v15119_v12  ;;  %v10384_v6 = vadd.f32 %v6770_v25, %v18817_v18  ;;  %v6690_v14 = vpop.f32.mrb[149].mxu0  ;;  %v6772_v3 = vpop.f32.mrb[165].mxu1  ;;  %v18969_v4 = vld [vmem:[#allocation66_spill] sm:$0xff] }
 0xa9e   :  { %v10383_v48 = vadd.f32 %v6690_v14, %v15123_v32  ;;  %v10385_v49 = vadd.f32 %v6772_v3, %v18726_v21  ;;  %v6692_v62 = vpop.f32.mrb[150].mxu0  ;;  %v6774_v22 = vpop.f32.mrb[166].mxu1 }
 0xa9f   :  { %11039 = vtanh.f32 %v10382_v60  ;;  %v6693_v1 = vpop.f32.mrb[151].mxu0  ;;  %v6775_v46 = vpop.f32.mrb[167].mxu1 }
 0xaa0   :  { %11041 = vtanh.f32 %v10384_v6 }
 0xaa1   :  { %11043 = vtanh.f32 %v10383_v48 }
 0xaa2   :  { %11045 = vtanh.f32 %v10385_v49 }
 0xaa9   :  { %v16921_v31 = vpop.eup %11039 }
 0xaaa   :  { %v16923_v38 = vpop.eup %11041  ;;  %v6785_v25 = vmax.f32 %v16426_v50, %v16921_v31  ;;  %v16929_v14 = vadd.f32 %v16921_v31, %v16429_v8  ;;  %v6797_v49 = vpack.c.bf16 %v16921_v31, %v16921_v31 }
 0xaab   :  { %v16931_v3 = vpop.eup %11043  ;;  %v6787_v60 = vmax.f32 %v16435_v27, %v16923_v38  ;;  %v16937_v46 = vadd.f32 %v16923_v38, %v16439_v5 }
 0xaac   :  { %v16939_v1 = vpop.eup %11045  ;;  %v6798_v62 = vpack.c.bf16 %v16931_v3, %v16931_v3  ;;  %v6786_v22 = vmax.f32 %v16444_v63, %v16931_v3  ;;  %v16947_v6 = vadd.f32 %v16931_v3, %v16447_v37  ;;  %v18937_v37 = vld [vmem:[#allocation80_spill] sm:$0xff]  ;;  %v11264_v63 = vld [vmem:[%s17884_s12 + $0x200] ss:$16 sps:$4 sm:$0xff]  }
 0xaad   :  { %v6788_v8 = vmax.f32 %v16452_v45, %v16939_v1  ;;  %v16955_v5 = vadd.f32 %v16939_v1, %v16455_v24  ;;  %v6800_v48 = vpack.c.bf16 %v16939_v1, %v16939_v1  ;;  %v18938_v24 = vld [vmem:[#allocation81_spill] sm:$0xff]  ;;  %v11265_v3 = vld [vmem:[%s17884_s12 + $0x208] ss:$16 sps:$4 sm:$0xff]  }
 0xaae   :  { %6833 = vmatprep.mubr.bf16.mxu0 %v6798_v62  ;;  %6915 = vmatprep.mubr.bf16.mxu1 %v6798_v62  ;;  %v18970_v62 = vld [vmem:[#allocation67_spill] sm:$0xff]  ;;  %v11269_v1 = vld [vmem:[%s17884_s12 + $0x228] ss:$16 sps:$4 sm:$0xff]  }
 0xaaf   :  { %6834 = vmatmul.mubr.bf16.vlgmr.msra.gmra.mrb[152].mxu0 %v6797_v49  ;;  %6916 = vmatmul.mubr.bf16.vlgmr.msra.gmra.mrb[168].mxu1 %v6797_v49  ;;  %v18971_v49 = vld [vmem:[#allocation89_spill] sm:$0xff] }
 0xab0   :  { %6843 = vmatpush1.bf16.msra.mxu0 %v15808_v28  ;;  %6925 = vmatpush1.bf16.msra.mxu1 %v15814_v13  ;;  %v18930_v28 = vld [vmem:[#allocation51_spill] sm:$0xff]  ;;  %v18931_v13 = vld [vmem:[#allocation54_spill] sm:$0xff] }
 0xab1   :  { %6874 = vmatprep.mubr.bf16.mxu0 %v6800_v48  ;;  %6956 = vmatprep.mubr.bf16.mxu1 %v6800_v48  ;;  %v18972_v48 = vld [vmem:[#allocation95_spill] sm:$0xff] }
 0xab2   :  { %6844 = vmatprep.subr.bf16.mxu0 %v15820_v55  ;;  %6926 = vmatprep.subr.bf16.mxu1 %v15826_v43  ;;  %v18932_v55 = vld [vmem:[#allocation69_spill] sm:$0xff]  ;;  %v18933_v43 = vld [vmem:[#allocation72_spill] sm:$0xff] }
 0xab3   :  { %v11266_v45 = vld [vmem:[%s17884_s12 + $0x224] ss:$16 sps:$4 sm:$0xff]  }
 0xab4   :  { %6845 = vmatpush1.bf16.msra.mxu0 %v15832_v54  ;;  %6927 = vmatpush1.bf16.msra.mxu1 %v15838_v20  ;;  %v18934_v54 = vld [vmem:[#allocation77_spill] sm:$0xff]  ;;  %v18935_v20 = vld [vmem:[#allocation78_spill] sm:$0xff] }
 0xab5   :  { %6846 = vmatprep.subr.bf16.mxu0 %v15844_v58  ;;  %6928 = vmatprep.subr.bf16.mxu1 %v18822_v17  ;;  %v18936_v58 = vld [vmem:[#allocation79_spill] sm:$0xff]  ;;  %v18939_v17 = vld [vmem:[#allocation82_spill] sm:$0xff] }
 0xab8   :  { %6847 = vmatpush1.bf16.msra.mxu0 %v18823_v0  ;;  %6929 = vmatpush1.bf16.msra.mxu1 %v18824_v10  ;;  %v18940_v0 = vld [vmem:[#allocation83_spill] sm:$0xff]  ;;  %v18941_v10 = vld [vmem:[#allocation85_spill] sm:$0xff] }
 0xab9   :  { %6848 = vmatprep.subr.bf16.mxu0 %v18825_v29  ;;  %6930 = vmatprep.subr.bf16.mxu1 %v18826_v40  ;;  %v18944_v29 = vld [vmem:[#allocation88_spill] sm:$0xff]  ;;  %v18945_v40 = vld [vmem:[#allocation90_spill] sm:$0xff] }
 0xabc   :  { %6849 = vmatpush1.bf16.msra.mxu0 %v18827_v35  ;;  %6931 = vmatpush1.bf16.msra.mxu1 %v18828_v33  ;;  %v18946_v35 = vld [vmem:[#allocation91_spill] sm:$0xff]  ;;  %v18947_v33 = vld [vmem:[#allocation92_spill] sm:$0xff] }
 0xabd   :  { %6850 = vmatprep.subr.bf16.mxu0 %v18829_v9  ;;  %6932 = vmatprep.subr.bf16.mxu1 %v18830_v41  ;;  %v18948_v9 = vld [vmem:[#allocation93_spill] sm:$0xff]  ;;  %v18949_v41 = vld [vmem:[#allocation94_spill] sm:$0xff] }
 0xac0   :  { %6851 = vmatpush1.bf16.msra.mxu0 %v18831_v26  ;;  %6933 = vmatpush1.bf16.msra.mxu1 %v18832_v16  ;;  %v18950_v26 = vld [vmem:[#allocation102_spill] sm:$0xff] }
 0xac1   :  { %6852 = vmatprep.subr.bf16.mxu0 %v18833_v11  ;;  %6934 = vmatprep.subr.bf16.mxu1 %v18834_v34  ;;  %v18951_v16 = vld [vmem:[#allocation106_spill] sm:$0xff]  ;;  %v18952_v11 = vld [vmem:[#allocation107_spill] sm:$0xff]  ;;  %v18953_v34 = vld [vmem:[#allocation108_spill] sm:$0xff] }
 0xac4   :  { %6853 = vmatpush1.bf16.msra.mxu0 %v18835_v61  ;;  %6935 = vmatpush1.bf16.msra.mxu1 %v18836_v57  ;;  %v6799_v61 = vpack.c.bf16 %v16923_v38, %v16923_v38  ;;  %v18954_v57 = vld [vmem:[#allocation105_spill] sm:$0xff] }
 0xac5   :  { %6854 = vmatprep.subr.bf16.mxu0 %v18837_v30  ;;  %6936 = vmatprep.subr.bf16.mxu1 %v18838_v47  ;;  %v18955_v30 = vld [vmem:[#allocation27_spill] sm:$0xff]  ;;  %v18956_v47 = vld [vmem:[#allocation28_spill] sm:$0xff] }
 0xac8   :  { %6855 = vmatpush1.bf16.msra.mxu0 %v18839_v2  ;;  %6937 = vmatpush1.bf16.msra.mxu1 %v18840_v39  ;;  %v18957_v2 = vld [vmem:[#allocation74_spill] sm:$0xff]  ;;  %v18958_v39 = vld [vmem:[#allocation75_spill] sm:$0xff] }
 0xac9   :  { %6856 = vmatprep.subr.bf16.mxu0 %v18841_v19  ;;  %6938 = vmatprep.subr.bf16.mxu1 %v18930_v28  ;;  %v18959_v19 = vld [vmem:[#allocation49_spill] sm:$0xff]  ;;  %v18973_v28 = vld [vmem:[#allocation96_spill] sm:$0xff] }
 0xacc   :  { %6857 = vmatpush1.bf16.msra.mxu0 %v18843_v59  ;;  %6939 = vmatpush1.bf16.msra.mxu1 %v18844_v42  ;;  %v18961_v59 = vld [vmem:[#allocation58_spill] sm:$0xff]  ;;  %v18962_v42 = vld [vmem:[#allocation59_spill] sm:$0xff] }
 0xacd   :  { %6858 = vmatprep.subr.bf16.mxu0 %v18931_v13  ;;  %6940 = vmatprep.subr.bf16.mxu1 %v18846_v56  ;;  %v18963_v56 = vld [vmem:[#allocation60_spill] sm:$0xff]  ;;  %v18974_v13 = vld [vmem:[#allocation97_spill] sm:$0xff] }
 0xad0   :  { %6859 = vmatpush1.bf16.msra.mxu0 %v18847_v15  ;;  %6941 = vmatpush1.bf16.msra.mxu1 %v18848_v52  ;;  %v18964_v15 = vld [vmem:[#allocation61_spill] sm:$0xff]  ;;  %v18965_v52 = vld [vmem:[#allocation62_spill] sm:$0xff] }
 0xad1   :  { %6860 = vmatprep.subr.bf16.mxu0 %v18932_v55  ;;  %6942 = vmatprep.subr.bf16.mxu1 %v18850_v44  ;;  %v18966_v44 = vld [vmem:[#allocation63_spill] sm:$0xff]  ;;  %v18975_v55 = vld [vmem:[#allocation98_spill] sm:$0xff] }
 0xad4   :  { %6861 = vmatpush1.bf16.msra.mxu0 %v18851_v51  ;;  %6943 = vmatpush1.bf16.msra.mxu1 %v18933_v43  ;;  %v18967_v51 = vld [vmem:[#allocation64_spill] sm:$0xff]  ;;  %v18976_v43 = vld [vmem:[#allocation99_spill] sm:$0xff] }
 0xad5   :  { %6862 = vmatprep.subr.bf16.mxu0 %v18853_v36  ;;  %6944 = vmatprep.subr.bf16.mxu1 %v18759_v53  ;;  %v18942_v53 = vld [vmem:[#allocation86_spill] sm:$0xff]  ;;  %v18960_v36 = vld [vmem:[#allocation57_spill] sm:$0xff] }
 0xad8   :  { %6863 = vmatpush1.bf16.msra.mxu0 %v18760_v7  ;;  %6945 = vmatpush1.bf16.msra.mxu1 %v18934_v54  ;;  %v18943_v7 = vld [vmem:[#allocation87_spill] sm:$0xff]  ;;  %v18977_v54 = vld [vmem:[#allocation100_spill] sm:$0xff] }
 0xad9   :  { %6864 = vmatprep.subr.bf16.mxu0 %v18935_v20  ;;  %6946 = vmatprep.subr.bf16.mxu1 %v18936_v58  ;;  %v18978_v20 = vld [vmem:[#allocation101_spill] sm:$0xff]  ;;  %v18979_v58 = vld [vmem:[#allocation103_spill] sm:$0xff] }
 0xadc   :  { %6865 = vmatpush1.bf16.msra.mxu0 %v18937_v37  ;;  %6947 = vmatpush1.bf16.msra.mxu1 %v18938_v24  ;;  %v18980_v37 = vld [vmem:[#allocation104_spill] sm:$0xff]  ;;  %v18981_v24 = vld [vmem:[#allocation11_spill] sm:$0xff] }
 0xadd   :  { %6866 = vmatprep.subr.bf16.mxu0 %v18939_v17  ;;  %6948 = vmatprep.subr.bf16.mxu1 %v18940_v0  ;;  %v18982_v17 = vld [vmem:[#allocation12_spill] sm:$0xff]  ;;  %v18983_v0 = vld [vmem:[#allocation13_spill] sm:$0xff] }
 0xae0   :  { %6867 = vmatpush1.bf16.msra.mxu0 %v18856_v23  ;;  %6949 = vmatpush1.bf16.msra.mxu1 %v18941_v10  ;;  %v18968_v23 = vld [vmem:[#allocation65_spill] sm:$0xff]  ;;  %v18984_v10 = vld [vmem:[#allocation14_spill] sm:$0xff] }
 0xae1   :  { %6868 = vmatprep.subr.bf16.mxu0 %v18942_v53  ;;  %6950 = vmatprep.subr.bf16.mxu1 %v18943_v7  ;;  %v18985_v53 = vld [vmem:[#allocation15_spill] sm:$0xff]  ;;  %v18986_v7 = vld [vmem:[#allocation16_spill] sm:$0xff] }
 0xae4   :  { %6869 = vmatpush1.bf16.msra.mxu0 %v18944_v29  ;;  %6951 = vmatpush1.bf16.msra.mxu1 %v18945_v40  ;;  %v18987_v29 = vld [vmem:[#allocation17_spill] sm:$0xff]  ;;  %v18988_v40 = vld [vmem:[#allocation18_spill] sm:$0xff] }
 0xae5   :  { %6870 = vmatprep.subr.bf16.mxu0 %v18946_v35  ;;  %6952 = vmatprep.subr.bf16.mxu1 %v18947_v33  ;;  %v18989_v35 = vld [vmem:[#allocation19_spill] sm:$0xff]  ;;  %v18990_v33 = vld [vmem:[#allocation20_spill] sm:$0xff] }
 0xae8   :  { %6871 = vmatpush1.bf16.msra.mxu0 %v18948_v9  ;;  %6953 = vmatpush1.bf16.msra.mxu1 %v18949_v41  ;;  %v18991_v9 = vld [vmem:[#allocation21_spill] sm:$0xff]  ;;  %v18992_v41 = vld [vmem:[#allocation22_spill] sm:$0xff] }
 0xae9   :  { %6872 = vmatprep.subr.bf16.mxu0 %v18950_v26  ;;  %6954 = vmatprep.subr.bf16.mxu1 %v18951_v16  ;;  %v18993_v26 = vld [vmem:[#allocation23_spill] sm:$0xff]  ;;  %v18994_v16 = vld [vmem:[#allocation24_spill] sm:$0xff] }
 0xaec   :  { %6873 = vmatpush1.bf16.msra.mxu0 %v18952_v11  ;;  %6955 = vmatpush1.bf16.msra.mxu1 %v18953_v34  ;;  %v18995_v11 = vld [vmem:[#allocation25_spill] sm:$0xff]  ;;  %v18996_v34 = vld [vmem:[#allocation26_spill] sm:$0xff] }
 0xaed   :  { %6989 = vmatprep.subr.bf16.mxu0 %v18954_v57  ;;  %7071 = vmatprep.subr.bf16.mxu1 %v18955_v30  ;;  %v18998_v57 = vld [vmem:[#allocation29_spill] sm:$0xff]  ;;  %v18999_v30 = vld [vmem:[#allocation30_spill] sm:$0xff] }
 0xaef   :  { %6875 = vmatmul.mubr.bf16.vlgmr.msra.gmra.mrb[152].mxu0 %v6799_v61  ;;  %6957 = vmatmul.mubr.bf16.vlgmr.msra.gmra.mrb[168].mxu1 %v6799_v61  ;;  %v18997_v61 = vld [vmem:[#allocation48_spill] sm:$0xff] }
 0xaf0   :  { %6990 = vmatpush1.bf16.msra.mxu0 %v18956_v47  ;;  %7072 = vmatpush1.bf16.msra.mxu1 %v18957_v2  ;;  %v19000_v47 = vld [vmem:[#allocation31_spill] sm:$0xff]  ;;  %v19001_v2 = vld [vmem:[#allocation32_spill] sm:$0xff] }
 0xaf1   :  { %6991 = vmatprep.subr.bf16.mxu0 %v18958_v39  ;;  %7073 = vmatprep.subr.bf16.mxu1 %v18959_v19  ;;  %v19002_v39 = vld [vmem:[#allocation33_spill] sm:$0xff]  ;;  %v19003_v19 = vld [vmem:[#allocation34_spill] sm:$0xff] }
 0xaf4   :  { %6992 = vmatpush1.bf16.msra.mxu0 %v18960_v36  ;;  %7074 = vmatpush1.bf16.msra.mxu1 %v18961_v59  ;;  %v19004_v36 = vld [vmem:[#allocation35_spill] sm:$0xff]  ;;  %v19005_v59 = vld [vmem:[#allocation36_spill] sm:$0xff] }
 0xaf5   :  { %6993 = vmatprep.subr.bf16.mxu0 %v18962_v42  ;;  %7075 = vmatprep.subr.bf16.mxu1 %v18963_v56  ;;  %v19006_v42 = vld [vmem:[#allocation37_spill] sm:$0xff]  ;;  %v19007_v56 = vld [vmem:[#allocation38_spill] sm:$0xff] }
 0xaf8   :  { %6994 = vmatpush1.bf16.msra.mxu0 %v18964_v15  ;;  %7076 = vmatpush1.bf16.msra.mxu1 %v18965_v52  ;;  %v19008_v15 = vld [vmem:[#allocation39_spill] sm:$0xff]  ;;  %v19009_v52 = vld [vmem:[#allocation40_spill] sm:$0xff] }
 0xaf9   :  { %6995 = vmatprep.subr.bf16.mxu0 %v18966_v44  ;;  %7077 = vmatprep.subr.bf16.mxu1 %v18967_v51  ;;  %v19010_v44 = vld [vmem:[#allocation41_spill] sm:$0xff]  ;;  %v19011_v51 = vld [vmem:[#allocation42_spill] sm:$0xff] }
 0xafc   :  { %6996 = vmatpush1.bf16.msra.mxu0 %v18968_v23  ;;  %7078 = vmatpush1.bf16.msra.mxu1 %v18969_v4  ;;  %v19012_v23 = vld [vmem:[#allocation43_spill] sm:$0xff]  ;;  %v19013_v4 = vld [vmem:[#allocation44_spill] sm:$0xff] }
 0xafd   :  { %6997 = vmatprep.subr.bf16.mxu0 %v18970_v62  ;;  %7079 = vmatprep.subr.bf16.mxu1 %v18971_v49  ;;  %v19014_v62 = vld [vmem:[#allocation45_spill] sm:$0xff]  ;;  %v19015_v49 = vld [vmem:[#allocation46_spill] sm:$0xff] }
 0xb00   :  { %6998 = vmatpush1.bf16.msra.mxu0 %v18972_v48  ;;  %7080 = vmatpush1.bf16.msra.mxu1 %v18973_v28  ;;  %v19016_v48 = vld [vmem:[#allocation47_spill] sm:$0xff]  ;;  %v19017_v28 = vld [vmem:[#allocation50_spill] sm:$0xff] }
 0xb01   :  { %6999 = vmatprep.subr.bf16.mxu0 %v18974_v13  ;;  %7081 = vmatprep.subr.bf16.mxu1 %v18975_v55  ;;  %v19018_v13 = vld [vmem:[#allocation52_spill] sm:$0xff]  ;;  %v19019_v55 = vld [vmem:[#allocation53_spill] sm:$0xff] }
 0xb04   :  { %7000 = vmatpush1.bf16.msra.mxu0 %v18976_v43  ;;  %7082 = vmatpush1.bf16.msra.mxu1 %v18977_v54 }
 0xb05   :  { %7001 = vmatprep.subr.bf16.mxu0 %v18978_v20  ;;  %7083 = vmatprep.subr.bf16.mxu1 %v18979_v58 }
 0xb08   :  { %7002 = vmatpush1.bf16.msra.mxu0 %v18980_v37  ;;  %7084 = vmatpush1.bf16.msra.mxu1 %v18981_v24 }
 0xb09   :  { %7003 = vmatprep.subr.bf16.mxu0 %v18982_v17  ;;  %7085 = vmatprep.subr.bf16.mxu1 %v18983_v0 }
 0xb0c   :  { %7004 = vmatpush1.bf16.msra.mxu0 %v18984_v10  ;;  %7086 = vmatpush1.bf16.msra.mxu1 %v18985_v53 }
 0xb0d   :  { %7005 = vmatprep.subr.bf16.mxu0 %v18986_v7  ;;  %7087 = vmatprep.subr.bf16.mxu1 %v18987_v29 }
 0xb10   :  { %7006 = vmatpush1.bf16.msra.mxu0 %v18988_v40  ;;  %7088 = vmatpush1.bf16.msra.mxu1 %v18989_v35 }
 0xb11   :  { %7007 = vmatprep.subr.bf16.mxu0 %v18990_v33  ;;  %7089 = vmatprep.subr.bf16.mxu1 %v18991_v9 }
 0xb14   :  { %7008 = vmatpush1.bf16.msra.mxu0 %v18992_v41  ;;  %7090 = vmatpush1.bf16.msra.mxu1 %v18993_v26 }
 0xb15   :  { %7009 = vmatprep.subr.bf16.mxu0 %v18994_v16  ;;  %7091 = vmatprep.subr.bf16.mxu1 %v18995_v11 }
 0xb18   :  { %7010 = vmatpush1.bf16.msra.mxu0 %v18996_v34  ;;  %7092 = vmatpush1.bf16.msra.mxu1 %v18997_v61  ;;  %v11274_v61 = vld [vmem:[%s17884_s12 + $0x264] ss:$16 sps:$4 sm:$0xff]  }
 0xb19   :  { %7011 = vmatprep.subr.bf16.mxu0 %v18998_v57  ;;  %7093 = vmatprep.subr.bf16.mxu1 %v18999_v30  ;;  %v11275_v57 = vld [vmem:[%s17884_s12 + $0x26c] ss:$16 sps:$4 sm:$0xff]   ;;  %v11276_v30 = vld [vmem:[%s17884_s12 + $0x260] ss:$16 sps:$4 sm:$0xff]  }
 0xb1c   :  { %7012 = vmatpush1.bf16.msra.mxu0 %v19000_v47  ;;  %7094 = vmatpush1.bf16.msra.mxu1 %v19001_v2  ;;  %v11277_v47 = vld [vmem:[%s17884_s12 + $0x268] ss:$16 sps:$4 sm:$0xff]   ;;  %v11278_v2 = vld [vmem:[%s17884_s12 + $0x284] ss:$16 sps:$4 sm:$0xff]  }
 0xb1d   :  { %7013 = vmatprep.subr.bf16.mxu0 %v19002_v39  ;;  %7095 = vmatprep.subr.bf16.mxu1 %v19003_v19  ;;  %v11279_v39 = vld [vmem:[%s17884_s12 + $0x28c] ss:$16 sps:$4 sm:$0xff]   ;;  %v11280_v19 = vld [vmem:[%s17884_s12 + $0x280] ss:$16 sps:$4 sm:$0xff]  }
 0xb20   :  { %7014 = vmatpush1.bf16.msra.mxu0 %v19004_v36  ;;  %7096 = vmatpush1.bf16.msra.mxu1 %v19005_v59  ;;  %v11281_v36 = vld [vmem:[%s17884_s12 + $0x288] ss:$16 sps:$4 sm:$0xff]   ;;  %v11282_v59 = vld [vmem:[%s17884_s12 + $0x2a4] ss:$16 sps:$4 sm:$0xff]  }
 0xb21   :  { %7015 = vmatprep.subr.bf16.mxu0 %v19006_v42  ;;  %7097 = vmatprep.subr.bf16.mxu1 %v19007_v56  ;;  %v11283_v42 = vld [vmem:[%s17884_s12 + $0x2ac] ss:$16 sps:$4 sm:$0xff]   ;;  %v11284_v56 = vld [vmem:[%s17884_s12 + $0x2a0] ss:$16 sps:$4 sm:$0xff]  }
 0xb24   :  { %7016 = vmatpush1.bf16.msra.mxu0 %v19008_v15  ;;  %7098 = vmatpush1.bf16.msra.mxu1 %v19009_v52  ;;  %v11285_v15 = vld [vmem:[%s17884_s12 + $0x2a8] ss:$16 sps:$4 sm:$0xff]   ;;  %v11286_v52 = vld [vmem:[%s17884_s12 + $0x2c4] ss:$16 sps:$4 sm:$0xff]  }
 0xb25   :  { %7017 = vmatprep.subr.bf16.mxu0 %v19010_v44  ;;  %7099 = vmatprep.subr.bf16.mxu1 %v19011_v51  ;;  %v11287_v44 = vld [vmem:[%s17884_s12 + $0x2cc] ss:$16 sps:$4 sm:$0xff]   ;;  %v11288_v51 = vld [vmem:[%s17884_s12 + $0x2c0] ss:$16 sps:$4 sm:$0xff]  }
 0xb28   :  { %7018 = vmatpush1.bf16.msra.mxu0 %v19012_v23  ;;  %7100 = vmatpush1.bf16.msra.mxu1 %v19013_v4  ;;  %v11289_v23 = vld [vmem:[%s17884_s12 + $0x2c8] ss:$16 sps:$4 sm:$0xff]   ;;  %v11290_v4 = vld [vmem:[%s17884_s12 + $0x2e4] ss:$16 sps:$4 sm:$0xff]  }
 0xb29   :  { %7019 = vmatprep.subr.bf16.mxu0 %v19014_v62  ;;  %7101 = vmatprep.subr.bf16.mxu1 %v19015_v49  ;;  %v11291_v62 = vld [vmem:[%s17884_s12 + $0x2ec] ss:$16 sps:$4 sm:$0xff]   ;;  %v11292_v49 = vld [vmem:[%s17884_s12 + $0x2e0] ss:$16 sps:$4 sm:$0xff]  }
 0xb2c   :  { %7020 = vmatpush1.bf16.msra.mxu0 %v19016_v48  ;;  %7102 = vmatpush1.bf16.msra.mxu1 %v19017_v28  ;;  %v11293_v48 = vld [vmem:[%s17884_s12 + $0x2e8] ss:$16 sps:$4 sm:$0xff]   ;;  %v11294_v28 = vld [vmem:[%s17884_s12 + $0x304] ss:$16 sps:$4 sm:$0xff]  }
 0xb2d   :  { %7030 = vmatprep.subr.bf16.mxu0 %v19018_v13  ;;  %7112 = vmatprep.subr.bf16.mxu1 %v19019_v55  ;;  %v11295_v13 = vld [vmem:[%s17884_s12 + $0x30c] ss:$16 sps:$4 sm:$0xff]   ;;  %v11296_v55 = vld [vmem:[%s17884_s12 + $0x300] ss:$16 sps:$4 sm:$0xff]  }
 0xbc2   :  { %v6876_v43 = vpop.f32.mrb[152].mxu0  ;;  %v6958_v54 = vpop.f32.mrb[168].mxu1 }
 0xbc3   :  { %v10386_v20 = vadd.f32 %v6876_v43, %v15119_v12  ;;  %v10388_v58 = vadd.f32 %v6958_v54, %v18817_v18  ;;  %v6878_v37 = vpop.f32.mrb[153].mxu0  ;;  %v6960_v24 = vpop.f32.mrb[169].mxu1  ;;  %v11297_v43 = vld [vmem:[%s17884_s12 + $0x308] ss:$16 sps:$4 sm:$0xff]   ;;  %v11298_v54 = vld [vmem:[%s17884_s12 + $0x324] ss:$16 sps:$4 sm:$0xff]  }
 0xbc4   :  { %v10387_v17 = vadd.f32 %v6878_v37, %v15123_v32  ;;  %v10389_v0 = vadd.f32 %v6960_v24, %v18726_v21  ;;  %v6880_v10 = vpop.f32.mrb[154].mxu0  ;;  %v6962_v53 = vpop.f32.mrb[170].mxu1  ;;  %v11301_v37 = vld [vmem:[%s17884_s12 + $0x328] ss:$16 sps:$4 sm:$0xff]   ;;  %v11302_v24 = vld [vmem:[%s17884_s12 + $0x344] ss:$16 sps:$4 sm:$0xff]  }
 0xbc5   :  { %11047 = vtanh.f32 %v10386_v20  ;;  %v6881_v7 = vpop.f32.mrb[155].mxu0  ;;  %v6963_v29 = vpop.f32.mrb[171].mxu1  ;;  %v11299_v20 = vld [vmem:[%s17884_s12 + $0x32c] ss:$16 sps:$4 sm:$0xff]   ;;  %v11305_v10 = vld [vmem:[%s17884_s12 + $0x348] ss:$16 sps:$4 sm:$0xff]  }
 0xbc6   :  { %11049 = vtanh.f32 %v10388_v58  ;;  %v11300_v58 = vld [vmem:[%s17884_s12 + $0x320] ss:$16 sps:$4 sm:$0xff]   ;;  %v11306_v53 = vld [vmem:[%s17884_s12 + $0x364] ss:$16 sps:$4 sm:$0xff]   ;;  %v11307_v7 = vld [vmem:[%s17884_s12 + $0x36c] ss:$16 sps:$4 sm:$0xff]  }
 0xbc7   :  { %11051 = vtanh.f32 %v10387_v17  ;;  %v11303_v17 = vld [vmem:[%s17884_s12 + $0x34c] ss:$16 sps:$4 sm:$0xff]   ;;  %v11308_v29 = vld [vmem:[%s17884_s12 + $0x360] ss:$16 sps:$4 sm:$0xff]  }
 0xbc8   :  { %11053 = vtanh.f32 %v10389_v0  ;;  %v11304_v0 = vld [vmem:[%s17884_s12 + $0x340] ss:$16 sps:$4 sm:$0xff]  }
 0xbcf   :  { %v11048_v40 = vpop.eup %11047 }
 0xbd0   :  { %v17093_v35 = vpop.eup %11049  ;;  %v17098_v33 = vmax.f32 %v6785_v25, %v11048_v40  ;;  %v17101_v9 = vadd.f32 %v11048_v40, %v16929_v14  ;;  %v6985_v25 = vpack.c.bf16 %v11048_v40, %v11048_v40  ;;  %v11309_v40 = vld [vmem:[%s17884_s12 + $0x368] ss:$16 sps:$4 sm:$0xff]  }
 0xbd1   :  { %v11052_v41 = vpop.eup %11051  ;;  %v17107_v26 = vmax.f32 %v6787_v60, %v17093_v35  ;;  %v17111_v16 = vadd.f32 %v17093_v35, %v16937_v46  ;;  %v11267_v60 = vld [vmem:[%s17884_s12 + $0x22c] ss:$16 sps:$4 sm:$0xff]   ;;  %v11268_v46 = vld [vmem:[%s17884_s12 + $0x220] ss:$16 sps:$4 sm:$0xff]  }
 0xbd2   :  { %v11054_v11 = vpop.eup %11053  ;;  %v6986_v34 = vpack.c.bf16 %v11052_v41, %v11052_v41  ;;  %v17116_v50 = vmax.f32 %v6786_v22, %v11052_v41  ;;  %v17119_v31 = vadd.f32 %v11052_v41, %v16947_v6  ;;  %v11270_v22 = vld [vmem:[%s17884_s12 + $0x244] ss:$16 sps:$4 sm:$0xff]   ;;  %v11271_v6 = vld [vmem:[%s17884_s12 + $0x24c] ss:$16 sps:$4 sm:$0xff]  }
 0xbd3   :  { %v17124_v38 = vmax.f32 %v6788_v8, %v11054_v11  ;;  %v17127_v27 = vadd.f32 %v11054_v11, %v16955_v5  ;;  %v6988_v14 = vpack.c.bf16 %v11054_v11, %v11054_v11  ;;  %v11272_v8 = vld [vmem:[%s17884_s12 + $0x240] ss:$16 sps:$4 sm:$0xff]   ;;  %v11273_v5 = vld [vmem:[%s17884_s12 + $0x248] ss:$16 sps:$4 sm:$0xff]   ;;  %v11310_v41 = vld [vmem:[%s17884_s12 + $0x384] ss:$16 sps:$4 sm:$0xff]  }
 0xbd4   :  { %7021 = vmatprep.mubr.bf16.mxu0 %v6986_v34  ;;  %7103 = vmatprep.mubr.bf16.mxu1 %v6986_v34  ;;  %v11311_v11 = vld [vmem:[%s17884_s12 + $0x38c] ss:$16 sps:$4 sm:$0xff]   ;;  %v11312_v34 = vld [vmem:[%s17884_s12 + $0x380] ss:$16 sps:$4 sm:$0xff]  }
 0xbd5   :  { %7022 = vmatmul.mubr.bf16.vlgmr.msra.gmra.mrb[156].mxu0 %v6985_v25  ;;  %7104 = vmatmul.mubr.bf16.vlgmr.msra.gmra.mrb[172].mxu1 %v6985_v25  ;;  %v11313_v25 = vld [vmem:[%s17884_s12 + $0x388] ss:$16 sps:$4 sm:$0xff]  }
 0xbd6   :  { %7031 = vmatpush1.bf16.msra.mxu0 %v11264_v63  ;;  %7113 = vmatpush1.bf16.msra.mxu1 %v11265_v3  ;;  %v11315_v63 = vld [vmem:[%s17884_s12 + $0x3ac] ss:$16 sps:$4 sm:$0xff]   ;;  %v11316_v3 = vld [vmem:[%s17884_s12 + $0x3a0] ss:$16 sps:$4 sm:$0xff]  }
 0xbd7   :  { %7062 = vmatprep.mubr.bf16.mxu0 %v6988_v14  ;;  %7144 = vmatprep.mubr.bf16.mxu1 %v6988_v14  ;;  %v11314_v14 = vld [vmem:[%s17884_s12 + $0x3a4] ss:$16 sps:$4 sm:$0xff]  }
 0xbd8   :  { %7032 = vmatprep.subr.bf16.mxu0 %v11266_v45  ;;  %7114 = vmatprep.subr.bf16.mxu1 %v11267_v60  ;;  %v11317_v45 = vld [vmem:[%s17884_s12 + $0x3a8] ss:$16 sps:$4 sm:$0xff]   ;;  %v11318_v60 = vld [vmem:[%s17884_s12 + $0x3c4] ss:$16 sps:$4 sm:$0xff]  }
 0xbda   :  { %7033 = vmatpush1.bf16.msra.mxu0 %v11268_v46  ;;  %7115 = vmatpush1.bf16.msra.mxu1 %v11269_v1  ;;  %v11319_v46 = vld [vmem:[%s17884_s12 + $0x3cc] ss:$16 sps:$4 sm:$0xff]   ;;  %v11320_v1 = vld [vmem:[%s17884_s12 + $0x3c0] ss:$16 sps:$4 sm:$0xff]  }
 0xbdb   :  { %7034 = vmatprep.subr.bf16.mxu0 %v11270_v22  ;;  %7116 = vmatprep.subr.bf16.mxu1 %v11271_v6  ;;  %v11321_v22 = vld [vmem:[%s17884_s12 + $0x3c8] ss:$16 sps:$4 sm:$0xff]   ;;  %v11322_v6 = vld [vmem:[%s17884_s12 + $0x3e4] ss:$16 sps:$4 sm:$0xff]  }
 0xbde   :  { %7035 = vmatpush1.bf16.msra.mxu0 %v11272_v8  ;;  %7117 = vmatpush1.bf16.msra.mxu1 %v11273_v5  ;;  %v11323_v8 = vld [vmem:[%s17884_s12 + $0x3ec] ss:$16 sps:$4 sm:$0xff]   ;;  %v10871_v5 = vld [vmem:[%s17888_s15 + $0x40] sm:$0xff]  }
 0xbdf   :  { %7036 = vmatprep.subr.bf16.mxu0 %v11274_v61  ;;  %7118 = vmatprep.subr.bf16.mxu1 %v11275_v57  ;;  %v10872_v61 = vld [vmem:[%s17888_s15 + $0xc0] sm:$0xff]  }
 0xbe0   :  { %v11324_v57 = vld [vmem:[%s17884_s12 + $0x3e0] ss:$16 sps:$4 sm:$0xff]  }
 0xbe2   :  { %7037 = vmatpush1.bf16.msra.mxu0 %v11276_v30  ;;  %7119 = vmatpush1.bf16.msra.mxu1 %v11277_v47  ;;  %v11325_v30 = vld [vmem:[%s17884_s12 + $0x3e8] ss:$16 sps:$4 sm:$0xff]   ;;  %v10873_v47 = vld [vmem:[%s17888_s15] sm:$0xff]  }
 0xbe3   :  { %7038 = vmatprep.subr.bf16.mxu0 %v11278_v2  ;;  %7120 = vmatprep.subr.bf16.mxu1 %v11279_v39  ;;  %v10874_v2 = vld [vmem:[%s17888_s15 + $0x80] sm:$0xff]   ;;  %v6987_v39 = vpack.c.bf16 %v17093_v35, %v17093_v35  ;;  %v10878_v35 = vld [vmem:[%s17888_s15 + $0x88] sm:$0xff]  }
 0xbe6   :  { %7039 = vmatpush1.bf16.msra.mxu0 %v11280_v19  ;;  %7121 = vmatpush1.bf16.msra.mxu1 %v11281_v36  ;;  %v10875_v19 = vld [vmem:[%s17888_s15 + $0x48] sm:$0xff]  }
 0xbe7   :  { %7040 = vmatprep.subr.bf16.mxu0 %v11282_v59  ;;  %7122 = vmatprep.subr.bf16.mxu1 %v11283_v42  ;;  %v10876_v36 = vld [vmem:[%s17888_s15 + $0xc8] sm:$0xff]   ;;  %v10879_v42 = vld [vmem:[%s17888_s15 + $0x50] sm:$0xff]  }
 0xbe8   :  { %v10877_v59 = vld [vmem:[%s17888_s15 + $0x8] sm:$0xff]  }
 0xbea   :  { %7041 = vmatpush1.bf16.msra.mxu0 %v11284_v56  ;;  %7123 = vmatpush1.bf16.msra.mxu1 %v11285_v15  ;;  %v10880_v56 = vld [vmem:[%s17888_s15 + $0xd0] sm:$0xff]  }
 0xbeb   :  { %7042 = vmatprep.subr.bf16.mxu0 %v11286_v52  ;;  %7124 = vmatprep.subr.bf16.mxu1 %v11287_v44  ;;  %v10881_v15 = vld [vmem:[%s17888_s15 + $0x10] sm:$0xff]   ;;  %v10883_v44 = vld [vmem:[%s17888_s15 + $0x58] sm:$0xff]  }
 0xbec   :  { %v10882_v52 = vld [vmem:[%s17888_s15 + $0x90] sm:$0xff]  }
 0xbee   :  { %7043 = vmatpush1.bf16.msra.mxu0 %v11288_v51  ;;  %7125 = vmatpush1.bf16.msra.mxu1 %v11289_v23  ;;  %v10884_v51 = vld [vmem:[%s17888_s15 + $0xd8] sm:$0xff]  }
 0xbef   :  { %7044 = vmatprep.subr.bf16.mxu0 %v11290_v4  ;;  %7126 = vmatprep.subr.bf16.mxu1 %v11291_v62  ;;  %v10885_v23 = vld [vmem:[%s17888_s15 + $0x18] sm:$0xff]   ;;  %v10887_v62 = vld [vmem:[%s17888_s15 + $0x60] sm:$0xff]  }
 0xbf0   :  { %v10886_v4 = vld [vmem:[%s17888_s15 + $0x98] sm:$0xff]  }
 0xbf2   :  { %7045 = vmatpush1.bf16.msra.mxu0 %v11292_v49  ;;  %7127 = vmatpush1.bf16.msra.mxu1 %v11293_v48  ;;  %v10888_v49 = vld [vmem:[%s17888_s15 + $0xe0] sm:$0xff]  }
 0xbf3   :  { %7046 = vmatprep.subr.bf16.mxu0 %v11294_v28  ;;  %7128 = vmatprep.subr.bf16.mxu1 %v11295_v13  ;;  %v10889_v48 = vld [vmem:[%s17888_s15 + $0x20] sm:$0xff]   ;;  %v10891_v13 = vld [vmem:[%s17888_s15 + $0x68] sm:$0xff]  }
 0xbf4   :  { %v10890_v28 = vld [vmem:[%s17888_s15 + $0xa0] sm:$0xff]  }
 0xbf6   :  { %7047 = vmatpush1.bf16.msra.mxu0 %v11296_v55  ;;  %7129 = vmatpush1.bf16.msra.mxu1 %v11297_v43  ;;  %v10892_v55 = vld [vmem:[%s17888_s15 + $0xe8] sm:$0xff]  }
 0xbf7   :  { %7048 = vmatprep.subr.bf16.mxu0 %v11298_v54  ;;  %7130 = vmatprep.subr.bf16.mxu1 %v11299_v20  ;;  %v10893_v43 = vld [vmem:[%s17888_s15 + $0x28] sm:$0xff]   ;;  %v10895_v20 = vld [vmem:[%s17888_s15 + $0x70] sm:$0xff]  }
 0xbf8   :  { %v10894_v54 = vld [vmem:[%s17888_s15 + $0xa8] sm:$0xff]  }
 0xbfa   :  { %7049 = vmatpush1.bf16.msra.mxu0 %v11300_v58  ;;  %7131 = vmatpush1.bf16.msra.mxu1 %v11301_v37  ;;  %v10896_v58 = vld [vmem:[%s17888_s15 + $0xf0] sm:$0xff]  }
 0xbfb   :  { %7050 = vmatprep.subr.bf16.mxu0 %v11302_v24  ;;  %7132 = vmatprep.subr.bf16.mxu1 %v11303_v17  ;;  %v10897_v37 = vld [vmem:[%s17888_s15 + $0x30] sm:$0xff]   ;;  %v10899_v17 = vld [vmem:[%s17888_s15 + $0x78] sm:$0xff]  }
 0xbfc   :  { %v10898_v24 = vld [vmem:[%s17888_s15 + $0xb0] sm:$0xff]  }
 0xbfe   :  { %7051 = vmatpush1.bf16.msra.mxu0 %v11304_v0  ;;  %7133 = vmatpush1.bf16.msra.mxu1 %v11305_v10  ;;  %v10900_v0 = vld [vmem:[%s17888_s15 + $0xf8] sm:$0xff]  }
 0xbff   :  { %7052 = vmatprep.subr.bf16.mxu0 %v11306_v53  ;;  %7134 = vmatprep.subr.bf16.mxu1 %v11307_v7  ;;  %v10901_v10 = vld [vmem:[%s17888_s15 + $0x38] sm:$0xff]   ;;  %v10903_v7 = vld [vmem:[%s17888_s15 + $0x140] sm:$0xff]  }
 0xc00   :  { %v10902_v53 = vld [vmem:[%s17888_s15 + $0xb8] sm:$0xff]  }
 0xc02   :  { %7053 = vmatpush1.bf16.msra.mxu0 %v11308_v29  ;;  %7135 = vmatpush1.bf16.msra.mxu1 %v11309_v40  ;;  %v10904_v29 = vld [vmem:[%s17888_s15 + $0x1c0] sm:$0xff]  }
 0xc03   :  { %7054 = vmatprep.subr.bf16.mxu0 %v11310_v41  ;;  %7136 = vmatprep.subr.bf16.mxu1 %v11311_v11 }
 0xc06   :  { %7055 = vmatpush1.bf16.msra.mxu0 %v11312_v34  ;;  %7137 = vmatpush1.bf16.msra.mxu1 %v11313_v25 }
 0xc07   :  { %7056 = vmatprep.subr.bf16.mxu0 %v11314_v14  ;;  %7138 = vmatprep.subr.bf16.mxu1 %v11315_v63 }
 0xc0a   :  { %7057 = vmatpush1.bf16.msra.mxu0 %v11316_v3  ;;  %7139 = vmatpush1.bf16.msra.mxu1 %v11317_v45 }
 0xc0b   :  { %7058 = vmatprep.subr.bf16.mxu0 %v11318_v60  ;;  %7140 = vmatprep.subr.bf16.mxu1 %v11319_v46 }
 0xc0e   :  { %7059 = vmatpush1.bf16.msra.mxu0 %v11320_v1  ;;  %7141 = vmatpush1.bf16.msra.mxu1 %v11321_v22  ;;  %v7173_v22 = vld [vmem:[%s17890_s14] sm:$0xff] }
 0xc0f   :  { %7060 = vmatprep.subr.bf16.mxu0 %v11322_v6  ;;  %7142 = vmatprep.subr.bf16.mxu1 %v11323_v8  ;;  %v19021_v6 = vld [vmem:[#allocation7_spill] sm:$0xff] }
 0xc10   :  { %v7190_v8 = vrot.slane %v7173_v22, %v19021_v6 }
 0xc12   :  { %7061 = vmatpush1.bf16.msra.mxu0 %v11324_v57  ;;  %7143 = vmatpush1.bf16.msra.mxu1 %v11325_v30  ;;  %v19024_v30 = vld [vmem:[#allocation8_spill] sm:$0xff] }
 0xc13   :  { %9858 = vmatprep.subr.bf16.mxu0 %v10871_v5  ;;  %9880 = vmatprep.subr.bf16.mxu1 %v10872_v61  ;;  %v19023_v61 = vld [vmem:[#allocation6_spill] sm:$0xff] }
 0xc14   :  { %v7306_v57 = vrot.slane %v7173_v22, %v19023_v61 }
 0xc15   :  { %7063 = vmatmul.mubr.bf16.vlgmr.msra.gmra.mrb[156].mxu0 %v6987_v39  ;;  %7145 = vmatmul.mubr.bf16.vlgmr.msra.gmra.mrb[172].mxu1 %v6987_v39 }
 0xc16   :  { %9859 = vmatpush3.bf16.msra.mxu0 %v10873_v47  ;;  %9881 = vmatpush3.bf16.msra.mxu1 %v10874_v2  ;;  %v7194_v47 = vrot.slane %v7173_v22, %v19024_v30  ;;  %v19025_v2 = vld [vmem:[#allocation10_spill] sm:$0xff] }
 0xc17   :  { %9860 = vmatprep.subr.bf16.mxu0 %v10875_v19  ;;  %9882 = vmatprep.subr.bf16.mxu1 %v10876_v36  ;;  %v7314_v39 = vrot.slane %v7173_v22, %v19025_v2  ;;  %v19026_v19 = vld [vmem:[#allocation5_spill] sm:$0xff] }
 0xc18   :  { %v7302_v36 = vrot.slane %v7173_v22, %v19026_v19 }
 0xc1a   :  { %9861 = vmatpush3.bf16.msra.mxu0 %v10877_v59  ;;  %9883 = vmatpush3.bf16.msra.mxu1 %v10878_v35  ;;  %v19027_v59 = vld [vmem:[#allocation9_spill] sm:$0xff] }
 0xc1b   :  { %9862 = vmatprep.subr.bf16.mxu0 %v10879_v42  ;;  %9884 = vmatprep.subr.bf16.mxu1 %v10880_v56  ;;  %v7310_v35 = vrot.slane %v7173_v22, %v19027_v59 }
 0xc1e   :  { %9863 = vmatpush3.bf16.msra.mxu0 %v10881_v15  ;;  %9885 = vmatpush3.bf16.msra.mxu1 %v10882_v52 }
 0xc1f   :  { %9864 = vmatprep.subr.bf16.mxu0 %v10883_v44  ;;  %9886 = vmatprep.subr.bf16.mxu1 %v10884_v51  ;;  %v7366_v51 = vrot.slane %v7306_v57, %v19026_v19 }
 0xc22   :  { %9865 = vmatpush3.bf16.msra.mxu0 %v10885_v23  ;;  %9887 = vmatpush3.bf16.msra.mxu1 %v10886_v4 }
 0xc23   :  { %9866 = vmatprep.subr.bf16.mxu0 %v10887_v62  ;;  %9888 = vmatprep.subr.bf16.mxu1 %v10888_v49  ;;  %v7374_v49 = vrot.slane %v7314_v39, %v19026_v19  ;;  %v10908_v39 = vld [vmem:[%s17888_s15 + $0x1c8] sm:$0xff]  }
 0xc26   :  { %9867 = vmatpush3.bf16.msra.mxu0 %v10889_v48  ;;  %9889 = vmatpush3.bf16.msra.mxu1 %v10890_v28  ;;  %v7362_v48 = vrot.slane %v7302_v36, %v19026_v19  ;;  %v7370_v28 = vrot.slane %v7310_v35, %v19026_v19  ;;  %v10910_v36 = vld [vmem:[%s17888_s15 + $0x188] sm:$0xff]   ;;  %v10911_v35 = vld [vmem:[%s17888_s15 + $0x150] sm:$0xff]  }
 0xc27   :  { %9868 = vmatprep.subr.bf16.mxu0 %v10891_v13  ;;  %9890 = vmatprep.subr.bf16.mxu1 %v10892_v55 }
 0xc2a   :  { %9869 = vmatpush3.bf16.msra.mxu0 %v10893_v43  ;;  %9891 = vmatpush3.bf16.msra.mxu1 %v10894_v54 }
 0xc2b   :  { %9870 = vmatprep.subr.bf16.mxu0 %v10895_v20  ;;  %9892 = vmatprep.subr.bf16.mxu1 %v10896_v58 }
 0xc2e   :  { %9871 = vmatpush3.bf16.msra.mxu0 %v10897_v37  ;;  %9893 = vmatpush3.bf16.msra.mxu1 %v10898_v24 }
 0xc2f   :  { %9872 = vmatprep.subr.bf16.mxu0 %v10899_v17  ;;  %9894 = vmatprep.subr.bf16.mxu1 %v10900_v0 }
 0xc32   :  { %9873 = vmatpush3.bf16.msra.mxu0 %v10901_v10  ;;  %9895 = vmatpush3.bf16.msra.mxu1 %v10902_v53 }
 0xc33   :  { %9902 = vmatprep.subr.bf16.mxu0 %v10903_v7  ;;  %9924 = vmatprep.subr.bf16.mxu1 %v10904_v29 }
 0xce8   :  { %v7064_v40 = vpop.f32.mrb[156].mxu0  ;;  %v7146_v41 = vpop.f32.mrb[172].mxu1 }
 0xce9   :  { %v10390_v11 = vadd.f32 %v7064_v40, %v15119_v12  ;;  %v10392_v34 = vadd.f32 %v7146_v41, %v18817_v18  ;;  %v7066_v25 = vpop.f32.mrb[157].mxu0  ;;  %v7148_v14 = vpop.f32.mrb[173].mxu1  ;;  %v19020_v12 = vld [vmem:[#allocation3_spill] sm:$0xff] }
 0xcea   :  { %v10391_v63 = vadd.f32 %v7066_v25, %v15123_v32  ;;  %v10393_v3 = vadd.f32 %v7148_v14, %v18726_v21  ;;  %v7068_v45 = vpop.f32.mrb[158].mxu0  ;;  %v7150_v60 = vpop.f32.mrb[174].mxu1  ;;  %v7182_v18 = vrot.slane %v7173_v22, %v19020_v12  ;;  %v17431_v32 = vld [vmem:[%s17890_s14 + $0x8] sm:$0xff]  ;;  %v7250_v15 = vrot.slane %v7190_v8, %v19020_v12 }
 0xceb   :  { %11055 = vtanh.f32 %v10390_v11  ;;  %v7069_v46 = vpop.f32.mrb[159].mxu0  ;;  %v7151_v1 = vpop.f32.mrb[175].mxu1  ;;  %v19022_v21 = vld [vmem:[#allocation4_spill] sm:$0xff]  ;;  %v7210_v52 = vrot.slane %v17431_v32, %v19024_v30  ;;  %v7254_v23 = vrot.slane %v7194_v47, %v19020_v12  ;;  %v7322_v4 = vrot.slane %v17431_v32, %v19023_v61 }
 0xcec   :  { %11057 = vtanh.f32 %v10392_v34  ;;  %v7186_v5 = vrot.slane %v7173_v22, %v19022_v21  ;;  %v7242_v42 = vrot.slane %v7182_v18, %v19020_v12  ;;  %v7202_v56 = vrot.slane %v17431_v32, %v19022_v21  ;;  %v10907_v47 = vld [vmem:[%s17888_s15 + $0x148] sm:$0xff]  }
 0xced   :  { %11059 = vtanh.f32 %v10391_v63  ;;  %v7330_v13 = vrot.slane %v17431_v32, %v19025_v2  ;;  %v7270_v17 = vrot.slane %v7210_v52, %v19020_v12  ;;  %v7382_v40 = vrot.slane %v7322_v4, %v19026_v19  ;;  %v10915_v52 = vld [vmem:[%s17888_s15 + $0x158] sm:$0xff]   ;;  %v10919_v4 = vld [vmem:[%s17888_s15 + $0x160] sm:$0xff]  }
 0xcee   :  { %11061 = vtanh.f32 %v10393_v3  ;;  %v7246_v44 = vrot.slane %v7186_v5, %v19020_v12  ;;  %v7262_v54 = vrot.slane %v7202_v56, %v19020_v12  ;;  %v10913_v56 = vld [vmem:[%s17888_s15 + $0x110] sm:$0xff]  }
 0xcef   :  { %v7390_v34 = vrot.slane %v7330_v13, %v19026_v19  ;;  %v10922_v13 = vld [vmem:[%s17888_s15 + $0x1a0] sm:$0xff]  }
 0xcf5   :  { %v17450_v62 = vpop.eup %11055 }
 0xcf6   :  { %v17457_v55 = vpop.eup %11057  ;;  %v7287_v43 = vmul.f32 %v17450_v62, %v7242_v42  ;;  %v7161_v20 = vmax.f32 %v17098_v33, %v17450_v62  ;;  %v17465_v58 = vadd.f32 %v17450_v62, %v17101_v9  ;;  %v10912_v42 = vld [vmem:[%s17888_s15 + $0x1d0] sm:$0xff]   ;;  %v10933_v33 = vld [vmem:[%s17888_s15 + $0x138] sm:$0xff]  }
 0xcf7   :  { %v11060_v37 = vpop.eup %11059  ;;  %v7289_v24 = vmul.f32 %v17457_v55, %v7250_v15  ;;  %v7163_v0 = vmax.f32 %v17107_v26, %v17457_v55  ;;  %v17473_v10 = vadd.f32 %v17457_v55, %v17111_v16  ;;  %v10905_v16 = vld [vmem:[%s17888_s15 + $0x100] sm:$0xff]   ;;  %v10914_v15 = vld [vmem:[%s17888_s15 + $0x190] sm:$0xff]   ;;  %v10934_v26 = vld [vmem:[%s17888_s15 + $0x1b8] sm:$0xff]  }
 0xcf8   :  { %v11062_v53 = vpop.eup %11061  ;;  %v7288_v7 = vmul.f32 %v11060_v37, %v7246_v44  ;;  %v7162_v29 = vmax.f32 %v17116_v50, %v11060_v37  ;;  %v7407_v41 = vadd.f32 %v7362_v48, %v7287_v43  ;;  %v17483_v50 = vadd.f32 %v11060_v37, %v17119_v31  ;;  %v10916_v44 = vld [vmem:[%s17888_s15 + $0x1d8] sm:$0xff]   ;;  %v10921_v48 = vld [vmem:[%s17888_s15 + $0x120] sm:$0xff]   ;;  %v10923_v43 = vld [vmem:[%s17888_s15 + $0x168] sm:$0xff]  }
 0xcf9   :  { %v7290_v9 = vmul.f32 %v11062_v53, %v7254_v23  ;;  %v7164_v11 = vmax.f32 %v17124_v38, %v11062_v53  ;;  %v7409_v14 = vadd.f32 %v7370_v28, %v7289_v24  ;;  %v10906_v38 = vld [vmem:[%s17888_s15 + $0x180] sm:$0xff]   ;;  %v17489_v8 = vadd.f32 %v11062_v53, %v17127_v27  ;;  %v10909_v27 = vld [vmem:[%s17888_s15 + $0x108] sm:$0xff]   ;;  %v10918_v23 = vld [vmem:[%s17888_s15 + $0x198] sm:$0xff]  }
 0xcfa   :  { %v7408_v25 = vadd.f32 %v7366_v51, %v7288_v7  ;;  %v7292_v63 = vmul.f32 %v7262_v54, %v7162_v29  ;;  %v7612_v22 = vpack.c.bf16 %v7407_v41, %v7407_v41  ;;  %v10917_v51 = vld [vmem:[%s17888_s15 + $0x118] sm:$0xff]   ;;  %v17539_v28 = vld [vmem:[%s17890_s14 + $0x10] sm:$0xff]  ;;  %v7198_v54 = vrot.slane %v17431_v32, %v19020_v12  ;;  %v10924_v37 = vld [vmem:[%s17888_s15 + $0x1e8] sm:$0xff]  }
 0xcfb   :  { %v7410_v3 = vadd.f32 %v7374_v49, %v7290_v9  ;;  %v7294_v45 = vmul.f32 %v7270_v17, %v7164_v11  ;;  %v7614_v5 = vpack.c.bf16 %v7409_v14, %v7409_v14  ;;  %v10920_v49 = vld [vmem:[%s17888_s15 + $0x1e0] sm:$0xff]   ;;  %v7206_v24 = vrot.slane %v17431_v32, %v19021_v6  ;;  %v10925_v53 = vld [vmem:[%s17888_s15 + $0x128] sm:$0xff]  }
 0xcfc   :  { %v7613_v60 = vpack.c.bf16 %v7408_v25, %v7408_v25  ;;  %v7412_v46 = vadd.f32 %v7382_v40, %v7292_v63  ;;  %v7218_v17 = vrot.slane %v17539_v28, %v19022_v21  ;;  %v7226_v7 = vrot.slane %v17539_v28, %v19024_v30  ;;  %v10926_v29 = vld [vmem:[%s17888_s15 + $0x1a8] sm:$0xff]   ;;  %v10927_v40 = vld [vmem:[%s17888_s15 + $0x170] sm:$0xff]  }
 0xcfd   :  { %v7615_v1 = vpack.c.bf16 %v7410_v3, %v7410_v3  ;;  %v7414_v18 = vadd.f32 %v7390_v34, %v7294_v45  ;;  %v7258_v9 = vrot.slane %v7198_v54, %v19020_v12  ;;  %v7318_v41 = vrot.slane %v17431_v32, %v19026_v19  ;;  %v10928_v30 = vld [vmem:[%s17888_s15 + $0x1f0] sm:$0xff]   ;;  %v10949_v54 = vld [vmem:[%s17888_s15 + $0x218] sm:$0xff]  }
 0xcfe   :  { %8238 = vmatprep.mubr.bf16.mxu0 %v7613_v60  ;;  %v7617_v57 = vpack.c.bf16 %v7412_v46, %v7412_v46  ;;  %v7266_v11 = vrot.slane %v7206_v24, %v19020_v12  ;;  %v7326_v34 = vrot.slane %v17431_v32, %v19027_v59  ;;  %v7170_v25 = vmul.f32 0.125, %v17483_v50  ;;  %v10929_v3 = vld [vmem:[%s17888_s15 + $0x130] sm:$0xff]   ;;  %v10931_v46 = vld [vmem:[%s17888_s15 + $0x178] sm:$0xff]   ;;  %v10951_v24 = vld [vmem:[%s17888_s15 + $0x260] sm:$0xff]  }
 0xcff   :  { %8278 = vmatprep.mubr.bf16.mxu1 %v7615_v1  ;;  %8239 = vmatmul.mubr.bf16.vlgmr.msra.gmra.mrb[160].mxu0 %v7612_v22  ;;  %v7619_v31 = vpack.c.bf16 %v7414_v18, %v7414_v18  ;;  %v7278_v14 = vrot.slane %v7218_v17, %v19020_v12  ;;  %v7338_v63 = vrot.slane %v17539_v28, %v19023_v61  ;;  %v7172_v45 = vmul.f32 0.125, %v17489_v8  ;;  %v10930_v32 = vld [vmem:[%s17888_s15 + $0x1b0] sm:$0xff]   ;;  %v10952_v17 = vld [vmem:[%s17888_s15 + $0x2e0] sm:$0xff]  }
 0xd00   :  { %8279 = vmatmul.mubr.bf16.vlgmr.msra.gmra.mrb[176].mxu1 %v7614_v5  ;;  %9903 = vmatpush3.bf16.msra.mxu0 %v10905_v16  ;;  %v7286_v60 = vrot.slane %v7226_v7, %v19020_v12  ;;  %v7346_v16 = vrot.slane %v17539_v28, %v19025_v2  ;;  %v7291_v50 = vmul.f32 %v7258_v9, %v7161_v20  ;;  %v10932_v2 = vld [vmem:[%s17888_s15 + $0x1f8] sm:$0xff]   ;;  %v10953_v7 = vld [vmem:[%s17888_s15 + $0x220] sm:$0xff]   ;;  %v10955_v9 = vld [vmem:[%s17888_s15 + $0x268] sm:$0xff]  }
 0xd01   :  { %9925 = vmatpush3.bf16.msra.mxu1 %v10906_v38  ;;  %8318 = vmatprep.mubr.bf16.mxu0 %v7617_v57  ;;  %v7378_v1 = vrot.slane %v7318_v41, %v19026_v19  ;;  %v7293_v22 = vmul.f32 %v7266_v11, %v7163_v0  ;;  %v7386_v38 = vrot.slane %v7326_v34, %v19026_v19  ;;  %v10935_v0 = vld [vmem:[%s17888_s15 + $0x240] sm:$0xff]  }
 0xd02   :  { %8358 = vmatprep.mubr.bf16.mxu1 %v7619_v31  ;;  %9904 = vmatprep.subr.bf16.mxu0 %v10907_v47  ;;  %v7296_v18 = vmul.f32 %v7278_v14, %v7170_v25  ;;  %v7398_v8 = vrot.slane %v7338_v63, %v19026_v19  ;;  %v7298_v62 = vmul.f32 %v7286_v60, %v7172_v45  ;;  %v10936_v57 = vld [vmem:[%s17888_s15 + $0x2c0] sm:$0xff]   ;;  %v10957_v25 = vld [vmem:[%s17888_s15 + $0x228] sm:$0xff]   ;;  %v7169_v45 = vmul.f32 0.125, %v17465_v58  ;;  %v10961_v58 = vld [vmem:[%s17888_s15 + $0x230] sm:$0xff]  }
 0xd03   :  { %9926 = vmatprep.subr.bf16.mxu1 %v10908_v39  ;;  %v7406_v20 = vrot.slane %v7346_v16, %v19026_v19  ;;  %v7411_v55 = vadd.f32 %v7378_v1, %v7291_v50  ;;  %v7413_v5 = vadd.f32 %v7386_v38, %v7293_v22  ;;  %v10937_v31 = vld [vmem:[%s17888_s15 + $0x200] sm:$0xff]   ;;  %v7222_v11 = vrot.slane %v17539_v28, %v19021_v6  ;;  %v10958_v63 = vld [vmem:[%s17888_s15 + $0x2a8] sm:$0xff]  }
 0xd04   :  { %9905 = vmatpush3.bf16.msra.mxu0 %v10909_v27  ;;  %v7416_v47 = vadd.f32 %v7398_v8, %v7296_v18  ;;  %v8447_v34 = vld [vmem:[%s17892_s2] sm:$0xff]  ;;  %v7171_v50 = vmul.f32 0.125, %v17473_v10  ;;  %v10963_v10 = vld [vmem:[%s17888_s15 + $0x278] sm:$0xff]  }
 0xd05   :  { %9927 = vmatpush3.bf16.msra.mxu1 %v10910_v36  ;;  %9906 = vmatprep.subr.bf16.mxu0 %v10911_v35  ;;  %v7418_v39 = vadd.f32 %v7406_v20, %v7298_v62  ;;  %v7616_v27 = vpack.c.bf16 %v7411_v55, %v7411_v55  ;;  %v10938_v36 = vld [vmem:[%s17888_s15 + $0x280] sm:$0xff]   ;;  %v7618_v35 = vpack.c.bf16 %v7413_v5, %v7413_v5  ;;  %v8448_v60 = vmax.f32 %v8447_v34, 0.0  ;;  %v10964_v8 = vld [vmem:[%s17888_s15 + $0x2f8] sm:$0xff]   ;;  %v10984_v34 = vld [vmem:[%s17889_s18 + $0x88] sm:$0xff]  }
 0xd06   :  { %9928 = vmatprep.subr.bf16.mxu1 %v10912_v42  ;;  %v10939_v42 = vld [vmem:[%s17888_s15 + $0x248] sm:$0xff]   ;;  %v7282_v1 = vrot.slane %v7222_v11, %v19020_v12  ;;  %v10965_v20 = vld [vmem:[%s17888_s15 + $0x238] sm:$0xff]   ;;  %v11327_v11 = vmov 0.0  }
 0xd08   :  { %9907 = vmatpush3.bf16.msra.mxu0 %v10913_v56  ;;  %v7621_v56 = vpack.c.bf16 %v7416_v47, %v7416_v47  ;;  %v10968_v47 = vld [vmem:[%s17889_s18] sm:$0xff]  }
 0xd09   :  { %9929 = vmatpush3.bf16.msra.mxu1 %v10914_v15  ;;  %9908 = vmatprep.subr.bf16.mxu0 %v10915_v52  ;;  %v10940_v15 = vld [vmem:[%s17888_s15 + $0x2c8] sm:$0xff]   ;;  %v7623_v52 = vpack.c.bf16 %v7418_v39, %v7418_v39 }
 0xd0a   :  { %9930 = vmatprep.subr.bf16.mxu1 %v10916_v44  ;;  %v10941_v44 = vld [vmem:[%s17888_s15 + $0x208] sm:$0xff]  }
 0xd0b   :  { %v10969_v39 = vld [vmem:[%s17889_s18 + $0x48] sm:$0xff]  }
 0xd0c   :  { %9909 = vmatpush3.bf16.msra.mxu0 %v10917_v51  ;;  %v10942_v51 = vld [vmem:[%s17888_s15 + $0x288] sm:$0xff]  }
 0xd0d   :  { %9931 = vmatpush3.bf16.msra.mxu1 %v10918_v23  ;;  %9910 = vmatprep.subr.bf16.mxu0 %v10919_v4  ;;  %v10943_v23 = vld [vmem:[%s17888_s15 + $0x250] sm:$0xff]  }
 0xd0e   :  { %9932 = vmatprep.subr.bf16.mxu1 %v10920_v49  ;;  %v10944_v4 = vld [vmem:[%s17888_s15 + $0x2d0] sm:$0xff]  }
 0xd0f   :  { %v10945_v49 = vld [vmem:[%s17888_s15 + $0x210] sm:$0xff]  }
 0xd10   :  { %9911 = vmatpush3.bf16.msra.mxu0 %v10921_v48  ;;  %v10946_v48 = vld [vmem:[%s17888_s15 + $0x290] sm:$0xff]  }
 0xd11   :  { %9933 = vmatpush3.bf16.msra.mxu1 %v10922_v13  ;;  %9912 = vmatprep.subr.bf16.mxu0 %v10923_v43  ;;  %v10947_v13 = vld [vmem:[%s17888_s15 + $0x258] sm:$0xff]  }
 0xd12   :  { %9934 = vmatprep.subr.bf16.mxu1 %v10924_v37  ;;  %v10948_v43 = vld [vmem:[%s17888_s15 + $0x2d8] sm:$0xff]  }
 0xd13   :  { %v10950_v37 = vld [vmem:[%s17888_s15 + $0x298] sm:$0xff]  }
 0xd14   :  { %9913 = vmatpush3.bf16.msra.mxu0 %v10925_v53  ;;  %v17669_v53 = vld [vmem:[%s17891_s17] sm:$0x3f] }
 0xd15   :  { %9935 = vmatpush3.bf16.msra.mxu1 %v10926_v29  ;;  %9914 = vmatprep.subr.bf16.mxu0 %v10927_v40  ;;  %v7214_v29 = vrot.slane %v17539_v28, %v19020_v12  ;;  %v10954_v40 = vld [vmem:[%s17888_s15 + $0x2a0] sm:$0xff]   ;;  %v8459_v41 = vrot.slane %v17669_v53, %v19022_v21  ;;  %v7334_v21 = vrot.slane %v17539_v28, %v19026_v19 }
 0xd16   :  { %9936 = vmatprep.subr.bf16.mxu1 %v10928_v30  ;;  %v10956_v30 = vld [vmem:[%s17888_s15 + $0x2e8] sm:$0xff]  }
 0xd17   :  { %v7274_v14 = vrot.slane %v7214_v29, %v19020_v12  ;;  %v8474_v16 = vrot.slane %v8459_v41, %v19020_v12  ;;  %v7394_v22 = vrot.slane %v7334_v21, %v19026_v19  ;;  %v10981_v29 = vld [vmem:[%s17889_s18 + $0x78] sm:$0xff]   ;;  %v10987_v21 = vld [vmem:[%s17889_s18 + $0xa0] sm:$0xff]  }
 0xd18   :  { %9915 = vmatpush3.bf16.msra.mxu0 %v10929_v3  ;;  %v10959_v3 = vld [vmem:[%s17888_s15 + $0x270] sm:$0xff]  }
 0xd19   :  { %9937 = vmatpush3.bf16.msra.mxu1 %v10930_v32  ;;  %9916 = vmatprep.subr.bf16.mxu0 %v10931_v46  ;;  %v8489_v32 = vrot.slane %v17669_v53, %v19023_v61  ;;  %v10960_v46 = vld [vmem:[%s17888_s15 + $0x2f0] sm:$0xff]   ;;  %v7295_v38 = vmul.f32 %v7274_v14, %v7169_v45  ;;  %v8480_v18 = vmul.f32 %v8474_v16, %v8448_v60  ;;  %v10986_v14 = vld [vmem:[%s17889_s18 + $0x98] sm:$0xff]   ;;  %v10991_v60 = vld [vmem:[%s17893_s20] sm:$0xff]  }
 0xd1a   :  { %9938 = vmatprep.subr.bf16.mxu1 %v10932_v2  ;;  %v7342_v2 = vrot.slane %v17539_v28, %v19027_v59  ;;  %v10962_v61 = vld [vmem:[%s17888_s15 + $0x2b0] sm:$0xff]   ;;  %v10990_v45 = vld [vmem:[%s17889_s18 + $0xb8] sm:$0xff]   ;;  %v10992_v16 = vld [vmem:[%s17893_s20 + $0x8] sm:$0xff]  }
 0xd1b   :  { %v8504_v28 = vrot.slane %v8489_v32, %v19026_v19  ;;  %v7415_v55 = vadd.f32 %v7394_v22, %v7295_v38  ;;  %v10993_v32 = vld [vmem:[%s17893_s20 + $0x10] sm:$0xff]   ;;  %v9538_v22 = vld [vmem:[%s17894_s16] ss:$0 sm:$0xff] }
 0xd1c   :  { %9917 = vmatpush3.bf16.msra.mxu0 %v10933_v33  ;;  %v7297_v33 = vmul.f32 %v7282_v1, %v7171_v50  ;;  %v7402_v62 = vrot.slane %v7342_v2, %v19026_v19  ;;  %v10995_v50 = vld [vmem:[%s17893_s20 + $0x20] sm:$0xff]   ;;  %v10996_v1 = vld [vmem:[%s17893_s20 + $0x28] sm:$0xff]  }
 0xd1d   :  { %9939 = vmatpush3.bf16.msra.mxu1 %v10934_v26  ;;  %9946 = vmatprep.subr.bf16.mxu0 %v10935_v0  ;;  %v10966_v26 = vld [vmem:[%s17888_s15 + $0x2b8] sm:$0xff]   ;;  %v10967_v0 = vld [vmem:[%s17889_s18 + $0x40] sm:$0xff]   ;;  %v8510_v5 = vadd.f32 %v8504_v28, %v8480_v18 }
 0xd1e   :  { %9968 = vmatprep.subr.bf16.mxu1 %v10936_v57  ;;  %v7417_v57 = vadd.f32 %v7402_v62, %v7297_v33 }
 0xd1f   :  { %8319 = vmatmul.mubr.bf16.vlgmr.msra.gmra.mrb[164].mxu0 %v7616_v27  ;;  %v8562_v27 = vpack.c.bf16 %v8510_v5, %v8510_v5 }
 0xd20   :  { %8359 = vmatmul.mubr.bf16.vlgmr.msra.gmra.mrb[180].mxu1 %v7618_v35  ;;  %9947 = vmatpush3.bf16.msra.mxu0 %v10937_v31  ;;  %v7620_v31 = vpack.c.bf16 %v7415_v55, %v7415_v55  ;;  %v10970_v35 = vld [vmem:[%s17889_s18 + $0x8] sm:$0xff]  }
 0xd21   :  { %8398 = vmatprep.mubr.bf16.mxu0 %v7621_v56  ;;  %9969 = vmatpush3.bf16.msra.mxu1 %v10938_v36  ;;  %v7622_v36 = vpack.c.bf16 %v7417_v57, %v7417_v57  ;;  %v10972_v56 = vld [vmem:[%s17889_s18 + $0x10] sm:$0xff]  }
 0xd22   :  { %8438 = vmatprep.mubr.bf16.mxu1 %v7623_v52  ;;  %9948 = vmatprep.subr.bf16.mxu0 %v10939_v42  ;;  %v10971_v42 = vld [vmem:[%s17889_s18 + $0x50] sm:$0xff]   ;;  %v10974_v52 = vld [vmem:[%s17889_s18 + $0x18] sm:$0xff]  }
 0xd23   :  { %9970 = vmatprep.subr.bf16.mxu1 %v10940_v15  ;;  %v10973_v15 = vld [vmem:[%s17889_s18 + $0x58] sm:$0xff]  }
 0xd24   :  { %9949 = vmatpush3.bf16.msra.mxu0 %v10941_v44  ;;  %v10975_v44 = vld [vmem:[%s17889_s18 + $0x60] sm:$0xff]  }
 0xd25   :  { %9971 = vmatpush3.bf16.msra.mxu1 %v10942_v51  ;;  %9950 = vmatprep.subr.bf16.mxu0 %v10943_v23  ;;  %v10976_v51 = vld [vmem:[%s17889_s18 + $0x20] sm:$0xff]   ;;  %v8455_v23 = vrot.slane %v17669_v53, %v19020_v12 }
 0xd26   :  { %9972 = vmatprep.subr.bf16.mxu1 %v10944_v4  ;;  %v10977_v4 = vld [vmem:[%s17889_s18 + $0x68] sm:$0xff]  }
 0xd28   :  { %9951 = vmatpush3.bf16.msra.mxu0 %v10945_v49  ;;  %v10978_v49 = vld [vmem:[%s17889_s18 + $0x28] sm:$0xff]  }
 0xd29   :  { %9973 = vmatpush3.bf16.msra.mxu1 %v10946_v48  ;;  %9952 = vmatprep.subr.bf16.mxu0 %v10947_v13  ;;  %v19028_v48 = vld [vmem:[#allocation76_spill] sm:$0xff] }
 0xd2a   :  { %9974 = vmatprep.subr.bf16.mxu1 %v10948_v43  ;;  %v8446_v13 = vmax.f32 %v19028_v48, 0.0  ;;  %v8470_v43 = vrot.slane %v8455_v23, %v19020_v12 }
 0xd2c   :  { %9953 = vmatpush3.bf16.msra.mxu0 %v10949_v54  ;;  %v8485_v54 = vrot.slane %v17669_v53, %v19026_v19 }
 0xd2d   :  { %9975 = vmatpush3.bf16.msra.mxu1 %v10950_v37  ;;  %9954 = vmatprep.subr.bf16.mxu0 %v10951_v24  ;;  %v10979_v37 = vld [vmem:[%s17889_s18 + $0x70] sm:$0xff]  }
 0xd2e   :  { %9976 = vmatprep.subr.bf16.mxu1 %v10952_v17  ;;  %v10980_v24 = vld [vmem:[%s17889_s18 + $0x30] sm:$0xff]   ;;  %v8479_v17 = vmul.f32 %v8470_v43, %v8446_v13 }
 0xd30   :  { %9955 = vmatpush3.bf16.msra.mxu0 %v10953_v7  ;;  %v8500_v7 = vrot.slane %v8485_v54, %v19026_v19 }
 0xd31   :  { %9977 = vmatpush3.bf16.msra.mxu1 %v10954_v40  ;;  %9956 = vmatprep.subr.bf16.mxu0 %v10955_v9  ;;  %v10982_v40 = vld [vmem:[%s17889_s18 + $0x38] sm:$0xff]  }
 0xd32   :  { %9978 = vmatprep.subr.bf16.mxu1 %v10956_v30  ;;  %v8509_v9 = vadd.f32 %v8500_v7, %v8479_v17  ;;  %v10983_v30 = vld [vmem:[%s17889_s18 + $0x80] sm:$0xff]  }
 0xd34   :  { %9957 = vmatpush3.bf16.msra.mxu0 %v10957_v25  ;;  %v8561_v41 = vpack.c.bf16 %v8509_v9, %v8509_v9  ;;  %v10985_v25 = vld [vmem:[%s17889_s18 + $0x90] sm:$0xff]  }
 0xd35   :  { %9979 = vmatpush3.bf16.msra.mxu1 %v10958_v63  ;;  %9958 = vmatprep.subr.bf16.mxu0 %v10959_v3  ;;  %v10988_v63 = vld [vmem:[%s17889_s18 + $0xa8] sm:$0xff]   ;;  %v10989_v3 = vld [vmem:[%s17889_s18 + $0xb0] sm:$0xff]  }
 0xd36   :  { %9980 = vmatprep.subr.bf16.mxu1 %v10960_v46  ;;  %v10994_v46 = vld [vmem:[%s17893_s20 + $0x18] sm:$0xff]  }
 0xd38   :  { %9959 = vmatpush3.bf16.msra.mxu0 %v10961_v58 }
 0xd39   :  { %9981 = vmatpush3.bf16.msra.mxu1 %v10962_v61  ;;  %9960 = vmatprep.subr.bf16.mxu0 %v10963_v10 }
 0xd3a   :  { %9982 = vmatprep.subr.bf16.mxu1 %v10964_v8 }
 0xd3c   :  { %9961 = vmatpush3.bf16.msra.mxu0 %v10965_v20 }
 0xd3d   :  { %9983 = vmatpush3.bf16.msra.mxu1 %v10966_v26  ;;  %9990 = vmatprep.subr.bf16.mxu0 %v10967_v0 }
 0xd3e   :  { %10318 = vmatprep.subr.bf16.mxu1 %v11327_v11 }
 0xd3f   :  { %8399 = vmatmul.mubr.bf16.vlgmr.msra.gmra.mrb[168].mxu0 %v7620_v31 }
 0xd40   :  { %8439 = vmatmul.mubr.bf16.vlgmr.msra.gmra.mrb[184].mxu1 %v7622_v36  ;;  %9991 = vmatpush3.bf16.msra.mxu0 %v10968_v47 }
 0xd41   :  { %9992 = vmatprep.subr.bf16.mxu0 %v10969_v39  ;;  %8746 = vmatprep.mubr.bf16.mxu0 %v8562_v27 }
 0xd42   :  { %10319 = vmatpush3.bf16.msra.mxu1 %v10983_v30  ;;  %10334 = vmatprep.mubr.msk.bf16.mxu1 %vm11328_vm9, %v11327_v11 }
 0xd43   :  { %10320 = vmatprep.subr.bf16.mxu1 %v11327_v11 }
 0xd44   :  { %9993 = vmatpush3.bf16.msra.mxu0 %v10970_v35 }
 0xd45   :  { %9994 = vmatprep.subr.bf16.mxu0 %v10971_v42 }
 0xd46   :  { %10321 = vmatpush3.bf16.msra.mxu1 %v10984_v34 }
 0xd47   :  { %10322 = vmatprep.subr.bf16.mxu1 %v11327_v11 }
 0xd48   :  { %9995 = vmatpush3.bf16.msra.mxu0 %v10972_v56 }
 0xd49   :  { %9996 = vmatprep.subr.bf16.mxu0 %v10973_v15 }
 0xd4a   :  { %10323 = vmatpush3.bf16.msra.mxu1 %v10985_v25 }
 0xd4b   :  { %10324 = vmatprep.subr.bf16.mxu1 %v11327_v11 }
 0xd4c   :  { %9997 = vmatpush3.bf16.msra.mxu0 %v10974_v52 }
 0xd4d   :  { %9998 = vmatprep.subr.bf16.mxu0 %v10975_v44 }
 0xd4e   :  { %10325 = vmatpush3.bf16.msra.mxu1 %v10986_v14 }
 0xd4f   :  { %10326 = vmatprep.subr.bf16.mxu1 %v11327_v11 }
 0xd50   :  { %9999 = vmatpush3.bf16.msra.mxu0 %v10976_v51 }
 0xd51   :  { %10000 = vmatprep.subr.bf16.mxu0 %v10977_v4  ;;  %v8463_v4 = vrot.slane %v17669_v53, %v19021_v6 }
 0xd52   :  { %10327 = vmatpush3.bf16.msra.mxu1 %v10987_v21 }
 0xd53   :  { %10328 = vmatprep.subr.bf16.mxu1 %v11327_v11  ;;  %v8478_v7 = vrot.slane %v8463_v4, %v19020_v12  ;;  %v10998_v12 = vld [vmem:[%s17893_s20 + $0x38] sm:$0xff]  }
 0xd54   :  { %10001 = vmatpush3.bf16.msra.mxu0 %v10978_v49 }
 0xd55   :  { %10002 = vmatprep.subr.bf16.mxu0 %v10979_v37  ;;  %v8493_v37 = vrot.slane %v17669_v53, %v19027_v59  ;;  %v10997_v59 = vld [vmem:[%s17893_s20 + $0x30] sm:$0xff]  }
 0xd56   :  { %10329 = vmatpush3.bf16.msra.mxu1 %v10988_v63 }
 0xd57   :  { %10330 = vmatprep.subr.bf16.mxu1 %v11327_v11 }
 0xd58   :  { %10003 = vmatpush3.bf16.msra.mxu0 %v10980_v24 }
 0xd59   :  { %10004 = vmatprep.subr.bf16.mxu0 %v10981_v29 }
 0xd5a   :  { %10331 = vmatpush3.bf16.msra.mxu1 %v10989_v3 }
 0xd5b   :  { %10332 = vmatprep.subr.bf16.mxu1 %v11327_v11 }
 0xd5c   :  { %10005 = vmatpush3.bf16.msra.mxu0 %v10982_v40  ;;  %v8508_v40 = vrot.slane %v8493_v37, %v19026_v19  ;;  %v9635_v19 = vld [vmem:[%s17895_s19] ss:$0 sm:$0xff] }
 0xd5d   :  { %10338 = vmatprep.subr.bf16.mxu0 %v11327_v11 }
 0xd5e   :  { %10333 = vmatpush3.bf16.msra.mxu1 %v10990_v45 }
 0xd5f   :  { %8747 = vmatmul.mubr.bf16.vlgmr.msra.gmra.mrb[172].mxu0 %v8561_v41 }
 0xd60   :  { %10354 = vmatprep.mubr.msk.bf16.mxu0 %vm11328_vm9, %v11327_v11  ;;  %10339 = vmatpush3.bf16.msra.mxu0 %v10991_v60 }
 0xd61   :  { %10340 = vmatprep.subr.bf16.mxu0 %v11327_v11 }
 0xd64   :  { %10341 = vmatpush3.bf16.msra.mxu0 %v10992_v16 }
 0xd65   :  { %10342 = vmatprep.subr.bf16.mxu0 %v11327_v11 }
 0xd68   :  { %10343 = vmatpush3.bf16.msra.mxu0 %v10993_v32 }
 0xd69   :  { %10344 = vmatprep.subr.bf16.mxu0 %v11327_v11 }
 0xd6c   :  { %10345 = vmatpush3.bf16.msra.mxu0 %v10994_v46 }
 0xd6d   :  { %10346 = vmatprep.subr.bf16.mxu0 %v11327_v11 }
 0xd70   :  { %10347 = vmatpush3.bf16.msra.mxu0 %v10995_v50  ;;  %v9660_v50 = vld [vmem:[%s17896_s21] ss:$0 sm:$0xff] }
 0xd71   :  { %10348 = vmatprep.subr.bf16.mxu0 %v11327_v11 }
 0xd74   :  { %10349 = vmatpush3.bf16.msra.mxu0 %v10996_v1 }
 0xd75   :  { %10350 = vmatprep.subr.bf16.mxu0 %v11327_v11 }
 0xd78   :  { %10351 = vmatpush3.bf16.msra.mxu0 %v10997_v59 }
 0xd79   :  { %10352 = vmatprep.subr.bf16.mxu0 %v11327_v11 }
 0xd7c   :  { %10353 = vmatpush3.bf16.msra.mxu0 %v10998_v12 }
 0xdd2   :  { %v9874_v2 = vpop.f32.mrb[160].mxu0 }
 0xdd3   :  { %v9896_v58 = vpop.f32.mrb[176].mxu1  ;;  %v9875_v61 = vpop.f32.mrb[161].mxu0 }
 0xdd4   :  { %v9876_v10 = vadd.f32 %v9875_v61, %v9874_v2  ;;  %v9897_v38 = vpop.f32.mrb[177].mxu1  ;;  %v9877_v18 = vpop.f32.mrb[162].mxu0 }
 0xdd5   :  { %v9898_v28 = vadd.f32 %v9897_v38, %v9896_v58  ;;  %v9899_v8 = vpop.f32.mrb[178].mxu1  ;;  %v9878_v33 = vpop.f32.mrb[163].mxu0 }
 0xdd6   :  { %v8241_v62 = vadd.f32 %v9876_v10, %v9538_v22  ;;  %v9900_v20 = vpop.f32.mrb[179].mxu1 }
 0xdd8   :  { %v8281_v26 = vadd.f32 %v9898_v28, %v8241_v62 }
 0xdf2   :  { %v9918_v55 = vpop.f32.mrb[164].mxu0 }
 0xdf3   :  { %v9940_v0 = vpop.f32.mrb[180].mxu1  ;;  %v9919_v5 = vpop.f32.mrb[165].mxu0 }
 0xdf4   :  { %v9920_v57 = vadd.f32 %v9919_v5, %v9918_v55  ;;  %v9941_v47 = vpop.f32.mrb[181].mxu1  ;;  %v9921_v31 = vpop.f32.mrb[166].mxu0 }
 0xdf5   :  { %v9942_v39 = vadd.f32 %v9941_v47, %v9940_v0  ;;  %v9943_v27 = vpop.f32.mrb[182].mxu1  ;;  %v9922_v36 = vpop.f32.mrb[167].mxu0 }
 0xdf6   :  { %v8321_v35 = vadd.f32 %v9920_v57, %v8281_v26  ;;  %v9944_v42 = vpop.f32.mrb[183].mxu1 }
 0xdf8   :  { %v8361_v56 = vadd.f32 %v9942_v39, %v8321_v35 }
 0xe12   :  { %v9962_v15 = vpop.f32.mrb[168].mxu0 }
 0xe13   :  { %v9984_v52 = vpop.f32.mrb[184].mxu1  ;;  %v9963_v44 = vpop.f32.mrb[169].mxu0 }
 0xe14   :  { %v9964_v51 = vadd.f32 %v9963_v44, %v9962_v15  ;;  %v9985_v23 = vpop.f32.mrb[185].mxu1  ;;  %v9965_v49 = vpop.f32.mrb[170].mxu0 }
 0xe15   :  { %v9986_v48 = vadd.f32 %v9985_v23, %v9984_v52  ;;  %v9987_v13 = vpop.f32.mrb[186].mxu1  ;;  %v9966_v43 = vpop.f32.mrb[171].mxu0 }
 0xe16   :  { %v8401_v54 = vadd.f32 %v9964_v51, %v8361_v56  ;;  %v9988_v24 = vpop.f32.mrb[187].mxu1 }
 0xe18   :  { %v8441_v17 = vadd.f32 %v9986_v48, %v8401_v54 }
 0xe1a   :  { %v8449_v29 = vmax.f32 %v8441_v17, 0.0 }
 0xe1c   :  { %v8481_v9 = vmul.f32 %v8478_v7, %v8449_v29 }
 0xe1e   :  { %v8511_v41 = vadd.f32 %v8508_v40, %v8481_v9 }
 0xe20   :  { %v8563_v30 = vpack.c.bf16 %v8511_v41, %v8511_v41 }
 0xe22   :  { %10335 = vmatmul.mubr.bf16.vlgmr.msra.gmra.mrb[188].mxu1 %v8563_v30 }
 0xe32   :  { %v10006_v6 = vpop.f32.mrb[172].mxu0 }
 0xe33   :  { %v10007_v34 = vpop.f32.mrb[173].mxu0 }
 0xe34   :  { %v10008_v25 = vadd.f32 %v10007_v34, %v10006_v6  ;;  %v10009_v14 = vpop.f32.mrb[174].mxu0 }
 0xe35   :  { %v10010_v21 = vpop.f32.mrb[175].mxu0 }
 0xe36   :  { %v8749_v53 = vadd.f32 %v10008_v25, %v9635_v19 }
 0xef5   :  { %v8788_v63 = vpop.f32.mrb[188].mxu1 }
 0xef6   :  { %v8789_v3 = vadd.f32 %v8788_v63, %v8749_v53  ;;  %v10336_v45 = vpop.f32.mrb[189].mxu1 }
 0xef7   :  { %v8791_v60 = vpop.f32.mrb[190].mxu1 }
 0xef8   :  { %v8794_v16 = vmax.f32 %v8789_v3, 0.0  ;;  %v10337_v32 = vpop.f32.mrb[191].mxu1 }
 0xefa   :  { %v8812_v46 = vpack.c.bf16 %v8794_v16, %v8794_v16 }
 0xefc   :  { %10355 = vmatmul.mubr.bf16.vlgmr.msra.gmra.mrb[176].mxu0 %v8812_v46 }
 0xfcf   :  { %v8901_v1 = vpop.f32.mrb[176].mxu0 }
 0xfd0   :  { %v8902_v11 = vadd.f32 %v9660_v50, %v8901_v1  ;;  %v10356_v2 = vpop.f32.mrb[177].mxu0 }
 0xfd1   :  { %v8904_v58 = vpop.f32.mrb[178].mxu0 }
 0xfd2   :  { %v9669_v22 = vmul.f32 -1.442695, %v8902_v11  ;;  %v10357_v61 = vpop.f32.mrb[179].mxu0 }
 0xfd4   :  { %11063 = vpow2.f32 %v9669_v22 }
 0xfde   :  { %v11064_v10 = vpop.eup %11063 }
 0xfdf   :  { %v8910_v38 = vadd.f32 1.0, %v11064_v10 }
 0xfe1   :  { %11065 = vrcp.f32 %v8910_v38 }
 0xfeb   :  { %v11066_v18 = vpop.eup %11065 }
 0xfec   :  { %8914 = vst.msk [vmem:[%s17897_s22] sm:$0xff] %vm8913_vm10, %v11066_v18 }

</bundles_post_ra>
